<compile_context>
chip_gen: v5e
topology: v5e:2x2
jax: 0.10.0
libtpu: 0.0.40
codegen_flags: <defaults>
</compile_context>

<pallas_src>
import functools

import jax
import jax.numpy as jnp
from jax import lax
from jax.experimental import pallas as pl
from jax.experimental.pallas import tpu as pltpu


# ----------------------------------------------------------------------------
# Static network geometry / padded (lane-dense) sizes
# ----------------------------------------------------------------------------
KH = KW = 5                  # conv kernel
H0, W0 = 28, 28              # input spatial
CH1, CW1 = 24, 24            # conv1 output spatial
PH1, PW1 = 12, 12            # pooled conv1 spatial
CH2, CW2 = 8, 8              # conv2 output spatial
PH2, PW2 = 4, 4              # pooled conv2 spatial
ROWS1 = 4 * PH1 * PW1        # 576 conv1 im2col rows / image (grouped per pool elem)

K1P = 128                    # conv1 contraction: 25  -> 128
C1P = 128                    # conv1 channels:    10  -> 128
C2P = 128                    # conv2 channels:    20  -> 128
OP = 128                     # fc outputs:        10  -> 128

BLOCK_B = 8                  # images per grid step (fits v7x 64MiB VMEM easily)


# ----------------------------------------------------------------------------
# Fused Pallas kernel: conv1+pool+relu -> conv2+pool+relu -> fc, per batch tile
# ----------------------------------------------------------------------------
def _net_kernel(p1_ref, w1_ref, b1_ref, w2_ref, b2_ref, wfc_ref, bfc_ref,
                out_ref, y1_scr, *, G):
    # ---- conv1 as one big im2col matmul, rows = (image, pool-elem, pool-cell)
    p1 = p1_ref[...].reshape(G * ROWS1, K1P)                    # (G*576, 128)
    h1 = jnp.dot(p1, w1_ref[...], preferred_element_type=jnp.float32)
    h1 = h1.reshape(G, 4, PH1 * PW1, C1P)                       # 4 pool candidates
    y1 = jnp.max(h1, axis=1) + b1_ref[...]                      # 2x2 maxpool + bias
    y1 = jnp.maximum(y1, 0.0)                                   # relu
    y1_scr[...] = y1.reshape(G, PH1, PW1, C1P)                  # keep y1 in VMEM

    # ---- conv2: in-kernel im2col via 25 shifted accumulating dots on y1 ----
    acc2 = jnp.zeros((G * CH2 * CW2, C2P), jnp.float32)
    for ki in range(KH):
        for kj in range(KW):
            ys = y1_scr[:, ki:ki + CH2, kj:kj + CW2, :]         # (G, 8, 8, C1P)
            acc2 = acc2 + jnp.dot(ys.reshape(G * CH2 * CW2, C1P),
                                  w2_ref[ki * KW + kj],
                                  preferred_element_type=jnp.float32)

    # ---- 2x2 maxpool + bias + relu (rows are (g, i, j) row-major) ----
    z = acc2.reshape(G, PH2, 2, CW2, C2P)                       # i = 2*pi + di
    z = jnp.max(z, axis=2)                                      # (G, 4, 8, C2P)
    z = z.reshape(G, PH2, PW2, 2, C2P)                          # j = 2*pj + dj
    z = jnp.max(z, axis=3)                                      # (G, 4, 4, C2P)
    z = jnp.maximum(z + b2_ref[...], 0.0)

    # ---- fc: accumulate per-spatial-position matmuls (weights pre-permuted
    #      in glue so torch's NCHW flatten order is respected) ----
    logits = jnp.zeros((G, OP), jnp.float32) + bfc_ref[...]
    for pi in range(PH2):
        for pj in range(PW2):
            logits = logits + jnp.dot(z[:, pi, pj, :],
                                      wfc_ref[pi * PW2 + pj],
                                      preferred_element_type=jnp.float32)
    out_ref[...] = logits                                       # lane-dense store


# ----------------------------------------------------------------------------
# Glue: conv1 im2col on the raw input + padded-weight preparation
# ----------------------------------------------------------------------------
def _conv1_patches(x_img):
    """x_img: (B, 28, 28) -> (B, 576, K1P).

    Rows per image are ordered (pool-window element e, pool cell), so the four
    conv outputs of each 2x2 pool window live in four contiguous 144-row blocks.
    Patch columns are (ki, kj) flattened and zero-padded 25 -> K1P.
    """
    B = x_img.shape[0]
    cols = [x_img[:, ki:ki + CH1, kj:kj + CW1]
            for ki in range(KH) for kj in range(KW)]
    p = jnp.stack(cols, axis=-1)                                # (B, 24, 24, 25)
    p = p.reshape(B, PH1, 2, PW1, 2, KH * KW)                   # (b,pi,di,pj,dj,c)
    p = p.transpose(0, 2, 4, 1, 3, 5)                           # (b,di,dj,pi,pj,c)
    p = p.reshape(B, ROWS1, KH * KW)
    return jnp.pad(p, ((0, 0), (0, 0), (0, K1P - KH * KW)))


@jax.jit
def net_forward(x_nchw, params):
    B = x_nchw.shape[0]
    G = min(BLOCK_B, B)
    B_pad = pl.cdiv(B, G) * G

    x = x_nchw[:, 0, :, :]                                      # (B, 28, 28)
    if B_pad != B:
        x = jnp.pad(x, ((0, B_pad - B), (0, 0), (0, 0)))
    p1 = _conv1_patches(x)                                      # (B_pad, 576, 128)

    out = pl.pallas_call(
        functools.partial(_net_kernel, G=G),
        out_shape=jax.ShapeDtypeStruct((B_pad, OP), jnp.float32),
        grid=(B_pad // G,),
        in_specs=[
            pl.BlockSpec((G, ROWS1, K1P), lambda i: (i, 0, 0)),
            pl.BlockSpec((K1P, C1P), lambda i: (0, 0)),
            pl.BlockSpec((1, C1P), lambda i: (0, 0)),
            pl.BlockSpec((KH * KW, C1P, C2P), lambda i: (0, 0, 0)),
            pl.BlockSpec((1, C2P), lambda i: (0, 0)),
            pl.BlockSpec((PH2 * PW2, C2P, OP), lambda i: (0, 0, 0)),
            pl.BlockSpec((1, OP), lambda i: (0, 0)),
        ],
        out_specs=pl.BlockSpec((G, OP), lambda i: (i, 0)),
        scratch_shapes=[pltpu.VMEM((G, PH1, PW1, C1P), jnp.float32)],
        compiler_params=pltpu.CompilerParams(
            dimension_semantics=("parallel",),
            vmem_limit_bytes=48 * 1024 * 1024,
        ),
    )(p1, params["w1"], params["b1"], params["w2"], params["b2"],
      params["wfc"], params["bfc"])

    return out[:B, :10]


# ----------------------------------------------------------------------------
# Parameter setup (torch-style init) + padded/permuted kernel layouts
# ----------------------------------------------------------------------------
def init_params(key):
    k1, k2, k3, k4, k5, k6 = jax.random.split(key, 6)

    def u(k, shape, fan_in):
        lim = 1.0 / jnp.sqrt(jnp.float32(fan_in))
        return jax.random.uniform(k, shape, jnp.float32, -lim, lim)

    # torch-shaped parameters
    w1_t = u(k1, (10, 1, 5, 5), 25)       # (C_out, C_in, kH, kW)
    b1_t = u(k2, (10,), 25)
    w2_t = u(k3, (20, 10, 5, 5), 250)
    b2_t = u(k4, (20,), 250)
    wfc_t = u(k5, (10, 320), 320)         # (out_features, in_features)
    bfc_t = u(k6, (10,), 320)

    # conv1: (25,10) -> zero-padded (K1P, C1P)
    w1 = jnp.zeros((K1P, C1P), jnp.float32).at[:25, :10].set(w1_t.reshape(10, 25).T)
    b1 = jnp.zeros((1, C1P), jnp.float32).at[0, :10].set(b1_t)

    # conv2: per-tap (C_in, C_out) matrices, zero-padded (25, C1P, C2P)
    w2r = jnp.transpose(w2_t, (2, 3, 1, 0)).reshape(25, 10, 20)
    w2 = jnp.zeros((25, C1P, C2P), jnp.float32).at[:, :10, :20].set(w2r)
    b2 = jnp.zeros((1, C2P), jnp.float32).at[0, :20].set(b2_t)

    # fc: per-spatial-position (C, O) matrices so the kernel's (g,pi,pj,c)
    # layout matches torch's NCHW flatten (idx = c*16 + pi*4 + pj).
    wfcr = jnp.transpose(wfc_t.reshape(10, 20, PH2 * PW2), (2, 1, 0))  # (s, c, o)
    wfc = jnp.zeros((PH2 * PW2, C2P, OP), jnp.float32).at[:, :20, :10].set(wfcr)
    bfc = jnp.zeros((1, OP), jnp.float32).at[0, :10].set(bfc_t)

    params = {"w1": w1, "b1": b1, "w2": w2, "b2": b2, "wfc": wfc, "bfc": bfc}
    torch_params = (w1_t, b1_t, w2_t, b2_t, wfc_t, bfc_t)
    return params, torch_params


def ref_forward(x, torch_params):
    """Pure-JAX NCHW reference replicating the PyTorch forward."""
    w1, b1, w2, b2, wfc, bfc = torch_params

    def conv(x, w, b):
        y = lax.conv_general_dilated(
            x, w, (1, 1), "VALID",
            dimension_numbers=("NCHW", "OIHW", "NCHW"))
        return y + b[None, :, None, None]

    def pool2(y):
        B, C, H, W = y.shape
        return y.reshape(B, C, H // 2, 2, W // 2, 2).max(axis=(3, 5))

    y = jnp.maximum(pool2(conv(x, w1, b1)), 0.0)
    y = jnp.maximum(pool2(conv(y, w2, b2)), 0.0)
    y = y.reshape(x.shape[0], -1)
    return y @ wfc.T + bfc[None, :]


if __name__ == "__main__":
    key = jax.random.PRNGKey(0)
    kx, kp = jax.random.split(key)

    batch = 2
    x = jax.random.normal(kx, (batch, 1, 28, 28), jnp.float32)  # NCHW like torch

    params, torch_params = init_params(kp)

    out = jax.block_until_ready(net_forward(x, params))
    assert out.shape == (batch, 10) and out.dtype == jnp.float32

    ref = ref_forward(x, torch_params)
    assert jnp.allclose(out, ref, atol=2e-4, rtol=2e-4), "mismatch vs reference"

    print("KERNEL_OK")
</pallas_src>

<mosaic_0001>
module attributes {stable_mosaic.version = 11 : i64} {
  func.func @_net_kernel(%arg0: i32, %arg1: memref<2x576x128xf32, #tpu.memory_space<vmem>>, %arg2: memref<128x128xf32, #tpu.memory_space<vmem>>, %arg3: memref<1x128xf32, #tpu.memory_space<vmem>>, %arg4: memref<25x128x128xf32, #tpu.memory_space<vmem>>, %arg5: memref<1x128xf32, #tpu.memory_space<vmem>>, %arg6: memref<16x128x128xf32, #tpu.memory_space<vmem>>, %arg7: memref<1x128xf32, #tpu.memory_space<vmem>>, %arg8: memref<2x128xf32, #tpu.memory_space<vmem>>, %arg9: memref<2x12x12x128xf32, #tpu.memory_space<vmem>>) attributes {dimension_semantics = [#tpu.dimension_semantics<parallel>], iteration_bounds = array<i64: 1>, scalar_prefetch = 0 : i64, scratch_operands = 1 : i64, tpu.core_type = #tpu.core_type<tc>, window_params = [{transform_indices = @transform_0, window_bounds = array<i64: 2, 576, 128>}, {pipeline_mode = #tpu.pipeline_mode<synchronous>, transform_indices = @transform_1, window_bounds = array<i64: 128, 128>}, {pipeline_mode = #tpu.pipeline_mode<synchronous>, transform_indices = @transform_2, window_bounds = array<i64: 1, 128>}, {pipeline_mode = #tpu.pipeline_mode<synchronous>, transform_indices = @transform_3, window_bounds = array<i64: 25, 128, 128>}, {pipeline_mode = #tpu.pipeline_mode<synchronous>, transform_indices = @transform_4, window_bounds = array<i64: 1, 128>}, {pipeline_mode = #tpu.pipeline_mode<synchronous>, transform_indices = @transform_5, window_bounds = array<i64: 16, 128, 128>}, {pipeline_mode = #tpu.pipeline_mode<synchronous>, transform_indices = @transform_6, window_bounds = array<i64: 1, 128>}, {transform_indices = @transform_7, window_bounds = array<i64: 2, 128>}]} {
    %c0 = arith.constant 0 : index
    %c0_0 = arith.constant 0 : index
    %c0_1 = arith.constant 0 : index
    %0 = vector.load %arg1[%c0, %c0_0, %c0_1] : memref<2x576x128xf32, #tpu.memory_space<vmem>>, vector<2x576x128xf32>
    %1 = vector.shape_cast %0 : vector<2x576x128xf32> to vector<1152x128xf32>
    %c0_2 = arith.constant 0 : index
    %c0_3 = arith.constant 0 : index
    %2 = vector.load %arg2[%c0_2, %c0_3] : memref<128x128xf32, #tpu.memory_space<vmem>>, vector<128x128xf32>
    %cst = arith.constant dense<0.000000e+00> : vector<1152x128xf32>
    %3 = tpu.matmul %1, %2, %cst {dimension_numbers = #tpu.dot_dimension_numbers<[1], [0], [0], [1], [0, 0, 1, 1], [], []>} : vector<1152x128xf32>, vector<128x128xf32>, vector<1152x128xf32> -> vector<1152x128xf32>
    %4 = vector.shape_cast %3 : vector<1152x128xf32> to vector<2x4x144x128xf32>
    %cst_4 = arith.constant dense<0xFF800000> : vector<2x144x128xf32>
    %5 = vector.multi_reduction <maximumf>, %4, %cst_4 [1] : vector<2x4x144x128xf32> to vector<2x144x128xf32>
    %c0_5 = arith.constant 0 : index
    %c0_6 = arith.constant 0 : index
    %6 = vector.load %arg3[%c0_5, %c0_6] : memref<1x128xf32, #tpu.memory_space<vmem>>, vector<1x128xf32>
    %7 = vector.shape_cast %6 : vector<1x128xf32> to vector<1x1x128xf32>
    %8 = vector.broadcast %7 : vector<1x1x128xf32> to vector<2x144x128xf32>
    %9 = arith.addf %5, %8 : vector<2x144x128xf32>
    %cst_7 = arith.constant 0.000000e+00 : f32
    %10 = vector.broadcast %cst_7 : f32 to vector<2x144x128xf32>
    %11 = arith.maximumf %9, %10 : vector<2x144x128xf32>
    %12 = vector.shape_cast %11 : vector<2x144x128xf32> to vector<2x12x12x128xf32>
    %c0_8 = arith.constant 0 : index
    %c0_9 = arith.constant 0 : index
    %c0_10 = arith.constant 0 : index
    %c0_11 = arith.constant 0 : index
    %13 = vector.load %arg9[%c0_8, %c0_9, %c0_10, %c0_11] : memref<2x12x12x128xf32, #tpu.memory_space<vmem>>, vector<2x12x12x128xf32>
    tpu.vector_store %arg9[%c0_8, %c0_9, %c0_10, %c0_11], %12 {strides = array<i32>} : memref<2x12x12x128xf32, #tpu.memory_space<vmem>>, vector<2x12x12x128xf32>,
    %cst_12 = arith.constant 0.000000e+00 : f32
    %14 = vector.broadcast %cst_12 : f32 to vector<128x128xf32>
    %c0_13 = arith.constant 0 : index
    %c0_14 = arith.constant 0 : index
    %c0_15 = arith.constant 0 : index
    %c0_16 = arith.constant 0 : index
    %15 = vector.load %arg9[%c0_13, %c0_14, %c0_15, %c0_16] : memref<2x12x12x128xf32, #tpu.memory_space<vmem>>, vector<2x8x8x128xf32>
    %16 = vector.shape_cast %15 : vector<2x8x8x128xf32> to vector<128x128xf32>
    %c0_17 = arith.constant 0 : index
    %c0_18 = arith.constant 0 : index
    %c0_19 = arith.constant 0 : index
    %17 = vector.load %arg4[%c0_17, %c0_18, %c0_19] : memref<25x128x128xf32, #tpu.memory_space<vmem>>, vector<1x128x128xf32>
    %18 = vector.shape_cast %17 : vector<1x128x128xf32> to vector<128x128xf32>
    %cst_20 = arith.constant dense<0.000000e+00> : vector<128x128xf32>
    %19 = tpu.matmul %16, %18, %cst_20 {dimension_numbers = #tpu.dot_dimension_numbers<[1], [0], [0], [1], [0, 0, 1, 1], [], []>} : vector<128x128xf32>, vector<128x128xf32>, vector<128x128xf32> -> vector<128x128xf32>
    %20 = arith.addf %14, %19 : vector<128x128xf32>
    %c0_21 = arith.constant 0 : index
    %c0_22 = arith.constant 0 : index
    %c1 = arith.constant 1 : index
    %c0_23 = arith.constant 0 : index
    %21 = vector.load %arg9[%c0_21, %c0_22, %c1, %c0_23] : memref<2x12x12x128xf32, #tpu.memory_space<vmem>>, vector<2x8x8x128xf32>
    %22 = vector.shape_cast %21 : vector<2x8x8x128xf32> to vector<128x128xf32>
    %c1_24 = arith.constant 1 : index
    %c0_25 = arith.constant 0 : index
    %c0_26 = arith.constant 0 : index
    %23 = vector.load %arg4[%c1_24, %c0_25, %c0_26] : memref<25x128x128xf32, #tpu.memory_space<vmem>>, vector<1x128x128xf32>
    %24 = vector.shape_cast %23 : vector<1x128x128xf32> to vector<128x128xf32>
    %cst_27 = arith.constant dense<0.000000e+00> : vector<128x128xf32>
    %25 = tpu.matmul %22, %24, %cst_27 {dimension_numbers = #tpu.dot_dimension_numbers<[1], [0], [0], [1], [0, 0, 1, 1], [], []>} : vector<128x128xf32>, vector<128x128xf32>, vector<128x128xf32> -> vector<128x128xf32>
    %26 = arith.addf %20, %25 : vector<128x128xf32>
    %c0_28 = arith.constant 0 : index
    %c0_29 = arith.constant 0 : index
    %c2 = arith.constant 2 : index
    %c0_30 = arith.constant 0 : index
    %27 = vector.load %arg9[%c0_28, %c0_29, %c2, %c0_30] : memref<2x12x12x128xf32, #tpu.memory_space<vmem>>, vector<2x8x8x128xf32>
    %28 = vector.shape_cast %27 : vector<2x8x8x128xf32> to vector<128x128xf32>
    %c2_31 = arith.constant 2 : index
    %c0_32 = arith.constant 0 : index
    %c0_33 = arith.constant 0 : index
    %29 = vector.load %arg4[%c2_31, %c0_32, %c0_33] : memref<25x128x128xf32, #tpu.memory_space<vmem>>, vector<1x128x128xf32>
    %30 = vector.shape_cast %29 : vector<1x128x128xf32> to vector<128x128xf32>
    %cst_34 = arith.constant dense<0.000000e+00> : vector<128x128xf32>
    %31 = tpu.matmul %28, %30, %cst_34 {dimension_numbers = #tpu.dot_dimension_numbers<[1], [0], [0], [1], [0, 0, 1, 1], [], []>} : vector<128x128xf32>, vector<128x128xf32>, vector<128x128xf32> -> vector<128x128xf32>
    %32 = arith.addf %26, %31 : vector<128x128xf32>
    %c0_35 = arith.constant 0 : index
    %c0_36 = arith.constant 0 : index
    %c3 = arith.constant 3 : index
    %c0_37 = arith.constant 0 : index
    %33 = vector.load %arg9[%c0_35, %c0_36, %c3, %c0_37] : memref<2x12x12x128xf32, #tpu.memory_space<vmem>>, vector<2x8x8x128xf32>
    %34 = vector.shape_cast %33 : vector<2x8x8x128xf32> to vector<128x128xf32>
    %c3_38 = arith.constant 3 : index
    %c0_39 = arith.constant 0 : index
    %c0_40 = arith.constant 0 : index
    %35 = vector.load %arg4[%c3_38, %c0_39, %c0_40] : memref<25x128x128xf32, #tpu.memory_space<vmem>>, vector<1x128x128xf32>
    %36 = vector.shape_cast %35 : vector<1x128x128xf32> to vector<128x128xf32>
    %cst_41 = arith.constant dense<0.000000e+00> : vector<128x128xf32>
    %37 = tpu.matmul %34, %36, %cst_41 {dimension_numbers = #tpu.dot_dimension_numbers<[1], [0], [0], [1], [0, 0, 1, 1], [], []>} : vector<128x128xf32>, vector<128x128xf32>, vector<128x128xf32> -> vector<128x128xf32>
    %38 = arith.addf %32, %37 : vector<128x128xf32>
    %c0_42 = arith.constant 0 : index
    %c0_43 = arith.constant 0 : index
    %c4 = arith.constant 4 : index
    %c0_44 = arith.constant 0 : index
    %39 = vector.load %arg9[%c0_42, %c0_43, %c4, %c0_44] : memref<2x12x12x128xf32, #tpu.memory_space<vmem>>, vector<2x8x8x128xf32>
    %40 = vector.shape_cast %39 : vector<2x8x8x128xf32> to vector<128x128xf32>
    %c4_45 = arith.constant 4 : index
    %c0_46 = arith.constant 0 : index
    %c0_47 = arith.constant 0 : index
    %41 = vector.load %arg4[%c4_45, %c0_46, %c0_47] : memref<25x128x128xf32, #tpu.memory_space<vmem>>, vector<1x128x128xf32>
    %42 = vector.shape_cast %41 : vector<1x128x128xf32> to vector<128x128xf32>
    %cst_48 = arith.constant dense<0.000000e+00> : vector<128x128xf32>
    %43 = tpu.matmul %40, %42, %cst_48 {dimension_numbers = #tpu.dot_dimension_numbers<[1], [0], [0], [1], [0, 0, 1, 1], [], []>} : vector<128x128xf32>, vector<128x128xf32>, vector<128x128xf32> -> vector<128x128xf32>
    %44 = arith.addf %38, %43 : vector<128x128xf32>
    %c0_49 = arith.constant 0 : index
    %c1_50 = arith.constant 1 : index
    %c0_51 = arith.constant 0 : index
    %c0_52 = arith.constant 0 : index
    %45 = vector.load %arg9[%c0_49, %c1_50, %c0_51, %c0_52] : memref<2x12x12x128xf32, #tpu.memory_space<vmem>>, vector<2x8x8x128xf32>
    %46 = vector.shape_cast %45 : vector<2x8x8x128xf32> to vector<128x128xf32>
    %c5 = arith.constant 5 : index
    %c0_53 = arith.constant 0 : index
    %c0_54 = arith.constant 0 : index
    %47 = vector.load %arg4[%c5, %c0_53, %c0_54] : memref<25x128x128xf32, #tpu.memory_space<vmem>>, vector<1x128x128xf32>
    %48 = vector.shape_cast %47 : vector<1x128x128xf32> to vector<128x128xf32>
    %cst_55 = arith.constant dense<0.000000e+00> : vector<128x128xf32>
    %49 = tpu.matmul %46, %48, %cst_55 {dimension_numbers = #tpu.dot_dimension_numbers<[1], [0], [0], [1], [0, 0, 1, 1], [], []>} : vector<128x128xf32>, vector<128x128xf32>, vector<128x128xf32> -> vector<128x128xf32>
    %50 = arith.addf %44, %49 : vector<128x128xf32>
    %c0_56 = arith.constant 0 : index
    %c1_57 = arith.constant 1 : index
    %c1_58 = arith.constant 1 : index
    %c0_59 = arith.constant 0 : index
    %51 = vector.load %arg9[%c0_56, %c1_57, %c1_58, %c0_59] : memref<2x12x12x128xf32, #tpu.memory_space<vmem>>, vector<2x8x8x128xf32>
    %52 = vector.shape_cast %51 : vector<2x8x8x128xf32> to vector<128x128xf32>
    %c6 = arith.constant 6 : index
    %c0_60 = arith.constant 0 : index
    %c0_61 = arith.constant 0 : index
    %53 = vector.load %arg4[%c6, %c0_60, %c0_61] : memref<25x128x128xf32, #tpu.memory_space<vmem>>, vector<1x128x128xf32>
    %54 = vector.shape_cast %53 : vector<1x128x128xf32> to vector<128x128xf32>
    %cst_62 = arith.constant dense<0.000000e+00> : vector<128x128xf32>
    %55 = tpu.matmul %52, %54, %cst_62 {dimension_numbers = #tpu.dot_dimension_numbers<[1], [0], [0], [1], [0, 0, 1, 1], [], []>} : vector<128x128xf32>, vector<128x128xf32>, vector<128x128xf32> -> vector<128x128xf32>
    %56 = arith.addf %50, %55 : vector<128x128xf32>
    %c0_63 = arith.constant 0 : index
    %c1_64 = arith.constant 1 : index
    %c2_65 = arith.constant 2 : index
    %c0_66 = arith.constant 0 : index
    %57 = vector.load %arg9[%c0_63, %c1_64, %c2_65, %c0_66] : memref<2x12x12x128xf32, #tpu.memory_space<vmem>>, vector<2x8x8x128xf32>
    %58 = vector.shape_cast %57 : vector<2x8x8x128xf32> to vector<128x128xf32>
    %c7 = arith.constant 7 : index
    %c0_67 = arith.constant 0 : index
    %c0_68 = arith.constant 0 : index
    %59 = vector.load %arg4[%c7, %c0_67, %c0_68] : memref<25x128x128xf32, #tpu.memory_space<vmem>>, vector<1x128x128xf32>
    %60 = vector.shape_cast %59 : vector<1x128x128xf32> to vector<128x128xf32>
    %cst_69 = arith.constant dense<0.000000e+00> : vector<128x128xf32>
    %61 = tpu.matmul %58, %60, %cst_69 {dimension_numbers = #tpu.dot_dimension_numbers<[1], [0], [0], [1], [0, 0, 1, 1], [], []>} : vector<128x128xf32>, vector<128x128xf32>, vector<128x128xf32> -> vector<128x128xf32>
    %62 = arith.addf %56, %61 : vector<128x128xf32>
    %c0_70 = arith.constant 0 : index
    %c1_71 = arith.constant 1 : index
    %c3_72 = arith.constant 3 : index
    %c0_73 = arith.constant 0 : index
    %63 = vector.load %arg9[%c0_70, %c1_71, %c3_72, %c0_73] : memref<2x12x12x128xf32, #tpu.memory_space<vmem>>, vector<2x8x8x128xf32>
    %64 = vector.shape_cast %63 : vector<2x8x8x128xf32> to vector<128x128xf32>
    %c8 = arith.constant 8 : index
    %c0_74 = arith.constant 0 : index
    %c0_75 = arith.constant 0 : index
    %65 = vector.load %arg4[%c8, %c0_74, %c0_75] : memref<25x128x128xf32, #tpu.memory_space<vmem>>, vector<1x128x128xf32>
    %66 = vector.shape_cast %65 : vector<1x128x128xf32> to vector<128x128xf32>
    %cst_76 = arith.constant dense<0.000000e+00> : vector<128x128xf32>
    %67 = tpu.matmul %64, %66, %cst_76 {dimension_numbers = #tpu.dot_dimension_numbers<[1], [0], [0], [1], [0, 0, 1, 1], [], []>} : vector<128x128xf32>, vector<128x128xf32>, vector<128x128xf32> -> vector<128x128xf32>
    %68 = arith.addf %62, %67 : vector<128x128xf32>
    %c0_77 = arith.constant 0 : index
    %c1_78 = arith.constant 1 : index
    %c4_79 = arith.constant 4 : index
    %c0_80 = arith.constant 0 : index
    %69 = vector.load %arg9[%c0_77, %c1_78, %c4_79, %c0_80] : memref<2x12x12x128xf32, #tpu.memory_space<vmem>>, vector<2x8x8x128xf32>
    %70 = vector.shape_cast %69 : vector<2x8x8x128xf32> to vector<128x128xf32>
    %c9 = arith.constant 9 : index
    %c0_81 = arith.constant 0 : index
    %c0_82 = arith.constant 0 : index
    %71 = vector.load %arg4[%c9, %c0_81, %c0_82] : memref<25x128x128xf32, #tpu.memory_space<vmem>>, vector<1x128x128xf32>
    %72 = vector.shape_cast %71 : vector<1x128x128xf32> to vector<128x128xf32>
    %cst_83 = arith.constant dense<0.000000e+00> : vector<128x128xf32>
    %73 = tpu.matmul %70, %72, %cst_83 {dimension_numbers = #tpu.dot_dimension_numbers<[1], [0], [0], [1], [0, 0, 1, 1], [], []>} : vector<128x128xf32>, vector<128x128xf32>, vector<128x128xf32> -> vector<128x128xf32>
    %74 = arith.addf %68, %73 : vector<128x128xf32>
    %c0_84 = arith.constant 0 : index
    %c2_85 = arith.constant 2 : index
    %c0_86 = arith.constant 0 : index
    %c0_87 = arith.constant 0 : index
    %75 = vector.load %arg9[%c0_84, %c2_85, %c0_86, %c0_87] : memref<2x12x12x128xf32, #tpu.memory_space<vmem>>, vector<2x8x8x128xf32>
    %76 = vector.shape_cast %75 : vector<2x8x8x128xf32> to vector<128x128xf32>
    %c10 = arith.constant 10 : index
    %c0_88 = arith.constant 0 : index
    %c0_89 = arith.constant 0 : index
    %77 = vector.load %arg4[%c10, %c0_88, %c0_89] : memref<25x128x128xf32, #tpu.memory_space<vmem>>, vector<1x128x128xf32>
    %78 = vector.shape_cast %77 : vector<1x128x128xf32> to vector<128x128xf32>
    %cst_90 = arith.constant dense<0.000000e+00> : vector<128x128xf32>
    %79 = tpu.matmul %76, %78, %cst_90 {dimension_numbers = #tpu.dot_dimension_numbers<[1], [0], [0], [1], [0, 0, 1, 1], [], []>} : vector<128x128xf32>, vector<128x128xf32>, vector<128x128xf32> -> vector<128x128xf32>
    %80 = arith.addf %74, %79 : vector<128x128xf32>
    %c0_91 = arith.constant 0 : index
    %c2_92 = arith.constant 2 : index
    %c1_93 = arith.constant 1 : index
    %c0_94 = arith.constant 0 : index
    %81 = vector.load %arg9[%c0_91, %c2_92, %c1_93, %c0_94] : memref<2x12x12x128xf32, #tpu.memory_space<vmem>>, vector<2x8x8x128xf32>
    %82 = vector.shape_cast %81 : vector<2x8x8x128xf32> to vector<128x128xf32>
    %c11 = arith.constant 11 : index
    %c0_95 = arith.constant 0 : index
    %c0_96 = arith.constant 0 : index
    %83 = vector.load %arg4[%c11, %c0_95, %c0_96] : memref<25x128x128xf32, #tpu.memory_space<vmem>>, vector<1x128x128xf32>
    %84 = vector.shape_cast %83 : vector<1x128x128xf32> to vector<128x128xf32>
    %cst_97 = arith.constant dense<0.000000e+00> : vector<128x128xf32>
    %85 = tpu.matmul %82, %84, %cst_97 {dimension_numbers = #tpu.dot_dimension_numbers<[1], [0], [0], [1], [0, 0, 1, 1], [], []>} : vector<128x128xf32>, vector<128x128xf32>, vector<128x128xf32> -> vector<128x128xf32>
    %86 = arith.addf %80, %85 : vector<128x128xf32>
    %c0_98 = arith.constant 0 : index
    %c2_99 = arith.constant 2 : index
    %c2_100 = arith.constant 2 : index
    %c0_101 = arith.constant 0 : index
    %87 = vector.load %arg9[%c0_98, %c2_99, %c2_100, %c0_101] : memref<2x12x12x128xf32, #tpu.memory_space<vmem>>, vector<2x8x8x128xf32>
    %88 = vector.shape_cast %87 : vector<2x8x8x128xf32> to vector<128x128xf32>
    %c12 = arith.constant 12 : index
    %c0_102 = arith.constant 0 : index
    %c0_103 = arith.constant 0 : index
    %89 = vector.load %arg4[%c12, %c0_102, %c0_103] : memref<25x128x128xf32, #tpu.memory_space<vmem>>, vector<1x128x128xf32>
    %90 = vector.shape_cast %89 : vector<1x128x128xf32> to vector<128x128xf32>
    %cst_104 = arith.constant dense<0.000000e+00> : vector<128x128xf32>
    %91 = tpu.matmul %88, %90, %cst_104 {dimension_numbers = #tpu.dot_dimension_numbers<[1], [0], [0], [1], [0, 0, 1, 1], [], []>} : vector<128x128xf32>, vector<128x128xf32>, vector<128x128xf32> -> vector<128x128xf32>
    %92 = arith.addf %86, %91 : vector<128x128xf32>
    %c0_105 = arith.constant 0 : index
    %c2_106 = arith.constant 2 : index
    %c3_107 = arith.constant 3 : index
    %c0_108 = arith.constant 0 : index
    %93 = vector.load %arg9[%c0_105, %c2_106, %c3_107, %c0_108] : memref<2x12x12x128xf32, #tpu.memory_space<vmem>>, vector<2x8x8x128xf32>
    %94 = vector.shape_cast %93 : vector<2x8x8x128xf32> to vector<128x128xf32>
    %c13 = arith.constant 13 : index
    %c0_109 = arith.constant 0 : index
    %c0_110 = arith.constant 0 : index
    %95 = vector.load %arg4[%c13, %c0_109, %c0_110] : memref<25x128x128xf32, #tpu.memory_space<vmem>>, vector<1x128x128xf32>
    %96 = vector.shape_cast %95 : vector<1x128x128xf32> to vector<128x128xf32>
    %cst_111 = arith.constant dense<0.000000e+00> : vector<128x128xf32>
    %97 = tpu.matmul %94, %96, %cst_111 {dimension_numbers = #tpu.dot_dimension_numbers<[1], [0], [0], [1], [0, 0, 1, 1], [], []>} : vector<128x128xf32>, vector<128x128xf32>, vector<128x128xf32> -> vector<128x128xf32>
    %98 = arith.addf %92, %97 : vector<128x128xf32>
    %c0_112 = arith.constant 0 : index
    %c2_113 = arith.constant 2 : index
    %c4_114 = arith.constant 4 : index
    %c0_115 = arith.constant 0 : index
    %99 = vector.load %arg9[%c0_112, %c2_113, %c4_114, %c0_115] : memref<2x12x12x128xf32, #tpu.memory_space<vmem>>, vector<2x8x8x128xf32>
    %100 = vector.shape_cast %99 : vector<2x8x8x128xf32> to vector<128x128xf32>
    %c14 = arith.constant 14 : index
    %c0_116 = arith.constant 0 : index
    %c0_117 = arith.constant 0 : index
    %101 = vector.load %arg4[%c14, %c0_116, %c0_117] : memref<25x128x128xf32, #tpu.memory_space<vmem>>, vector<1x128x128xf32>
    %102 = vector.shape_cast %101 : vector<1x128x128xf32> to vector<128x128xf32>
    %cst_118 = arith.constant dense<0.000000e+00> : vector<128x128xf32>
    %103 = tpu.matmul %100, %102, %cst_118 {dimension_numbers = #tpu.dot_dimension_numbers<[1], [0], [0], [1], [0, 0, 1, 1], [], []>} : vector<128x128xf32>, vector<128x128xf32>, vector<128x128xf32> -> vector<128x128xf32>
    %104 = arith.addf %98, %103 : vector<128x128xf32>
    %c0_119 = arith.constant 0 : index
    %c3_120 = arith.constant 3 : index
    %c0_121 = arith.constant 0 : index
    %c0_122 = arith.constant 0 : index
    %105 = vector.load %arg9[%c0_119, %c3_120, %c0_121, %c0_122] : memref<2x12x12x128xf32, #tpu.memory_space<vmem>>, vector<2x8x8x128xf32>
    %106 = vector.shape_cast %105 : vector<2x8x8x128xf32> to vector<128x128xf32>
    %c15 = arith.constant 15 : index
    %c0_123 = arith.constant 0 : index
    %c0_124 = arith.constant 0 : index
    %107 = vector.load %arg4[%c15, %c0_123, %c0_124] : memref<25x128x128xf32, #tpu.memory_space<vmem>>, vector<1x128x128xf32>
    %108 = vector.shape_cast %107 : vector<1x128x128xf32> to vector<128x128xf32>
    %cst_125 = arith.constant dense<0.000000e+00> : vector<128x128xf32>
    %109 = tpu.matmul %106, %108, %cst_125 {dimension_numbers = #tpu.dot_dimension_numbers<[1], [0], [0], [1], [0, 0, 1, 1], [], []>} : vector<128x128xf32>, vector<128x128xf32>, vector<128x128xf32> -> vector<128x128xf32>
    %110 = arith.addf %104, %109 : vector<128x128xf32>
    %c0_126 = arith.constant 0 : index
    %c3_127 = arith.constant 3 : index
    %c1_128 = arith.constant 1 : index
    %c0_129 = arith.constant 0 : index
    %111 = vector.load %arg9[%c0_126, %c3_127, %c1_128, %c0_129] : memref<2x12x12x128xf32, #tpu.memory_space<vmem>>, vector<2x8x8x128xf32>
    %112 = vector.shape_cast %111 : vector<2x8x8x128xf32> to vector<128x128xf32>
    %c16 = arith.constant 16 : index
    %c0_130 = arith.constant 0 : index
    %c0_131 = arith.constant 0 : index
    %113 = vector.load %arg4[%c16, %c0_130, %c0_131] : memref<25x128x128xf32, #tpu.memory_space<vmem>>, vector<1x128x128xf32>
    %114 = vector.shape_cast %113 : vector<1x128x128xf32> to vector<128x128xf32>
    %cst_132 = arith.constant dense<0.000000e+00> : vector<128x128xf32>
    %115 = tpu.matmul %112, %114, %cst_132 {dimension_numbers = #tpu.dot_dimension_numbers<[1], [0], [0], [1], [0, 0, 1, 1], [], []>} : vector<128x128xf32>, vector<128x128xf32>, vector<128x128xf32> -> vector<128x128xf32>
    %116 = arith.addf %110, %115 : vector<128x128xf32>
    %c0_133 = arith.constant 0 : index
    %c3_134 = arith.constant 3 : index
    %c2_135 = arith.constant 2 : index
    %c0_136 = arith.constant 0 : index
    %117 = vector.load %arg9[%c0_133, %c3_134, %c2_135, %c0_136] : memref<2x12x12x128xf32, #tpu.memory_space<vmem>>, vector<2x8x8x128xf32>
    %118 = vector.shape_cast %117 : vector<2x8x8x128xf32> to vector<128x128xf32>
    %c17 = arith.constant 17 : index
    %c0_137 = arith.constant 0 : index
    %c0_138 = arith.constant 0 : index
    %119 = vector.load %arg4[%c17, %c0_137, %c0_138] : memref<25x128x128xf32, #tpu.memory_space<vmem>>, vector<1x128x128xf32>
    %120 = vector.shape_cast %119 : vector<1x128x128xf32> to vector<128x128xf32>
    %cst_139 = arith.constant dense<0.000000e+00> : vector<128x128xf32>
    %121 = tpu.matmul %118, %120, %cst_139 {dimension_numbers = #tpu.dot_dimension_numbers<[1], [0], [0], [1], [0, 0, 1, 1], [], []>} : vector<128x128xf32>, vector<128x128xf32>, vector<128x128xf32> -> vector<128x128xf32>
    %122 = arith.addf %116, %121 : vector<128x128xf32>
    %c0_140 = arith.constant 0 : index
    %c3_141 = arith.constant 3 : index
    %c3_142 = arith.constant 3 : index
    %c0_143 = arith.constant 0 : index
    %123 = vector.load %arg9[%c0_140, %c3_141, %c3_142, %c0_143] : memref<2x12x12x128xf32, #tpu.memory_space<vmem>>, vector<2x8x8x128xf32>
    %124 = vector.shape_cast %123 : vector<2x8x8x128xf32> to vector<128x128xf32>
    %c18 = arith.constant 18 : index
    %c0_144 = arith.constant 0 : index
    %c0_145 = arith.constant 0 : index
    %125 = vector.load %arg4[%c18, %c0_144, %c0_145] : memref<25x128x128xf32, #tpu.memory_space<vmem>>, vector<1x128x128xf32>
    %126 = vector.shape_cast %125 : vector<1x128x128xf32> to vector<128x128xf32>
    %cst_146 = arith.constant dense<0.000000e+00> : vector<128x128xf32>
    %127 = tpu.matmul %124, %126, %cst_146 {dimension_numbers = #tpu.dot_dimension_numbers<[1], [0], [0], [1], [0, 0, 1, 1], [], []>} : vector<128x128xf32>, vector<128x128xf32>, vector<128x128xf32> -> vector<128x128xf32>
    %128 = arith.addf %122, %127 : vector<128x128xf32>
    %c0_147 = arith.constant 0 : index
    %c3_148 = arith.constant 3 : index
    %c4_149 = arith.constant 4 : index
    %c0_150 = arith.constant 0 : index
    %129 = vector.load %arg9[%c0_147, %c3_148, %c4_149, %c0_150] : memref<2x12x12x128xf32, #tpu.memory_space<vmem>>, vector<2x8x8x128xf32>
    %130 = vector.shape_cast %129 : vector<2x8x8x128xf32> to vector<128x128xf32>
    %c19 = arith.constant 19 : index
    %c0_151 = arith.constant 0 : index
    %c0_152 = arith.constant 0 : index
    %131 = vector.load %arg4[%c19, %c0_151, %c0_152] : memref<25x128x128xf32, #tpu.memory_space<vmem>>, vector<1x128x128xf32>
    %132 = vector.shape_cast %131 : vector<1x128x128xf32> to vector<128x128xf32>
    %cst_153 = arith.constant dense<0.000000e+00> : vector<128x128xf32>
    %133 = tpu.matmul %130, %132, %cst_153 {dimension_numbers = #tpu.dot_dimension_numbers<[1], [0], [0], [1], [0, 0, 1, 1], [], []>} : vector<128x128xf32>, vector<128x128xf32>, vector<128x128xf32> -> vector<128x128xf32>
    %134 = arith.addf %128, %133 : vector<128x128xf32>
    %c0_154 = arith.constant 0 : index
    %c4_155 = arith.constant 4 : index
    %c0_156 = arith.constant 0 : index
    %c0_157 = arith.constant 0 : index
    %135 = vector.load %arg9[%c0_154, %c4_155, %c0_156, %c0_157] : memref<2x12x12x128xf32, #tpu.memory_space<vmem>>, vector<2x8x8x128xf32>
    %136 = vector.shape_cast %135 : vector<2x8x8x128xf32> to vector<128x128xf32>
    %c20 = arith.constant 20 : index
    %c0_158 = arith.constant 0 : index
    %c0_159 = arith.constant 0 : index
    %137 = vector.load %arg4[%c20, %c0_158, %c0_159] : memref<25x128x128xf32, #tpu.memory_space<vmem>>, vector<1x128x128xf32>
    %138 = vector.shape_cast %137 : vector<1x128x128xf32> to vector<128x128xf32>
    %cst_160 = arith.constant dense<0.000000e+00> : vector<128x128xf32>
    %139 = tpu.matmul %136, %138, %cst_160 {dimension_numbers = #tpu.dot_dimension_numbers<[1], [0], [0], [1], [0, 0, 1, 1], [], []>} : vector<128x128xf32>, vector<128x128xf32>, vector<128x128xf32> -> vector<128x128xf32>
    %140 = arith.addf %134, %139 : vector<128x128xf32>
    %c0_161 = arith.constant 0 : index
    %c4_162 = arith.constant 4 : index
    %c1_163 = arith.constant 1 : index
    %c0_164 = arith.constant 0 : index
    %141 = vector.load %arg9[%c0_161, %c4_162, %c1_163, %c0_164] : memref<2x12x12x128xf32, #tpu.memory_space<vmem>>, vector<2x8x8x128xf32>
    %142 = vector.shape_cast %141 : vector<2x8x8x128xf32> to vector<128x128xf32>
    %c21 = arith.constant 21 : index
    %c0_165 = arith.constant 0 : index
    %c0_166 = arith.constant 0 : index
    %143 = vector.load %arg4[%c21, %c0_165, %c0_166] : memref<25x128x128xf32, #tpu.memory_space<vmem>>, vector<1x128x128xf32>
    %144 = vector.shape_cast %143 : vector<1x128x128xf32> to vector<128x128xf32>
    %cst_167 = arith.constant dense<0.000000e+00> : vector<128x128xf32>
    %145 = tpu.matmul %142, %144, %cst_167 {dimension_numbers = #tpu.dot_dimension_numbers<[1], [0], [0], [1], [0, 0, 1, 1], [], []>} : vector<128x128xf32>, vector<128x128xf32>, vector<128x128xf32> -> vector<128x128xf32>
    %146 = arith.addf %140, %145 : vector<128x128xf32>
    %c0_168 = arith.constant 0 : index
    %c4_169 = arith.constant 4 : index
    %c2_170 = arith.constant 2 : index
    %c0_171 = arith.constant 0 : index
    %147 = vector.load %arg9[%c0_168, %c4_169, %c2_170, %c0_171] : memref<2x12x12x128xf32, #tpu.memory_space<vmem>>, vector<2x8x8x128xf32>
    %148 = vector.shape_cast %147 : vector<2x8x8x128xf32> to vector<128x128xf32>
    %c22 = arith.constant 22 : index
    %c0_172 = arith.constant 0 : index
    %c0_173 = arith.constant 0 : index
    %149 = vector.load %arg4[%c22, %c0_172, %c0_173] : memref<25x128x128xf32, #tpu.memory_space<vmem>>, vector<1x128x128xf32>
    %150 = vector.shape_cast %149 : vector<1x128x128xf32> to vector<128x128xf32>
    %cst_174 = arith.constant dense<0.000000e+00> : vector<128x128xf32>
    %151 = tpu.matmul %148, %150, %cst_174 {dimension_numbers = #tpu.dot_dimension_numbers<[1], [0], [0], [1], [0, 0, 1, 1], [], []>} : vector<128x128xf32>, vector<128x128xf32>, vector<128x128xf32> -> vector<128x128xf32>
    %152 = arith.addf %146, %151 : vector<128x128xf32>
    %c0_175 = arith.constant 0 : index
    %c4_176 = arith.constant 4 : index
    %c3_177 = arith.constant 3 : index
    %c0_178 = arith.constant 0 : index
    %153 = vector.load %arg9[%c0_175, %c4_176, %c3_177, %c0_178] : memref<2x12x12x128xf32, #tpu.memory_space<vmem>>, vector<2x8x8x128xf32>
    %154 = vector.shape_cast %153 : vector<2x8x8x128xf32> to vector<128x128xf32>
    %c23 = arith.constant 23 : index
    %c0_179 = arith.constant 0 : index
    %c0_180 = arith.constant 0 : index
    %155 = vector.load %arg4[%c23, %c0_179, %c0_180] : memref<25x128x128xf32, #tpu.memory_space<vmem>>, vector<1x128x128xf32>
    %156 = vector.shape_cast %155 : vector<1x128x128xf32> to vector<128x128xf32>
    %cst_181 = arith.constant dense<0.000000e+00> : vector<128x128xf32>
    %157 = tpu.matmul %154, %156, %cst_181 {dimension_numbers = #tpu.dot_dimension_numbers<[1], [0], [0], [1], [0, 0, 1, 1], [], []>} : vector<128x128xf32>, vector<128x128xf32>, vector<128x128xf32> -> vector<128x128xf32>
    %158 = arith.addf %152, %157 : vector<128x128xf32>
    %c0_182 = arith.constant 0 : index
    %c4_183 = arith.constant 4 : index
    %c4_184 = arith.constant 4 : index
    %c0_185 = arith.constant 0 : index
    %159 = vector.load %arg9[%c0_182, %c4_183, %c4_184, %c0_185] : memref<2x12x12x128xf32, #tpu.memory_space<vmem>>, vector<2x8x8x128xf32>
    %160 = vector.shape_cast %159 : vector<2x8x8x128xf32> to vector<128x128xf32>
    %c24 = arith.constant 24 : index
    %c0_186 = arith.constant 0 : index
    %c0_187 = arith.constant 0 : index
    %161 = vector.load %arg4[%c24, %c0_186, %c0_187] : memref<25x128x128xf32, #tpu.memory_space<vmem>>, vector<1x128x128xf32>
    %162 = vector.shape_cast %161 : vector<1x128x128xf32> to vector<128x128xf32>
    %cst_188 = arith.constant dense<0.000000e+00> : vector<128x128xf32>
    %163 = tpu.matmul %160, %162, %cst_188 {dimension_numbers = #tpu.dot_dimension_numbers<[1], [0], [0], [1], [0, 0, 1, 1], [], []>} : vector<128x128xf32>, vector<128x128xf32>, vector<128x128xf32> -> vector<128x128xf32>
    %164 = arith.addf %158, %163 : vector<128x128xf32>
    %165 = vector.shape_cast %164 : vector<128x128xf32> to vector<2x4x2x8x128xf32>
    %cst_189 = arith.constant dense<0xFF800000> : vector<2x4x8x128xf32>
    %166 = vector.multi_reduction <maximumf>, %165, %cst_189 [2] : vector<2x4x2x8x128xf32> to vector<2x4x8x128xf32>
    %167 = vector.shape_cast %166 : vector<2x4x8x128xf32> to vector<2x4x4x2x128xf32>
    %cst_190 = arith.constant dense<0xFF800000> : vector<2x4x4x128xf32>
    %168 = vector.multi_reduction <maximumf>, %167, %cst_190 [3] : vector<2x4x4x2x128xf32> to vector<2x4x4x128xf32>
    %c0_191 = arith.constant 0 : index
    %c0_192 = arith.constant 0 : index
    %169 = vector.load %arg5[%c0_191, %c0_192] : memref<1x128xf32, #tpu.memory_space<vmem>>, vector<1x128xf32>
    %170 = vector.shape_cast %169 : vector<1x128xf32> to vector<1x1x1x128xf32>
    %171 = vector.broadcast %170 : vector<1x1x1x128xf32> to vector<2x4x4x128xf32>
    %172 = arith.addf %168, %171 : vector<2x4x4x128xf32>
    %cst_193 = arith.constant 0.000000e+00 : f32
    %173 = vector.broadcast %cst_193 : f32 to vector<2x4x4x128xf32>
    %174 = arith.maximumf %172, %173 : vector<2x4x4x128xf32>
    %cst_194 = arith.constant 0.000000e+00 : f32
    %175 = vector.broadcast %cst_194 : f32 to vector<2x128xf32>
    %c0_195 = arith.constant 0 : index
    %c0_196 = arith.constant 0 : index
    %176 = vector.load %arg7[%c0_195, %c0_196] : memref<1x128xf32, #tpu.memory_space<vmem>>, vector<1x128xf32>
    %177 = vector.broadcast %176 : vector<1x128xf32> to vector<2x128xf32>
    %178 = arith.addf %175, %177 : vector<2x128xf32>
    %179 = vector.extract_strided_slice %174 {offsets = [0, 0, 0, 0], sizes = [2, 1, 1, 128], strides = [1, 1, 1, 1]} : vector<2x4x4x128xf32> to vector<2x1x1x128xf32>
    %180 = vector.shape_cast %179 : vector<2x1x1x128xf32> to vector<2x128xf32>
    %c0_197 = arith.constant 0 : index
    %c0_198 = arith.constant 0 : index
    %c0_199 = arith.constant 0 : index
    %181 = vector.load %arg6[%c0_197, %c0_198, %c0_199] : memref<16x128x128xf32, #tpu.memory_space<vmem>>, vector<1x128x128xf32>
    %182 = vector.shape_cast %181 : vector<1x128x128xf32> to vector<128x128xf32>
    %cst_200 = arith.constant dense<0.000000e+00> : vector<2x128xf32>
    %183 = tpu.matmul %180, %182, %cst_200 {dimension_numbers = #tpu.dot_dimension_numbers<[1], [0], [0], [1], [0, 0, 1, 1], [], []>} : vector<2x128xf32>, vector<128x128xf32>, vector<2x128xf32> -> vector<2x128xf32>
    %184 = arith.addf %178, %183 : vector<2x128xf32>
    %185 = vector.extract_strided_slice %174 {offsets = [0, 0, 1, 0], sizes = [2, 1, 1, 128], strides = [1, 1, 1, 1]} : vector<2x4x4x128xf32> to vector<2x1x1x128xf32>
    %186 = vector.shape_cast %185 : vector<2x1x1x128xf32> to vector<2x128xf32>
    %c1_201 = arith.constant 1 : index
    %c0_202 = arith.constant 0 : index
    %c0_203 = arith.constant 0 : index
    %187 = vector.load %arg6[%c1_201, %c0_202, %c0_203] : memref<16x128x128xf32, #tpu.memory_space<vmem>>, vector<1x128x128xf32>
    %188 = vector.shape_cast %187 : vector<1x128x128xf32> to vector<128x128xf32>
    %cst_204 = arith.constant dense<0.000000e+00> : vector<2x128xf32>
    %189 = tpu.matmul %186, %188, %cst_204 {dimension_numbers = #tpu.dot_dimension_numbers<[1], [0], [0], [1], [0, 0, 1, 1], [], []>} : vector<2x128xf32>, vector<128x128xf32>, vector<2x128xf32> -> vector<2x128xf32>
    %190 = arith.addf %184, %189 : vector<2x128xf32>
    %191 = vector.extract_strided_slice %174 {offsets = [0, 0, 2, 0], sizes = [2, 1, 1, 128], strides = [1, 1, 1, 1]} : vector<2x4x4x128xf32> to vector<2x1x1x128xf32>
    %192 = vector.shape_cast %191 : vector<2x1x1x128xf32> to vector<2x128xf32>
    %c2_205 = arith.constant 2 : index
    %c0_206 = arith.constant 0 : index
    %c0_207 = arith.constant 0 : index
    %193 = vector.load %arg6[%c2_205, %c0_206, %c0_207] : memref<16x128x128xf32, #tpu.memory_space<vmem>>, vector<1x128x128xf32>
    %194 = vector.shape_cast %193 : vector<1x128x128xf32> to vector<128x128xf32>
    %cst_208 = arith.constant dense<0.000000e+00> : vector<2x128xf32>
    %195 = tpu.matmul %192, %194, %cst_208 {dimension_numbers = #tpu.dot_dimension_numbers<[1], [0], [0], [1], [0, 0, 1, 1], [], []>} : vector<2x128xf32>, vector<128x128xf32>, vector<2x128xf32> -> vector<2x128xf32>
    %196 = arith.addf %190, %195 : vector<2x128xf32>
    %197 = vector.extract_strided_slice %174 {offsets = [0, 0, 3, 0], sizes = [2, 1, 1, 128], strides = [1, 1, 1, 1]} : vector<2x4x4x128xf32> to vector<2x1x1x128xf32>
    %198 = vector.shape_cast %197 : vector<2x1x1x128xf32> to vector<2x128xf32>
    %c3_209 = arith.constant 3 : index
    %c0_210 = arith.constant 0 : index
    %c0_211 = arith.constant 0 : index
    %199 = vector.load %arg6[%c3_209, %c0_210, %c0_211] : memref<16x128x128xf32, #tpu.memory_space<vmem>>, vector<1x128x128xf32>
    %200 = vector.shape_cast %199 : vector<1x128x128xf32> to vector<128x128xf32>
    %cst_212 = arith.constant dense<0.000000e+00> : vector<2x128xf32>
    %201 = tpu.matmul %198, %200, %cst_212 {dimension_numbers = #tpu.dot_dimension_numbers<[1], [0], [0], [1], [0, 0, 1, 1], [], []>} : vector<2x128xf32>, vector<128x128xf32>, vector<2x128xf32> -> vector<2x128xf32>
    %202 = arith.addf %196, %201 : vector<2x128xf32>
    %203 = vector.extract_strided_slice %174 {offsets = [0, 1, 0, 0], sizes = [2, 1, 1, 128], strides = [1, 1, 1, 1]} : vector<2x4x4x128xf32> to vector<2x1x1x128xf32>
    %204 = vector.shape_cast %203 : vector<2x1x1x128xf32> to vector<2x128xf32>
    %c4_213 = arith.constant 4 : index
    %c0_214 = arith.constant 0 : index
    %c0_215 = arith.constant 0 : index
    %205 = vector.load %arg6[%c4_213, %c0_214, %c0_215] : memref<16x128x128xf32, #tpu.memory_space<vmem>>, vector<1x128x128xf32>
    %206 = vector.shape_cast %205 : vector<1x128x128xf32> to vector<128x128xf32>
    %cst_216 = arith.constant dense<0.000000e+00> : vector<2x128xf32>
    %207 = tpu.matmul %204, %206, %cst_216 {dimension_numbers = #tpu.dot_dimension_numbers<[1], [0], [0], [1], [0, 0, 1, 1], [], []>} : vector<2x128xf32>, vector<128x128xf32>, vector<2x128xf32> -> vector<2x128xf32>
    %208 = arith.addf %202, %207 : vector<2x128xf32>
    %209 = vector.extract_strided_slice %174 {offsets = [0, 1, 1, 0], sizes = [2, 1, 1, 128], strides = [1, 1, 1, 1]} : vector<2x4x4x128xf32> to vector<2x1x1x128xf32>
    %210 = vector.shape_cast %209 : vector<2x1x1x128xf32> to vector<2x128xf32>
    %c5_217 = arith.constant 5 : index
    %c0_218 = arith.constant 0 : index
    %c0_219 = arith.constant 0 : index
    %211 = vector.load %arg6[%c5_217, %c0_218, %c0_219] : memref<16x128x128xf32, #tpu.memory_space<vmem>>, vector<1x128x128xf32>
    %212 = vector.shape_cast %211 : vector<1x128x128xf32> to vector<128x128xf32>
    %cst_220 = arith.constant dense<0.000000e+00> : vector<2x128xf32>
    %213 = tpu.matmul %210, %212, %cst_220 {dimension_numbers = #tpu.dot_dimension_numbers<[1], [0], [0], [1], [0, 0, 1, 1], [], []>} : vector<2x128xf32>, vector<128x128xf32>, vector<2x128xf32> -> vector<2x128xf32>
    %214 = arith.addf %208, %213 : vector<2x128xf32>
    %215 = vector.extract_strided_slice %174 {offsets = [0, 1, 2, 0], sizes = [2, 1, 1, 128], strides = [1, 1, 1, 1]} : vector<2x4x4x128xf32> to vector<2x1x1x128xf32>
    %216 = vector.shape_cast %215 : vector<2x1x1x128xf32> to vector<2x128xf32>
    %c6_221 = arith.constant 6 : index
    %c0_222 = arith.constant 0 : index
    %c0_223 = arith.constant 0 : index
    %217 = vector.load %arg6[%c6_221, %c0_222, %c0_223] : memref<16x128x128xf32, #tpu.memory_space<vmem>>, vector<1x128x128xf32>
    %218 = vector.shape_cast %217 : vector<1x128x128xf32> to vector<128x128xf32>
    %cst_224 = arith.constant dense<0.000000e+00> : vector<2x128xf32>
    %219 = tpu.matmul %216, %218, %cst_224 {dimension_numbers = #tpu.dot_dimension_numbers<[1], [0], [0], [1], [0, 0, 1, 1], [], []>} : vector<2x128xf32>, vector<128x128xf32>, vector<2x128xf32> -> vector<2x128xf32>
    %220 = arith.addf %214, %219 : vector<2x128xf32>
    %221 = vector.extract_strided_slice %174 {offsets = [0, 1, 3, 0], sizes = [2, 1, 1, 128], strides = [1, 1, 1, 1]} : vector<2x4x4x128xf32> to vector<2x1x1x128xf32>
    %222 = vector.shape_cast %221 : vector<2x1x1x128xf32> to vector<2x128xf32>
    %c7_225 = arith.constant 7 : index
    %c0_226 = arith.constant 0 : index
    %c0_227 = arith.constant 0 : index
    %223 = vector.load %arg6[%c7_225, %c0_226, %c0_227] : memref<16x128x128xf32, #tpu.memory_space<vmem>>, vector<1x128x128xf32>
    %224 = vector.shape_cast %223 : vector<1x128x128xf32> to vector<128x128xf32>
    %cst_228 = arith.constant dense<0.000000e+00> : vector<2x128xf32>
    %225 = tpu.matmul %222, %224, %cst_228 {dimension_numbers = #tpu.dot_dimension_numbers<[1], [0], [0], [1], [0, 0, 1, 1], [], []>} : vector<2x128xf32>, vector<128x128xf32>, vector<2x128xf32> -> vector<2x128xf32>
    %226 = arith.addf %220, %225 : vector<2x128xf32>
    %227 = vector.extract_strided_slice %174 {offsets = [0, 2, 0, 0], sizes = [2, 1, 1, 128], strides = [1, 1, 1, 1]} : vector<2x4x4x128xf32> to vector<2x1x1x128xf32>
    %228 = vector.shape_cast %227 : vector<2x1x1x128xf32> to vector<2x128xf32>
    %c8_229 = arith.constant 8 : index
    %c0_230 = arith.constant 0 : index
    %c0_231 = arith.constant 0 : index
    %229 = vector.load %arg6[%c8_229, %c0_230, %c0_231] : memref<16x128x128xf32, #tpu.memory_space<vmem>>, vector<1x128x128xf32>
    %230 = vector.shape_cast %229 : vector<1x128x128xf32> to vector<128x128xf32>
    %cst_232 = arith.constant dense<0.000000e+00> : vector<2x128xf32>
    %231 = tpu.matmul %228, %230, %cst_232 {dimension_numbers = #tpu.dot_dimension_numbers<[1], [0], [0], [1], [0, 0, 1, 1], [], []>} : vector<2x128xf32>, vector<128x128xf32>, vector<2x128xf32> -> vector<2x128xf32>
    %232 = arith.addf %226, %231 : vector<2x128xf32>
    %233 = vector.extract_strided_slice %174 {offsets = [0, 2, 1, 0], sizes = [2, 1, 1, 128], strides = [1, 1, 1, 1]} : vector<2x4x4x128xf32> to vector<2x1x1x128xf32>
    %234 = vector.shape_cast %233 : vector<2x1x1x128xf32> to vector<2x128xf32>
    %c9_233 = arith.constant 9 : index
    %c0_234 = arith.constant 0 : index
    %c0_235 = arith.constant 0 : index
    %235 = vector.load %arg6[%c9_233, %c0_234, %c0_235] : memref<16x128x128xf32, #tpu.memory_space<vmem>>, vector<1x128x128xf32>
    %236 = vector.shape_cast %235 : vector<1x128x128xf32> to vector<128x128xf32>
    %cst_236 = arith.constant dense<0.000000e+00> : vector<2x128xf32>
    %237 = tpu.matmul %234, %236, %cst_236 {dimension_numbers = #tpu.dot_dimension_numbers<[1], [0], [0], [1], [0, 0, 1, 1], [], []>} : vector<2x128xf32>, vector<128x128xf32>, vector<2x128xf32> -> vector<2x128xf32>
    %238 = arith.addf %232, %237 : vector<2x128xf32>
    %239 = vector.extract_strided_slice %174 {offsets = [0, 2, 2, 0], sizes = [2, 1, 1, 128], strides = [1, 1, 1, 1]} : vector<2x4x4x128xf32> to vector<2x1x1x128xf32>
    %240 = vector.shape_cast %239 : vector<2x1x1x128xf32> to vector<2x128xf32>
    %c10_237 = arith.constant 10 : index
    %c0_238 = arith.constant 0 : index
    %c0_239 = arith.constant 0 : index
    %241 = vector.load %arg6[%c10_237, %c0_238, %c0_239] : memref<16x128x128xf32, #tpu.memory_space<vmem>>, vector<1x128x128xf32>
    %242 = vector.shape_cast %241 : vector<1x128x128xf32> to vector<128x128xf32>
    %cst_240 = arith.constant dense<0.000000e+00> : vector<2x128xf32>
    %243 = tpu.matmul %240, %242, %cst_240 {dimension_numbers = #tpu.dot_dimension_numbers<[1], [0], [0], [1], [0, 0, 1, 1], [], []>} : vector<2x128xf32>, vector<128x128xf32>, vector<2x128xf32> -> vector<2x128xf32>
    %244 = arith.addf %238, %243 : vector<2x128xf32>
    %245 = vector.extract_strided_slice %174 {offsets = [0, 2, 3, 0], sizes = [2, 1, 1, 128], strides = [1, 1, 1, 1]} : vector<2x4x4x128xf32> to vector<2x1x1x128xf32>
    %246 = vector.shape_cast %245 : vector<2x1x1x128xf32> to vector<2x128xf32>
    %c11_241 = arith.constant 11 : index
    %c0_242 = arith.constant 0 : index
    %c0_243 = arith.constant 0 : index
    %247 = vector.load %arg6[%c11_241, %c0_242, %c0_243] : memref<16x128x128xf32, #tpu.memory_space<vmem>>, vector<1x128x128xf32>
    %248 = vector.shape_cast %247 : vector<1x128x128xf32> to vector<128x128xf32>
    %cst_244 = arith.constant dense<0.000000e+00> : vector<2x128xf32>
    %249 = tpu.matmul %246, %248, %cst_244 {dimension_numbers = #tpu.dot_dimension_numbers<[1], [0], [0], [1], [0, 0, 1, 1], [], []>} : vector<2x128xf32>, vector<128x128xf32>, vector<2x128xf32> -> vector<2x128xf32>
    %250 = arith.addf %244, %249 : vector<2x128xf32>
    %251 = vector.extract_strided_slice %174 {offsets = [0, 3, 0, 0], sizes = [2, 1, 1, 128], strides = [1, 1, 1, 1]} : vector<2x4x4x128xf32> to vector<2x1x1x128xf32>
    %252 = vector.shape_cast %251 : vector<2x1x1x128xf32> to vector<2x128xf32>
    %c12_245 = arith.constant 12 : index
    %c0_246 = arith.constant 0 : index
    %c0_247 = arith.constant 0 : index
    %253 = vector.load %arg6[%c12_245, %c0_246, %c0_247] : memref<16x128x128xf32, #tpu.memory_space<vmem>>, vector<1x128x128xf32>
    %254 = vector.shape_cast %253 : vector<1x128x128xf32> to vector<128x128xf32>
    %cst_248 = arith.constant dense<0.000000e+00> : vector<2x128xf32>
    %255 = tpu.matmul %252, %254, %cst_248 {dimension_numbers = #tpu.dot_dimension_numbers<[1], [0], [0], [1], [0, 0, 1, 1], [], []>} : vector<2x128xf32>, vector<128x128xf32>, vector<2x128xf32> -> vector<2x128xf32>
    %256 = arith.addf %250, %255 : vector<2x128xf32>
    %257 = vector.extract_strided_slice %174 {offsets = [0, 3, 1, 0], sizes = [2, 1, 1, 128], strides = [1, 1, 1, 1]} : vector<2x4x4x128xf32> to vector<2x1x1x128xf32>
    %258 = vector.shape_cast %257 : vector<2x1x1x128xf32> to vector<2x128xf32>
    %c13_249 = arith.constant 13 : index
    %c0_250 = arith.constant 0 : index
    %c0_251 = arith.constant 0 : index
    %259 = vector.load %arg6[%c13_249, %c0_250, %c0_251] : memref<16x128x128xf32, #tpu.memory_space<vmem>>, vector<1x128x128xf32>
    %260 = vector.shape_cast %259 : vector<1x128x128xf32> to vector<128x128xf32>
    %cst_252 = arith.constant dense<0.000000e+00> : vector<2x128xf32>
    %261 = tpu.matmul %258, %260, %cst_252 {dimension_numbers = #tpu.dot_dimension_numbers<[1], [0], [0], [1], [0, 0, 1, 1], [], []>} : vector<2x128xf32>, vector<128x128xf32>, vector<2x128xf32> -> vector<2x128xf32>
    %262 = arith.addf %256, %261 : vector<2x128xf32>
    %263 = vector.extract_strided_slice %174 {offsets = [0, 3, 2, 0], sizes = [2, 1, 1, 128], strides = [1, 1, 1, 1]} : vector<2x4x4x128xf32> to vector<2x1x1x128xf32>
    %264 = vector.shape_cast %263 : vector<2x1x1x128xf32> to vector<2x128xf32>
    %c14_253 = arith.constant 14 : index
    %c0_254 = arith.constant 0 : index
    %c0_255 = arith.constant 0 : index
    %265 = vector.load %arg6[%c14_253, %c0_254, %c0_255] : memref<16x128x128xf32, #tpu.memory_space<vmem>>, vector<1x128x128xf32>
    %266 = vector.shape_cast %265 : vector<1x128x128xf32> to vector<128x128xf32>
    %cst_256 = arith.constant dense<0.000000e+00> : vector<2x128xf32>
    %267 = tpu.matmul %264, %266, %cst_256 {dimension_numbers = #tpu.dot_dimension_numbers<[1], [0], [0], [1], [0, 0, 1, 1], [], []>} : vector<2x128xf32>, vector<128x128xf32>, vector<2x128xf32> -> vector<2x128xf32>
    %268 = arith.addf %262, %267 : vector<2x128xf32>
    %269 = vector.extract_strided_slice %174 {offsets = [0, 3, 3, 0], sizes = [2, 1, 1, 128], strides = [1, 1, 1, 1]} : vector<2x4x4x128xf32> to vector<2x1x1x128xf32>
    %270 = vector.shape_cast %269 : vector<2x1x1x128xf32> to vector<2x128xf32>
    %c15_257 = arith.constant 15 : index
    %c0_258 = arith.constant 0 : index
    %c0_259 = arith.constant 0 : index
    %271 = vector.load %arg6[%c15_257, %c0_258, %c0_259] : memref<16x128x128xf32, #tpu.memory_space<vmem>>, vector<1x128x128xf32>
    %272 = vector.shape_cast %271 : vector<1x128x128xf32> to vector<128x128xf32>
    %cst_260 = arith.constant dense<0.000000e+00> : vector<2x128xf32>
    %273 = tpu.matmul %270, %272, %cst_260 {dimension_numbers = #tpu.dot_dimension_numbers<[1], [0], [0], [1], [0, 0, 1, 1], [], []>} : vector<2x128xf32>, vector<128x128xf32>, vector<2x128xf32> -> vector<2x128xf32>
    %274 = arith.addf %268, %273 : vector<2x128xf32>
    %c0_261 = arith.constant 0 : index
    %c0_262 = arith.constant 0 : index
    %275 = vector.load %arg8[%c0_261, %c0_262] : memref<2x128xf32, #tpu.memory_space<vmem>>, vector<2x128xf32>
    tpu.vector_store %arg8[%c0_261, %c0_262], %274 {strides = array<i32>} : memref<2x128xf32, #tpu.memory_space<vmem>>, vector<2x128xf32>,
    return
  }
  func.func @transform_0(%arg0: i32) -> (i32, i32, i32) {
    %c0_i32 = arith.constant 0 : i32
    %c0_i32_0 = arith.constant 0 : i32
    %c0_i32_1 = arith.constant 0 : i32
    return %arg0, %c0_i32, %c0_i32_0 : i32, i32, i32
  }
  func.func @transform_1(%arg0: i32) -> (i32, i32) {
    %c0_i32 = arith.constant 0 : i32
    %c0_i32_0 = arith.constant 0 : i32
    %c0_i32_1 = arith.constant 0 : i32
    return %c0_i32, %c0_i32_0 : i32, i32
  }
  func.func @transform_2(%arg0: i32) -> (i32, i32) {
    %c0_i32 = arith.constant 0 : i32
    %c0_i32_0 = arith.constant 0 : i32
    %c0_i32_1 = arith.constant 0 : i32
    return %c0_i32, %c0_i32_0 : i32, i32
  }
  func.func @transform_3(%arg0: i32) -> (i32, i32, i32) {
    %c0_i32 = arith.constant 0 : i32
    %c0_i32_0 = arith.constant 0 : i32
    %c0_i32_1 = arith.constant 0 : i32
    %c0_i32_2 = arith.constant 0 : i32
    return %c0_i32, %c0_i32_0, %c0_i32_1 : i32, i32, i32
  }
  func.func @transform_4(%arg0: i32) -> (i32, i32) {
    %c0_i32 = arith.constant 0 : i32
    %c0_i32_0 = arith.constant 0 : i32
    %c0_i32_1 = arith.constant 0 : i32
    return %c0_i32, %c0_i32_0 : i32, i32
  }
  func.func @transform_5(%arg0: i32) -> (i32, i32, i32) {
    %c0_i32 = arith.constant 0 : i32
    %c0_i32_0 = arith.constant 0 : i32
    %c0_i32_1 = arith.constant 0 : i32
    %c0_i32_2 = arith.constant 0 : i32
    return %c0_i32, %c0_i32_0, %c0_i32_1 : i32, i32, i32
  }
  func.func @transform_6(%arg0: i32) -> (i32, i32) {
    %c0_i32 = arith.constant 0 : i32
    %c0_i32_0 = arith.constant 0 : i32
    %c0_i32_1 = arith.constant 0 : i32
    return %c0_i32, %c0_i32_0 : i32, i32
  }
  func.func @transform_7(%arg0: i32) -> (i32, i32) {
    %c0_i32 = arith.constant 0 : i32
    %c0_i32_0 = arith.constant 0 : i32
    return %arg0, %c0_i32 : i32, i32
  }
}

</mosaic_0001>

<bundles_post_ra>
// kernel: net_forward.1
= control target key start
LH: loop header
LB: loop body
LE: loop exit
PB: predicated region body
PF: predicated region fallthrough
CT: control target
= control target key end

     0   :  { %s9797_s0 = inlined_call_operand.vmem [shape: f32[2,576,128], index: 0, kind: input, shape index: {}]   ;;  %s9798_s1 = inlined_call_operand.vmem [shape: f32[128,128], index: 1, kind: input, shape index: {}]   ;;  %s9799_s2 = inlined_call_operand.vmem [shape: f32[1,128], index: 2, kind: input, shape index: {}]   ;;  %s9800_s3 = inlined_call_operand.vmem [shape: f32[25,128,128], index: 3, kind: input, shape index: {}]   ;;  %s9801_s4 = inlined_call_operand.vmem [shape: f32[1,128], index: 4, kind: input, shape index: {}]   ;;  %s9802_s5 = inlined_call_operand.vmem [shape: f32[16,128,128], index: 5, kind: input, shape index: {}]   ;;  %s9803_s6 = inlined_call_operand.vmem [shape: f32[1,128], index: 6, kind: input, shape index: {}]   ;;  %s9804_s7 = inlined_call_operand.hbm [shape: f32[2,128], index: 7, kind: output, shape index: {}]  }
   0x1   :  { %v186_v0 = vld [vmem:[%s9798_s1 + $0x78] sm:$0xff]  ;;  %v185_v1 = vld [vmem:[%s9798_s1 + $0x70] sm:$0xff]  ;;  %v184_v2 = vld [vmem:[%s9798_s1 + $0x68] sm:$0xff] }
   0x2   :  { %187 = vmatpush.msra.mxu0 %v186_v0  ;;  %v183_v3 = vld [vmem:[%s9798_s1 + $0x60] sm:$0xff]  ;;  %v182_v4 = vld [vmem:[%s9798_s1 + $0x58] sm:$0xff] }
   0x4   :  { %188 = vmatpush.msra.mxu0 %v185_v1 }
   0x6   :  { %189 = vmatpush.msra.mxu0 %v184_v2 }
   0x8   :  { %190 = vmatpush.msra.mxu0 %v183_v3 }
   0x9   :  { %12 = vsyncpa [#allocation4], 0  ;;  %v181_v5 = vld [vmem:[%s9798_s1 + $0x50] sm:$0xff]  ;;  %v180_v6 = vld [vmem:[%s9798_s1 + $0x48] sm:$0xff]  ;;  %vm3998_vm0 = vcmask 1041408   ;;  %vm4315_vm1 = vcmask 1041409  }
   0xa   :  { %191 = vmatpush.msra.mxu0 %v182_v4  ;;  %v179_v7 = vld [vmem:[%s9798_s1 + $0x40] sm:$0xff]  ;;  %v178_v8 = vld [vmem:[%s9798_s1 + $0x38] sm:$0xff]  ;;  %v177_v9 = vld [vmem:[%s9798_s1 + $0x30] sm:$0xff]  ;;  %s4992_s9 = sshll.u32 %s9804_s7, 4  ;;  %s4993_s9 = int_to_ptr.hbm [resolvable:$true] %s4992_s9 }
   0xb   :  { %v176_v10 = vld [vmem:[%s9798_s1 + $0x28] sm:$0xff]  ;;  %v175_v11 = vld [vmem:[%s9798_s1 + $0x20] sm:$0xff]  ;;  %v174_v12 = vld [vmem:[%s9798_s1 + $0x18] sm:$0xff] }
   0xc   :  { %192 = vmatpush.msra.mxu0 %v181_v5  ;;  %v173_v13 = vld [vmem:[%s9798_s1 + $0x10] sm:$0xff]  ;;  %v172_v14 = vld [vmem:[%s9798_s1 + $0x8] sm:$0xff]  ;;  %v171_v15 = vld [vmem:[%s9798_s1] sm:$0xff] }
   0xd   :  { %v27_v16 = vld [vmem:[%s9797_s0] sm:$0xff]  ;;  %v28_v17 = vld [vmem:[%s9797_s0 + $0x8] sm:$0xff]  ;;  %v29_v18 = vld [vmem:[%s9797_s0 + $0x10] sm:$0xff] }
   0xe   :  { %193 = vmatpush.msra.mxu0 %v180_v6  ;;  %v30_v19 = vld [vmem:[%s9797_s0 + $0x18] sm:$0xff]  ;;  %v31_v20 = vld [vmem:[%s9797_s0 + $0x20] sm:$0xff]  ;;  %v32_v21 = vld [vmem:[%s9797_s0 + $0x28] sm:$0xff] }
   0xf   :  { %v33_v22 = vld [vmem:[%s9797_s0 + $0x30] sm:$0xff]  ;;  %v34_v23 = vld [vmem:[%s9797_s0 + $0x38] sm:$0xff]  ;;  %v35_v24 = vld [vmem:[%s9797_s0 + $0x40] sm:$0xff] }
  0x10   :  { %194 = vmatpush.msra.mxu0 %v179_v7  ;;  %v36_v25 = vld [vmem:[%s9797_s0 + $0x48] sm:$0xff]  ;;  %v37_v26 = vld [vmem:[%s9797_s0 + $0x50] sm:$0xff]  ;;  %v38_v27 = vld [vmem:[%s9797_s0 + $0x58] sm:$0xff] }
  0x11   :  { %v39_v28 = vld [vmem:[%s9797_s0 + $0x60] sm:$0xff]  ;;  %v40_v29 = vld [vmem:[%s9797_s0 + $0x68] sm:$0xff]  ;;  %v41_v30 = vld [vmem:[%s9797_s0 + $0x70] sm:$0xff] }
  0x12   :  { %195 = vmatpush.msra.mxu0 %v178_v8  ;;  %v42_v31 = vld [vmem:[%s9797_s0 + $0x78] sm:$0xff]  ;;  %v43_v33 = vld [vmem:[%s9797_s0 + $0x80] sm:$0xff]  ;;  %v44_v35 = vld [vmem:[%s9797_s0 + $0x88] sm:$0xff] }
  0x13   :  { %v45_v37 = vld [vmem:[%s9797_s0 + $0x90] sm:$0xff]  ;;  %v46_v39 = vld [vmem:[%s9797_s0 + $0x98] sm:$0xff]  ;;  %v47_v41 = vld [vmem:[%s9797_s0 + $0xa0] sm:$0xff] }
  0x14   :  { %196 = vmatpush.msra.mxu0 %v177_v9  ;;  %v48_v43 = vld [vmem:[%s9797_s0 + $0xa8] sm:$0xff]  ;;  %v49_v45 = vld [vmem:[%s9797_s0 + $0xb0] sm:$0xff]  ;;  %v50_v47 = vld [vmem:[%s9797_s0 + $0xb8] sm:$0xff] }
  0x15   :  { %v51_v49 = vld [vmem:[%s9797_s0 + $0xc0] sm:$0xff]  ;;  %v52_v51 = vld [vmem:[%s9797_s0 + $0xc8] sm:$0xff]  ;;  %v53_v53 = vld [vmem:[%s9797_s0 + $0xd0] sm:$0xff] }
  0x16   :  { %197 = vmatpush.msra.mxu0 %v176_v10  ;;  %v54_v55 = vld [vmem:[%s9797_s0 + $0xd8] sm:$0xff]  ;;  %v55_v57 = vld [vmem:[%s9797_s0 + $0xe0] sm:$0xff]  ;;  %v56_v59 = vld [vmem:[%s9797_s0 + $0xe8] sm:$0xff] }
  0x17   :  { %v57_v61 = vld [vmem:[%s9797_s0 + $0xf0] sm:$0xff]  ;;  %v58_v63 = vld [vmem:[%s9797_s0 + $0xf8] sm:$0xff]  ;;  %v59_v1 = vld [vmem:[%s9797_s0 + $0x100] sm:$0xff] }
  0x18   :  { %198 = vmatpush.msra.mxu0 %v175_v11  ;;  %v60_v3 = vld [vmem:[%s9797_s0 + $0x108] sm:$0xff]  ;;  %v61_v5 = vld [vmem:[%s9797_s0 + $0x110] sm:$0xff]  ;;  %v62_v7 = vld [vmem:[%s9797_s0 + $0x118] sm:$0xff] }
  0x19   :  { %v63_v9 = vld [vmem:[%s9797_s0 + $0x120] sm:$0xff]  ;;  %v64_v11 = vld [vmem:[%s9797_s0 + $0x128] sm:$0xff] }
  0x1a   :  { %199 = vmatpush.msra.mxu0 %v174_v12 }
  0x1c   :  { %200 = vmatpush.msra.mxu0 %v173_v13  ;;  %v65_v13 = vld [vmem:[%s9797_s0 + $0x130] sm:$0xff] }
  0x1e   :  { %201 = vmatpush.msra.mxu0 %v172_v14 }
  0x20   :  { %202 = vmatpush.msra.mxu0 %v171_v15  ;;  %v66_v15 = vld [vmem:[%s9797_s0 + $0x138] sm:$0xff] }
  0x21   :  { %203 = vmatmul.f32.vlgmr.msra.gmra.mxu0 %v27_v16 }
  0x29   :  { %206 = vmatmul.f32.gmra.mxu0 %v28_v17  ;;  %v67_v17 = vld [vmem:[%s9797_s0 + $0x140] sm:$0xff] }
  0x31   :  { %209 = vmatmul.f32.gmra.mxu0 %v29_v18 }
  0x39   :  { %212 = vmatmul.f32.gmra.mxu0 %v30_v19  ;;  %v68_v19 = vld [vmem:[%s9797_s0 + $0x148] sm:$0xff] }
  0x41   :  { %215 = vmatmul.f32.gmra.mxu0 %v31_v20 }
  0x49   :  { %218 = vmatmul.f32.gmra.mxu0 %v32_v21  ;;  %v69_v21 = vld [vmem:[%s9797_s0 + $0x150] sm:$0xff] }
  0x51   :  { %221 = vmatmul.f32.gmra.mxu0 %v33_v22 }
  0x59   :  { %224 = vmatmul.f32.gmra.mxu0 %v34_v23  ;;  %v70_v23 = vld [vmem:[%s9797_s0 + $0x158] sm:$0xff] }
  0x61   :  { %227 = vmatmul.f32.gmra.mxu0 %v35_v24 }
  0x69   :  { %230 = vmatmul.f32.gmra.mxu0 %v36_v25  ;;  %v71_v25 = vld [vmem:[%s9797_s0 + $0x160] sm:$0xff] }
  0x71   :  { %233 = vmatmul.f32.gmra.mxu0 %v37_v26 }
  0x79   :  { %236 = vmatmul.f32.gmra.mxu0 %v38_v27  ;;  %v72_v27 = vld [vmem:[%s9797_s0 + $0x168] sm:$0xff] }
  0x81   :  { %239 = vmatmul.f32.gmra.mxu0 %v39_v28 }
  0x89   :  { %242 = vmatmul.f32.gmra.mxu0 %v40_v29  ;;  %v73_v29 = vld [vmem:[%s9797_s0 + $0x170] sm:$0xff] }
  0x91   :  { %245 = vmatmul.f32.gmra.mxu0 %v41_v30 }
  0x99   :  { %248 = vmatmul.f32.gmra.mxu0 %v42_v31  ;;  %v74_v31 = vld [vmem:[%s9797_s0 + $0x178] sm:$0xff] }
  0x9e   :  { %v5798_v32 = vpop.f32.mrf.mxu0 }
  0xa1   :  { %251 = vmatmul.f32.gmra.mxu0 %v43_v33 }
  0xa6   :  { %v5803_v34 = vpop.f32.mrf.mxu0 }
  0xa9   :  { %254 = vmatmul.f32.gmra.mxu0 %v44_v35  ;;  %v75_v35 = vld [vmem:[%s9797_s0 + $0x180] sm:$0xff] }
  0xae   :  { %v5808_v36 = vpop.f32.mrf.mxu0 }
  0xb1   :  { %257 = vmatmul.f32.gmra.mxu0 %v45_v37 }
  0xb6   :  { %v5813_v38 = vpop.f32.mrf.mxu0 }
  0xb9   :  { %260 = vmatmul.f32.gmra.mxu0 %v46_v39  ;;  %v76_v39 = vld [vmem:[%s9797_s0 + $0x188] sm:$0xff] }
  0xbe   :  { %v5818_v40 = vpop.f32.mrf.mxu0 }
  0xc1   :  { %263 = vmatmul.f32.gmra.mxu0 %v47_v41 }
  0xc6   :  { %v5823_v42 = vpop.f32.mrf.mxu0 }
  0xc9   :  { %266 = vmatmul.f32.gmra.mxu0 %v48_v43  ;;  %v77_v43 = vld [vmem:[%s9797_s0 + $0x190] sm:$0xff] }
  0xce   :  { %v5828_v44 = vpop.f32.mrf.mxu0 }
  0xd1   :  { %269 = vmatmul.f32.gmra.mxu0 %v49_v45 }
  0xd6   :  { %v5833_v46 = vpop.f32.mrf.mxu0 }
  0xd9   :  { %272 = vmatmul.f32.gmra.mxu0 %v50_v47  ;;  %v78_v47 = vld [vmem:[%s9797_s0 + $0x198] sm:$0xff] }
  0xde   :  { %v5838_v48 = vpop.f32.mrf.mxu0 }
  0xe1   :  { %275 = vmatmul.f32.gmra.mxu0 %v51_v49 }
  0xe6   :  { %v5843_v50 = vpop.f32.mrf.mxu0 }
  0xe9   :  { %278 = vmatmul.f32.gmra.mxu0 %v52_v51  ;;  %v79_v51 = vld [vmem:[%s9797_s0 + $0x1a0] sm:$0xff] }
  0xee   :  { %v5848_v52 = vpop.f32.mrf.mxu0 }
  0xf1   :  { %281 = vmatmul.f32.gmra.mxu0 %v53_v53 }
  0xf6   :  { %v5853_v54 = vpop.f32.mrf.mxu0 }
  0xf9   :  { %284 = vmatmul.f32.gmra.mxu0 %v54_v55  ;;  %v80_v55 = vld [vmem:[%s9797_s0 + $0x1a8] sm:$0xff] }
  0xfe   :  { %v5858_v56 = vpop.f32.mrf.mxu0 }
 0x101   :  { %287 = vmatmul.f32.gmra.mxu0 %v55_v57 }
 0x106   :  { %v5863_v58 = vpop.f32.mrf.mxu0 }
 0x109   :  { %290 = vmatmul.f32.gmra.mxu0 %v56_v59  ;;  %v81_v59 = vld [vmem:[%s9797_s0 + $0x1b0] sm:$0xff] }
 0x10e   :  { %v5868_v60 = vpop.f32.mrf.mxu0 }
 0x111   :  { %293 = vmatmul.f32.gmra.mxu0 %v57_v61 }
 0x116   :  { %v5873_v62 = vpop.f32.mrf.mxu0 }
 0x119   :  { %296 = vmatmul.f32.gmra.mxu0 %v58_v63  ;;  %v82_v63 = vld [vmem:[%s9797_s0 + $0x1b8] sm:$0xff] }
 0x11e   :  { %v5878_v0 = vpop.f32.mrf.mxu0 }
 0x121   :  { %299 = vmatmul.f32.gmra.mxu0 %v59_v1 }
 0x126   :  { %v5883_v2 = vpop.f32.mrf.mxu0 }
 0x129   :  { %302 = vmatmul.f32.gmra.mxu0 %v60_v3  ;;  %v83_v3 = vld [vmem:[%s9797_s0 + $0x1c0] sm:$0xff] }
 0x12e   :  { %v5888_v4 = vpop.f32.mrf.mxu0 }
 0x131   :  { %305 = vmatmul.f32.gmra.mxu0 %v61_v5 }
 0x136   :  { %v5893_v6 = vpop.f32.mrf.mxu0 }
 0x139   :  { %308 = vmatmul.f32.gmra.mxu0 %v62_v7  ;;  %v84_v7 = vld [vmem:[%s9797_s0 + $0x1c8] sm:$0xff] }
 0x13e   :  { %v5898_v8 = vpop.f32.mrf.mxu0 }
 0x141   :  { %311 = vmatmul.f32.gmra.mxu0 %v63_v9 }
 0x146   :  { %v5903_v10 = vpop.f32.mrf.mxu0 }
 0x149   :  { %314 = vmatmul.f32.gmra.mxu0 %v64_v11  ;;  %v85_v11 = vld [vmem:[%s9797_s0 + $0x1d0] sm:$0xff] }
 0x14e   :  { %v5908_v12 = vpop.f32.mrf.mxu0 }
 0x151   :  { %317 = vmatmul.f32.gmra.mxu0 %v65_v13 }
 0x156   :  { %v5913_v14 = vpop.f32.mrf.mxu0 }
 0x159   :  { %320 = vmatmul.f32.gmra.mxu0 %v66_v15  ;;  %v86_v15 = vld [vmem:[%s9797_s0 + $0x1d8] sm:$0xff] }
 0x15e   :  { %v5918_v16 = vpop.f32.mrf.mxu0 }
 0x161   :  { %323 = vmatmul.f32.gmra.mxu0 %v67_v17 }
 0x166   :  { %v5923_v18 = vpop.f32.mrf.mxu0 }
 0x169   :  { %326 = vmatmul.f32.gmra.mxu0 %v68_v19  ;;  %v87_v19 = vld [vmem:[%s9797_s0 + $0x1e0] sm:$0xff] }
 0x16e   :  { %v5928_v20 = vpop.f32.mrf.mxu0 }
 0x171   :  { %329 = vmatmul.f32.gmra.mxu0 %v69_v21 }
 0x176   :  { %v5933_v22 = vpop.f32.mrf.mxu0 }
 0x179   :  { %332 = vmatmul.f32.gmra.mxu0 %v70_v23  ;;  %v88_v23 = vld [vmem:[%s9797_s0 + $0x1e8] sm:$0xff] }
 0x17e   :  { %v5938_v24 = vpop.f32.mrf.mxu0 }
 0x181   :  { %335 = vmatmul.f32.gmra.mxu0 %v71_v25 }
 0x186   :  { %v5943_v26 = vpop.f32.mrf.mxu0 }
 0x189   :  { %338 = vmatmul.f32.gmra.mxu0 %v72_v27  ;;  %v89_v27 = vld [vmem:[%s9797_s0 + $0x1f0] sm:$0xff] }
 0x18e   :  { %v5948_v28 = vpop.f32.mrf.mxu0 }
 0x191   :  { %341 = vmatmul.f32.gmra.mxu0 %v73_v29 }
 0x196   :  { %v5953_v30 = vpop.f32.mrf.mxu0 }
 0x199   :  { %344 = vmatmul.f32.gmra.mxu0 %v74_v31  ;;  %v90_v31 = vld [vmem:[%s9797_s0 + $0x1f8] sm:$0xff] }
 0x19e   :  { %v5958_v33 = vpop.f32.mrf.mxu0 }
 0x1a1   :  { %347 = vmatmul.f32.gmra.mxu0 %v75_v35 }
 0x1a6   :  { %v5963_v37 = vpop.f32.mrf.mxu0 }
 0x1a9   :  { %350 = vmatmul.f32.gmra.mxu0 %v76_v39  ;;  %v91_v39 = vld [vmem:[%s9797_s0 + $0x200] sm:$0xff] }
 0x1ae   :  { %v5968_v41 = vpop.f32.mrf.mxu0 }
 0x1b1   :  { %353 = vmatmul.f32.gmra.mxu0 %v77_v43  ;;  %v1144_v43 = vld [vmem:[%s9800_s3 + $0x78] sm:$0xff] }
 0x1b2   :  { %1243 = vmatpush.msra.mxu2 %v1144_v43  ;;  %v5031_v43 = vld [vmem:[%s9800_s3 + $0x170] sm:$0xff] }
 0x1b6   :  { %v5973_v45 = vpop.f32.mrf.mxu0 }
 0x1b9   :  { %356 = vmatmul.f32.gmra.mxu0 %v78_v47  ;;  %v1143_v47 = vld [vmem:[%s9800_s3 + $0x70] sm:$0xff] }
 0x1ba   :  { %1244 = vmatpush.msra.mxu2 %v1143_v47  ;;  %v1136_v47 = vld [vmem:[%s9800_s3 + $0x38] sm:$0xff] }
 0x1be   :  { %v5978_v49 = vpop.f32.mrf.mxu0 }
 0x1c1   :  { %359 = vmatmul.f32.gmra.mxu0 %v79_v51  ;;  %v1142_v51 = vld [vmem:[%s9800_s3 + $0x68] sm:$0xff] }
 0x1c2   :  { %1245 = vmatpush.msra.mxu2 %v1142_v51  ;;  %v5014_v51 = vld [vmem:[%s9800_s3 + $0xe8] sm:$0xff] }
 0x1c6   :  { %v5983_v53 = vpop.f32.mrf.mxu0 }
 0x1c9   :  { %362 = vmatmul.f32.gmra.mxu0 %v80_v55  ;;  %v1141_v55 = vld [vmem:[%s9800_s3 + $0x60] sm:$0xff] }
 0x1ca   :  { %1246 = vmatpush.msra.mxu2 %v1141_v55  ;;  %v5030_v55 = vld [vmem:[%s9800_s3 + $0x168] sm:$0xff] }
 0x1ce   :  { %v5988_v57 = vpop.f32.mrf.mxu0 }
 0x1d1   :  { %365 = vmatmul.f32.gmra.mxu0 %v81_v59 }
 0x1d6   :  { %v5993_v61 = vpop.f32.mrf.mxu0 }
 0x1d9   :  { %368 = vmatmul.f32.gmra.mxu0 %v82_v63  ;;  %v92_v63 = vld [vmem:[%s9797_s0 + $0x208] sm:$0xff] }
 0x1de   :  { %v5998_v1 = vpop.f32.mrf.mxu0 }
 0x1e1   :  { %371 = vmatmul.f32.gmra.mxu0 %v83_v3  ;;  %v1140_v3 = vld [vmem:[%s9800_s3 + $0x58] sm:$0xff] }
 0x1e2   :  { %1247 = vmatpush.msra.mxu2 %v1140_v3  ;;  %v5013_v3 = vld [vmem:[%s9800_s3 + $0xe0] sm:$0xff] }
 0x1e6   :  { %v6003_v5 = vpop.f32.mrf.mxu0 }
 0x1e9   :  { %374 = vmatmul.f32.gmra.mxu0 %v84_v7  ;;  %v1139_v7 = vld [vmem:[%s9800_s3 + $0x50] sm:$0xff] }
 0x1ea   :  { %1248 = vmatpush.msra.mxu2 %v1139_v7  ;;  %v5029_v7 = vld [vmem:[%s9800_s3 + $0x160] sm:$0xff] }
 0x1ee   :  { %v6008_v9 = vpop.f32.mrf.mxu0 }
 0x1f1   :  { %377 = vmatmul.f32.gmra.mxu0 %v85_v11  ;;  %v1138_v11 = vld [vmem:[%s9800_s3 + $0x48] sm:$0xff] }
 0x1f2   :  { %1249 = vmatpush.msra.mxu2 %v1138_v11  ;;  %v1134_v11 = vld [vmem:[%s9800_s3 + $0x28] sm:$0xff] }
 0x1f6   :  { %v6013_v13 = vpop.f32.mrf.mxu0 }
 0x1f9   :  { %380 = vmatmul.f32.gmra.mxu0 %v86_v15  ;;  %v5016_v15 = vld [vmem:[%s9800_s3 + $0xf8] sm:$0xff] }
 0x1fa   :  { %1178 = vmatpush.msra.mxu1 %v5016_v15  ;;  %v94_v15 = vld [vmem:[%s9797_s0 + $0x218] sm:$0xff] }
 0x1fe   :  { %v6018_v17 = vpop.f32.mrf.mxu0 }
 0x201   :  { %383 = vmatmul.f32.gmra.mxu0 %v87_v19  ;;  %v5032_v19 = vld [vmem:[%s9800_s3 + $0x178] sm:$0xff] }
 0x202   :  { %1341 = vmatpush.msra.mxu3 %v5032_v19 }
 0x204   :  { %1342 = vmatpush.msra.mxu3 %v5031_v43  ;;  %v5011_v43 = vld [vmem:[%s9800_s3 + $0xd0] sm:$0xff] }
 0x206   :  { %v6023_v21 = vpop.f32.mrf.mxu0  ;;  %1343 = vmatpush.msra.mxu3 %v5030_v55  ;;  %v5010_v55 = vld [vmem:[%s9800_s3 + $0xc8] sm:$0xff] }
 0x208   :  { %1344 = vmatpush.msra.mxu3 %v5029_v7  ;;  %v5009_v7 = vld [vmem:[%s9800_s3 + $0xc0] sm:$0xff] }
 0x209   :  { %386 = vmatmul.f32.gmra.mxu0 %v88_v23 }
 0x20e   :  { %v6028_v25 = vpop.f32.mrf.mxu0 }
 0x211   :  { %389 = vmatmul.f32.gmra.mxu0 %v89_v27  ;;  %v93_v27 = vld [vmem:[%s9797_s0 + $0x210] sm:$0xff] }
 0x216   :  { %v6033_v29 = vpop.f32.mrf.mxu0 }
 0x219   :  { %392 = vmatmul.f32.gmra.mxu0 %v90_v31  ;;  %v1137_v31 = vld [vmem:[%s9800_s3 + $0x40] sm:$0xff] }
 0x21a   :  { %1250 = vmatpush.msra.mxu2 %v1137_v31  ;;  %v5028_v31 = vld [vmem:[%s9800_s3 + $0x158] sm:$0xff] }
 0x21b   :  { %1345 = vmatpush.msra.mxu3 %v5028_v31 }
 0x21c   :  { %1251 = vmatpush.msra.mxu2 %v1136_v47  ;;  %v5027_v47 = vld [vmem:[%s9800_s3 + $0x150] sm:$0xff] }
 0x21d   :  { %1346 = vmatpush.msra.mxu3 %v5027_v47  ;;  %v1129_v47 = vld [vmem:[%s9800_s3] sm:$0xff] }
 0x21e   :  { %v6038_v35 = vpop.f32.mrf.mxu0 }
 0x221   :  { %395 = vmatmul.f32.gmra.mxu0 %v91_v39  ;;  %v5015_v39 = vld [vmem:[%s9800_s3 + $0xf0] sm:$0xff] }
 0x222   :  { %1179 = vmatpush.msra.mxu1 %v5015_v39  ;;  %v1133_v39 = vld [vmem:[%s9800_s3 + $0x20] sm:$0xff] }
 0x224   :  { %1180 = vmatpush.msra.mxu1 %v5014_v51  ;;  %v1132_v51 = vld [vmem:[%s9800_s3 + $0x18] sm:$0xff] }
 0x226   :  { %v6055_v59 = vpop.f32.mrf.mxu0  ;;  %1181 = vmatpush.msra.mxu1 %v5013_v3  ;;  %v1131_v3 = vld [vmem:[%s9800_s3 + $0x10] sm:$0xff] }
 0x229   :  { %398 = vmatmul.f32.gmra.mxu0 %v92_v63  ;;  %v1135_v63 = vld [vmem:[%s9800_s3 + $0x30] sm:$0xff] }
 0x22a   :  { %1252 = vmatpush.msra.mxu2 %v1135_v63  ;;  %v5026_v63 = vld [vmem:[%s9800_s3 + $0x148] sm:$0xff] }
 0x22b   :  { %1347 = vmatpush.msra.mxu3 %v5026_v63  ;;  %v5006_v63 = vld [vmem:[%s9800_s3 + $0xa8] sm:$0xff] }
 0x22c   :  { %1253 = vmatpush.msra.mxu2 %v1134_v11  ;;  %v5025_v11 = vld [vmem:[%s9800_s3 + $0x140] sm:$0xff] }
 0x22d   :  { %1348 = vmatpush.msra.mxu3 %v5025_v11  ;;  %v5021_v11 = vld [vmem:[%s9800_s3 + $0x120] sm:$0xff] }
 0x22e   :  { %v6075_v23 = vpop.f32.mrf.mxu0  ;;  %1254 = vmatpush.msra.mxu2 %v1133_v39  ;;  %v5008_v39 = vld [vmem:[%s9800_s3 + $0xb8] sm:$0xff] }
 0x230   :  { %1255 = vmatpush.msra.mxu2 %v1132_v51  ;;  %v5007_v51 = vld [vmem:[%s9800_s3 + $0xb0] sm:$0xff] }
 0x231   :  { %401 = vmatmul.f32.gmra.mxu0 %v93_v27  ;;  %v5012_v27 = vld [vmem:[%s9800_s3 + $0xd8] sm:$0xff] }
 0x232   :  { %1182 = vmatpush.msra.mxu1 %v5012_v27  ;;  %1256 = vmatpush.msra.mxu2 %v1131_v3  ;;  %v95_v27 = vld [vmem:[%s9797_s0 + $0x220] sm:$0xff]  ;;  %v5022_v3 = vld [vmem:[%s9800_s3 + $0x128] sm:$0xff] }
 0x234   :  { %1183 = vmatpush.msra.mxu1 %v5011_v43  ;;  %v5024_v43 = vld [vmem:[%s9800_s3 + $0x138] sm:$0xff] }
 0x235   :  { %1349 = vmatpush.msra.mxu3 %v5024_v43  ;;  %v5020_v43 = vld [vmem:[%s9800_s3 + $0x118] sm:$0xff] }
 0x236   :  { %v6113_v19 = vpop.f32.mrf.mxu0  ;;  %1184 = vmatpush.msra.mxu1 %v5010_v55  ;;  %v5023_v55 = vld [vmem:[%s9800_s3 + $0x130] sm:$0xff] }
 0x237   :  { %1350 = vmatpush.msra.mxu3 %v5023_v55  ;;  %v5002_v55 = vld [vmem:[%s9800_s3 + $0x88] sm:$0xff] }
 0x238   :  { %1185 = vmatpush.msra.mxu1 %v5009_v7  ;;  %v5005_v7 = vld [vmem:[%s9800_s3 + $0xa0] sm:$0xff] }
 0x239   :  { %404 = vmatmul.f32.gmra.mxu0 %v94_v15  ;;  %v1130_v15 = vld [vmem:[%s9800_s3 + $0x8] sm:$0xff]  ;;  %1351 = vmatpush.msra.mxu3 %v5022_v3  ;;  %v636_v3 = vmax.f32 %v5798_v32, %v5888_v4  ;;  %v97_v32 = vld [vmem:[%s9797_s0 + $0x230] sm:$0xff] }
 0x23a   :  { %1257 = vmatpush.msra.mxu2 %v1130_v15  ;;  %1186 = vmatpush.msra.mxu1 %v5008_v39  ;;  %v5004_v39 = vld [vmem:[%s9800_s3 + $0x98] sm:$0xff] }
 0x23b   :  { %1352 = vmatpush.msra.mxu3 %v5021_v11  ;;  %v5017_v11 = vld [vmem:[%s9800_s3 + $0x100] sm:$0xff] }
 0x23c   :  { %1258 = vmatpush.msra.mxu2 %v1129_v47  ;;  %1187 = vmatpush.msra.mxu1 %v5007_v51  ;;  %v5003_v47 = vld [vmem:[%s9800_s3 + $0x90] sm:$0xff] }
 0x23d   :  { %1353 = vmatpush.msra.mxu3 %v5020_v43  ;;  %v5019_v51 = vld [vmem:[%s9800_s3 + $0x110] sm:$0xff] }
 0x23e   :  { %v6154_v31 = vpop.f32.mrf.mxu0  ;;  %1188 = vmatpush.msra.mxu1 %v5006_v63  ;;  %v5018_v63 = vld [vmem:[%s9800_s3 + $0x108] sm:$0xff] }
 0x23f   :  { %1354 = vmatpush.msra.mxu3 %v5019_v51  ;;  %v639_v51 = vmax.f32 %v5803_v34, %v5893_v6 }
 0x240   :  { %1189 = vmatpush.msra.mxu1 %v5005_v7  ;;  %v5001_v7 = vld [vmem:[%s9800_s3 + $0x80] sm:$0xff] }
 0x241   :  { %407 = vmatmul.f32.gmra.mxu0 %v95_v27  ;;  %v96_v27 = vld [vmem:[%s9797_s0 + $0x228] sm:$0xff]  ;;  %1355 = vmatpush.msra.mxu3 %v5018_v63 }
 0x242   :  { %1190 = vmatpush.msra.mxu1 %v5004_v39  ;;  %v6218_v39 = vld [vmem:[%s9799_s2] ss:$0 sm:$0xff] }
 0x243   :  { %1356 = vmatpush.msra.mxu3 %v5017_v11 }
 0x244   :  { %1191 = vmatpush.msra.mxu1 %v5003_v47 }
 0x246   :  { %v6183_v15 = vpop.f32.mrf.mxu0  ;;  %1192 = vmatpush.msra.mxu1 %v5002_v55  ;;  %v640_v55 = vmax.f32 %v639_v51, %v5983_v53 }
 0x247   :  { %9808 = vst [vmem:[#allocation6_spill] sm:$0xff] %v6183_v15 }
 0x248   :  { %1193 = vmatpush.msra.mxu1 %v5001_v7  ;;  %v98_v7 = vld [vmem:[%s9797_s0 + $0x238] sm:$0xff] }
 0x249   :  { %410 = vmatmul.f32.gmra.mxu0 %v96_v27  ;;  %v637_v27 = vmax.f32 %v636_v3, %v5978_v49 }
 0x24e   :  { %v366_v43 = vpop.f32.mrf.mxu0 }
 0x24f   :  { %v638_v4 = vmax.f32 %v637_v27, %v366_v43  ;;  %v642_v27 = vmax.f32 %v5808_v36, %v5898_v8  ;;  %v645_v36 = vmax.f32 %v5813_v38, %v5903_v10  ;;  %v648_v38 = vmax.f32 %v5818_v40, %v5908_v12 }
 0x251   :  { %v748_v47 = vadd.f32 %v6218_v39, %v638_v4  ;;  %413 = vmatmul.f32.gmra.mxu0 %v97_v32  ;;  %v643_v34 = vmax.f32 %v642_v27, %v5988_v57  ;;  %v99_v4 = vld [vmem:[%s9797_s0 + $0x240] sm:$0xff]  ;;  %v646_v51 = vmax.f32 %v645_v36, %v5993_v61  ;;  %v649_v61 = vmax.f32 %v648_v38, %v5998_v1 }
 0x252   :  { %v651_v1 = vmax.f32 %v5823_v42, %v5913_v14  ;;  %v654_v14 = vmax.f32 %v5828_v44, %v5918_v16  ;;  %v657_v44 = vmax.f32 %v5833_v46, %v5923_v18 }
 0x253   :  { %v784_v49 = vmax.f32 %v748_v47, 0.0 }
 0x255   :  { %v856_v63 = vrot.slane %v784_v49, 4  ;;  %892 = vst [vmem:[#allocation1] ss:$2 sm:$0xff] %v784_v49 }
 0x256   :  { %v369_v3 = vpop.f32.mrf.mxu0 }
 0x257   :  { %894 = vst [vmem:[#allocation1 + $0x1] ss:$2 sm:$0xff] %v856_v63  ;;  %v641_v15 = vmax.f32 %v640_v55, %v369_v3  ;;  %v100_v63 = vld [vmem:[%s9797_s0 + $0x248] sm:$0xff] }
 0x259   :  { %v749_v11 = vadd.f32 %v6218_v39, %v641_v15  ;;  %416 = vmatmul.f32.gmra.mxu0 %v98_v7 }
 0x25b   :  { %v785_v43 = vmax.f32 %v749_v11, 0.0 }
 0x25d   :  { %v857_v6 = vrot.slane %v785_v43, 4  ;;  %896 = vst [vmem:[#allocation1 + $0x10] ss:$2 sm:$0xff] %v785_v43 }
 0x25e   :  { %v897_v53 = vld.sshfl [vmem:[#allocation1] sm:$0xff pattern:$0x75316420]  ;;  %v372_v32 = vpop.f32.mrf.mxu0 }
 0x25f   :  { %1065 = vst [vmem:[#allocation2] sm:$0xff] %v897_v53  ;;  %v644_v47 = vmax.f32 %v643_v34, %v372_v32  ;;  %1259 = vmatmul.f32.vlgmr.msra.gmra.mxu2 %v897_v53  ;;  %v101_v32 = vld [vmem:[%s9797_s0 + $0x250] sm:$0xff] }
 0x260   :  { %900 = vst [vmem:[#allocation1 + $0x20] ss:$2 sm:$0xff] %v857_v6 }
 0x261   :  { %v750_v15 = vadd.f32 %v6218_v39, %v644_v47  ;;  %419 = vmatmul.f32.gmra.mxu0 %v99_v4  ;;  %v652_v47 = vmax.f32 %v651_v1, %v6003_v5 }
 0x263   :  { %v786_v8 = vmax.f32 %v750_v15, 0.0 }
 0x264   :  { %v898_v57 = vld.sshfl [vmem:[#allocation1 + $0x10] sm:$0xff pattern:$0x75316420] }
 0x265   :  { %1066 = vst [vmem:[#allocation2 + $0x8] sm:$0xf] %v898_v57  ;;  %v858_v49 = vrot.slane %v786_v8, 4 }
 0x266   :  { %902 = vst [vmem:[#allocation1 + $0x21] ss:$2 sm:$0xff] %v786_v8  ;;  %v375_v55 = vpop.f32.mrf.mxu0 }
 0x267   :  { %904 = vst [vmem:[#allocation1 + $0x30] ss:$2 sm:$0xff] %v858_v49  ;;  %v647_v3 = vmax.f32 %v646_v51, %v375_v55  ;;  %v102_v51 = vld [vmem:[%s9797_s0 + $0x258] sm:$0xff] }
 0x269   :  { %v751_v7 = vadd.f32 %v6218_v39, %v647_v3  ;;  %422 = vmatmul.f32.gmra.mxu0 %v100_v63  ;;  %v655_v3 = vmax.f32 %v654_v14, %v6008_v9  ;;  %v658_v9 = vmax.f32 %v657_v44, %v6013_v13  ;;  %v660_v13 = vmax.f32 %v5838_v48, %v5928_v20  ;;  %v107_v44 = vld [vmem:[%s9797_s0 + $0x280] sm:$0xff] }
 0x26a   :  { %v663_v20 = vmax.f32 %v5843_v50, %v5933_v22  ;;  %v666_v50 = vmax.f32 %v5848_v52, %v5938_v24 }
 0x26b   :  { %v787_v10 = vmax.f32 %v751_v7, 0.0  ;;  %v661_v1 = vmax.f32 %v660_v13, %v6018_v17 }
 0x26c   :  { %v1145_v11 = vld [vmem:[#allocation2 + $0x1] sm:$0xff] }
 0x26d   :  { %v1308_v27 = vld [vmem:[#allocation2 + $0x2] sm:$0xff]  ;;  %v905_v43 = vld.sshfl [vmem:[#allocation1 + $0x20] sm:$0xff pattern:$0x75316420]  ;;  %v859_v34 = vrot.slane %v787_v10, 4  ;;  %1194 = vmatmul.f32.vlgmr.msra.gmra.mxu1 %v1145_v11 }
 0x26e   :  { %907 = vst [vmem:[#allocation1] ss:$2 sm:$0xff] %v787_v10  ;;  %1357 = vmatmul.f32.vlgmr.msra.gmra.mxu3 %v1308_v27  ;;  %v906_v6 = vld.sshfl [vmem:[#allocation1 + $0x30] sm:$0xff pattern:$0x75316420]  ;;  %v378_v53 = vpop.f32.mrf.mxu0  ;;  %1262 = vmatmul.f32.gmra.mxu2 %v905_v43 }
 0x26f   :  { %1067 = vst [vmem:[#allocation2 + $0x10] sm:$0xff] %v905_v43  ;;  %v650_v40 = vmax.f32 %v649_v61, %v378_v53  ;;  %v103_v10 = vld [vmem:[%s9797_s0 + $0x260] sm:$0xff] }
 0x270   :  { %1068 = vst [vmem:[#allocation2 + $0x18] sm:$0xf] %v906_v6 }
 0x271   :  { %908 = vst [vmem:[#allocation1 + $0x1] ss:$2 sm:$0xff] %v859_v34  ;;  %v752_v12 = vadd.f32 %v6218_v39, %v650_v40  ;;  %425 = vmatmul.f32.gmra.mxu0 %v101_v32  ;;  %v104_v40 = vld [vmem:[%s9797_s0 + $0x268] sm:$0xff] }
 0x273   :  { %v788_v4 = vmax.f32 %v752_v12, 0.0 }
 0x275   :  { %v860_v15 = vrot.slane %v788_v4, 4  ;;  %909 = vst [vmem:[#allocation1 + $0x10] ss:$2 sm:$0xff] %v788_v4 }
 0x276   :  { %v381_v36 = vpop.f32.mrf.mxu0 }
 0x277   :  { %v1146_v8 = vld [vmem:[#allocation2 + $0x11] sm:$0xff]  ;;  %912 = vst [vmem:[#allocation1 + $0x20] ss:$2 sm:$0xff] %v860_v15  ;;  %v653_v55 = vmax.f32 %v652_v47, %v381_v36 }
 0x278   :  { %v1309_v57 = vld [vmem:[#allocation2 + $0x12] sm:$0xff]  ;;  %1197 = vmatmul.f32.gmra.mxu1 %v1146_v8 }
 0x279   :  { %v910_v49 = vld.sshfl [vmem:[#allocation1] sm:$0xff pattern:$0x75316420]  ;;  %1360 = vmatmul.f32.gmra.mxu3 %v1309_v57  ;;  %v753_v42 = vadd.f32 %v6218_v39, %v653_v55  ;;  %428 = vmatmul.f32.gmra.mxu0 %v102_v51  ;;  %v664_v55 = vmax.f32 %v663_v20, %v6023_v21  ;;  %v667_v21 = vmax.f32 %v666_v50, %v6028_v25  ;;  %v110_v20 = vld [vmem:[%s9797_s0 + $0x298] sm:$0xff] }
 0x27a   :  { %1069 = vst [vmem:[#allocation2 + $0x20] sm:$0xff] %v910_v49  ;;  %1265 = vmatmul.f32.gmra.mxu2 %v910_v49  ;;  %v105_v8 = vld [vmem:[%s9797_s0 + $0x270] sm:$0xff]  ;;  %v669_v25 = vmax.f32 %v5853_v54, %v5943_v26  ;;  %v672_v26 = vmax.f32 %v5858_v56, %v5948_v28  ;;  %v675_v56 = vmax.f32 %v5863_v58, %v5953_v30 }
 0x27b   :  { %v789_v5 = vmax.f32 %v753_v42, 0.0 }
 0x27c   :  { %v911_v63 = vld.sshfl [vmem:[#allocation1 + $0x10] sm:$0xff pattern:$0x75316420]  ;;  %v673_v13 = vmax.f32 %v672_v26, %v6038_v35  ;;  %v676_v35 = vmax.f32 %v675_v56, %v6055_v59  ;;  %v678_v59 = vmax.f32 %v5868_v60, %v5958_v33  ;;  %v681_v33 = vmax.f32 %v5873_v62, %v5963_v37 }
 0x27d   :  { %1070 = vst [vmem:[#allocation2 + $0x28] sm:$0xf] %v911_v63  ;;  %v861_v7 = vrot.slane %v789_v5, 4  ;;  %v684_v62 = vmax.f32 %v5878_v0, %v5968_v41  ;;  %v687_v0 = vmax.f32 %v5883_v2, %v5973_v45 }
 0x27e   :  { %913 = vst [vmem:[#allocation1 + $0x21] ss:$2 sm:$0xff] %v789_v5  ;;  %v384_v38 = vpop.f32.mrf.mxu0  ;;  %v106_v5 = vld [vmem:[%s9797_s0 + $0x278] sm:$0xff] }
 0x27f   :  { %914 = vst [vmem:[#allocation1 + $0x30] ss:$2 sm:$0xff] %v861_v7  ;;  %v656_v11 = vmax.f32 %v655_v3, %v384_v38 }
 0x281   :  { %v754_v27 = vadd.f32 %v6218_v39, %v656_v11  ;;  %431 = vmatmul.f32.gmra.mxu0 %v103_v10 }
 0x283   :  { %v790_v16 = vmax.f32 %v754_v27, 0.0 }
 0x284   :  { %v1147_v61 = vld [vmem:[#allocation2 + $0x21] sm:$0xff] }
 0x285   :  { %v1310_v43 = vld [vmem:[#allocation2 + $0x22] sm:$0xff]  ;;  %v915_v34 = vld.sshfl [vmem:[#allocation1 + $0x20] sm:$0xff pattern:$0x75316420]  ;;  %v862_v6 = vrot.slane %v790_v16, 4  ;;  %1200 = vmatmul.f32.gmra.mxu1 %v1147_v61 }
 0x286   :  { %917 = vst [vmem:[#allocation1] ss:$2 sm:$0xff] %v790_v16  ;;  %1363 = vmatmul.f32.gmra.mxu3 %v1310_v43  ;;  %v916_v53 = vld.sshfl [vmem:[#allocation1 + $0x30] sm:$0xff pattern:$0x75316420]  ;;  %v387_v32 = vpop.f32.mrf.mxu0  ;;  %1268 = vmatmul.f32.gmra.mxu2 %v915_v34  ;;  %v670_v43 = vmax.f32 %v669_v25, %v6033_v29  ;;  %v113_v25 = vld [vmem:[%s9797_s0 + $0x2b0] sm:$0xff] }
 0x287   :  { %1071 = vst [vmem:[#allocation2 + $0x30] sm:$0xff] %v915_v34  ;;  %v659_v46 = vmax.f32 %v658_v9, %v387_v32 }
 0x288   :  { %1072 = vst [vmem:[#allocation2 + $0x38] sm:$0xf] %v916_v53  ;;  %v108_v53 = vld [vmem:[%s9797_s0 + $0x288] sm:$0xff] }
 0x289   :  { %918 = vst [vmem:[#allocation1 + $0x1] ss:$2 sm:$0xff] %v862_v6  ;;  %v755_v18 = vadd.f32 %v6218_v39, %v659_v46  ;;  %434 = vmatmul.f32.gmra.mxu0 %v104_v40 }
 0x28b   :  { %v791_v12 = vmax.f32 %v755_v18, 0.0 }
 0x28d   :  { %v863_v4 = vrot.slane %v791_v12, 4  ;;  %919 = vst [vmem:[#allocation1 + $0x10] ss:$2 sm:$0xff] %v791_v12 }
 0x28e   :  { %v390_v47 = vpop.f32.mrf.mxu0 }
 0x28f   :  { %v1148_v15 = vld [vmem:[#allocation2 + $0x31] sm:$0xff]  ;;  %922 = vst [vmem:[#allocation1 + $0x20] ss:$2 sm:$0xff] %v863_v4  ;;  %v662_v51 = vmax.f32 %v661_v1, %v390_v47 }
 0x290   :  { %v1311_v36 = vld [vmem:[#allocation2 + $0x32] sm:$0xff]  ;;  %1203 = vmatmul.f32.gmra.mxu1 %v1148_v15 }
 0x291   :  { %v920_v57 = vld.sshfl [vmem:[#allocation1] sm:$0xff pattern:$0x75316420]  ;;  %1366 = vmatmul.f32.gmra.mxu3 %v1311_v36  ;;  %v756_v48 = vadd.f32 %v6218_v39, %v662_v51  ;;  %437 = vmatmul.f32.gmra.mxu0 %v105_v8 }
 0x292   :  { %1073 = vst [vmem:[#allocation2 + $0x40] sm:$0xff] %v920_v57  ;;  %1271 = vmatmul.f32.gmra.mxu2 %v920_v57  ;;  %v109_v4 = vld [vmem:[%s9797_s0 + $0x290] sm:$0xff] }
 0x293   :  { %v792_v17 = vmax.f32 %v756_v48, 0.0 }
 0x294   :  { %v921_v49 = vld.sshfl [vmem:[#allocation1 + $0x10] sm:$0xff pattern:$0x75316420] }
 0x295   :  { %1074 = vst [vmem:[#allocation2 + $0x48] sm:$0xf] %v921_v49  ;;  %v864_v42 = vrot.slane %v792_v17, 4 }
 0x296   :  { %923 = vst [vmem:[#allocation1 + $0x21] ss:$2 sm:$0xff] %v792_v17  ;;  %v393_v14 = vpop.f32.mrf.mxu0 }
 0x297   :  { %924 = vst [vmem:[#allocation1 + $0x30] ss:$2 sm:$0xff] %v864_v42  ;;  %v665_v63 = vmax.f32 %v664_v55, %v393_v14  ;;  %v679_v55 = vmax.f32 %v678_v59, %v6075_v23 }
 0x299   :  { %v757_v3 = vadd.f32 %v6218_v39, %v665_v63  ;;  %440 = vmatmul.f32.gmra.mxu0 %v106_v5  ;;  %v111_v63 = vld [vmem:[%s9797_s0 + $0x2a0] sm:$0xff] }
 0x29b   :  { %v793_v22 = vmax.f32 %v757_v3, 0.0 }
 0x29c   :  { %v1149_v7 = vld [vmem:[#allocation2 + $0x41] sm:$0xff] }
 0x29d   :  { %v1312_v38 = vld [vmem:[#allocation2 + $0x42] sm:$0xff]  ;;  %v925_v10 = vld.sshfl [vmem:[#allocation1 + $0x20] sm:$0xff pattern:$0x75316420]  ;;  %v865_v11 = vrot.slane %v793_v22, 4  ;;  %1206 = vmatmul.f32.gmra.mxu1 %v1149_v7 }
 0x29e   :  { %927 = vst [vmem:[#allocation1] ss:$2 sm:$0xff] %v793_v22  ;;  %1369 = vmatmul.f32.gmra.mxu3 %v1312_v38  ;;  %v396_v27 = vpop.f32.mrf.mxu0  ;;  %1274 = vmatmul.f32.gmra.mxu2 %v925_v10  ;;  %v926_v16 = vld.sshfl [vmem:[#allocation1 + $0x30] sm:$0xff pattern:$0x75316420]  ;;  %v682_v38 = vmax.f32 %v681_v33, %v6113_v19  ;;  %v685_v19 = vmax.f32 %v684_v62, %v6154_v31  ;;  %v129_v33 = vld [vmem:[%s9797_s0 + $0x330] sm:$0xff] }
 0x29f   :  { %1075 = vst [vmem:[#allocation2 + $0x50] sm:$0xff] %v925_v10  ;;  %v668_v52 = vmax.f32 %v667_v21, %v396_v27  ;;  %v9809_v31 = vld [vmem:[#allocation6_spill] sm:$0xff] }
 0x2a0   :  { %928 = vst [vmem:[#allocation1 + $0x1] ss:$2 sm:$0xff] %v865_v11  ;;  %v112_v11 = vld [vmem:[%s9797_s0 + $0x2a8] sm:$0xff] }
 0x2a1   :  { %1076 = vst [vmem:[#allocation2 + $0x58] sm:$0xf] %v926_v16  ;;  %v758_v24 = vadd.f32 %v6218_v39, %v668_v52  ;;  %443 = vmatmul.f32.gmra.mxu0 %v107_v44 }
 0x2a3   :  { %v794_v61 = vmax.f32 %v758_v24, 0.0 }
 0x2a5   :  { %v866_v9 = vrot.slane %v794_v61, 4  ;;  %929 = vst [vmem:[#allocation1 + $0x10] ss:$2 sm:$0xff] %v794_v61 }
 0x2a6   :  { %v399_v6 = vpop.f32.mrf.mxu0 }
 0x2a7   :  { %v930_v34 = vld.sshfl [vmem:[#allocation1] sm:$0xff pattern:$0x75316420]  ;;  %v671_v32 = vmax.f32 %v670_v43, %v399_v6  ;;  %932 = vst [vmem:[#allocation1 + $0x20] ss:$2 sm:$0xff] %v866_v9 }
 0x2a8   :  { %1077 = vst [vmem:[#allocation2 + $0x60] sm:$0xff] %v930_v34  ;;  %v1150_v40 = vld [vmem:[#allocation2 + $0x51] sm:$0xff]  ;;  %1277 = vmatmul.f32.gmra.mxu2 %v930_v34  ;;  %v688_v34 = vmax.f32 %v687_v0, %v9809_v31 }
 0x2a9   :  { %v1313_v46 = vld [vmem:[#allocation2 + $0x52] sm:$0xff]  ;;  %1209 = vmatmul.f32.gmra.mxu1 %v1150_v40  ;;  %v759_v54 = vadd.f32 %v6218_v39, %v671_v32  ;;  %446 = vmatmul.f32.gmra.mxu0 %v108_v53  ;;  %v114_v40 = vld [vmem:[%s9797_s0 + $0x2b8] sm:$0xff] }
 0x2aa   :  { %1372 = vmatmul.f32.gmra.mxu3 %v1313_v46 }
 0x2ab   :  { %v795_v29 = vmax.f32 %v759_v54, 0.0 }
 0x2ac   :  { %v931_v18 = vld.sshfl [vmem:[#allocation1 + $0x10] sm:$0xff pattern:$0x75316420] }
 0x2ad   :  { %1078 = vst [vmem:[#allocation2 + $0x68] sm:$0xf] %v931_v18  ;;  %v867_v12 = vrot.slane %v795_v29, 4  ;;  %v115_v18 = vld [vmem:[%s9797_s0 + $0x2c0] sm:$0xff] }
 0x2ae   :  { %933 = vst [vmem:[#allocation1 + $0x21] ss:$2 sm:$0xff] %v795_v29  ;;  %v402_v1 = vpop.f32.mrf.mxu0 }
 0x2af   :  { %934 = vst [vmem:[#allocation1 + $0x30] ss:$2 sm:$0xff] %v867_v12  ;;  %v674_v47 = vmax.f32 %v673_v13, %v402_v1  ;;  %v116_v1 = vld [vmem:[%s9797_s0 + $0x2c8] sm:$0xff] }
 0x2b1   :  { %v760_v15 = vadd.f32 %v6218_v39, %v674_v47  ;;  %449 = vmatmul.f32.gmra.mxu0 %v109_v4 }
 0x2b3   :  { %v796_v28 = vmax.f32 %v760_v15, 0.0  ;;  %v117_v15 = vld [vmem:[%s9797_s0 + $0x2d0] sm:$0xff] }
 0x2b4   :  { %v1151_v36 = vld [vmem:[#allocation2 + $0x61] sm:$0xff] }
 0x2b5   :  { %v1314_v8 = vld [vmem:[#allocation2 + $0x62] sm:$0xff]  ;;  %v935_v57 = vld.sshfl [vmem:[#allocation1 + $0x20] sm:$0xff pattern:$0x75316420]  ;;  %v868_v51 = vrot.slane %v796_v28, 4  ;;  %1212 = vmatmul.f32.gmra.mxu1 %v1151_v36 }
 0x2b6   :  { %937 = vst [vmem:[#allocation1] ss:$2 sm:$0xff] %v796_v28  ;;  %1375 = vmatmul.f32.gmra.mxu3 %v1314_v8  ;;  %v405_v48 = vpop.f32.mrf.mxu0  ;;  %1280 = vmatmul.f32.gmra.mxu2 %v935_v57  ;;  %v936_v17 = vld.sshfl [vmem:[#allocation1 + $0x30] sm:$0xff pattern:$0x75316420]  ;;  %v118_v28 = vld [vmem:[%s9797_s0 + $0x2d8] sm:$0xff] }
 0x2b7   :  { %1079 = vst [vmem:[#allocation2 + $0x70] sm:$0xff] %v935_v57  ;;  %v677_v58 = vmax.f32 %v676_v35, %v405_v48  ;;  %v119_v8 = vld [vmem:[%s9797_s0 + $0x2e0] sm:$0xff]  ;;  %v120_v57 = vld [vmem:[%s9797_s0 + $0x2e8] sm:$0xff]  ;;  %v121_v48 = vld [vmem:[%s9797_s0 + $0x2f0] sm:$0xff] }
 0x2b8   :  { %938 = vst [vmem:[#allocation1 + $0x1] ss:$2 sm:$0xff] %v868_v51 }
 0x2b9   :  { %1080 = vst [vmem:[#allocation2 + $0x78] sm:$0xf] %v936_v17  ;;  %v761_v30 = vadd.f32 %v6218_v39, %v677_v58  ;;  %452 = vmatmul.f32.gmra.mxu0 %v110_v20  ;;  %v122_v17 = vld [vmem:[%s9797_s0 + $0x2f8] sm:$0xff] }
 0x2bb   :  { %v797_v49 = vmax.f32 %v761_v30, 0.0  ;;  %v123_v30 = vld [vmem:[%s9797_s0 + $0x300] sm:$0xff] }
 0x2bd   :  { %v869_v42 = vrot.slane %v797_v49, 4  ;;  %939 = vst [vmem:[#allocation1 + $0x10] ss:$2 sm:$0xff] %v797_v49  ;;  %v124_v49 = vld [vmem:[%s9797_s0 + $0x308] sm:$0xff] }
 0x2be   :  { %v408_v5 = vpop.f32.mrf.mxu0 }
 0x2bf   :  { %v940_v14 = vld.sshfl [vmem:[#allocation1] sm:$0xff pattern:$0x75316420]  ;;  %v680_v3 = vmax.f32 %v679_v55, %v408_v5  ;;  %942 = vst [vmem:[#allocation1 + $0x20] ss:$2 sm:$0xff] %v869_v42  ;;  %v126_v5 = vld [vmem:[%s9797_s0 + $0x318] sm:$0xff] }
 0x2c0   :  { %1081 = vst [vmem:[#allocation2 + $0x80] sm:$0xff] %v940_v14  ;;  %v1152_v50 = vld [vmem:[#allocation2 + $0x71] sm:$0xff] }
 0x2c1   :  { %v1315_v22 = vld [vmem:[#allocation2 + $0x72] sm:$0xff]  ;;  %1215 = vmatmul.f32.gmra.mxu1 %v1152_v50  ;;  %v762_v60 = vadd.f32 %v6218_v39, %v680_v3  ;;  %455 = vmatmul.f32.gmra.mxu0 %v111_v63  ;;  %v127_v3 = vld [vmem:[%s9797_s0 + $0x320] sm:$0xff] }
 0x2c2   :  { %1378 = vmatmul.f32.gmra.mxu3 %v1315_v22  ;;  %v125_v42 = vld [vmem:[%s9797_s0 + $0x310] sm:$0xff]  ;;  %v128_v22 = vld [vmem:[%s9797_s0 + $0x328] sm:$0xff] }
 0x2c3   :  { %v798_v23 = vmax.f32 %v762_v60, 0.0 }
 0x2c4   :  { %v941_v7 = vld.sshfl [vmem:[#allocation1 + $0x10] sm:$0xff pattern:$0x75316420] }
 0x2c5   :  { %v870_v21 = vrot.slane %v798_v23, 4  ;;  %943 = vst [vmem:[#allocation1 + $0x21] ss:$2 sm:$0xff] %v798_v23 }
 0x2c6   :  { %v411_v10 = vpop.f32.mrf.mxu0  ;;  %1082 = vst [vmem:[#allocation2 + $0x88] sm:$0xf] %v941_v7  ;;  %v130_v7 = vld [vmem:[%s9797_s0 + $0x338] sm:$0xff] }
 0x2c7   :  { %944 = vst [vmem:[#allocation1 + $0x30] ss:$2 sm:$0xff] %v870_v21  ;;  %v683_v27 = vmax.f32 %v682_v38, %v411_v10  ;;  %v131_v21 = vld [vmem:[%s9797_s0 + $0x340] sm:$0xff] }
 0x2c9   :  { %v763_v44 = vadd.f32 %v6218_v39, %v683_v27  ;;  %458 = vmatmul.f32.gmra.mxu0 %v112_v11  ;;  %v132_v11 = vld [vmem:[%s9797_s0 + $0x348] sm:$0xff] }
 0x2cb   :  { %v799_v37 = vmax.f32 %v763_v44, 0.0  ;;  %v133_v44 = vld [vmem:[%s9797_s0 + $0x350] sm:$0xff] }
 0x2cc   :  { %v945_v16 = vld.sshfl [vmem:[#allocation1 + $0x20] sm:$0xff pattern:$0x75316420] }
 0x2cd   :  { %1083 = vst [vmem:[#allocation2 + $0x90] sm:$0xff] %v945_v16  ;;  %v871_v52 = vrot.slane %v799_v37, 4 }
 0x2ce   :  { %947 = vst [vmem:[#allocation1] ss:$2 sm:$0xff] %v799_v37  ;;  %v414_v24 = vpop.f32.mrf.mxu0  ;;  %v946_v61 = vld.sshfl [vmem:[#allocation1 + $0x30] sm:$0xff pattern:$0x75316420]  ;;  %v134_v37 = vld [vmem:[%s9797_s0 + $0x358] sm:$0xff] }
 0x2cf   :  { %948 = vst [vmem:[#allocation1 + $0x1] ss:$2 sm:$0xff] %v871_v52  ;;  %v686_v43 = vmax.f32 %v685_v19, %v414_v24  ;;  %v135_v19 = vld [vmem:[%s9797_s0 + $0x360] sm:$0xff]  ;;  %v136_v24 = vld [vmem:[%s9797_s0 + $0x368] sm:$0xff] }
 0x2d0   :  { %1084 = vst [vmem:[#allocation2 + $0x98] sm:$0xf] %v946_v61  ;;  %v137_v61 = vld [vmem:[%s9797_s0 + $0x370] sm:$0xff] }
 0x2d1   :  { %v764_v9 = vadd.f32 %v6218_v39, %v686_v43  ;;  %461 = vmatmul.f32.gmra.mxu0 %v113_v25 }
 0x2d3   :  { %v800_v41 = vmax.f32 %v764_v9, 0.0  ;;  %v138_v9 = vld [vmem:[%s9797_s0 + $0x378] sm:$0xff] }
 0x2d5   :  { %v872_v6 = vrot.slane %v800_v41, 4  ;;  %949 = vst [vmem:[#allocation1 + $0x10] ss:$2 sm:$0xff] %v800_v41  ;;  %v139_v41 = vld [vmem:[%s9797_s0 + $0x380] sm:$0xff] }
 0x2d6   :  { %v950_v53 = vld.sshfl [vmem:[#allocation1] sm:$0xff pattern:$0x75316420]  ;;  %v417_v32 = vpop.f32.mrf.mxu0 }
 0x2d7   :  { %1085 = vst [vmem:[#allocation2 + $0xa0] sm:$0xff] %v950_v53  ;;  %v689_v46 = vmax.f32 %v688_v34, %v417_v32  ;;  %v140_v34 = vld [vmem:[%s9797_s0 + $0x388] sm:$0xff]  ;;  %v141_v53 = vld [vmem:[%s9797_s0 + $0x390] sm:$0xff] }
 0x2d8   :  { %952 = vst [vmem:[#allocation1 + $0x20] ss:$2 sm:$0xff] %v872_v6 }
 0x2d9   :  { %v765_v54 = vadd.f32 %v6218_v39, %v689_v46  ;;  %464 = vmatmul.f32.gmra.mxu0 %v114_v40  ;;  %v142_v40 = vld [vmem:[%s9797_s0 + $0x398] sm:$0xff] }
 0x2db   :  { %v801_v26 = vmax.f32 %v765_v54, 0.0  ;;  %v143_v54 = vld [vmem:[%s9797_s0 + $0x3a0] sm:$0xff] }
 0x2dc   :  { %v951_v29 = vld.sshfl [vmem:[#allocation1 + $0x10] sm:$0xff pattern:$0x75316420] }
 0x2dd   :  { %v873_v2 = vrot.slane %v801_v26, 4  ;;  %953 = vst [vmem:[#allocation1 + $0x21] ss:$2 sm:$0xff] %v801_v26 }
 0x2de   :  { %v6343_v45 = vpop.f32.mrf.mxu0  ;;  %1086 = vst [vmem:[#allocation2 + $0xa8] sm:$0xf] %v951_v29  ;;  %v144_v29 = vld [vmem:[%s9797_s0 + $0x3a8] sm:$0xff] }
 0x2df   :  { %954 = vst [vmem:[#allocation1 + $0x30] ss:$2 sm:$0xff] %v873_v2 }
 0x2e1   :  { %467 = vmatmul.f32.gmra.mxu0 %v115_v18  ;;  %v145_v18 = vld [vmem:[%s9797_s0 + $0x3b0] sm:$0xff] }
 0x2e4   :  { %v955_v13 = vld.sshfl [vmem:[#allocation1 + $0x20] sm:$0xff pattern:$0x75316420] }
 0x2e5   :  { %1087 = vst [vmem:[#allocation2 + $0xb0] sm:$0xff] %v955_v13 }
 0x2e6   :  { %v6348_v12 = vpop.f32.mrf.mxu0  ;;  %v956_v4 = vld.sshfl [vmem:[#allocation1 + $0x30] sm:$0xff pattern:$0x75316420] }
 0x2e7   :  { %1088 = vst [vmem:[#allocation2 + $0xb8] sm:$0xf] %v956_v4 }
 0x2e9   :  { %470 = vmatmul.f32.gmra.mxu0 %v116_v1  ;;  %v146_v1 = vld [vmem:[%s9797_s0 + $0x3b8] sm:$0xff] }
 0x2ee   :  { %v6353_v47 = vpop.f32.mrf.mxu0 }
 0x2f1   :  { %473 = vmatmul.f32.gmra.mxu0 %v117_v15  ;;  %v147_v15 = vld [vmem:[%s9797_s0 + $0x3c0] sm:$0xff] }
 0x2f6   :  { %v6358_v56 = vpop.f32.mrf.mxu0 }
 0x2f9   :  { %476 = vmatmul.f32.gmra.mxu0 %v118_v28 }
 0x2fe   :  { %v6363_v36 = vpop.f32.mrf.mxu0 }
 0x301   :  { %479 = vmatmul.f32.gmra.mxu0 %v119_v8  ;;  %v148_v8 = vld [vmem:[%s9797_s0 + $0x3c8] sm:$0xff] }
 0x306   :  { %v6368_v35 = vpop.f32.mrf.mxu0 }
 0x309   :  { %482 = vmatmul.f32.gmra.mxu0 %v120_v57 }
 0x30e   :  { %v6373_v51 = vpop.f32.mrf.mxu0 }
 0x311   :  { %485 = vmatmul.f32.gmra.mxu0 %v121_v48  ;;  %v149_v48 = vld [vmem:[%s9797_s0 + $0x3d0] sm:$0xff] }
 0x316   :  { %v6378_v20 = vpop.f32.mrf.mxu0 }
 0x319   :  { %488 = vmatmul.f32.gmra.mxu0 %v122_v17 }
 0x31e   :  { %v6383_v58 = vpop.f32.mrf.mxu0 }
 0x321   :  { %491 = vmatmul.f32.gmra.mxu0 %v123_v30  ;;  %v150_v30 = vld [vmem:[%s9797_s0 + $0x3d8] sm:$0xff] }
 0x326   :  { %v6388_v59 = vpop.f32.mrf.mxu0 }
 0x329   :  { %494 = vmatmul.f32.gmra.mxu0 %v124_v49 }
 0x32e   :  { %v6393_v55 = vpop.f32.mrf.mxu0 }
 0x331   :  { %497 = vmatmul.f32.gmra.mxu0 %v125_v42  ;;  %v151_v42 = vld [vmem:[%s9797_s0 + $0x3e0] sm:$0xff] }
 0x336   :  { %v6398_v14 = vpop.f32.mrf.mxu0 }
 0x339   :  { %500 = vmatmul.f32.gmra.mxu0 %v126_v5 }
 0x33e   :  { %v6403_v63 = vpop.f32.mrf.mxu0 }
 0x341   :  { %503 = vmatmul.f32.gmra.mxu0 %v127_v3  ;;  %v152_v3 = vld [vmem:[%s9797_s0 + $0x3e8] sm:$0xff] }
 0x346   :  { %v6408_v50 = vpop.f32.mrf.mxu0 }
 0x349   :  { %506 = vmatmul.f32.gmra.mxu0 %v128_v22 }
 0x34e   :  { %v6413_v60 = vpop.f32.mrf.mxu0 }
 0x351   :  { %509 = vmatmul.f32.gmra.mxu0 %v129_v33  ;;  %v153_v33 = vld [vmem:[%s9797_s0 + $0x3f0] sm:$0xff] }
 0x356   :  { %v6418_v23 = vpop.f32.mrf.mxu0 }
 0x359   :  { %512 = vmatmul.f32.gmra.mxu0 %v130_v7 }
 0x35e   :  { %v6423_v38 = vpop.f32.mrf.mxu0 }
 0x361   :  { %515 = vmatmul.f32.gmra.mxu0 %v131_v21  ;;  %v154_v21 = vld [vmem:[%s9797_s0 + $0x3f8] sm:$0xff] }
 0x366   :  { %v6428_v10 = vpop.f32.mrf.mxu0 }
 0x367   :  { %9810 = vst [vmem:[#allocation6_spill] sm:$0xff] %v6428_v10 }
 0x369   :  { %518 = vmatmul.f32.gmra.mxu0 %v132_v11 }
 0x36e   :  { %v6433_v27 = vpop.f32.mrf.mxu0 }
 0x371   :  { %521 = vmatmul.f32.gmra.mxu0 %v133_v44  ;;  %v155_v44 = vld [vmem:[%s9797_s0 + $0x400] sm:$0xff] }
 0x376   :  { %v6438_v62 = vpop.f32.mrf.mxu0 }
 0x379   :  { %524 = vmatmul.f32.gmra.mxu0 %v134_v37 }
 0x37e   :  { %v6443_v16 = vpop.f32.mrf.mxu0 }
 0x381   :  { %527 = vmatmul.f32.gmra.mxu0 %v135_v19  ;;  %v156_v19 = vld [vmem:[%s9797_s0 + $0x408] sm:$0xff] }
 0x386   :  { %v6448_v52 = vpop.f32.mrf.mxu0 }
 0x389   :  { %530 = vmatmul.f32.gmra.mxu0 %v136_v24 }
 0x38e   :  { %v6453_v25 = vpop.f32.mrf.mxu0 }
 0x391   :  { %533 = vmatmul.f32.gmra.mxu0 %v137_v61  ;;  %v157_v61 = vld [vmem:[%s9797_s0 + $0x410] sm:$0xff] }
 0x396   :  { %v6458_v43 = vpop.f32.mrf.mxu0 }
 0x399   :  { %536 = vmatmul.f32.gmra.mxu0 %v138_v9 }
 0x39e   :  { %v6463_v0 = vpop.f32.mrf.mxu0 }
 0x3a1   :  { %539 = vmatmul.f32.gmra.mxu0 %v139_v41  ;;  %v158_v41 = vld [vmem:[%s9797_s0 + $0x418] sm:$0xff] }
 0x3a6   :  { %v6468_v31 = vpop.f32.mrf.mxu0 }
 0x3a9   :  { %542 = vmatmul.f32.gmra.mxu0 %v140_v34 }
 0x3ae   :  { %v6473_v6 = vpop.f32.mrf.mxu0 }
 0x3b1   :  { %545 = vmatmul.f32.gmra.mxu0 %v141_v53  ;;  %v159_v53 = vld [vmem:[%s9797_s0 + $0x420] sm:$0xff] }
 0x3b6   :  { %v6478_v32 = vpop.f32.mrf.mxu0 }
 0x3b9   :  { %548 = vmatmul.f32.gmra.mxu0 %v142_v40 }
 0x3be   :  { %v6483_v46 = vpop.f32.mrf.mxu0 }
 0x3c1   :  { %551 = vmatmul.f32.gmra.mxu0 %v143_v54  ;;  %v160_v54 = vld [vmem:[%s9797_s0 + $0x428] sm:$0xff] }
 0x3c6   :  { %v6488_v26 = vpop.f32.mrf.mxu0 }
 0x3c9   :  { %554 = vmatmul.f32.gmra.mxu0 %v144_v29 }
 0x3ce   :  { %v6493_v2 = vpop.f32.mrf.mxu0 }
 0x3d1   :  { %557 = vmatmul.f32.gmra.mxu0 %v145_v18  ;;  %v161_v18 = vld [vmem:[%s9797_s0 + $0x430] sm:$0xff] }
 0x3d6   :  { %v6498_v13 = vpop.f32.mrf.mxu0 }
 0x3d9   :  { %560 = vmatmul.f32.gmra.mxu0 %v146_v1 }
 0x3de   :  { %v6503_v4 = vpop.f32.mrf.mxu0 }
 0x3e1   :  { %563 = vmatmul.f32.gmra.mxu0 %v147_v15  ;;  %v162_v15 = vld [vmem:[%s9797_s0 + $0x438] sm:$0xff] }
 0x3e6   :  { %v6508_v28 = vpop.f32.mrf.mxu0 }
 0x3e9   :  { %566 = vmatmul.f32.gmra.mxu0 %v148_v8 }
 0x3ee   :  { %v6513_v57 = vpop.f32.mrf.mxu0 }
 0x3f1   :  { %569 = vmatmul.f32.gmra.mxu0 %v149_v48  ;;  %v163_v48 = vld [vmem:[%s9797_s0 + $0x440] sm:$0xff] }
 0x3f6   :  { %v6518_v17 = vpop.f32.mrf.mxu0 }
 0x3f9   :  { %572 = vmatmul.f32.gmra.mxu0 %v150_v30 }
 0x3fe   :  { %v528_v49 = vpop.f32.mrf.mxu0 }
 0x401   :  { %575 = vmatmul.f32.gmra.mxu0 %v151_v42  ;;  %v164_v42 = vld [vmem:[%s9797_s0 + $0x448] sm:$0xff] }
 0x406   :  { %v531_v5 = vpop.f32.mrf.mxu0 }
 0x409   :  { %578 = vmatmul.f32.gmra.mxu0 %v152_v3 }
 0x40e   :  { %v6529_v22 = vpop.f32.mrf.mxu0 }
 0x411   :  { %581 = vmatmul.f32.gmra.mxu0 %v153_v33  ;;  %v165_v33 = vld [vmem:[%s9797_s0 + $0x450] sm:$0xff] }
 0x416   :  { %v6534_v7 = vpop.f32.mrf.mxu0 }
 0x419   :  { %584 = vmatmul.f32.gmra.mxu0 %v154_v21 }
 0x41e   :  { %v6539_v11 = vpop.f32.mrf.mxu0 }
 0x421   :  { %587 = vmatmul.f32.gmra.mxu0 %v155_v44  ;;  %v166_v44 = vld [vmem:[%s9797_s0 + $0x458] sm:$0xff] }
 0x426   :  { %v6544_v37 = vpop.f32.mrf.mxu0 }
 0x429   :  { %590 = vmatmul.f32.gmra.mxu0 %v156_v19 }
 0x42e   :  { %v6549_v24 = vpop.f32.mrf.mxu0 }
 0x431   :  { %593 = vmatmul.f32.gmra.mxu0 %v157_v61  ;;  %v167_v61 = vld [vmem:[%s9797_s0 + $0x460] sm:$0xff] }
 0x436   :  { %v6554_v9 = vpop.f32.mrf.mxu0 }
 0x439   :  { %596 = vmatmul.f32.gmra.mxu0 %v158_v41 }
 0x43e   :  { %v6559_v34 = vpop.f32.mrf.mxu0 }
 0x441   :  { %599 = vmatmul.f32.gmra.mxu0 %v159_v53  ;;  %v168_v53 = vld [vmem:[%s9797_s0 + $0x468] sm:$0xff] }
 0x446   :  { %v6564_v40 = vpop.f32.mrf.mxu0 }
 0x449   :  { %602 = vmatmul.f32.gmra.mxu0 %v160_v54  ;;  %v690_v54 = vmax.f32 %v6343_v45, %v6433_v27  ;;  %v170_v45 = vld [vmem:[%s9797_s0 + $0x478] sm:$0xff] }
 0x44e   :  { %v6569_v29 = vpop.f32.mrf.mxu0 }
 0x451   :  { %605 = vmatmul.f32.gmra.mxu0 %v161_v18  ;;  %v691_v18 = vmax.f32 %v690_v54, %v528_v49  ;;  %v696_v54 = vmax.f32 %v6353_v47, %v6443_v16  ;;  %v699_v47 = vmax.f32 %v6358_v56, %v6448_v52  ;;  %v702_v56 = vmax.f32 %v6363_v36, %v6453_v25 }
 0x456   :  { %v6574_v1 = vpop.f32.mrf.mxu0 }
 0x459   :  { %608 = vmatmul.f32.gmra.mxu0 %v162_v15 }
 0x45e   :  { %v6579_v8 = vpop.f32.mrf.mxu0 }
 0x461   :  { %611 = vmatmul.f32.gmra.mxu0 %v163_v48  ;;  %v169_v48 = vld [vmem:[%s9797_s0 + $0x470] sm:$0xff] }
 0x466   :  { %v6584_v30 = vpop.f32.mrf.mxu0 }
 0x469   :  { %614 = vmatmul.f32.gmra.mxu0 %v164_v42 }
 0x46e   :  { %v6589_v3 = vpop.f32.mrf.mxu0 }
 0x471   :  { %617 = vmatmul.f32.gmra.mxu0 %v165_v33 }
 0x476   :  { %v6594_v21 = vpop.f32.mrf.mxu0 }
 0x479   :  { %620 = vmatmul.f32.gmra.mxu0 %v166_v44  ;;  %v693_v44 = vmax.f32 %v6348_v12, %v6438_v62  ;;  %v697_v12 = vmax.f32 %v696_v54, %v6529_v22 }
 0x47e   :  { %v6599_v19 = vpop.f32.mrf.mxu0 }
 0x481   :  { %623 = vmatmul.f32.gmra.mxu0 %v167_v61 }
 0x486   :  { %v6604_v41 = vpop.f32.mrf.mxu0 }
 0x487   :  { %9811 = vst [vmem:[#allocation7_spill] sm:$0xff] %v6604_v41  ;;  %v694_v41 = vmax.f32 %v693_v44, %v531_v5 }
 0x489   :  { %626 = vmatmul.f32.gmra.mxu0 %v168_v53 }
 0x48e   :  { %v582_v15 = vpop.f32.mrf.mxu0 }
 0x48f   :  { %v692_v42 = vmax.f32 %v691_v18, %v582_v15 }
 0x491   :  { %v766_v33 = vadd.f32 %v6218_v39, %v692_v42  ;;  %629 = vmatmul.f32.gmra.mxu0 %v169_v48  ;;  %v700_v42 = vmax.f32 %v699_v47, %v6534_v7  ;;  %v703_v7 = vmax.f32 %v702_v56, %v6539_v11  ;;  %v6648_v11 = vld [vmem:[%s9799_s2] ss:$0 sm:$0xff]  ;;  %v5064_v56 = vld [vmem:[%s9800_s3 + $0x278] sm:$0xff] }
 0x492   :  { %1569 = vmatpush.msrb.mxu2 %v5064_v56 }
 0x493   :  { %v802_v61 = vmax.f32 %v766_v33, 0.0 }
 0x495   :  { %v874_v10 = vrot.slane %v802_v61, 4  ;;  %957 = vst [vmem:[#allocation1] ss:$2 sm:$0xff] %v802_v61 }
 0x496   :  { %v585_v53 = vpop.f32.mrf.mxu0 }
 0x497   :  { %958 = vst [vmem:[#allocation1 + $0x1] ss:$2 sm:$0xff] %v874_v10  ;;  %v695_v27 = vmax.f32 %v694_v41, %v585_v53  ;;  %v5048_v10 = vld [vmem:[%s9800_s3 + $0x1f8] sm:$0xff]  ;;  %v5047_v53 = vld [vmem:[%s9800_s3 + $0x1f0] sm:$0xff] }
 0x498   :  { %1455 = vmatpush.msrb.mxu1 %v5048_v10 }
 0x499   :  { %v767_v49 = vadd.f32 %v6218_v39, %v695_v27  ;;  %632 = vmatmul.f32.gmra.mxu0 %v170_v45 }
 0x49a   :  { %1456 = vmatpush.msrb.mxu1 %v5047_v53 }
 0x49b   :  { %v803_v18 = vmax.f32 %v767_v49, 0.0 }
 0x49d   :  { %v875_v62 = vrot.slane %v803_v18, 4  ;;  %959 = vst [vmem:[#allocation1 + $0x10] ss:$2 sm:$0xff] %v803_v18 }
 0x49e   :  { %v960_v5 = vld.sshfl [vmem:[#allocation1] sm:$0xff pattern:$0x75316420]  ;;  %v588_v15 = vpop.f32.mrf.mxu0 }
 0x49f   :  { %1089 = vst [vmem:[#allocation2 + $0xc0] sm:$0xff] %v960_v5  ;;  %v698_v48 = vmax.f32 %v697_v12, %v588_v15  ;;  %1283 = vmatmul.f32.gmra.mxu2 %v960_v5  ;;  %v5046_v12 = vld [vmem:[%s9800_s3 + $0x1e8] sm:$0xff]  ;;  %v705_v5 = vmax.f32 %v6368_v35, %v6458_v43  ;;  %v708_v43 = vmax.f32 %v6373_v51, %v6463_v0  ;;  %v5063_v51 = vld [vmem:[%s9800_s3 + $0x270] sm:$0xff] }
 0x4a0   :  { %962 = vst [vmem:[#allocation1 + $0x20] ss:$2 sm:$0xff] %v875_v62  ;;  %1457 = vmatpush.msrb.mxu1 %v5046_v12  ;;  %1570 = vmatpush.msrb.mxu2 %v5063_v51  ;;  %v5061_v12 = vld [vmem:[%s9800_s3 + $0x260] sm:$0xff]  ;;  %v5056_v51 = vld [vmem:[%s9800_s3 + $0x238] sm:$0xff] }
 0x4a1   :  { %v768_v41 = vadd.f32 %v6218_v39, %v698_v48  ;;  %v706_v48 = vmax.f32 %v705_v5, %v6544_v37 }
 0x4a3   :  { %v804_v16 = vmax.f32 %v768_v41, 0.0 }
 0x4a4   :  { %v961_v22 = vld.sshfl [vmem:[#allocation1 + $0x10] sm:$0xff pattern:$0x75316420] }
 0x4a5   :  { %v876_v33 = vrot.slane %v804_v16, 4  ;;  %963 = vst [vmem:[#allocation1 + $0x21] ss:$2 sm:$0xff] %v804_v16 }
 0x4a6   :  { %v591_v44 = vpop.f32.mrf.mxu0  ;;  %1090 = vst [vmem:[#allocation2 + $0xc8] sm:$0xf] %v961_v22 }
 0x4a7   :  { %964 = vst [vmem:[#allocation1 + $0x30] ss:$2 sm:$0xff] %v876_v33  ;;  %v701_v61 = vmax.f32 %v700_v42, %v591_v44  ;;  %v5045_v33 = vld [vmem:[%s9800_s3 + $0x1e0] sm:$0xff] }
 0x4a8   :  { %1458 = vmatpush.msrb.mxu1 %v5045_v33 }
 0x4a9   :  { %v769_v45 = vadd.f32 %v6218_v39, %v701_v61  ;;  %v709_v61 = vmax.f32 %v708_v43, %v6549_v24  ;;  %v5062_v24 = vld [vmem:[%s9800_s3 + $0x268] sm:$0xff] }
 0x4aa   :  { %1571 = vmatpush.msrb.mxu2 %v5062_v24  ;;  %v717_v24 = vmax.f32 %v6388_v59, %v6478_v32  ;;  %v5054_v59 = vld [vmem:[%s9800_s3 + $0x228] sm:$0xff] }
 0x4ab   :  { %v805_v52 = vmax.f32 %v769_v45, 0.0 }
 0x4ac   :  { %v6637_v27 = vld.sshfl [vmem:[#allocation1 + $0x20] sm:$0xff pattern:$0x75316420]  ;;  %1572 = vmatpush.msrb.mxu2 %v5061_v12 }
 0x4ad   :  { %1091 = vst [vmem:[#allocation2 + $0xd0] sm:$0xff] %v6637_v27  ;;  %v877_v49 = vrot.slane %v805_v52, 4  ;;  %v1153_v54 = vld [vmem:[#allocation2 + $0xc1] sm:$0xff]  ;;  %1286 = vmatmul.f32.gmra.mxu2 %v6637_v27 }
 0x4ae   :  { %v1316_v18 = vld [vmem:[#allocation2 + $0xc2] sm:$0xff]  ;;  %967 = vst [vmem:[#allocation1] ss:$2 sm:$0xff] %v805_v52  ;;  %1218 = vmatmul.f32.gmra.mxu1 %v1153_v54  ;;  %v594_v39 = vpop.f32.mrf.mxu0 }
 0x4af   :  { %1381 = vmatmul.f32.gmra.mxu3 %v1316_v18  ;;  %v966_v36 = vld.sshfl [vmem:[#allocation1 + $0x30] sm:$0xff pattern:$0x75316420]  ;;  %968 = vst [vmem:[#allocation1 + $0x1] ss:$2 sm:$0xff] %v877_v49  ;;  %v704_v25 = vmax.f32 %v703_v7, %v594_v39  ;;  %v5044_v7 = vld [vmem:[%s9800_s3 + $0x1d8] sm:$0xff]  ;;  %v711_v49 = vmax.f32 %v6378_v20, %v6468_v31 }
 0x4b0   :  { %1092 = vst [vmem:[#allocation2 + $0xd8] sm:$0xf] %v966_v36  ;;  %1459 = vmatpush.msrb.mxu1 %v5044_v7  ;;  %v5043_v20 = vld [vmem:[%s9800_s3 + $0x1d0] sm:$0xff] }
 0x4b1   :  { %v770_v62 = vadd.f32 %v6648_v11, %v704_v25  ;;  %v712_v39 = vmax.f32 %v711_v49, %v6554_v9  ;;  %v5060_v9 = vld [vmem:[%s9800_s3 + $0x258] sm:$0xff] }
 0x4b2   :  { %1460 = vmatpush.msrb.mxu1 %v5043_v20  ;;  %1573 = vmatpush.msrb.mxu2 %v5060_v9  ;;  %v5073_v20 = vld [vmem:[%s9800_s3 + $0x2c0] sm:$0xff]  ;;  %v5072_v9 = vld [vmem:[%s9800_s3 + $0x2b8] sm:$0xff] }
 0x4b3   :  { %v806_v15 = vmax.f32 %v770_v62, 0.0 }
 0x4b5   :  { %v878_v10 = vrot.slane %v806_v15, 4  ;;  %969 = vst [vmem:[#allocation1 + $0x10] ss:$2 sm:$0xff] %v806_v15 }
 0x4b6   :  { %v597_v41 = vpop.f32.mrf.mxu0  ;;  %v6654_v47 = vld.sshfl [vmem:[#allocation1] sm:$0xff pattern:$0x75316420] }
 0x4b7   :  { %972 = vst [vmem:[#allocation1 + $0x20] ss:$2 sm:$0xff] %v878_v10  ;;  %v707_v16 = vmax.f32 %v706_v48, %v597_v41  ;;  %v1154_v22 = vld [vmem:[#allocation2 + $0xd1] sm:$0xff]  ;;  %1289 = vmatmul.f32.gmra.mxu2 %v6654_v47  ;;  %v5080_v48 = vld [vmem:[%s9800_s3 + $0x2f8] sm:$0xff] }
 0x4b8   :  { %v1317_v42 = vld [vmem:[#allocation2 + $0xd2] sm:$0xff]  ;;  %1221 = vmatmul.f32.gmra.mxu1 %v1154_v22  ;;  %1093 = vst [vmem:[#allocation2 + $0xe0] sm:$0xff] %v6654_v47  ;;  %1684 = vmatpush.msrb.mxu3 %v5080_v48  ;;  %v5052_v48 = vld [vmem:[%s9800_s3 + $0x218] sm:$0xff] }
 0x4b9   :  { %1384 = vmatmul.f32.gmra.mxu3 %v1317_v42  ;;  %v771_v35 = vadd.f32 %v6648_v11, %v707_v16  ;;  %v5059_v10 = vld [vmem:[%s9800_s3 + $0x250] sm:$0xff]  ;;  %v5058_v22 = vld [vmem:[%s9800_s3 + $0x248] sm:$0xff]  ;;  %v714_v42 = vmax.f32 %v6383_v58, %v6473_v6  ;;  %v5077_v58 = vld [vmem:[%s9800_s3 + $0x2e0] sm:$0xff] }
 0x4ba   :  { %v5079_v16 = vld [vmem:[%s9800_s3 + $0x2f0] sm:$0xff]  ;;  %1574 = vmatpush.msrb.mxu2 %v5059_v10  ;;  %v5057_v6 = vld [vmem:[%s9800_s3 + $0x240] sm:$0xff] }
 0x4bb   :  { %v807_v37 = vmax.f32 %v771_v35, 0.0  ;;  %1685 = vmatpush.msrb.mxu3 %v5079_v16  ;;  %v5078_v35 = vld [vmem:[%s9800_s3 + $0x2e8] sm:$0xff]  ;;  %v715_v43 = vmax.f32 %v714_v42, %v6559_v34  ;;  %v5039_v10 = vld [vmem:[%s9800_s3 + $0x1b0] sm:$0xff]  ;;  %v720_v16 = vmax.f32 %v6393_v55, %v6483_v46 }
 0x4bc   :  { %v971_v44 = vld.sshfl [vmem:[#allocation1 + $0x10] sm:$0xff pattern:$0x75316420]  ;;  %1575 = vmatpush.msrb.mxu2 %v5058_v22  ;;  %v5042_v34 = vld [vmem:[%s9800_s3 + $0x1c8] sm:$0xff]  ;;  %v5051_v46 = vld [vmem:[%s9800_s3 + $0x210] sm:$0xff] }
 0x4bd   :  { %v879_v53 = vrot.slane %v807_v37, 4  ;;  %973 = vst [vmem:[#allocation1 + $0x21] ss:$2 sm:$0xff] %v807_v37  ;;  %1686 = vmatpush.msrb.mxu3 %v5078_v35  ;;  %1461 = vmatpush.msrb.mxu1 %v5042_v34  ;;  %v5070_v35 = vld [vmem:[%s9800_s3 + $0x2a8] sm:$0xff]  ;;  %v5036_v34 = vld [vmem:[%s9800_s3 + $0x198] sm:$0xff] }
 0x4be   :  { %v600_v45 = vpop.f32.mrf.mxu0  ;;  %1094 = vst [vmem:[#allocation2 + $0xe8] sm:$0xf] %v971_v44  ;;  %1576 = vmatpush.msrb.mxu2 %v5057_v6 }
 0x4bf   :  { %974 = vst [vmem:[#allocation1 + $0x30] ss:$2 sm:$0xff] %v879_v53  ;;  %v710_v52 = vmax.f32 %v709_v61, %v600_v45  ;;  %1687 = vmatpush.msrb.mxu3 %v5077_v58 }
 0x4c0   :  { %1577 = vmatpush.msrb.mxu2 %v5056_v51  ;;  %v5049_v51 = vld [vmem:[%s9800_s3 + $0x200] sm:$0xff] }
 0x4c1   :  { %v772_v0 = vadd.f32 %v6648_v11, %v710_v52  ;;  %v5076_v52 = vld [vmem:[%s9800_s3 + $0x2d8] sm:$0xff] }
 0x4c2   :  { %1688 = vmatpush.msrb.mxu3 %v5076_v52  ;;  %v5068_v52 = vld [vmem:[%s9800_s3 + $0x298] sm:$0xff] }
 0x4c3   :  { %v808_v54 = vmax.f32 %v772_v0, 0.0  ;;  %v5075_v0 = vld [vmem:[%s9800_s3 + $0x2d0] sm:$0xff] }
 0x4c4   :  { %v6680_v18 = vld.sshfl [vmem:[#allocation1 + $0x20] sm:$0xff pattern:$0x75316420]  ;;  %1689 = vmatpush.msrb.mxu3 %v5075_v0 }
 0x4c5   :  { %v880_v36 = vrot.slane %v808_v54, 4  ;;  %977 = vst [vmem:[#allocation1] ss:$2 sm:$0xff] %v808_v54  ;;  %v1155_v25 = vld [vmem:[#allocation2 + $0xe1] sm:$0xff]  ;;  %1292 = vmatmul.f32.gmra.mxu2 %v6680_v18  ;;  %v5055_v54 = vld [vmem:[%s9800_s3 + $0x230] sm:$0xff] }
 0x4c6   :  { %v1318_v62 = vld [vmem:[#allocation2 + $0xe2] sm:$0xff]  ;;  %1224 = vmatmul.f32.gmra.mxu1 %v1155_v25  ;;  %v603_v31 = vpop.f32.mrf.mxu0  ;;  %1095 = vst [vmem:[#allocation2 + $0xf0] sm:$0xff] %v6680_v18  ;;  %1578 = vmatpush.msrb.mxu2 %v5055_v54  ;;  %v5035_v0 = vld [vmem:[%s9800_s3 + $0x190] sm:$0xff] }
 0x4c7   :  { %1387 = vmatmul.f32.gmra.mxu3 %v1318_v62  ;;  %v976_v5 = vld.sshfl [vmem:[#allocation1 + $0x30] sm:$0xff pattern:$0x75316420]  ;;  %978 = vst [vmem:[#allocation1 + $0x1] ss:$2 sm:$0xff] %v880_v36  ;;  %v713_v15 = vmax.f32 %v712_v39, %v603_v31  ;;  %v5074_v39 = vld [vmem:[%s9800_s3 + $0x2c8] sm:$0xff]  ;;  %v718_v36 = vmax.f32 %v717_v24, %v6564_v40 }
 0x4c8   :  { %1096 = vst [vmem:[#allocation2 + $0xf8] sm:$0xf] %v976_v5  ;;  %1690 = vmatpush.msrb.mxu3 %v5074_v39  ;;  %v5041_v62 = vld [vmem:[%s9800_s3 + $0x1c0] sm:$0xff]  ;;  %v5040_v5 = vld [vmem:[%s9800_s3 + $0x1b8] sm:$0xff]  ;;  %1579 = vmatpush.msrb.mxu2 %v5054_v59  ;;  %v5067_v24 = vld [vmem:[%s9800_s3 + $0x290] sm:$0xff] }
 0x4c9   :  { %v773_v41 = vadd.f32 %v6648_v11, %v713_v15  ;;  %1462 = vmatpush.msrb.mxu1 %v5041_v62  ;;  %v5053_v31 = vld [vmem:[%s9800_s3 + $0x220] sm:$0xff]  ;;  %v5066_v39 = vld [vmem:[%s9800_s3 + $0x288] sm:$0xff] }
 0x4ca   :  { %1691 = vmatpush.msrb.mxu3 %v5073_v20  ;;  %1580 = vmatpush.msrb.mxu2 %v5053_v31  ;;  %v726_v31 = vmax.f32 %v6403_v63, %v6493_v2 }
 0x4cb   :  { %v809_v33 = vmax.f32 %v773_v41, 0.0  ;;  %1463 = vmatpush.msrb.mxu1 %v5040_v5  ;;  %v5071_v41 = vld [vmem:[%s9800_s3 + $0x2b0] sm:$0xff] }
 0x4cc   :  { %1692 = vmatpush.msrb.mxu3 %v5072_v9  ;;  %1581 = vmatpush.msrb.mxu2 %v5052_v48 }
 0x4cd   :  { %v881_v37 = vrot.slane %v809_v33, 4  ;;  %979 = vst [vmem:[#allocation1 + $0x10] ss:$2 sm:$0xff] %v809_v33  ;;  %1464 = vmatpush.msrb.mxu1 %v5039_v10  ;;  %v5038_v33 = vld [vmem:[%s9800_s3 + $0x1a8] sm:$0xff] }
 0x4ce   :  { %v606_v44 = vpop.f32.mrf.mxu0  ;;  %v6713_v61 = vld.sshfl [vmem:[#allocation1] sm:$0xff pattern:$0x75316420]  ;;  %1693 = vmatpush.msrb.mxu3 %v5071_v41  ;;  %1582 = vmatpush.msrb.mxu2 %v5051_v46  ;;  %v1536_v46 = vld [vmem:[#allocation2 + $0x4] sm:$0xff] }
 0x4cf   :  { %982 = vst [vmem:[#allocation1 + $0x20] ss:$2 sm:$0xff] %v881_v37  ;;  %v716_v53 = vmax.f32 %v715_v43, %v606_v44  ;;  %v1156_v45 = vld [vmem:[#allocation2 + $0xf1] sm:$0xff]  ;;  %1295 = vmatmul.f32.gmra.mxu2 %v6713_v61  ;;  %v721_v43 = vmax.f32 %v720_v16, %v6569_v29  ;;  %1465 = vmatpush.msrb.mxu1 %v5038_v33  ;;  %v5037_v29 = vld [vmem:[%s9800_s3 + $0x1a0] sm:$0xff] }
 0x4d0   :  { %v1319_v56 = vld [vmem:[#allocation2 + $0xf2] sm:$0xff]  ;;  %1227 = vmatmul.f32.gmra.mxu1 %v1156_v45  ;;  %1097 = vst [vmem:[#allocation2 + $0x100] sm:$0xff] %v6713_v61  ;;  %1694 = vmatpush.msrb.mxu3 %v5070_v35 }
 0x4d1   :  { %1390 = vmatmul.f32.gmra.mxu3 %v1319_v56  ;;  %v774_v7 = vadd.f32 %v6648_v11, %v716_v53  ;;  %v5069_v53 = vld [vmem:[%s9800_s3 + $0x2a0] sm:$0xff]  ;;  %1466 = vmatpush.msrb.mxu1 %v5037_v29  ;;  %v5050_v56 = vld [vmem:[%s9800_s3 + $0x208] sm:$0xff] }
 0x4d2   :  { %1695 = vmatpush.msrb.mxu3 %v5069_v53  ;;  %1583 = vmatpush.msrb.mxu2 %v5050_v56 }
 0x4d3   :  { %v810_v49 = vmax.f32 %v774_v7, 0.0  ;;  %1467 = vmatpush.msrb.mxu1 %v5036_v34 }
 0x4d4   :  { %v981_v12 = vld.sshfl [vmem:[#allocation1 + $0x10] sm:$0xff pattern:$0x75316420]  ;;  %1696 = vmatpush.msrb.mxu3 %v5068_v52  ;;  %1584 = vmatpush.msrb.mxu2 %v5049_v51  ;;  %v6851_v52 = vpop.f32.mrf.mxu2 }
 0x4d5   :  { %v882_v25 = vrot.slane %v810_v49, 4  ;;  %983 = vst [vmem:[#allocation1 + $0x21] ss:$2 sm:$0xff] %v810_v49  ;;  %v723_v49 = vmax.f32 %v6398_v14, %v6488_v26  ;;  %1468 = vmatpush.msrb.mxu1 %v5035_v0  ;;  %v5033_v26 = vld [vmem:[%s9800_s3 + $0x180] sm:$0xff]  ;;  %v6857_v0 = vpop.f32.mrf.mxu1 }
 0x4d6   :  { %v609_v32 = vpop.f32.mrf.mxu0  ;;  %1098 = vst [vmem:[#allocation2 + $0x108] sm:$0xf] %v981_v12  ;;  %v5034_v12 = vld [vmem:[%s9800_s3 + $0x188] sm:$0xff]  ;;  %1697 = vmatpush.msrb.mxu3 %v5067_v24 }
 0x4d7   :  { %984 = vst [vmem:[#allocation1 + $0x30] ss:$2 sm:$0xff] %v882_v25  ;;  %v719_v40 = vmax.f32 %v718_v36, %v609_v32  ;;  %v724_v36 = vmax.f32 %v723_v49, %v6574_v1  ;;  %1469 = vmatpush.msrb.mxu1 %v5034_v12  ;;  %v5065_v32 = vld [vmem:[%s9800_s3 + $0x280] sm:$0xff] }
 0x4d8   :  { %1698 = vmatpush.msrb.mxu3 %v5066_v39  ;;  %v1422_v39 = vld [vmem:[#allocation2 + $0x3] sm:$0xff] }
 0x4d9   :  { %v775_v15 = vadd.f32 %v6648_v11, %v719_v40  ;;  %1470 = vmatpush.msrb.mxu1 %v5033_v26  ;;  %v1538_v26 = vld [vmem:[#allocation2 + $0x24] sm:$0xff] }
 0x4da   :  { %1699 = vmatpush.msrb.mxu3 %v5065_v32 }
 0x4db   :  { %v811_v22 = vmax.f32 %v775_v15, 0.0  ;;  %v727_v15 = vmax.f32 %v726_v31, %v6579_v8 }
 0x4dc   :  { %v6775_v42 = vld.sshfl [vmem:[#allocation1 + $0x20] sm:$0xff pattern:$0x75316420] }
 0x4dd   :  { %v883_v37 = vrot.slane %v811_v22, 4  ;;  %987 = vst [vmem:[#allocation1] ss:$2 sm:$0xff] %v811_v22  ;;  %v1157_v44 = vld [vmem:[#allocation2 + $0x101] sm:$0xff]  ;;  %1298 = vmatmul.f32.gmra.mxu2 %v6775_v42  ;;  %v729_v22 = vmax.f32 %v6408_v50, %v6498_v13  ;;  %v732_v13 = vmax.f32 %v6413_v60, %v6503_v4  ;;  %v735_v4 = vmax.f32 %v6418_v23, %v6508_v28  ;;  %v6862_v23 = vpop.f32.mrf.mxu3 }
 0x4de   :  { %v1320_v55 = vld [vmem:[#allocation2 + $0x102] sm:$0xff]  ;;  %1230 = vmatmul.f32.gmra.mxu1 %v1157_v44  ;;  %v612_v58 = vpop.f32.mrf.mxu0  ;;  %1099 = vst [vmem:[#allocation2 + $0x110] sm:$0xff] %v6775_v42 }
 0x4df   :  { %1393 = vmatmul.f32.gmra.mxu3 %v1320_v55  ;;  %v986_v6 = vld.sshfl [vmem:[#allocation1 + $0x30] sm:$0xff pattern:$0x75316420]  ;;  %988 = vst [vmem:[#allocation1 + $0x1] ss:$2 sm:$0xff] %v883_v37  ;;  %v722_v45 = vmax.f32 %v721_v43, %v612_v58  ;;  %v730_v63 = vmax.f32 %v729_v22, %v6584_v30  ;;  %v733_v58 = vmax.f32 %v732_v13, %v6589_v3 }
 0x4e0   :  { %1100 = vst [vmem:[#allocation2 + $0x118] sm:$0xf] %v986_v6  ;;  %v736_v24 = vmax.f32 %v735_v4, %v6594_v21  ;;  %v738_v21 = vmax.f32 %v6423_v38, %v6513_v57  ;;  %v1541_v4 = vld [vmem:[#allocation2 + $0x54] sm:$0xff] }
 0x4e1   :  { %v776_v7 = vadd.f32 %v6648_v11, %v722_v45 }
 0x4e3   :  { %v812_v54 = vmax.f32 %v776_v7, 0.0  ;;  %v1537_v7 = vld [vmem:[#allocation2 + $0x14] sm:$0xff] }
 0x4e5   :  { %v884_v25 = vrot.slane %v812_v54, 4  ;;  %989 = vst [vmem:[#allocation1 + $0x10] ss:$2 sm:$0xff] %v812_v54  ;;  %v6875_v38 = vpop.f32.mrf.mxu3 }
 0x4e6   :  { %v615_v59 = vpop.f32.mrf.mxu0  ;;  %v6823_v14 = vld.sshfl [vmem:[#allocation1] sm:$0xff pattern:$0x75316420] }
 0x4e7   :  { %992 = vst [vmem:[#allocation1 + $0x20] ss:$2 sm:$0xff] %v884_v25  ;;  %v725_v62 = vmax.f32 %v724_v36, %v615_v59  ;;  %v1158_v20 = vld [vmem:[#allocation2 + $0x111] sm:$0xff]  ;;  %1301 = vmatmul.f32.gmra.mxu2 %v6823_v14  ;;  %v6860_v25 = vpop.f32.mrf.mxu2 }
 0x4e8   :  { %v1321_v40 = vld [vmem:[#allocation2 + $0x112] sm:$0xff]  ;;  %1233 = vmatmul.f32.gmra.mxu1 %v1158_v20  ;;  %1101 = vst [vmem:[#allocation2 + $0x120] sm:$0xff] %v6823_v14  ;;  %v739_v20 = vmax.f32 %v738_v21, %v6599_v19  ;;  %v9812_v19 = vld [vmem:[#allocation6_spill] sm:$0xff] }
 0x4e9   :  { %1396 = vmatmul.f32.gmra.mxu3 %v1321_v40  ;;  %v777_v1 = vadd.f32 %v6648_v11, %v725_v62  ;;  %v1651_v36 = vld [vmem:[#allocation2 + $0x10] sm:$0xff]  ;;  %v6867_v62 = vpop.f32.mrf.mxu1 }
 0x4ea   :  { %v5094_v21 = vld [vmem:[%s9800_s3 + $0x368] sm:$0xff] }
 0x4eb   :  { %v813_v5 = vmax.f32 %v777_v1, 0.0 }
 0x4ec   :  { %v991_v9 = vld.sshfl [vmem:[#allocation1 + $0x10] sm:$0xff pattern:$0x75316420] }
 0x4ed   :  { %v885_v48 = vrot.slane %v813_v5, 4  ;;  %993 = vst [vmem:[#allocation1 + $0x21] ss:$2 sm:$0xff] %v813_v5 }
 0x4ee   :  { %v618_v10 = vpop.f32.mrf.mxu0  ;;  %1102 = vst [vmem:[#allocation2 + $0x128] sm:$0xf] %v991_v9  ;;  %v6870_v9 = vld [vmem:[#allocation2 + $0x13] sm:$0xff] }
 0x4ef   :  { %994 = vst [vmem:[#allocation1 + $0x30] ss:$2 sm:$0xff] %v885_v48  ;;  %v728_v41 = vmax.f32 %v727_v15, %v618_v10  ;;  %v1652_v15 = vld [vmem:[#allocation2 + $0x20] sm:$0xff]  ;;  %v6872_v48 = vpop.f32.mrf.mxu2  ;;  %v741_v10 = vmax.f32 %v9812_v19, %v6518_v17  ;;  %v6888_v17 = vpop.f32.mrf.mxu3 }
 0x4f1   :  { %v778_v16 = vadd.f32 %v6648_v11, %v728_v41  ;;  %v6880_v22 = vpop.f32.mrf.mxu1 }
 0x4f3   :  { %v814_v33 = vmax.f32 %v778_v16, 0.0  ;;  %v1539_v16 = vld [vmem:[#allocation2 + $0x34] sm:$0xff] }
 0x4f4   :  { %v6840_v35 = vld.sshfl [vmem:[#allocation1 + $0x20] sm:$0xff pattern:$0x75316420] }
 0x4f5   :  { %v886_v2 = vrot.slane %v814_v33, 4  ;;  %997 = vst [vmem:[#allocation1] ss:$2 sm:$0xff] %v814_v33  ;;  %v1159_v43 = vld [vmem:[#allocation2 + $0x121] sm:$0xff]  ;;  %1304 = vmatmul.f32.gmra.mxu2 %v6840_v35  ;;  %v9813_v33 = vld [vmem:[#allocation7_spill] sm:$0xff] }
 0x4f6   :  { %v1322_v8 = vld [vmem:[#allocation2 + $0x122] sm:$0xff]  ;;  %1236 = vmatmul.f32.gmra.mxu1 %v1159_v43  ;;  %v621_v37 = vpop.f32.mrf.mxu0  ;;  %1103 = vst [vmem:[#allocation2 + $0x130] sm:$0xff] %v6840_v35 }
 0x4f7   :  { %1399 = vmatmul.f32.gmra.mxu3 %v1322_v8  ;;  %v996_v44 = vld.sshfl [vmem:[#allocation1 + $0x30] sm:$0xff pattern:$0x75316420]  ;;  %998 = vst [vmem:[#allocation1 + $0x1] ss:$2 sm:$0xff] %v886_v2  ;;  %v731_v55 = vmax.f32 %v730_v63, %v621_v37  ;;  %v742_v63 = vmax.f32 %v741_v10, %v9813_v33 }
 0x4f8   :  { %1104 = vst [vmem:[#allocation2 + $0x138] sm:$0xf] %v996_v44  ;;  %v6883_v44 = vld [vmem:[#allocation2 + $0x23] sm:$0xff] }
 0x4f9   :  { %v779_v50 = vadd.f32 %v6648_v11, %v731_v55  ;;  %v1653_v55 = vld [vmem:[#allocation2 + $0x30] sm:$0xff]  ;;  %v1544_v10 = vld [vmem:[#allocation2 + $0xc4] sm:$0xff] }
 0x4fb   :  { %v815_v30 = vmax.f32 %v779_v50, 0.0  ;;  %v6885_v50 = vpop.f32.mrf.mxu2 }
 0x4fd   :  { %v887_v6 = vrot.slane %v815_v30, 4  ;;  %999 = vst [vmem:[#allocation1 + $0x10] ss:$2 sm:$0xff] %v815_v30  ;;  %1585 = vmatmul.f32.vlgmr.msrb.gmra.mxu2 %v1536_v46  ;;  %v1540_v46 = vld [vmem:[#allocation2 + $0x44] sm:$0xff] }
 0x4fe   :  { %v624_v29 = vpop.f32.mrf.mxu0  ;;  %v6849_v53 = vld.sshfl [vmem:[#allocation1] sm:$0xff pattern:$0x75316420] }
 0x4ff   :  { %1002 = vst [vmem:[#allocation1 + $0x20] ss:$2 sm:$0xff] %v887_v6  ;;  %v734_v45 = vmax.f32 %v733_v58, %v624_v29  ;;  %v1160_v56 = vld [vmem:[#allocation2 + $0x131] sm:$0xff]  ;;  %v5096_v58 = vld [vmem:[%s9800_s3 + $0x378] sm:$0xff]  ;;  %v6894_v29 = vpop.f32.mrf.mxu1 }
 0x500   :  { %v1323_v34 = vld [vmem:[#allocation2 + $0x132] sm:$0xff]  ;;  %1239 = vmatmul.f32.gmra.mxu1 %v1160_v56  ;;  %1105 = vst [vmem:[#allocation2 + $0x140] sm:$0xff] %v6849_v53 }
 0x501   :  { %1402 = vmatmul.f32.gmra.mxu3 %v1323_v34  ;;  %v780_v60 = vadd.f32 %v6648_v11, %v734_v45  ;;  %1798 = vmatpush.msra.mxu1 %v5096_v58  ;;  %v6896_v56 = vld [vmem:[#allocation2 + $0x33] sm:$0xff]  ;;  %v1654_v34 = vld [vmem:[#allocation2 + $0x40] sm:$0xff] }
 0x502   :  { %v5091_v58 = vld [vmem:[%s9800_s3 + $0x350] sm:$0xff] }
 0x503   :  { %v816_v3 = vmax.f32 %v780_v60, 0.0  ;;  %v6898_v60 = vpop.f32.mrf.mxu2 }
 0x504   :  { %v1001_v51 = vld.sshfl [vmem:[#allocation1 + $0x10] sm:$0xff pattern:$0x75316420] }
 0x505   :  { %v888_v49 = vrot.slane %v816_v3, 4  ;;  %1003 = vst [vmem:[#allocation1 + $0x21] ss:$2 sm:$0xff] %v816_v3  ;;  %1588 = vmatmul.f32.gmra.mxu2 %v1537_v7  ;;  %v5095_v3 = vld [vmem:[%s9800_s3 + $0x370] sm:$0xff] }
 0x506   :  { %v627_v54 = vpop.f32.mrf.mxu0  ;;  %1106 = vst [vmem:[#allocation2 + $0x148] sm:$0xf] %v1001_v51  ;;  %1799 = vmatpush.msra.mxu1 %v5095_v3  ;;  %v5108_v3 = vld [vmem:[%s9800_s3 + $0x3d8] sm:$0xff] }
 0x507   :  { %1004 = vst [vmem:[#allocation1 + $0x30] ss:$2 sm:$0xff] %v888_v49  ;;  %v737_v12 = vmax.f32 %v736_v24, %v627_v54  ;;  %v6906_v51 = vpop.f32.mrf.mxu1  ;;  %v6908_v49 = vld [vmem:[#allocation2 + $0x43] sm:$0xff]  ;;  %v1655_v54 = vld [vmem:[#allocation2 + $0x50] sm:$0xff] }
 0x508   :  { %1471 = vmatmul.f32.vlgmr.msrb.gmra.mxu1 %v1422_v39 }
 0x509   :  { %1700 = vmatmul.f32.vlgmr.msrb.gmra.mxu3 %v1651_v36  ;;  %v781_v28 = vadd.f32 %v6648_v11, %v737_v12  ;;  %v1542_v36 = vld [vmem:[#allocation2 + $0x64] sm:$0xff]  ;;  %1800 = vmatpush.msra.mxu1 %v5094_v21  ;;  %v5126_v21 = vld [vmem:[%s9800_s3 + $0x468] sm:$0xff] }
 0x50b   :  { %v817_v59 = vmax.f32 %v781_v28, 0.0  ;;  %v6910_v12 = vpop.f32.mrf.mxu2 }
 0x50c   :  { %v1005_v32 = vld.sshfl [vmem:[#allocation1 + $0x20] sm:$0xff pattern:$0x75316420] }
 0x50d   :  { %v889_v40 = vrot.slane %v817_v59, 4  ;;  %1591 = vmatmul.f32.gmra.mxu2 %v1538_v26  ;;  %1007 = vst [vmem:[#allocation1] ss:$2 sm:$0xff] %v817_v59  ;;  %v6920_v59 = vld [vmem:[#allocation2 + $0x53] sm:$0xff]  ;;  %v1656_v26 = vld [vmem:[#allocation2 + $0x60] sm:$0xff] }
 0x50e   :  { %v630_v1 = vpop.f32.mrf.mxu0  ;;  %1107 = vst [vmem:[#allocation2 + $0x150] sm:$0xff] %v1005_v32  ;;  %v1006_v31 = vld.sshfl [vmem:[#allocation1 + $0x30] sm:$0xff pattern:$0x75316420] }
 0x50f   :  { %v740_v5 = vmax.f32 %v739_v20, %v630_v1  ;;  %1008 = vst [vmem:[#allocation1 + $0x1] ss:$2 sm:$0xff] %v889_v40  ;;  %v6915_v28 = vpop.f32.mrf.mxu1  ;;  %v1543_v40 = vld [vmem:[#allocation2 + $0x74] sm:$0xff]  ;;  %v5093_v1 = vld [vmem:[%s9800_s3 + $0x360] sm:$0xff] }
 0x510   :  { %1474 = vmatmul.f32.gmra.mxu1 %v6870_v9  ;;  %1108 = vst [vmem:[#allocation2 + $0x158] sm:$0xf] %v1006_v31 }
 0x511   :  { %1703 = vmatmul.f32.gmra.mxu3 %v1652_v15  ;;  %v782_v57 = vadd.f32 %v6648_v11, %v740_v5  ;;  %1801 = vmatpush.msra.mxu1 %v5093_v1  ;;  %v6932_v5 = vld [vmem:[#allocation2 + $0x63] sm:$0xff]  ;;  %v1657_v15 = vld [vmem:[#allocation2 + $0x70] sm:$0xff] }
 0x512   :  { %v5106_v1 = vld [vmem:[%s9800_s3 + $0x3c8] sm:$0xff] }
 0x513   :  { %v818_v41 = vmax.f32 %v782_v57, 0.0  ;;  %v6922_v32 = vpop.f32.mrf.mxu2 }
 0x515   :  { %v890_v2 = vrot.slane %v818_v41, 4  ;;  %1594 = vmatmul.f32.gmra.mxu2 %v1539_v16  ;;  %1009 = vst [vmem:[#allocation1 + $0x10] ss:$2 sm:$0xff] %v818_v41  ;;  %v5512_v41 = vld [vmem:[%s9802_s5 + $0x478] sm:$0xff] }
 0x516   :  { %v633_v43 = vpop.f32.mrf.mxu0  ;;  %v1010_v8 = vld.sshfl [vmem:[#allocation1] sm:$0xff pattern:$0x75316420]  ;;  %v5092_v16 = vld [vmem:[%s9800_s3 + $0x358] sm:$0xff]  ;;  %4662 = vmatpush.msrb.mxu0 %v5512_v41 }
 0x517   :  { %v743_v37 = vmax.f32 %v742_v63, %v633_v43  ;;  %1012 = vst [vmem:[#allocation1 + $0x20] ss:$2 sm:$0xff] %v890_v2  ;;  %v6930_v31 = vpop.f32.mrf.mxu1  ;;  %1802 = vmatpush.msra.mxu1 %v5092_v16  ;;  %v6947_v63 = vld [vmem:[#allocation2 + $0x73] sm:$0xff]  ;;  %v1658_v2 = vld [vmem:[#allocation2 + $0x80] sm:$0xff]  ;;  %v5105_v16 = vld [vmem:[%s9800_s3 + $0x3c0] sm:$0xff] }
 0x518   :  { %1477 = vmatmul.f32.gmra.mxu1 %v6883_v44  ;;  %1109 = vst [vmem:[#allocation2 + $0x160] sm:$0xff] %v1010_v8  ;;  %v5112_v8 = vld [vmem:[%s9800_s3 + $0x3f8] sm:$0xff] }
 0x519   :  { %1706 = vmatmul.f32.gmra.mxu3 %v1653_v55  ;;  %v783_v13 = vadd.f32 %v6648_v11, %v743_v37  ;;  %v6901_v11 = vpop.f32.mrf.mxu3  ;;  %1912 = vmatpush.msra.mxu2 %v5112_v8  ;;  %v5111_v55 = vld [vmem:[%s9800_s3 + $0x3f0] sm:$0xff]  ;;  %v5124_v41 = vld [vmem:[%s9800_s3 + $0x458] sm:$0xff] }
 0x51a   :  { %1803 = vmatpush.msra.mxu1 %v5091_v58  ;;  %v1547_v8 = vld [vmem:[#allocation2 + $0xf4] sm:$0xff] }
 0x51b   :  { %v819_v30 = vmax.f32 %v783_v13, 0.0  ;;  %v6934_v57 = vpop.f32.mrf.mxu2  ;;  %1913 = vmatpush.msra.mxu2 %v5111_v55  ;;  %v1545_v13 = vld [vmem:[#allocation2 + $0xd4] sm:$0xff]  ;;  %v5104_v55 = vld [vmem:[%s9800_s3 + $0x3b8] sm:$0xff] }
 0x51c   :  { %v1011_v6 = vld.sshfl [vmem:[#allocation1 + $0x10] sm:$0xff pattern:$0x75316420] }
 0x51d   :  { %v891_v45 = vrot.slane %v819_v30, 4  ;;  %1597 = vmatmul.f32.gmra.mxu2 %v1540_v46  ;;  %1013 = vst [vmem:[#allocation1 + $0x21] ss:$2 sm:$0xff] %v819_v30  ;;  %v5110_v30 = vld [vmem:[%s9800_s3 + $0x3e8] sm:$0xff] }
 0x51e   :  { %1110 = vst [vmem:[#allocation2 + $0x168] sm:$0xf] %v1011_v6  ;;  %1914 = vmatpush.msra.mxu2 %v5110_v30  ;;  %v5109_v6 = vld [vmem:[%s9800_s3 + $0x3e0] sm:$0xff]  ;;  %v5122_v30 = vld [vmem:[%s9800_s3 + $0x448] sm:$0xff] }
 0x51f   :  { %1014 = vst [vmem:[#allocation1 + $0x30] ss:$2 sm:$0xff] %v891_v45  ;;  %v6945_v33 = vpop.f32.mrf.mxu1  ;;  %v1430_v45 = vld [vmem:[#allocation2 + $0xc3] sm:$0xff] }
 0x520   :  { %1480 = vmatmul.f32.gmra.mxu1 %v6896_v56  ;;  %1915 = vmatpush.msra.mxu2 %v5109_v6  ;;  %v5121_v6 = vld [vmem:[%s9800_s3 + $0x440] sm:$0xff] }
 0x521   :  { %1709 = vmatmul.f32.gmra.mxu3 %v1654_v34  ;;  %v6913_v39 = vpop.f32.mrf.mxu3 }
 0x522   :  { %1916 = vmatpush.msra.mxu2 %v5108_v3 }
 0x523   :  { %v6949_v43 = vpop.f32.mrf.mxu2 }
 0x524   :  { %v1015_v7 = vld.sshfl [vmem:[#allocation1 + $0x20] sm:$0xff pattern:$0x75316420] }
 0x525   :  { %1600 = vmatmul.f32.gmra.mxu2 %v1541_v4  ;;  %1111 = vst [vmem:[#allocation2 + $0x170] sm:$0xff] %v1015_v7  ;;  %v5128_v4 = vld [vmem:[%s9800_s3 + $0x478] sm:$0xff] }
 0x526   :  { %v1016_v24 = vld.sshfl [vmem:[#allocation1 + $0x30] sm:$0xff pattern:$0x75316420]  ;;  %2026 = vmatpush.msra.mxu3 %v5128_v4 }
 0x527   :  { %1112 = vst [vmem:[#allocation2 + $0x178] sm:$0xf] %v1016_v24  ;;  %v1546_v24 = vld [vmem:[#allocation2 + $0xe4] sm:$0xff] }
 0x528   :  { %1483 = vmatmul.f32.gmra.mxu1 %v6908_v49  ;;  %v7036_v4 = vld [vmem:[#allocation2 + $0xe3] sm:$0xff] }
 0x529   :  { %1712 = vmatmul.f32.gmra.mxu3 %v1655_v54  ;;  %v6925_v20 = vpop.f32.mrf.mxu3  ;;  %v5107_v54 = vld [vmem:[%s9800_s3 + $0x3d0] sm:$0xff] }
 0x52a   :  { %1917 = vmatpush.msra.mxu2 %v5107_v54  ;;  %v5102_v54 = vld [vmem:[%s9800_s3 + $0x3a8] sm:$0xff] }
 0x52b   :  { %v6963_v46 = vpop.f32.mrf.mxu1 }
 0x52c   :  { %1918 = vmatpush.msra.mxu2 %v5106_v1  ;;  %v1548_v1 = vld [vmem:[#allocation2 + $0x104] sm:$0xff] }
 0x52d   :  { %1603 = vmatmul.f32.gmra.mxu2 %v1542_v36  ;;  %v5090_v36 = vld [vmem:[%s9800_s3 + $0x348] sm:$0xff] }
 0x52e   :  { %1804 = vmatpush.msra.mxu1 %v5090_v36  ;;  %1919 = vmatpush.msra.mxu2 %v5105_v16  ;;  %v5120_v36 = vld [vmem:[%s9800_s3 + $0x438] sm:$0xff]  ;;  %v5086_v16 = vld [vmem:[%s9800_s3 + $0x328] sm:$0xff] }
 0x530   :  { %1486 = vmatmul.f32.gmra.mxu1 %v6920_v59  ;;  %v6971_v34 = vpop.f32.mrf.mxu2  ;;  %1920 = vmatpush.msra.mxu2 %v5104_v55  ;;  %v5085_v55 = vld [vmem:[%s9800_s3 + $0x320] sm:$0xff] }
 0x531   :  { %1715 = vmatmul.f32.gmra.mxu3 %v1656_v26  ;;  %v6937_v19 = vpop.f32.mrf.mxu3 }
 0x535   :  { %1606 = vmatmul.f32.gmra.mxu2 %v1543_v40  ;;  %v6994_v26 = vpop.f32.mrf.mxu1  ;;  %v5125_v40 = vld [vmem:[%s9800_s3 + $0x460] sm:$0xff] }
 0x538   :  { %1489 = vmatmul.f32.gmra.mxu1 %v6932_v5 }
 0x539   :  { %1718 = vmatmul.f32.gmra.mxu3 %v1657_v15  ;;  %v6955_v37 = vpop.f32.mrf.mxu3  ;;  %v7002_v15 = vld [vmem:[#allocation2 + $0xd3] sm:$0xff] }
 0x53d   :  { %1609 = vmatmul.f32.gmra.mxu2 %v1544_v10  ;;  %v7004_v10 = vpop.f32.mrf.mxu2 }
 0x540   :  { %1492 = vmatmul.f32.gmra.mxu1 %v6947_v63 }
 0x541   :  { %1721 = vmatmul.f32.gmra.mxu3 %v1658_v2  ;;  %v6980_v7 = vpop.f32.mrf.mxu3 }
 0x543   :  { %v7028_v58 = vpop.f32.mrf.mxu1 }
 0x545   :  { %1612 = vmatmul.f32.gmra.mxu2 %v1545_v13  ;;  %v5089_v13 = vld [vmem:[%s9800_s3 + $0x340] sm:$0xff] }
 0x546   :  { %1805 = vmatpush.msra.mxu1 %v5089_v13  ;;  %v5100_v13 = vld [vmem:[%s9800_s3 + $0x398] sm:$0xff] }
 0x548   :  { %1495 = vmatmul.f32.gmra.mxu1 %v1430_v45  ;;  %v5103_v45 = vld [vmem:[%s9800_s3 + $0x3b0] sm:$0xff]  ;;  %v7038_v3 = vpop.f32.mrf.mxu2 }
 0x549   :  { %1724 = vmatmul.f32.gmra.mxu3 %v6637_v27  ;;  %v5127_v27 = vld [vmem:[%s9800_s3 + $0x470] sm:$0xff]  ;;  %v7014_v2 = vpop.f32.mrf.mxu3  ;;  %1921 = vmatpush.msra.mxu2 %v5103_v45  ;;  %v5084_v45 = vld [vmem:[%s9800_s3 + $0x318] sm:$0xff] }
 0x54a   :  { %2027 = vmatpush.msra.mxu3 %v5127_v27  ;;  %v5088_v27 = vld [vmem:[%s9800_s3 + $0x338] sm:$0xff] }
 0x54b   :  { %1806 = vmatpush.msra.mxu1 %v5088_v27  ;;  %1922 = vmatpush.msra.mxu2 %v5102_v54  ;;  %v5099_v27 = vld [vmem:[%s9800_s3 + $0x390] sm:$0xff] }
 0x54c   :  { %2028 = vmatpush.msra.mxu3 %v5126_v21  ;;  %v5119_v21 = vld [vmem:[%s9800_s3 + $0x430] sm:$0xff] }
 0x54d   :  { %1615 = vmatmul.f32.gmra.mxu2 %v1546_v24 }
 0x54e   :  { %2029 = vmatpush.msra.mxu3 %v5125_v40  ;;  %v5101_v40 = vld [vmem:[%s9800_s3 + $0x3a0] sm:$0xff] }
 0x54f   :  { %1923 = vmatpush.msra.mxu2 %v5101_v40  ;;  %v5115_v40 = vld [vmem:[%s9800_s3 + $0x410] sm:$0xff] }
 0x550   :  { %1498 = vmatmul.f32.gmra.mxu1 %v7002_v15  ;;  %2030 = vmatpush.msra.mxu3 %v5124_v41  ;;  %v7062_v41 = vpop.f32.mrf.mxu1 }
 0x551   :  { %1727 = vmatmul.f32.gmra.mxu3 %v6654_v47  ;;  %v5123_v47 = vld [vmem:[%s9800_s3 + $0x450] sm:$0xff]  ;;  %v7042_v24 = vpop.f32.mrf.mxu3  ;;  %1924 = vmatpush.msra.mxu2 %v5100_v13  ;;  %v5114_v13 = vld [vmem:[%s9800_s3 + $0x408] sm:$0xff] }
 0x552   :  { %2031 = vmatpush.msra.mxu3 %v5123_v47  ;;  %v7073_v47 = vld [vmem:[#allocation2 + $0xf3] sm:$0xff] }
 0x553   :  { %1925 = vmatpush.msra.mxu2 %v5099_v27 }
 0x554   :  { %2032 = vmatpush.msra.mxu3 %v5122_v30  ;;  %v7078_v30 = vpop.f32.mrf.mxu2 }
 0x555   :  { %1618 = vmatmul.f32.gmra.mxu2 %v1547_v8  ;;  %v5118_v8 = vld [vmem:[%s9800_s3 + $0x428] sm:$0xff] }
 0x556   :  { %2033 = vmatpush.msra.mxu3 %v5121_v6  ;;  %v5117_v6 = vld [vmem:[%s9800_s3 + $0x420] sm:$0xff] }
 0x558   :  { %1501 = vmatmul.f32.gmra.mxu1 %v7036_v4  ;;  %2034 = vmatpush.msra.mxu3 %v5120_v36  ;;  %v5098_v36 = vld [vmem:[%s9800_s3 + $0x388] sm:$0xff] }
 0x559   :  { %1730 = vmatmul.f32.gmra.mxu3 %v6680_v18  ;;  %v5087_v18 = vld [vmem:[%s9800_s3 + $0x330] sm:$0xff]  ;;  %v7088_v54 = vpop.f32.mrf.mxu3  ;;  %1926 = vmatpush.msra.mxu2 %v5098_v36  ;;  %v1550_v36 = vld [vmem:[#allocation2 + $0x124] sm:$0xff] }
 0x55a   :  { %1807 = vmatpush.msra.mxu1 %v5087_v18  ;;  %2035 = vmatpush.msra.mxu3 %v5119_v21  ;;  %v1549_v18 = vld [vmem:[#allocation2 + $0x114] sm:$0xff] }
 0x55b   :  { %v5083_v21 = vld [vmem:[%s9800_s3 + $0x310] sm:$0xff] }
 0x55c   :  { %1808 = vmatpush.msra.mxu1 %v5086_v16  ;;  %2036 = vmatpush.msra.mxu3 %v5118_v8  ;;  %v5082_v16 = vld [vmem:[%s9800_s3 + $0x308] sm:$0xff]  ;;  %v5097_v8 = vld [vmem:[%s9800_s3 + $0x380] sm:$0xff] }
 0x55d   :  { %1621 = vmatmul.f32.gmra.mxu2 %v1548_v1  ;;  %v7105_v1 = vpop.f32.mrf.mxu1 }
 0x55e   :  { %1809 = vmatpush.msra.mxu1 %v5085_v55  ;;  %2037 = vmatpush.msra.mxu3 %v5117_v6  ;;  %v7113_v55 = vld [vmem:[#allocation2 + $0x103] sm:$0xff] }
 0x55f   :  { %1927 = vmatpush.msra.mxu2 %v5097_v8 }
 0x560   :  { %1504 = vmatmul.f32.gmra.mxu1 %v7073_v47  ;;  %v7120_v6 = vpop.f32.mrf.mxu2 }
 0x561   :  { %1733 = vmatmul.f32.gmra.mxu3 %v6713_v61  ;;  %v5116_v61 = vld [vmem:[%s9800_s3 + $0x418] sm:$0xff]  ;;  %1810 = vmatpush.msra.mxu1 %v5084_v45  ;;  %9814 = vst [vmem:[#allocation6_spill] sm:$0xff] %v7120_v6  ;;  %v5081_v45 = vld [vmem:[%s9800_s3 + $0x300] sm:$0xff] }
 0x562   :  { %2038 = vmatpush.msra.mxu3 %v5116_v61  ;;  %v7125_v27 = vpop.f32.mrf.mxu3  ;;  %v5113_v61 = vld [vmem:[%s9800_s3 + $0x400] sm:$0xff] }
 0x563   :  { %1811 = vmatpush.msra.mxu1 %v5083_v21  ;;  %v7138_v6 = vld [vmem:[#allocation2 + $0x123] sm:$0xff] }
 0x564   :  { %2039 = vmatpush.msra.mxu3 %v5115_v40  ;;  %9818 = vst [vmem:[#allocation10_spill] sm:$0xff] %v7138_v6 }
 0x565   :  { %1624 = vmatmul.f32.gmra.mxu2 %v1549_v18  ;;  %1812 = vmatpush.msra.mxu1 %v5082_v16  ;;  %v7130_v18 = vpop.f32.mrf.mxu1  ;;  %v1551_v16 = vld [vmem:[#allocation2 + $0x134] sm:$0xff] }
 0x566   :  { %2040 = vmatpush.msra.mxu3 %v5114_v13  ;;  %9815 = vst [vmem:[#allocation7_spill] sm:$0xff] %v7130_v18  ;;  %v1879_v18 = vld [vmem:[#allocation2 + $0x12] sm:$0xff] }
 0x567   :  { %1813 = vmatpush.msra.mxu1 %v5081_v45 }
 0x568   :  { %1507 = vmatmul.f32.gmra.mxu1 %v7113_v55  ;;  %2041 = vmatpush.msra.mxu3 %v5113_v61 }
 0x569   :  { %1736 = vmatmul.f32.gmra.mxu3 %v6775_v42  ;;  %v7132_v42 = vld [vmem:[#allocation2 + $0x113] sm:$0xff] }
 0x56a   :  { %9816 = vst [vmem:[#allocation8_spill] sm:$0xff] %v7132_v42  ;;  %v1302_v21 = vpop.f32.mrf.mxu2 }
 0x56c   :  { %v7136_v40 = vpop.f32.mrf.mxu3 }
 0x56d   :  { %1627 = vmatmul.f32.gmra.mxu2 %v1550_v36  ;;  %9817 = vst [vmem:[#allocation9_spill] sm:$0xff] %v7136_v40 }
 0x570   :  { %1510 = vmatmul.f32.gmra.mxu1 %v7132_v42 }
 0x571   :  { %1739 = vmatmul.f32.gmra.mxu3 %v6823_v14  ;;  %v7144_v14 = vld [vmem:[#allocation2 + $0x133] sm:$0xff] }
 0x572   :  { %9819 = vst [vmem:[#allocation11_spill] sm:$0xff] %v7144_v14 }
 0x573   :  { %v1237_v8 = vpop.f32.mrf.mxu1 }
 0x574   :  { %v1303_v13 = vadd.f32 %v1302_v21, %v1237_v8  ;;  %v1261_v21 = vadd.f32 %v6851_v52, %v6857_v0  ;;  %v1264_v0 = vadd.f32 %v6860_v25, %v6867_v62  ;;  %v1267_v25 = vadd.f32 %v6872_v48, %v6880_v22 }
 0x575   :  { %1630 = vmatmul.f32.gmra.mxu2 %v1551_v16  ;;  %v1270_v48 = vadd.f32 %v6885_v50, %v6894_v29  ;;  %v1273_v29 = vadd.f32 %v6898_v60, %v6906_v51  ;;  %v1276_v51 = vadd.f32 %v6910_v12, %v6915_v28  ;;  %v1279_v28 = vadd.f32 %v6922_v32, %v6930_v31 }
 0x576   :  { %v1282_v31 = vadd.f32 %v6934_v57, %v6945_v33  ;;  %v5160_v33 = vld [vmem:[%s9800_s3 + $0x578] sm:$0xff] }
 0x577   :  { %2255 = vmatpush.msrb.mxu2 %v5160_v33  ;;  %v1291_v33 = vadd.f32 %v7004_v10, %v7028_v58  ;;  %v5137_v58 = vld [vmem:[%s9800_s3 + $0x4c0] sm:$0xff] }
 0x578   :  { %1513 = vmatmul.f32.gmra.mxu1 %v7138_v6  ;;  %v1305_v45 = vpop.f32.mrf.mxu2 }
 0x579   :  { %1742 = vmatmul.f32.gmra.mxu3 %v6840_v35  ;;  %v1406_v35 = vadd.f32 %v6862_v23, %v1261_v21  ;;  %v1881_v21 = vld [vmem:[#allocation2 + $0x32] sm:$0xff] }
 0x57a   :  { %v1400_v61 = vpop.f32.mrf.mxu3 }
 0x57b   :  { %v7142_v36 = vadd.f32 %v1400_v61, %v1303_v13  ;;  %v1880_v13 = vld [vmem:[#allocation2 + $0x22] sm:$0xff] }
 0x57d   :  { %v1240_v42 = vpop.f32.mrf.mxu1  ;;  %1928 = vmatmul.f32.vlgmr.msra.gmra.mxu2 %v1879_v18  ;;  %v5511_v18 = vld [vmem:[%s9802_s5 + $0x470] sm:$0xff] }
 0x57e   :  { %v1306_v8 = vadd.f32 %v1305_v45, %v1240_v42  ;;  %4663 = vmatpush.msrb.mxu0 %v5511_v18  ;;  %v1407_v42 = vadd.f32 %v6875_v38, %v1264_v0  ;;  %v7162_v18 = vld [vmem:[#allocation2 + $0x21] sm:$0xff]  ;;  %v1408_v38 = vadd.f32 %v6888_v17, %v1267_v25  ;;  %v7171_v0 = vld [vmem:[#allocation2 + $0x31] sm:$0xff]  ;;  %v1409_v17 = vadd.f32 %v6901_v11, %v1270_v48 }
 0x57f   :  { %v1885_v48 = vld [vmem:[#allocation2 + $0x72] sm:$0xff] }
 0x580   :  { %1516 = vmatmul.f32.gmra.mxu1 %v7144_v14  ;;  %v1586_v16 = vpop.f32.mrf.mxu2 }
 0x581   :  { %1745 = vmatmul.f32.gmra.mxu3 %v6849_v53  ;;  %v1765_v53 = vld [vmem:[#allocation2 + $0x11] sm:$0xff] }
 0x584   :  { %v1403_v6 = vpop.f32.mrf.mxu3 }
 0x585   :  { %v7151_v40 = vadd.f32 %v1403_v6, %v1306_v8  ;;  %v1472_v61 = vpop.f32.mrf.mxu1  ;;  %1931 = vmatmul.f32.gmra.mxu2 %v1880_v13 }
 0x586   :  { %v1520_v14 = vadd.f32 %v1472_v61, %v1406_v35  ;;  %v1882_v35 = vld [vmem:[#allocation2 + $0x42] sm:$0xff] }
 0x588   :  { %1814 = vmatmul.f32.vlgmr.msra.gmra.mxu1 %v1765_v53  ;;  %v1589_v52 = vpop.f32.mrf.mxu2  ;;  %v1634_v23 = vadd.f32 %v1586_v16, %v1520_v14 }
 0x589   :  { %2042 = vmatmul.f32.vlgmr.msra.gmra.mxu3 %v6870_v9 }
 0x58c   :  { %v1701_v6 = vpop.f32.mrf.mxu3 }
 0x58d   :  { %v7160_v45 = vadd.f32 %v1701_v6, %v1634_v23  ;;  %v1475_v8 = vpop.f32.mrf.mxu1  ;;  %1934 = vmatmul.f32.gmra.mxu2 %v1881_v21  ;;  %v1883_v6 = vld [vmem:[#allocation2 + $0x52] sm:$0xff] }
 0x58e   :  { %v1521_v13 = vadd.f32 %v1475_v8, %v1407_v42  ;;  %v5144_v8 = vld [vmem:[%s9800_s3 + $0x4f8] sm:$0xff] }
 0x58f   :  { %2140 = vmatpush.msrb.mxu1 %v5144_v8  ;;  %v1886_v8 = vld [vmem:[#allocation2 + $0x82] sm:$0xff] }
 0x590   :  { %1817 = vmatmul.f32.gmra.mxu1 %v7162_v18  ;;  %v1592_v9 = vpop.f32.mrf.mxu2  ;;  %v1635_v62 = vadd.f32 %v1589_v52, %v1521_v13  ;;  %v7183_v13 = vld [vmem:[#allocation2 + $0x41] sm:$0xff] }
 0x591   :  { %2045 = vmatmul.f32.gmra.mxu3 %v6883_v44 }
 0x594   :  { %v1704_v14 = vpop.f32.mrf.mxu3 }
 0x595   :  { %v7169_v16 = vadd.f32 %v1704_v14, %v1635_v62  ;;  %v1478_v61 = vpop.f32.mrf.mxu1  ;;  %1937 = vmatmul.f32.gmra.mxu2 %v1882_v35  ;;  %v1884_v62 = vld [vmem:[#allocation2 + $0x62] sm:$0xff]  ;;  %v5143_v35 = vld [vmem:[%s9800_s3 + $0x4f0] sm:$0xff] }
 0x596   :  { %v1522_v53 = vadd.f32 %v1478_v61, %v1408_v38  ;;  %v7195_v61 = vld [vmem:[#allocation2 + $0x51] sm:$0xff]  ;;  %2141 = vmatpush.msrb.mxu1 %v5143_v35 }
 0x598   :  { %1820 = vmatmul.f32.gmra.mxu1 %v7171_v0  ;;  %v1595_v44 = vpop.f32.mrf.mxu2  ;;  %v1636_v22 = vadd.f32 %v1592_v9, %v1522_v53  ;;  %v1410_v9 = vadd.f32 %v6913_v39, %v1273_v29  ;;  %v1411_v53 = vadd.f32 %v6925_v20, %v1276_v51  ;;  %v7231_v51 = vld [vmem:[#allocation2 + $0x81] sm:$0xff] }
 0x599   :  { %2048 = vmatmul.f32.gmra.mxu3 %v6896_v56 }
 0x59c   :  { %v1707_v52 = vpop.f32.mrf.mxu3 }
 0x59d   :  { %v7178_v23 = vadd.f32 %v1707_v52, %v1636_v22  ;;  %v1481_v42 = vpop.f32.mrf.mxu1  ;;  %1940 = vmatmul.f32.gmra.mxu2 %v1883_v6  ;;  %v7207_v6 = vld [vmem:[#allocation2 + $0x61] sm:$0xff] }
 0x59e   :  { %v1523_v21 = vadd.f32 %v1481_v42, %v1409_v17  ;;  %v5142_v17 = vld [vmem:[%s9800_s3 + $0x4e8] sm:$0xff]  ;;  %v1412_v42 = vadd.f32 %v6937_v19, %v1279_v28 }
 0x59f   :  { %2142 = vmatpush.msrb.mxu1 %v5142_v17  ;;  %v1773_v28 = vld [vmem:[#allocation2 + $0xd1] sm:$0xff] }
 0x5a0   :  { %1823 = vmatmul.f32.gmra.mxu1 %v7183_v13  ;;  %v1598_v50 = vpop.f32.mrf.mxu2  ;;  %v1637_v56 = vadd.f32 %v1595_v44, %v1523_v21 }
 0x5a1   :  { %2051 = vmatmul.f32.gmra.mxu3 %v6908_v49 }
 0x5a4   :  { %v1710_v11 = vpop.f32.mrf.mxu3 }
 0x5a5   :  { %v7190_v25 = vadd.f32 %v1710_v11, %v1637_v56  ;;  %v1484_v14 = vpop.f32.mrf.mxu1  ;;  %1943 = vmatmul.f32.gmra.mxu2 %v1884_v62  ;;  %v5141_v56 = vld [vmem:[%s9800_s3 + $0x4e0] sm:$0xff]  ;;  %v7219_v11 = vld [vmem:[#allocation2 + $0x71] sm:$0xff] }
 0x5a6   :  { %v1524_v38 = vadd.f32 %v1484_v14, %v1410_v9  ;;  %2143 = vmatpush.msrb.mxu1 %v5141_v56  ;;  %v1413_v9 = vadd.f32 %v6955_v37, %v1282_v31  ;;  %v1887_v14 = vld [vmem:[#allocation2 + $0xd2] sm:$0xff]  ;;  %v1285_v37 = vadd.f32 %v6949_v43, %v6963_v46 }
 0x5a7   :  { %v5139_v46 = vld [vmem:[%s9800_s3 + $0x4d0] sm:$0xff] }
 0x5a8   :  { %1826 = vmatmul.f32.gmra.mxu1 %v7195_v61  ;;  %v1601_v60 = vpop.f32.mrf.mxu2  ;;  %v1638_v49 = vadd.f32 %v1598_v50, %v1524_v38  ;;  %v1889_v31 = vld [vmem:[#allocation2 + $0xf2] sm:$0xff] }
 0x5a9   :  { %2054 = vmatmul.f32.gmra.mxu3 %v6920_v59 }
 0x5ac   :  { %v1713_v39 = vpop.f32.mrf.mxu3 }
 0x5ad   :  { %v7202_v44 = vadd.f32 %v1713_v39, %v1638_v49  ;;  %v1487_v22 = vpop.f32.mrf.mxu1  ;;  %1946 = vmatmul.f32.gmra.mxu2 %v1885_v48  ;;  %v1414_v48 = vadd.f32 %v6980_v7, %v1285_v37  ;;  %v5157_v7 = vld [vmem:[%s9800_s3 + $0x560] sm:$0xff] }
 0x5ae   :  { %v1525_v52 = vadd.f32 %v1487_v22, %v1411_v53  ;;  %v5159_v53 = vld [vmem:[%s9800_s3 + $0x570] sm:$0xff] }
 0x5af   :  { %2256 = vmatpush.msrb.mxu2 %v5159_v53 }
 0x5b0   :  { %1829 = vmatmul.f32.gmra.mxu1 %v7207_v6  ;;  %v1604_v12 = vpop.f32.mrf.mxu2  ;;  %v1639_v59 = vadd.f32 %v1601_v60, %v1525_v52  ;;  %v5140_v60 = vld [vmem:[%s9800_s3 + $0x4d8] sm:$0xff] }
 0x5b1   :  { %2057 = vmatmul.f32.gmra.mxu3 %v6932_v5  ;;  %2144 = vmatpush.msrb.mxu1 %v5140_v60  ;;  %v1888_v52 = vld [vmem:[#allocation2 + $0xe2] sm:$0xff] }
 0x5b3   :  { %2145 = vmatpush.msrb.mxu1 %v5139_v46  ;;  %v5151_v46 = vld [vmem:[%s9800_s3 + $0x530] sm:$0xff] }
 0x5b4   :  { %v1716_v20 = vpop.f32.mrf.mxu3 }
 0x5b5   :  { %v7214_v21 = vadd.f32 %v1716_v20, %v1639_v59  ;;  %v1490_v50 = vpop.f32.mrf.mxu1  ;;  %1949 = vmatmul.f32.gmra.mxu2 %v1886_v8  ;;  %v5176_v20 = vld [vmem:[%s9800_s3 + $0x5f8] sm:$0xff]  ;;  %v1288_v8 = vadd.f32 %v6971_v34, %v6994_v26  ;;  %v5510_v34 = vld [vmem:[%s9802_s5 + $0x468] sm:$0xff] }
 0x5b6   :  { %v1526_v29 = vadd.f32 %v1490_v50, %v1412_v42  ;;  %2369 = vmatpush.msrb.mxu3 %v5176_v20  ;;  %v5156_v42 = vld [vmem:[%s9800_s3 + $0x558] sm:$0xff]  ;;  %4664 = vmatpush.msrb.mxu0 %v5510_v34  ;;  %v5150_v20 = vld [vmem:[%s9800_s3 + $0x528] sm:$0xff] }
 0x5b7   :  { %v1415_v56 = vadd.f32 %v7014_v2, %v1288_v8  ;;  %v5138_v2 = vld [vmem:[%s9800_s3 + $0x4c8] sm:$0xff] }
 0x5b8   :  { %1832 = vmatmul.f32.gmra.mxu1 %v7219_v11  ;;  %v1607_v32 = vpop.f32.mrf.mxu2  ;;  %v1640_v5 = vadd.f32 %v1604_v12, %v1526_v29  ;;  %v5158_v12 = vld [vmem:[%s9800_s3 + $0x568] sm:$0xff] }
 0x5b9   :  { %2060 = vmatmul.f32.gmra.mxu3 %v6947_v63  ;;  %v2000_v63 = vld [vmem:[#allocation2 + $0x83] sm:$0xff]  ;;  %2257 = vmatpush.msrb.mxu2 %v5158_v12  ;;  %v5170_v12 = vld [vmem:[%s9800_s3 + $0x5c8] sm:$0xff] }
 0x5ba   :  { %2146 = vmatpush.msrb.mxu1 %v5138_v2  ;;  %v5166_v34 = vld [vmem:[%s9800_s3 + $0x5a8] sm:$0xff] }
 0x5bb   :  { %2258 = vmatpush.msrb.mxu2 %v5157_v7  ;;  %v5136_v7 = vld [vmem:[%s9800_s3 + $0x4b8] sm:$0xff] }
 0x5bc   :  { %v1719_v19 = vpop.f32.mrf.mxu3  ;;  %2147 = vmatpush.msrb.mxu1 %v5137_v58  ;;  %v5162_v58 = vld [vmem:[%s9800_s3 + $0x588] sm:$0xff] }
 0x5bd   :  { %v7226_v62 = vadd.f32 %v1719_v19, %v1640_v5  ;;  %v1493_v38 = vpop.f32.mrf.mxu1  ;;  %1952 = vmatmul.f32.gmra.mxu2 %v1887_v14  ;;  %v5175_v5 = vld [vmem:[%s9800_s3 + $0x5f0] sm:$0xff]  ;;  %v5154_v19 = vld [vmem:[%s9800_s3 + $0x548] sm:$0xff] }
 0x5be   :  { %v1527_v35 = vadd.f32 %v1493_v38, %v1413_v9  ;;  %2259 = vmatpush.msrb.mxu2 %v5156_v42  ;;  %2370 = vmatpush.msrb.mxu3 %v5175_v5  ;;  %v5174_v14 = vld [vmem:[%s9800_s3 + $0x5e8] sm:$0xff]  ;;  %v5173_v38 = vld [vmem:[%s9800_s3 + $0x5e0] sm:$0xff]  ;;  %v1294_v42 = vadd.f32 %v7038_v3, %v7062_v41  ;;  %v5167_v3 = vld [vmem:[%s9800_s3 + $0x5b0] sm:$0xff] }
 0x5bf   :  { %2148 = vmatpush.msrb.mxu1 %v5136_v7  ;;  %v9821_v7 = vld [vmem:[#allocation7_spill] sm:$0xff] }
 0x5c0   :  { %1835 = vmatmul.f32.gmra.mxu1 %v7231_v51  ;;  %v1610_v57 = vpop.f32.mrf.mxu2  ;;  %v1641_v49 = vadd.f32 %v1607_v32, %v1527_v35  ;;  %v7287_v35 = vld [vmem:[#allocation2 + $0xe1] sm:$0xff]  ;;  %2371 = vmatpush.msrb.mxu3 %v5174_v14 }
 0x5c1   :  { %2063 = vmatmul.f32.gmra.mxu3 %v2000_v63  ;;  %v5172_v63 = vld [vmem:[%s9800_s3 + $0x5d8] sm:$0xff]  ;;  %v5165_v14 = vld [vmem:[%s9800_s3 + $0x5a0] sm:$0xff] }
 0x5c2   :  { %2372 = vmatpush.msrb.mxu3 %v5173_v38  ;;  %v5132_v38 = vld [vmem:[%s9800_s3 + $0x498] sm:$0xff] }
 0x5c4   :  { %v1722_v39 = vpop.f32.mrf.mxu3  ;;  %2373 = vmatpush.msrb.mxu3 %v5172_v63  ;;  %v1297_v63 = vadd.f32 %v7078_v30, %v7105_v1  ;;  %v5131_v30 = vld [vmem:[%s9800_s3 + $0x490] sm:$0xff] }
 0x5c5   :  { %v7243_v22 = vadd.f32 %v1722_v39, %v1641_v49  ;;  %v1496_v17 = vpop.f32.mrf.mxu1  ;;  %1955 = vmatmul.f32.gmra.mxu2 %v1888_v52  ;;  %v1416_v39 = vadd.f32 %v7042_v24, %v1291_v33  ;;  %v5171_v52 = vld [vmem:[%s9800_s3 + $0x5d0] sm:$0xff]  ;;  %v5169_v24 = vld [vmem:[%s9800_s3 + $0x5c0] sm:$0xff] }
 0x5c6   :  { %v1528_v43 = vadd.f32 %v1496_v17, %v1414_v48  ;;  %v1890_v48 = vld [vmem:[#allocation2 + $0x102] sm:$0xff]  ;;  %2374 = vmatpush.msrb.mxu3 %v5171_v52  ;;  %v5163_v1 = vld [vmem:[%s9800_s3 + $0x590] sm:$0xff] }
 0x5c8   :  { %1838 = vmatmul.f32.gmra.mxu1 %v1773_v28  ;;  %v1613_v59 = vpop.f32.mrf.mxu2  ;;  %v1642_v50 = vadd.f32 %v1610_v57, %v1528_v43  ;;  %v5153_v57 = vld [vmem:[%s9800_s3 + $0x540] sm:$0xff]  ;;  %v7317_v43 = vld [vmem:[#allocation2 + $0xf1] sm:$0xff]  ;;  %2375 = vmatpush.msrb.mxu3 %v5170_v12 }
 0x5c9   :  { %2066 = vmatmul.f32.gmra.mxu3 %v7002_v15  ;;  %v5155_v15 = vld [vmem:[%s9800_s3 + $0x550] sm:$0xff] }
 0x5ca   :  { %2260 = vmatpush.msrb.mxu2 %v5155_v15  ;;  %2376 = vmatpush.msrb.mxu3 %v5169_v24  ;;  %v9820_v12 = vld [vmem:[#allocation8_spill] sm:$0xff] }
 0x5cc   :  { %v1725_v29 = vpop.f32.mrf.mxu3  ;;  %2261 = vmatpush.msrb.mxu2 %v5154_v19  ;;  %v7356_v19 = vld [vmem:[#allocation2 + $0x101] sm:$0xff] }
 0x5cd   :  { %v7267_v32 = vadd.f32 %v1725_v29, %v1642_v50  ;;  %v1499_v26 = vpop.f32.mrf.mxu1  ;;  %1958 = vmatmul.f32.gmra.mxu2 %v1889_v31  ;;  %v5149_v50 = vld [vmem:[%s9800_s3 + $0x520] sm:$0xff]  ;;  %v1417_v29 = vadd.f32 %v7088_v54, %v1294_v42  ;;  %v5135_v31 = vld [vmem:[%s9800_s3 + $0x4b0] sm:$0xff]  ;;  %v5134_v54 = vld [vmem:[%s9800_s3 + $0x4a8] sm:$0xff] }
 0x5ce   :  { %v1529_v9 = vadd.f32 %v1499_v26, %v1415_v56  ;;  %2262 = vmatpush.msrb.mxu2 %v5153_v57  ;;  %v1891_v56 = vld [vmem:[#allocation2 + $0x112] sm:$0xff]  ;;  %2149 = vmatpush.msrb.mxu1 %v5135_v31  ;;  %v5133_v26 = vld [vmem:[%s9800_s3 + $0x4a0] sm:$0xff] }
 0x5cf   :  { %v5630_v31 = vld [vmem:[#allocation2 + $0x132] sm:$0xff] }
 0x5d0   :  { %1841 = vmatmul.f32.gmra.mxu1 %v7287_v35  ;;  %v1616_v60 = vpop.f32.mrf.mxu2  ;;  %v1643_v37 = vadd.f32 %v1613_v59, %v1529_v9  ;;  %v5168_v59 = vld [vmem:[%s9800_s3 + $0x5b8] sm:$0xff] }
 0x5d1   :  { %2069 = vmatmul.f32.gmra.mxu3 %v7036_v4  ;;  %v5152_v4 = vld [vmem:[%s9800_s3 + $0x538] sm:$0xff]  ;;  %2150 = vmatpush.msrb.mxu1 %v5134_v54 }
 0x5d2   :  { %2263 = vmatpush.msrb.mxu2 %v5152_v4  ;;  %2377 = vmatpush.msrb.mxu3 %v5168_v59  ;;  %v5148_v9 = vld [vmem:[%s9800_s3 + $0x518] sm:$0xff] }
 0x5d3   :  { %2151 = vmatpush.msrb.mxu1 %v5133_v26  ;;  %v9822_v59 = vld [vmem:[#allocation6_spill] sm:$0xff] }
 0x5d4   :  { %v1728_v49 = vpop.f32.mrf.mxu3  ;;  %2264 = vmatpush.msrb.mxu2 %v5151_v46  ;;  %2378 = vmatpush.msrb.mxu3 %v5167_v3  ;;  %v5129_v46 = vld [vmem:[%s9800_s3 + $0x480] sm:$0xff] }
 0x5d5   :  { %v7303_v53 = vadd.f32 %v1728_v49, %v1643_v37  ;;  %v1502_v17 = vpop.f32.mrf.mxu1  ;;  %1961 = vmatmul.f32.gmra.mxu2 %v1890_v48  ;;  %2152 = vmatpush.msrb.mxu1 %v5132_v38  ;;  %v5146_v37 = vld [vmem:[%s9800_s3 + $0x508] sm:$0xff]  ;;  %v1418_v49 = vadd.f32 %v7125_v27, %v1297_v63 }
 0x5d6   :  { %v1530_v10 = vadd.f32 %v1502_v17, %v1416_v39  ;;  %2265 = vmatpush.msrb.mxu2 %v5150_v20  ;;  %2379 = vmatpush.msrb.mxu3 %v5166_v34  ;;  %v1892_v39 = vld [vmem:[#allocation2 + $0x122] sm:$0xff]  ;;  %v5130_v27 = vld [vmem:[%s9800_s3 + $0x488] sm:$0xff]  ;;  %v1300_v20 = vadd.f32 %v9822_v59, %v9821_v7 }
 0x5d7   :  { %2153 = vmatpush.msrb.mxu1 %v5131_v30  ;;  %v5145_v17 = vld [vmem:[%s9800_s3 + $0x500] sm:$0xff] }
 0x5d8   :  { %1844 = vmatmul.f32.gmra.mxu1 %v7317_v43  ;;  %v1619_v28 = vpop.f32.mrf.mxu2  ;;  %v1644_v8 = vadd.f32 %v1616_v60, %v1530_v10  ;;  %2266 = vmatpush.msrb.mxu2 %v5149_v50  ;;  %v5147_v60 = vld [vmem:[%s9800_s3 + $0x510] sm:$0xff]  ;;  %v9825_v63 = vld [vmem:[#allocation11_spill] sm:$0xff] }
 0x5d9   :  { %2072 = vmatmul.f32.gmra.mxu3 %v7073_v47  ;;  %v7395_v10 = vld [vmem:[#allocation2 + $0x111] sm:$0xff]  ;;  %2154 = vmatpush.msrb.mxu1 %v5130_v27 }
 0x5da   :  { %2267 = vmatpush.msrb.mxu2 %v5148_v9  ;;  %2380 = vmatpush.msrb.mxu3 %v5165_v14 }
 0x5db   :  { %2155 = vmatpush.msrb.mxu1 %v5129_v46  ;;  %v2107_v46 = vld [vmem:[#allocation2 + $0x14] sm:$0xff] }
 0x5dc   :  { %v1731_v47 = vpop.f32.mrf.mxu3  ;;  %2268 = vmatpush.msrb.mxu2 %v5147_v60  ;;  %v5631_v60 = vld [vmem:[#allocation2 + $0x131] sm:$0xff] }
 0x5dd   :  { %v7339_v15 = vadd.f32 %v1731_v47, %v1644_v8  ;;  %v1505_v41 = vpop.f32.mrf.mxu1  ;;  %1964 = vmatmul.f32.gmra.mxu2 %v1891_v56  ;;  %v9823_v47 = vld [vmem:[#allocation9_spill] sm:$0xff] }
 0x5de   :  { %v1531_v5 = vadd.f32 %v1505_v41, %v1417_v29  ;;  %2269 = vmatpush.msrb.mxu2 %v5146_v37  ;;  %v1419_v50 = vadd.f32 %v9823_v47, %v1300_v20  ;;  %v7413_v41 = vld [vmem:[#allocation2 + $0x121] sm:$0xff] }
 0x5df   :  { %v2224_v20 = vld [vmem:[#allocation2 + $0x40] sm:$0xff] }
 0x5e0   :  { %1847 = vmatmul.f32.gmra.mxu1 %v7356_v19  ;;  %v1622_v2 = vpop.f32.mrf.mxu2  ;;  %v1645_v57 = vadd.f32 %v1619_v28, %v1531_v5  ;;  %2270 = vmatpush.msrb.mxu2 %v5145_v17  ;;  %v5161_v28 = vld [vmem:[%s9800_s3 + $0x580] sm:$0xff] }
 0x5e1   :  { %2075 = vmatmul.f32.gmra.mxu3 %v7113_v55  ;;  %v5164_v55 = vld [vmem:[%s9800_s3 + $0x598] sm:$0xff] }
 0x5e2   :  { %2381 = vmatpush.msrb.mxu3 %v5164_v55  ;;  %v9824_v5 = vld [vmem:[#allocation10_spill] sm:$0xff] }
 0x5e3   :  { %v7434_v47 = vld [vmem:[#allocation2 + $0x24] sm:$0xff] }
 0x5e4   :  { %v1734_v33 = vpop.f32.mrf.mxu3  ;;  %2382 = vmatpush.msrb.mxu3 %v5163_v1  ;;  %v7424_v1 = vld [vmem:[#allocation2 + $0x141] sm:$0xff] }
 0x5e5   :  { %v7381_v4 = vadd.f32 %v1734_v33, %v1645_v57  ;;  %v1508_v48 = vpop.f32.mrf.mxu1  ;;  %1967 = vmatmul.f32.gmra.mxu2 %v1892_v39 }
 0x5e6   :  { %v1532_v52 = vadd.f32 %v1508_v48, %v1418_v49  ;;  %2383 = vmatpush.msrb.mxu3 %v5162_v58  ;;  %v2222_v49 = vld [vmem:[#allocation2 + $0x20] sm:$0xff]  ;;  %v2223_v58 = vld [vmem:[#allocation2 + $0x30] sm:$0xff] }
 0x5e7   :  { %v2008_v48 = vld [vmem:[#allocation2 + $0x143] sm:$0xff] }
 0x5e8   :  { %1850 = vmatmul.f32.gmra.mxu1 %v7395_v10  ;;  %v1625_v24 = vpop.f32.mrf.mxu2  ;;  %v1646_v42 = vadd.f32 %v1622_v2, %v1532_v52  ;;  %2384 = vmatpush.msrb.mxu3 %v5161_v28  ;;  %v1894_v2 = vld [vmem:[#allocation2 + $0x142] sm:$0xff] }
 0x5e9   :  { %2078 = vmatmul.f32.gmra.mxu3 %v9820_v12 }
 0x5ec   :  { %v1737_v8 = vpop.f32.mrf.mxu3 }
 0x5ed   :  { %v7411_v29 = vadd.f32 %v1737_v8, %v1646_v42  ;;  %v1511_v56 = vpop.f32.mrf.mxu1  ;;  %1970 = vmatmul.f32.gmra.mxu2 %v5630_v31  ;;  %v2225_v31 = vld [vmem:[#allocation2 + $0x50] sm:$0xff] }
 0x5ee   :  { %v1533_v3 = vadd.f32 %v1511_v56, %v1419_v50 }
 0x5f0   :  { %1853 = vmatmul.f32.gmra.mxu1 %v7413_v41  ;;  %v1647_v54 = vadd.f32 %v1625_v24, %v1533_v3  ;;  %v1628_v34 = vpop.f32.mrf.mxu2  ;;  %v5509_v3 = vld [vmem:[%s9802_s5 + $0x460] sm:$0xff] }
 0x5f1   :  { %2081 = vmatmul.f32.gmra.mxu3 %v9824_v5  ;;  %4665 = vmatpush.msrb.mxu0 %v5509_v3  ;;  %v2230_v3 = vld [vmem:[#allocation2 + $0xe0] sm:$0xff] }
 0x5f4   :  { %v1740_v26 = vpop.f32.mrf.mxu3 }
 0x5f5   :  { %v7417_v9 = vadd.f32 %v1740_v26, %v1647_v54  ;;  %v1514_v14 = vpop.f32.mrf.mxu1  ;;  %1973 = vmatmul.f32.gmra.mxu2 %v1894_v2  ;;  %v7444_v54 = vld [vmem:[#allocation2 + $0x34] sm:$0xff] }
 0x5f6   :  { %v1534_v38 = vadd.f32 %v1514_v14, %v7142_v36  ;;  %v2226_v14 = vld [vmem:[#allocation2 + $0x60] sm:$0xff] }
 0x5f8   :  { %1856 = vmatmul.f32.gmra.mxu1 %v5631_v60  ;;  %v1648_v57 = vadd.f32 %v1628_v34, %v1534_v38  ;;  %v1631_v55 = vpop.f32.mrf.mxu2 }
 0x5f9   :  { %2084 = vmatmul.f32.gmra.mxu3 %v9825_v63  ;;  %v7454_v63 = vld [vmem:[#allocation2 + $0x44] sm:$0xff] }
 0x5fc   :  { %v1743_v33 = vpop.f32.mrf.mxu3 }
 0x5fd   :  { %v7421_v37 = vadd.f32 %v1743_v33, %v1648_v57  ;;  %v1517_v39 = vpop.f32.mrf.mxu1  ;;  %2271 = vmatmul.f32.vlgmr.msrb.gmra.mxu2 %v2222_v49  ;;  %v2227_v49 = vld [vmem:[#allocation2 + $0x70] sm:$0xff] }
 0x5fe   :  { %v1535_v30 = vadd.f32 %v1517_v39, %v7151_v40 }
 0x600   :  { %1859 = vmatmul.f32.gmra.mxu1 %v7424_v1  ;;  %v1649_v36 = vadd.f32 %v1631_v55, %v1535_v30  ;;  %v1929_v52 = vpop.f32.mrf.mxu2  ;;  %v5191_v30 = vld [vmem:[%s9800_s3 + $0x670] sm:$0xff] }
 0x601   :  { %2087 = vmatmul.f32.gmra.mxu3 %v2008_v48  ;;  %v7464_v48 = vld [vmem:[#allocation2 + $0x54] sm:$0xff] }
 0x604   :  { %v1746_v27 = vpop.f32.mrf.mxu3 }
 0x605   :  { %v7427_v17 = vadd.f32 %v1746_v27, %v1649_v36  ;;  %v1815_v12 = vpop.f32.mrf.mxu1  ;;  %2274 = vmatmul.f32.gmra.mxu2 %v2223_v58  ;;  %v2228_v58 = vld [vmem:[#allocation2 + $0x80] sm:$0xff] }
 0x606   :  { %v1863_v24 = vadd.f32 %v1815_v12, %v7160_v45 }
 0x608   :  { %2156 = vmatmul.f32.vlgmr.msrb.gmra.mxu1 %v2107_v46  ;;  %v1977_v40 = vadd.f32 %v1929_v52, %v1863_v24  ;;  %v1932_v28 = vpop.f32.mrf.mxu2  ;;  %v5190_v24 = vld [vmem:[%s9800_s3 + $0x668] sm:$0xff]  ;;  %v7474_v46 = vld [vmem:[#allocation2 + $0x64] sm:$0xff] }
 0x609   :  { %2385 = vmatmul.f32.vlgmr.msrb.gmra.mxu3 %v7162_v18 }
 0x60c   :  { %v2043_v7 = vpop.f32.mrf.mxu3 }
 0x60d   :  { %v7431_v59 = vadd.f32 %v2043_v7, %v1977_v40  ;;  %v1818_v42 = vpop.f32.mrf.mxu1  ;;  %2277 = vmatmul.f32.gmra.mxu2 %v2224_v20  ;;  %v2229_v20 = vld [vmem:[#allocation2 + $0x90] sm:$0xff] }
 0x60e   :  { %v1864_v8 = vadd.f32 %v1818_v42, %v7169_v16 }
 0x610   :  { %2159 = vmatmul.f32.gmra.mxu1 %v7434_v47  ;;  %v1978_v45 = vadd.f32 %v1932_v28, %v1864_v8  ;;  %v1935_v50 = vpop.f32.mrf.mxu2  ;;  %v5189_v8 = vld [vmem:[%s9800_s3 + $0x660] sm:$0xff] }
 0x611   :  { %2388 = vmatmul.f32.gmra.mxu3 %v7171_v0 }
 0x614   :  { %v2046_v56 = vpop.f32.mrf.mxu3 }
 0x615   :  { %v7438_v18 = vadd.f32 %v2046_v56, %v1978_v45  ;;  %v1821_v5 = vpop.f32.mrf.mxu1  ;;  %2280 = vmatmul.f32.gmra.mxu2 %v2225_v31  ;;  %v7484_v45 = vld [vmem:[#allocation2 + $0x74] sm:$0xff] }
 0x616   :  { %v1865_v16 = vadd.f32 %v1821_v5, %v7178_v23  ;;  %v5192_v23 = vld [vmem:[%s9800_s3 + $0x678] sm:$0xff] }
 0x617   :  { %2483 = vmatpush.msra.mxu1 %v5192_v23  ;;  %v5207_v23 = vld [vmem:[%s9800_s3 + $0x6f0] sm:$0xff] }
 0x618   :  { %2162 = vmatmul.f32.gmra.mxu1 %v7444_v54  ;;  %v1979_v0 = vadd.f32 %v1935_v50, %v1865_v16  ;;  %v1938_v34 = vpop.f32.mrf.mxu2  ;;  %v5188_v16 = vld [vmem:[%s9800_s3 + $0x658] sm:$0xff] }
 0x619   :  { %2391 = vmatmul.f32.gmra.mxu3 %v7183_v13  ;;  %2484 = vmatpush.msra.mxu1 %v5191_v30 }
 0x61b   :  { %2485 = vmatpush.msra.mxu1 %v5190_v24  ;;  %v5203_v24 = vld [vmem:[%s9800_s3 + $0x6d0] sm:$0xff] }
 0x61c   :  { %v2049_v26 = vpop.f32.mrf.mxu3 }
 0x61d   :  { %v7448_v2 = vadd.f32 %v2049_v26, %v1979_v0  ;;  %v1824_v38 = vpop.f32.mrf.mxu1  ;;  %2283 = vmatmul.f32.gmra.mxu2 %v2226_v14  ;;  %2486 = vmatpush.msra.mxu1 %v5189_v8  ;;  %v7494_v0 = vld [vmem:[#allocation2 + $0x84] sm:$0xff] }
 0x61e   :  { %v1866_v60 = vadd.f32 %v1824_v38, %v7190_v25  ;;  %v5208_v14 = vld [vmem:[%s9800_s3 + $0x6f8] sm:$0xff] }
 0x61f   :  { %2487 = vmatpush.msra.mxu1 %v5188_v16  ;;  %2597 = vmatpush.msra.mxu2 %v5208_v14  ;;  %v5220_v8 = vld [vmem:[%s9800_s3 + $0x758] sm:$0xff]  ;;  %v5217_v14 = vld [vmem:[%s9800_s3 + $0x740] sm:$0xff] }
 0x620   :  { %2165 = vmatmul.f32.gmra.mxu1 %v7454_v63  ;;  %v1980_v13 = vadd.f32 %v1938_v34, %v1866_v60  ;;  %v1941_v57 = vpop.f32.mrf.mxu2  ;;  %v2343_v34 = vld [vmem:[#allocation2 + $0x91] sm:$0xff]  ;;  %v5200_v16 = vld [vmem:[%s9800_s3 + $0x6b8] sm:$0xff] }
 0x621   :  { %2394 = vmatmul.f32.gmra.mxu3 %v7195_v61  ;;  %v2231_v60 = vld [vmem:[#allocation2 + $0xf0] sm:$0xff]  ;;  %2598 = vmatpush.msra.mxu2 %v5207_v23  ;;  %v5184_v23 = vld [vmem:[%s9800_s3 + $0x638] sm:$0xff] }
 0x624   :  { %v2052_v55 = vpop.f32.mrf.mxu3 }
 0x625   :  { %v7458_v33 = vadd.f32 %v2052_v55, %v1980_v13  ;;  %v1827_v39 = vpop.f32.mrf.mxu1  ;;  %2286 = vmatmul.f32.gmra.mxu2 %v2227_v49  ;;  %v5187_v55 = vld [vmem:[%s9800_s3 + $0x650] sm:$0xff]  ;;  %v5206_v49 = vld [vmem:[%s9800_s3 + $0x6e8] sm:$0xff] }
 0x626   :  { %v1867_v25 = vadd.f32 %v1827_v39, %v7202_v44  ;;  %v2115_v39 = vld [vmem:[#allocation2 + $0xd4] sm:$0xff]  ;;  %2488 = vmatpush.msra.mxu1 %v5187_v55  ;;  %2599 = vmatpush.msra.mxu2 %v5206_v49  ;;  %v2234_v49 = vld [vmem:[#allocation2 + $0x120] sm:$0xff] }
 0x628   :  { %2168 = vmatmul.f32.gmra.mxu1 %v7464_v48  ;;  %v1981_v61 = vadd.f32 %v1941_v57, %v1867_v25  ;;  %v1944_v36 = vpop.f32.mrf.mxu2 }
 0x629   :  { %2397 = vmatmul.f32.gmra.mxu3 %v7207_v6 }
 0x62c   :  { %v2055_v52 = vpop.f32.mrf.mxu3 }
 0x62d   :  { %v7468_v27 = vadd.f32 %v2055_v52, %v1981_v61  ;;  %v1830_v12 = vpop.f32.mrf.mxu1  ;;  %2289 = vmatmul.f32.gmra.mxu2 %v2228_v58  ;;  %v5205_v61 = vld [vmem:[%s9800_s3 + $0x6e0] sm:$0xff]  ;;  %v5204_v52 = vld [vmem:[%s9800_s3 + $0x6d8] sm:$0xff] }
 0x62e   :  { %v1868_v44 = vadd.f32 %v1830_v12, %v7214_v21  ;;  %2600 = vmatpush.msra.mxu2 %v5205_v61  ;;  %v5223_v12 = vld [vmem:[%s9800_s3 + $0x770] sm:$0xff] }
 0x630   :  { %2171 = vmatmul.f32.gmra.mxu1 %v7474_v46  ;;  %v1982_v6 = vadd.f32 %v1944_v36, %v1868_v44  ;;  %v1947_v40 = vpop.f32.mrf.mxu2  ;;  %2601 = vmatpush.msra.mxu2 %v5204_v52  ;;  %v5182_v52 = vld [vmem:[%s9800_s3 + $0x628] sm:$0xff] }
 0x631   :  { %2400 = vmatmul.f32.gmra.mxu3 %v7219_v11 }
 0x632   :  { %2602 = vmatpush.msra.mxu2 %v5203_v24 }
 0x634   :  { %v2058_v28 = vpop.f32.mrf.mxu3 }
 0x635   :  { %v7478_v7 = vadd.f32 %v2058_v28, %v1982_v6  ;;  %v1833_v42 = vpop.f32.mrf.mxu1  ;;  %2292 = vmatmul.f32.gmra.mxu2 %v2229_v20  ;;  %v5222_v28 = vld [vmem:[%s9800_s3 + $0x768] sm:$0xff]  ;;  %v5221_v20 = vld [vmem:[%s9800_s3 + $0x760] sm:$0xff] }
 0x636   :  { %v1869_v21 = vadd.f32 %v1833_v42, %v7226_v62  ;;  %v7540_v42 = vld [vmem:[#allocation2 + $0xe4] sm:$0xff] }
 0x638   :  { %2174 = vmatmul.f32.gmra.mxu1 %v7484_v45  ;;  %v1983_v11 = vadd.f32 %v1947_v40, %v1869_v21  ;;  %v1950_v50 = vpop.f32.mrf.mxu2  ;;  %v5186_v40 = vld [vmem:[%s9800_s3 + $0x648] sm:$0xff] }
 0x639   :  { %2403 = vmatmul.f32.gmra.mxu3 %v7231_v51  ;;  %2489 = vmatpush.msra.mxu1 %v5186_v40  ;;  %v5196_v40 = vld [vmem:[%s9800_s3 + $0x698] sm:$0xff] }
 0x63c   :  { %v2061_v56 = vpop.f32.mrf.mxu3 }
 0x63d   :  { %v7488_v31 = vadd.f32 %v2061_v56, %v1983_v11  ;;  %v1836_v5 = vpop.f32.mrf.mxu1  ;;  %2295 = vmatmul.f32.gmra.mxu2 %v2230_v3  ;;  %v5202_v11 = vld [vmem:[%s9800_s3 + $0x6c8] sm:$0xff]  ;;  %v5201_v56 = vld [vmem:[%s9800_s3 + $0x6c0] sm:$0xff] }
 0x63e   :  { %v1870_v62 = vadd.f32 %v1836_v5, %v7243_v22  ;;  %2603 = vmatpush.msra.mxu2 %v5202_v11  ;;  %v2233_v3 = vld [vmem:[#allocation2 + $0x110] sm:$0xff]  ;;  %v5219_v5 = vld [vmem:[%s9800_s3 + $0x750] sm:$0xff] }
 0x63f   :  { %v2235_v11 = vld [vmem:[#allocation2 + $0x130] sm:$0xff] }
 0x640   :  { %2177 = vmatmul.f32.gmra.mxu1 %v7494_v0  ;;  %v1984_v51 = vadd.f32 %v1950_v50, %v1870_v62  ;;  %v1953_v26 = vpop.f32.mrf.mxu2  ;;  %2604 = vmatpush.msra.mxu2 %v5201_v56  ;;  %v5211_v56 = vld [vmem:[%s9800_s3 + $0x710] sm:$0xff] }
 0x641   :  { %2406 = vmatmul.f32.gmra.mxu3 %v2343_v34 }
 0x642   :  { %2605 = vmatpush.msra.mxu2 %v5200_v16  ;;  %v5178_v16 = vld [vmem:[%s9800_s3 + $0x608] sm:$0xff] }
 0x644   :  { %v2064_v38 = vpop.f32.mrf.mxu3 }
 0x645   :  { %v7500_v22 = vadd.f32 %v2064_v38, %v1984_v51  ;;  %v1839_v13 = vpop.f32.mrf.mxu1  ;;  %2298 = vmatmul.f32.gmra.mxu2 %v2231_v60  ;;  %v5185_v51 = vld [vmem:[%s9800_s3 + $0x640] sm:$0xff]  ;;  %v7571_v38 = vld [vmem:[#allocation2 + $0xf4] sm:$0xff] }
 0x646   :  { %v1871_v57 = vadd.f32 %v1839_v13, %v7267_v32  ;;  %v5224_v32 = vld [vmem:[%s9800_s3 + $0x778] sm:$0xff]  ;;  %2490 = vmatpush.msra.mxu1 %v5185_v51  ;;  %v5199_v13 = vld [vmem:[%s9800_s3 + $0x6b0] sm:$0xff]  ;;  %v5210_v51 = vld [vmem:[%s9800_s3 + $0x708] sm:$0xff] }
 0x647   :  { %2711 = vmatpush.msra.mxu3 %v5224_v32  ;;  %2606 = vmatpush.msra.mxu2 %v5199_v13  ;;  %v5508_v32 = vld [vmem:[%s9802_s5 + $0x458] sm:$0xff] }
 0x648   :  { %2180 = vmatmul.f32.gmra.mxu1 %v2115_v39  ;;  %v1985_v25 = vadd.f32 %v1953_v26, %v1871_v57  ;;  %v1956_v30 = vpop.f32.mrf.mxu2  ;;  %v5218_v26 = vld [vmem:[%s9800_s3 + $0x748] sm:$0xff]  ;;  %v5216_v57 = vld [vmem:[%s9800_s3 + $0x738] sm:$0xff]  ;;  %4666 = vmatpush.msrb.mxu0 %v5508_v32 }
 0x649   :  { %2409 = vmatmul.f32.gmra.mxu3 %v7287_v35  ;;  %v2232_v35 = vld [vmem:[#allocation2 + $0x100] sm:$0xff]  ;;  %2491 = vmatpush.msra.mxu1 %v5184_v23 }
 0x64a   :  { %2712 = vmatpush.msra.mxu3 %v5223_v12  ;;  %v5214_v12 = vld [vmem:[%s9800_s3 + $0x728] sm:$0xff]  ;;  %v2236_v13 = vld [vmem:[#allocation2 + $0x140] sm:$0xff] }
 0x64c   :  { %v2067_v36 = vpop.f32.mrf.mxu3  ;;  %2713 = vmatpush.msra.mxu3 %v5222_v28  ;;  %v5213_v28 = vld [vmem:[%s9800_s3 + $0x720] sm:$0xff] }
 0x64d   :  { %v7522_v58 = vadd.f32 %v2067_v36, %v1985_v25  ;;  %v1842_v44 = vpop.f32.mrf.mxu1  ;;  %2301 = vmatmul.f32.gmra.mxu2 %v2232_v35  ;;  %v5183_v25 = vld [vmem:[%s9800_s3 + $0x630] sm:$0xff]  ;;  %v5197_v35 = vld [vmem:[%s9800_s3 + $0x6a0] sm:$0xff] }
 0x64e   :  { %v1872_v6 = vadd.f32 %v1842_v44, %v7303_v53  ;;  %2714 = vmatpush.msra.mxu3 %v5221_v20  ;;  %2492 = vmatpush.msra.mxu1 %v5183_v25  ;;  %v7608_v44 = vld [vmem:[#allocation2 + $0x104] sm:$0xff] }
 0x64f   :  { %v5180_v20 = vld [vmem:[%s9800_s3 + $0x618] sm:$0xff] }
 0x650   :  { %2183 = vmatmul.f32.gmra.mxu1 %v7540_v42  ;;  %v1986_v53 = vadd.f32 %v1956_v30, %v1872_v6  ;;  %v1959_v21 = vpop.f32.mrf.mxu2  ;;  %2715 = vmatpush.msra.mxu3 %v5220_v8  ;;  %v5215_v30 = vld [vmem:[%s9800_s3 + $0x730] sm:$0xff] }
 0x651   :  { %2412 = vmatmul.f32.gmra.mxu3 %v7317_v43  ;;  %2493 = vmatpush.msra.mxu1 %v5182_v52  ;;  %v5632_v52 = vld [vmem:[#allocation2 + $0x150] sm:$0xff] }
 0x652   :  { %2716 = vmatpush.msra.mxu3 %v5219_v5 }
 0x654   :  { %v2070_v50 = vpop.f32.mrf.mxu3  ;;  %2717 = vmatpush.msra.mxu3 %v5218_v26 }
 0x655   :  { %v7553_v43 = vadd.f32 %v2070_v50, %v1986_v53  ;;  %v1845_v62 = vpop.f32.mrf.mxu1  ;;  %2304 = vmatmul.f32.gmra.mxu2 %v2233_v3  ;;  %v5179_v50 = vld [vmem:[%s9800_s3 + $0x610] sm:$0xff] }
 0x656   :  { %v1873_v34 = vadd.f32 %v1845_v62, %v7339_v15  ;;  %2718 = vmatpush.msra.mxu3 %v5217_v14  ;;  %v5194_v62 = vld [vmem:[%s9800_s3 + $0x688] sm:$0xff]  ;;  %v5193_v14 = vld [vmem:[%s9800_s3 + $0x680] sm:$0xff] }
 0x658   :  { %2186 = vmatmul.f32.gmra.mxu1 %v7571_v38  ;;  %v1987_v15 = vadd.f32 %v1959_v21, %v1873_v34  ;;  %v1962_v60 = vpop.f32.mrf.mxu2  ;;  %2719 = vmatpush.msra.mxu3 %v5216_v57  ;;  %v5195_v21 = vld [vmem:[%s9800_s3 + $0x690] sm:$0xff] }
 0x659   :  { %2415 = vmatmul.f32.gmra.mxu3 %v7356_v19  ;;  %v5198_v19 = vld [vmem:[%s9800_s3 + $0x6a8] sm:$0xff] }
 0x65a   :  { %2607 = vmatpush.msra.mxu2 %v5198_v19  ;;  %2720 = vmatpush.msra.mxu3 %v5215_v30  ;;  %v7645_v34 = vld [vmem:[#allocation2 + $0x114] sm:$0xff] }
 0x65b   :  { %v2349_v19 = vld [vmem:[#allocation2 + $0x131] sm:$0xff] }
 0x65c   :  { %v2073_v55 = vpop.f32.mrf.mxu3  ;;  %2608 = vmatpush.msra.mxu2 %v5197_v35  ;;  %2721 = vmatpush.msra.mxu3 %v5214_v12  ;;  %v7670_v12 = vld [vmem:[#allocation2 + $0x134] sm:$0xff] }
 0x65d   :  { %v7587_v39 = vadd.f32 %v2073_v55, %v1987_v15  ;;  %v1848_v61 = vpop.f32.mrf.mxu1  ;;  %2307 = vmatmul.f32.gmra.mxu2 %v2234_v49  ;;  %v5177_v15 = vld [vmem:[%s9800_s3 + $0x600] sm:$0xff] }
 0x65e   :  { %v1874_v36 = vadd.f32 %v1848_v61, %v7381_v4  ;;  %v5181_v4 = vld [vmem:[%s9800_s3 + $0x620] sm:$0xff]  ;;  %2609 = vmatpush.msra.mxu2 %v5196_v40  ;;  %2722 = vmatpush.msra.mxu3 %v5213_v28 }
 0x65f   :  { %2494 = vmatpush.msra.mxu1 %v5181_v4  ;;  %v7664_v49 = vld [vmem:[#allocation2 + $0x124] sm:$0xff] }
 0x660   :  { %2189 = vmatmul.f32.gmra.mxu1 %v7608_v44  ;;  %v1988_v24 = vadd.f32 %v1962_v60, %v1874_v36  ;;  %v1965_v6 = vpop.f32.mrf.mxu2  ;;  %2610 = vmatpush.msra.mxu2 %v5195_v21  ;;  %v5209_v60 = vld [vmem:[%s9800_s3 + $0x700] sm:$0xff] }
 0x661   :  { %2418 = vmatmul.f32.gmra.mxu3 %v7395_v10  ;;  %v5212_v10 = vld [vmem:[%s9800_s3 + $0x718] sm:$0xff]  ;;  %2495 = vmatpush.msra.mxu1 %v5180_v20 }
 0x662   :  { %2723 = vmatpush.msra.mxu3 %v5212_v10  ;;  %2611 = vmatpush.msra.mxu2 %v5194_v62  ;;  %v2564_v40 = vld [vmem:[#allocation2 + $0x23] sm:$0xff] }
 0x663   :  { %2496 = vmatpush.msra.mxu1 %v5179_v50  ;;  %v7677_v10 = vld [vmem:[#allocation2 + $0x144] sm:$0xff]  ;;  %v2565_v50 = vld [vmem:[#allocation2 + $0x33] sm:$0xff] }
 0x664   :  { %v2076_v53 = vpop.f32.mrf.mxu3  ;;  %2724 = vmatpush.msra.mxu3 %v5211_v56  ;;  %2612 = vmatpush.msra.mxu2 %v5193_v14 }
 0x665   :  { %v7630_v8 = vadd.f32 %v2076_v53, %v1988_v24  ;;  %v1851_v3 = vpop.f32.mrf.mxu1  ;;  %2310 = vmatmul.f32.gmra.mxu2 %v2235_v11  ;;  %2497 = vmatpush.msra.mxu1 %v5178_v16  ;;  %v2351_v53 = vld [vmem:[#allocation2 + $0x151] sm:$0xff] }
 0x666   :  { %v1875_v5 = vadd.f32 %v1851_v3, %v7411_v29  ;;  %2725 = vmatpush.msra.mxu3 %v5210_v51 }
 0x667   :  { %2498 = vmatpush.msra.mxu1 %v5177_v15  ;;  %v7687_v15 = vld [vmem:[#allocation2 + $0x32] sm:$0xff] }
 0x668   :  { %2192 = vmatmul.f32.gmra.mxu1 %v7645_v34  ;;  %v1989_v29 = vadd.f32 %v1965_v6, %v1875_v5  ;;  %v1968_v26 = vpop.f32.mrf.mxu2  ;;  %2726 = vmatpush.msra.mxu3 %v5209_v60  ;;  %v2450_v5 = vld [vmem:[#allocation2 + $0x22] sm:$0xff] }
 0x669   :  { %2421 = vmatmul.f32.gmra.mxu3 %v7413_v41 }
 0x66c   :  { %v2079_v23 = vpop.f32.mrf.mxu3 }
 0x66d   :  { %v7661_v41 = vadd.f32 %v2079_v23, %v1989_v29  ;;  %v1854_v57 = vpop.f32.mrf.mxu1  ;;  %2313 = vmatmul.f32.gmra.mxu2 %v2236_v13  ;;  %v2566_v29 = vld [vmem:[#allocation2 + $0x43] sm:$0xff]  ;;  %v2567_v13 = vld [vmem:[#allocation2 + $0x53] sm:$0xff] }
 0x66e   :  { %v1876_v55 = vadd.f32 %v1854_v57, %v7417_v9 }
 0x670   :  { %2195 = vmatmul.f32.gmra.mxu1 %v7664_v49  ;;  %v1990_v25 = vadd.f32 %v1968_v26, %v1876_v55  ;;  %v1971_v30 = vpop.f32.mrf.mxu2 }
 0x671   :  { %2424 = vmatmul.f32.gmra.mxu3 %v2349_v19  ;;  %v7694_v19 = vld [vmem:[#allocation2 + $0x42] sm:$0xff] }
 0x674   :  { %v2082_v32 = vpop.f32.mrf.mxu3 }
 0x675   :  { %v7667_v61 = vadd.f32 %v2082_v32, %v1990_v25  ;;  %v1857_v36 = vpop.f32.mrf.mxu1  ;;  %2316 = vmatmul.f32.gmra.mxu2 %v5632_v52  ;;  %v2568_v32 = vld [vmem:[#allocation2 + $0x63] sm:$0xff] }
 0x676   :  { %v1877_v35 = vadd.f32 %v1857_v36, %v7421_v37 }
 0x678   :  { %2198 = vmatmul.f32.gmra.mxu1 %v7670_v12  ;;  %v1991_v9 = vadd.f32 %v1971_v30, %v1877_v35  ;;  %v1974_v4 = vpop.f32.mrf.mxu2  ;;  %v7704_v35 = vld [vmem:[#allocation2 + $0x52] sm:$0xff] }
 0x679   :  { %2427 = vmatmul.f32.gmra.mxu3 %v7424_v1 }
 0x67c   :  { %v2085_v24 = vpop.f32.mrf.mxu3 }
 0x67d   :  { %v7674_v6 = vadd.f32 %v2085_v24, %v1991_v9  ;;  %v1860_v28 = vpop.f32.mrf.mxu1  ;;  %2613 = vmatmul.f32.vlgmr.msra.gmra.mxu2 %v2564_v40  ;;  %v2569_v40 = vld [vmem:[#allocation2 + $0x73] sm:$0xff] }
 0x67e   :  { %v1878_v20 = vadd.f32 %v1860_v28, %v7427_v17 }
 0x680   :  { %2201 = vmatmul.f32.gmra.mxu1 %v7677_v10  ;;  %v1992_v37 = vadd.f32 %v1974_v4, %v1878_v20  ;;  %v2272_v21 = vpop.f32.mrf.mxu2 }
 0x681   :  { %2430 = vmatmul.f32.gmra.mxu3 %v2351_v53  ;;  %v5239_v53 = vld [vmem:[%s9800_s3 + $0x7f0] sm:$0xff] }
 0x684   :  { %v2088_v11 = vpop.f32.mrf.mxu3 }
 0x685   :  { %v7680_v1 = vadd.f32 %v2088_v11, %v1992_v37  ;;  %v2157_v56 = vpop.f32.mrf.mxu1  ;;  %2616 = vmatmul.f32.gmra.mxu2 %v2565_v50 }
 0x686   :  { %v2205_v3 = vadd.f32 %v2157_v56, %v7431_v59  ;;  %v2570_v56 = vld [vmem:[#allocation2 + $0x83] sm:$0xff] }
 0x688   :  { %2499 = vmatmul.f32.vlgmr.msra.gmra.mxu1 %v2450_v5  ;;  %v2320_v17 = vadd.f32 %v2272_v21, %v2205_v3  ;;  %v2275_v62 = vpop.f32.mrf.mxu2  ;;  %v5238_v5 = vld [vmem:[%s9800_s3 + $0x7e8] sm:$0xff] }
 0x689   :  { %2727 = vmatmul.f32.vlgmr.msra.gmra.mxu3 %v7434_v47 }
 0x68c   :  { %v2386_v16 = vpop.f32.mrf.mxu3 }
 0x68d   :  { %v7684_v51 = vadd.f32 %v2386_v16, %v2320_v17  ;;  %v2160_v26 = vpop.f32.mrf.mxu1  ;;  %2619 = vmatmul.f32.gmra.mxu2 %v2566_v29  ;;  %v7727_v17 = vld [vmem:[#allocation2 + $0x72] sm:$0xff] }
 0x68e   :  { %v2206_v14 = vadd.f32 %v2160_v26, %v7438_v18  ;;  %v2571_v26 = vld [vmem:[#allocation2 + $0x93] sm:$0xff] }
 0x690   :  { %2502 = vmatmul.f32.gmra.mxu1 %v7687_v15  ;;  %v2321_v59 = vadd.f32 %v2275_v62, %v2206_v14  ;;  %v2278_v60 = vpop.f32.mrf.mxu2 }
 0x691   :  { %2730 = vmatmul.f32.gmra.mxu3 %v7444_v54 }
 0x694   :  { %v2389_v23 = vpop.f32.mrf.mxu3 }
 0x695   :  { %v7691_v47 = vadd.f32 %v2389_v23, %v2321_v59  ;;  %v2163_v57 = vpop.f32.mrf.mxu1  ;;  %2622 = vmatmul.f32.gmra.mxu2 %v2567_v13  ;;  %v5237_v59 = vld [vmem:[%s9800_s3 + $0x7e0] sm:$0xff] }
 0x696   :  { %v2207_v55 = vadd.f32 %v2163_v57, %v7448_v2  ;;  %v5240_v2 = vld [vmem:[%s9800_s3 + $0x7f8] sm:$0xff] }
 0x697   :  { %2826 = vmatpush.msrb.mxu1 %v5240_v2 }
 0x698   :  { %2505 = vmatmul.f32.gmra.mxu1 %v7694_v19  ;;  %v2322_v18 = vadd.f32 %v2278_v60, %v2207_v55  ;;  %v2281_v25 = vpop.f32.mrf.mxu2  ;;  %v7737_v60 = vld [vmem:[#allocation2 + $0x82] sm:$0xff] }
 0x699   :  { %2733 = vmatmul.f32.gmra.mxu3 %v7454_v63  ;;  %2827 = vmatpush.msrb.mxu1 %v5239_v53  ;;  %v2572_v55 = vld [vmem:[#allocation2 + $0xe3] sm:$0xff] }
 0x69b   :  { %2828 = vmatpush.msrb.mxu1 %v5238_v5 }
 0x69c   :  { %v2392_v30 = vpop.f32.mrf.mxu3 }
 0x69d   :  { %v7698_v54 = vadd.f32 %v2392_v30, %v2322_v18  ;;  %v2166_v36 = vpop.f32.mrf.mxu1  ;;  %2625 = vmatmul.f32.gmra.mxu2 %v2568_v32  ;;  %2829 = vmatpush.msrb.mxu1 %v5237_v59  ;;  %v7747_v30 = vld [vmem:[#allocation2 + $0x92] sm:$0xff] }
 0x69e   :  { %v2208_v52 = vadd.f32 %v2166_v36, %v7458_v33  ;;  %v5507_v33 = vld [vmem:[%s9802_s5 + $0x450] sm:$0xff] }
 0x69f   :  { %4667 = vmatpush.msrb.mxu0 %v5507_v33  ;;  %v2685_v32 = vld [vmem:[#allocation2 + $0x94] sm:$0xff] }
 0x6a0   :  { %2508 = vmatmul.f32.gmra.mxu1 %v7704_v35  ;;  %v2323_v63 = vadd.f32 %v2281_v25, %v2208_v52  ;;  %v2284_v9 = vpop.f32.mrf.mxu2  ;;  %v5236_v25 = vld [vmem:[%s9800_s3 + $0x7d8] sm:$0xff]  ;;  %v5235_v33 = vld [vmem:[%s9800_s3 + $0x7d0] sm:$0xff] }
 0x6a1   :  { %2736 = vmatmul.f32.gmra.mxu3 %v7464_v48  ;;  %v7717_v48 = vld [vmem:[#allocation2 + $0x62] sm:$0xff]  ;;  %2830 = vmatpush.msrb.mxu1 %v5236_v25 }
 0x6a2   :  { %v5256_v52 = vld [vmem:[%s9800_s3 + $0x878] sm:$0xff] }
 0x6a3   :  { %2940 = vmatpush.msrb.mxu2 %v5256_v52  ;;  %2831 = vmatpush.msrb.mxu1 %v5235_v33  ;;  %v5266_v52 = vld [vmem:[%s9800_s3 + $0x8c8] sm:$0xff]  ;;  %v5264_v33 = vld [vmem:[%s9800_s3 + $0x8b8] sm:$0xff] }
 0x6a4   :  { %v2395_v4 = vpop.f32.mrf.mxu3 }
 0x6a5   :  { %v7708_v24 = vadd.f32 %v2395_v4, %v2323_v63  ;;  %v2169_v28 = vpop.f32.mrf.mxu1  ;;  %2628 = vmatmul.f32.gmra.mxu2 %v2569_v40  ;;  %v2573_v63 = vld [vmem:[#allocation2 + $0xf3] sm:$0xff] }
 0x6a6   :  { %v2209_v20 = vadd.f32 %v2169_v28, %v7468_v27  ;;  %v5254_v28 = vld [vmem:[%s9800_s3 + $0x868] sm:$0xff] }
 0x6a8   :  { %2511 = vmatmul.f32.gmra.mxu1 %v7717_v48  ;;  %v2324_v37 = vadd.f32 %v2284_v9, %v2209_v20  ;;  %v2287_v21 = vpop.f32.mrf.mxu2  ;;  %v5255_v9 = vld [vmem:[%s9800_s3 + $0x870] sm:$0xff]  ;;  %v2458_v20 = vld [vmem:[#allocation2 + $0xe2] sm:$0xff] }
 0x6a9   :  { %2739 = vmatmul.f32.gmra.mxu3 %v7474_v46  ;;  %2941 = vmatpush.msrb.mxu2 %v5255_v9 }
 0x6ab   :  { %2942 = vmatpush.msrb.mxu2 %v5254_v28 }
 0x6ac   :  { %v2398_v11 = vpop.f32.mrf.mxu3 }
 0x6ad   :  { %v7721_v50 = vadd.f32 %v2398_v11, %v2324_v37  ;;  %v2172_v3 = vpop.f32.mrf.mxu1  ;;  %2631 = vmatmul.f32.gmra.mxu2 %v2570_v56  ;;  %v5252_v56 = vld [vmem:[%s9800_s3 + $0x858] sm:$0xff] }
 0x6ae   :  { %v2210_v27 = vadd.f32 %v2172_v3, %v7478_v7 }
 0x6b0   :  { %2514 = vmatmul.f32.gmra.mxu1 %v7727_v17  ;;  %v2325_v46 = vadd.f32 %v2287_v21, %v2210_v27  ;;  %v2290_v62 = vpop.f32.mrf.mxu2  ;;  %v5253_v21 = vld [vmem:[%s9800_s3 + $0x860] sm:$0xff]  ;;  %v5271_v27 = vld [vmem:[%s9800_s3 + $0x8f0] sm:$0xff] }
 0x6b1   :  { %2742 = vmatmul.f32.gmra.mxu3 %v7484_v45  ;;  %2943 = vmatpush.msrb.mxu2 %v5253_v21 }
 0x6b3   :  { %2944 = vmatpush.msrb.mxu2 %v5252_v56  ;;  %v5230_v56 = vld [vmem:[%s9800_s3 + $0x7a8] sm:$0xff] }
 0x6b4   :  { %v2401_v16 = vpop.f32.mrf.mxu3 }
 0x6b5   :  { %v7731_v29 = vadd.f32 %v2401_v16, %v2325_v46  ;;  %v2175_v14 = vpop.f32.mrf.mxu1  ;;  %2634 = vmatmul.f32.gmra.mxu2 %v2571_v26  ;;  %v5251_v46 = vld [vmem:[%s9800_s3 + $0x850] sm:$0xff]  ;;  %v5234_v16 = vld [vmem:[%s9800_s3 + $0x7c8] sm:$0xff] }
 0x6b6   :  { %v2211_v7 = vadd.f32 %v2175_v14, %v7488_v31  ;;  %v5270_v26 = vld [vmem:[%s9800_s3 + $0x8e8] sm:$0xff]  ;;  %v5269_v14 = vld [vmem:[%s9800_s3 + $0x8e0] sm:$0xff]  ;;  %2832 = vmatpush.msrb.mxu1 %v5234_v16  ;;  %2945 = vmatpush.msrb.mxu2 %v5251_v46  ;;  %v5244_v16 = vld [vmem:[%s9800_s3 + $0x818] sm:$0xff] }
 0x6b8   :  { %2517 = vmatmul.f32.gmra.mxu1 %v7737_v60  ;;  %v2326_v45 = vadd.f32 %v2290_v62, %v2211_v7  ;;  %v2293_v23 = vpop.f32.mrf.mxu2  ;;  %v7793_v7 = vld [vmem:[#allocation2 + $0xf2] sm:$0xff] }
 0x6b9   :  { %2745 = vmatmul.f32.gmra.mxu3 %v7494_v0 }
 0x6bc   :  { %v2404_v13 = vpop.f32.mrf.mxu3 }
 0x6bd   :  { %v7741_v57 = vadd.f32 %v2404_v13, %v2326_v45  ;;  %v2178_v18 = vpop.f32.mrf.mxu1  ;;  %2637 = vmatmul.f32.gmra.mxu2 %v2572_v55  ;;  %v5268_v45 = vld [vmem:[%s9800_s3 + $0x8d8] sm:$0xff]  ;;  %v5249_v55 = vld [vmem:[%s9800_s3 + $0x840] sm:$0xff] }
 0x6be   :  { %v2212_v31 = vadd.f32 %v2178_v18, %v7500_v22  ;;  %v2575_v18 = vld [vmem:[#allocation2 + $0x113] sm:$0xff] }
 0x6c0   :  { %2520 = vmatmul.f32.gmra.mxu1 %v7747_v30  ;;  %v2327_v0 = vadd.f32 %v2293_v23, %v2212_v31  ;;  %v2296_v36 = vpop.f32.mrf.mxu2  ;;  %v5250_v23 = vld [vmem:[%s9800_s3 + $0x848] sm:$0xff]  ;;  %v5267_v31 = vld [vmem:[%s9800_s3 + $0x8d0] sm:$0xff] }
 0x6c1   :  { %2748 = vmatmul.f32.gmra.mxu3 %v2685_v32  ;;  %2946 = vmatpush.msrb.mxu2 %v5250_v23  ;;  %v5248_v32 = vld [vmem:[%s9800_s3 + $0x838] sm:$0xff]  ;;  %v2577_v23 = vld [vmem:[#allocation2 + $0x133] sm:$0xff] }
 0x6c3   :  { %2947 = vmatpush.msrb.mxu2 %v5249_v55  ;;  %v5259_v55 = vld [vmem:[%s9800_s3 + $0x890] sm:$0xff] }
 0x6c4   :  { %v2407_v2 = vpop.f32.mrf.mxu3 }
 0x6c5   :  { %v7753_v22 = vadd.f32 %v2407_v2, %v2327_v0  ;;  %v2181_v4 = vpop.f32.mrf.mxu1  ;;  %2640 = vmatmul.f32.gmra.mxu2 %v2573_v63  ;;  %v5265_v2 = vld [vmem:[%s9800_s3 + $0x8c0] sm:$0xff] }
 0x6c6   :  { %v2213_v40 = vadd.f32 %v2181_v4, %v7522_v58  ;;  %v5272_v58 = vld [vmem:[%s9800_s3 + $0x8f8] sm:$0xff]  ;;  %2948 = vmatpush.msrb.mxu2 %v5248_v32  ;;  %v5226_v32 = vld [vmem:[%s9800_s3 + $0x788] sm:$0xff] }
 0x6c7   :  { %3054 = vmatpush.msrb.mxu3 %v5272_v58  ;;  %v7824_v63 = vld [vmem:[#allocation2 + $0x102] sm:$0xff]  ;;  %v5263_v58 = vld [vmem:[%s9800_s3 + $0x8b0] sm:$0xff] }
 0x6c8   :  { %2523 = vmatmul.f32.gmra.mxu1 %v2458_v20  ;;  %v2328_v53 = vadd.f32 %v2296_v36, %v2213_v40  ;;  %v2299_v37 = vpop.f32.mrf.mxu2  ;;  %v5233_v36 = vld [vmem:[%s9800_s3 + $0x7c0] sm:$0xff]  ;;  %v5232_v4 = vld [vmem:[%s9800_s3 + $0x7b8] sm:$0xff]  ;;  %v5247_v40 = vld [vmem:[%s9800_s3 + $0x830] sm:$0xff] }
 0x6c9   :  { %2751 = vmatmul.f32.gmra.mxu3 %v7540_v42  ;;  %v2574_v42 = vld [vmem:[#allocation2 + $0x103] sm:$0xff]  ;;  %2833 = vmatpush.msrb.mxu1 %v5233_v36  ;;  %v5258_v36 = vld [vmem:[%s9800_s3 + $0x888] sm:$0xff] }
 0x6ca   :  { %3055 = vmatpush.msrb.mxu3 %v5271_v27  ;;  %2949 = vmatpush.msrb.mxu2 %v5247_v40  ;;  %v5262_v27 = vld [vmem:[%s9800_s3 + $0x8a8] sm:$0xff]  ;;  %v2578_v40 = vld [vmem:[#allocation2 + $0x143] sm:$0xff] }
 0x6cb   :  { %2834 = vmatpush.msrb.mxu1 %v5232_v4 }
 0x6cc   :  { %v2410_v11 = vpop.f32.mrf.mxu3  ;;  %3056 = vmatpush.msrb.mxu3 %v5270_v26  ;;  %v5261_v26 = vld [vmem:[%s9800_s3 + $0x8a0] sm:$0xff] }
 0x6cd   :  { %v7775_v3 = vadd.f32 %v2410_v11, %v2328_v53  ;;  %v2184_v5 = vpop.f32.mrf.mxu1  ;;  %2643 = vmatmul.f32.gmra.mxu2 %v2574_v42  ;;  %v2576_v53 = vld [vmem:[#allocation2 + $0x123] sm:$0xff] }
 0x6ce   :  { %v2214_v62 = vadd.f32 %v2184_v5, %v7553_v43  ;;  %3057 = vmatpush.msrb.mxu3 %v5269_v14  ;;  %v5245_v42 = vld [vmem:[%s9800_s3 + $0x820] sm:$0xff]  ;;  %v7858_v5 = vld [vmem:[#allocation2 + $0x112] sm:$0xff]  ;;  %v5228_v14 = vld [vmem:[%s9800_s3 + $0x798] sm:$0xff] }
 0x6d0   :  { %2526 = vmatmul.f32.gmra.mxu1 %v7793_v7  ;;  %v2329_v43 = vadd.f32 %v2299_v37, %v2214_v62  ;;  %v2302_v59 = vpop.f32.mrf.mxu2  ;;  %3058 = vmatpush.msrb.mxu3 %v5268_v45  ;;  %v5231_v37 = vld [vmem:[%s9800_s3 + $0x7b0] sm:$0xff] }
 0x6d1   :  { %2754 = vmatmul.f32.gmra.mxu3 %v7571_v38  ;;  %2835 = vmatpush.msrb.mxu1 %v5231_v37 }
 0x6d2   :  { %3059 = vmatpush.msrb.mxu3 %v5267_v31 }
 0x6d3   :  { %2836 = vmatpush.msrb.mxu1 %v5230_v56  ;;  %v2579_v56 = vld [vmem:[#allocation2 + $0x153] sm:$0xff] }
 0x6d4   :  { %v2413_v13 = vpop.f32.mrf.mxu3  ;;  %3060 = vmatpush.msrb.mxu3 %v5266_v52 }
 0x6d5   :  { %v7806_v38 = vadd.f32 %v2413_v13, %v2329_v43  ;;  %v2187_v25 = vpop.f32.mrf.mxu1  ;;  %2646 = vmatmul.f32.gmra.mxu2 %v2575_v18  ;;  %v5227_v13 = vld [vmem:[%s9800_s3 + $0x790] sm:$0xff] }
 0x6d6   :  { %v2215_v0 = vadd.f32 %v2187_v25, %v7587_v39  ;;  %3061 = vmatpush.msrb.mxu3 %v5265_v2  ;;  %v5242_v25 = vld [vmem:[%s9800_s3 + $0x808] sm:$0xff]  ;;  %v5241_v2 = vld [vmem:[%s9800_s3 + $0x800] sm:$0xff] }
 0x6d8   :  { %2529 = vmatmul.f32.gmra.mxu1 %v7824_v63  ;;  %v2330_v39 = vadd.f32 %v2302_v59, %v2215_v0  ;;  %v2305_v9 = vpop.f32.mrf.mxu2  ;;  %3062 = vmatpush.msrb.mxu3 %v5264_v33  ;;  %v5243_v59 = vld [vmem:[%s9800_s3 + $0x810] sm:$0xff]  ;;  %v7895_v0 = vld [vmem:[#allocation2 + $0x122] sm:$0xff]  ;;  %v5506_v33 = vld [vmem:[%s9802_s5 + $0x448] sm:$0xff] }
 0x6d9   :  { %2757 = vmatmul.f32.gmra.mxu3 %v7608_v44  ;;  %v5246_v44 = vld [vmem:[%s9800_s3 + $0x828] sm:$0xff]  ;;  %4668 = vmatpush.msrb.mxu0 %v5506_v33 }
 0x6da   :  { %2950 = vmatpush.msrb.mxu2 %v5246_v44  ;;  %3063 = vmatpush.msrb.mxu3 %v5263_v58 }
 0x6dc   :  { %v2416_v28 = vpop.f32.mrf.mxu3  ;;  %2951 = vmatpush.msrb.mxu2 %v5245_v42  ;;  %3064 = vmatpush.msrb.mxu3 %v5262_v27 }
 0x6dd   :  { %v7840_v20 = vadd.f32 %v2416_v28, %v2330_v39  ;;  %v2190_v21 = vpop.f32.mrf.mxu1  ;;  %2649 = vmatmul.f32.gmra.mxu2 %v2576_v53  ;;  %v5225_v39 = vld [vmem:[%s9800_s3 + $0x780] sm:$0xff]  ;;  %v7917_v53 = vld [vmem:[#allocation2 + $0x132] sm:$0xff] }
 0x6de   :  { %v2216_v11 = vadd.f32 %v2190_v21, %v7630_v8  ;;  %v5229_v8 = vld [vmem:[%s9800_s3 + $0x7a0] sm:$0xff]  ;;  %2952 = vmatpush.msrb.mxu2 %v5244_v16  ;;  %3065 = vmatpush.msrb.mxu3 %v5261_v26  ;;  %v2907_v16 = vld [vmem:[#allocation2 + $0x31] sm:$0xff] }
 0x6df   :  { %2837 = vmatpush.msrb.mxu1 %v5229_v8  ;;  %v7924_v8 = vld [vmem:[#allocation2 + $0x142] sm:$0xff] }
 0x6e0   :  { %2532 = vmatmul.f32.gmra.mxu1 %v7858_v5  ;;  %v2331_v46 = vadd.f32 %v2305_v9, %v2216_v11  ;;  %v2308_v62 = vpop.f32.mrf.mxu2  ;;  %2953 = vmatpush.msrb.mxu2 %v5243_v59  ;;  %v5257_v9 = vld [vmem:[%s9800_s3 + $0x880] sm:$0xff] }
 0x6e1   :  { %2760 = vmatmul.f32.gmra.mxu3 %v7645_v34  ;;  %v5260_v34 = vld [vmem:[%s9800_s3 + $0x898] sm:$0xff]  ;;  %2838 = vmatpush.msrb.mxu1 %v5228_v14 }
 0x6e2   :  { %3066 = vmatpush.msrb.mxu3 %v5260_v34  ;;  %2954 = vmatpush.msrb.mxu2 %v5242_v25  ;;  %v7931_v34 = vld [vmem:[#allocation2 + $0x152] sm:$0xff] }
 0x6e3   :  { %2839 = vmatpush.msrb.mxu1 %v5227_v13  ;;  %v2908_v13 = vld [vmem:[#allocation2 + $0x41] sm:$0xff] }
 0x6e4   :  { %v2419_v43 = vpop.f32.mrf.mxu3  ;;  %3067 = vmatpush.msrb.mxu3 %v5259_v55  ;;  %2955 = vmatpush.msrb.mxu2 %v5241_v2 }
 0x6e5   :  { %v7880_v45 = vadd.f32 %v2419_v43, %v2331_v46  ;;  %v2193_v18 = vpop.f32.mrf.mxu1  ;;  %2652 = vmatmul.f32.gmra.mxu2 %v2577_v23  ;;  %2840 = vmatpush.msrb.mxu1 %v5226_v32  ;;  %v2693_v43 = vld [vmem:[#allocation2 + $0x154] sm:$0xff] }
 0x6e6   :  { %v2217_v31 = vadd.f32 %v2193_v18, %v7661_v41  ;;  %3068 = vmatpush.msrb.mxu3 %v5258_v36 }
 0x6e7   :  { %2841 = vmatpush.msrb.mxu1 %v5225_v39  ;;  %v7941_v39 = vld [vmem:[#allocation2 + $0x40] sm:$0xff] }
 0x6e8   :  { %2535 = vmatmul.f32.gmra.mxu1 %v7895_v0  ;;  %v2332_v41 = vadd.f32 %v2308_v62, %v2217_v31  ;;  %v2311_v52 = vpop.f32.mrf.mxu2  ;;  %3069 = vmatpush.msrb.mxu3 %v5257_v9  ;;  %v2793_v31 = vld [vmem:[#allocation2 + $0x30] sm:$0xff] }
 0x6e9   :  { %2763 = vmatmul.f32.gmra.mxu3 %v7664_v49 }
 0x6ec   :  { %v2422_v4 = vpop.f32.mrf.mxu3 }
 0x6ed   :  { %v7911_v49 = vadd.f32 %v2422_v4, %v2332_v41  ;;  %v2196_v28 = vpop.f32.mrf.mxu1  ;;  %2655 = vmatmul.f32.gmra.mxu2 %v2578_v40  ;;  %v2909_v41 = vld [vmem:[#allocation2 + $0x51] sm:$0xff]  ;;  %v2910_v40 = vld [vmem:[#allocation2 + $0x61] sm:$0xff] }
 0x6ee   :  { %v2218_v44 = vadd.f32 %v2196_v28, %v7667_v61 }
 0x6f0   :  { %2538 = vmatmul.f32.gmra.mxu1 %v7917_v53  ;;  %v2333_v37 = vadd.f32 %v2311_v52, %v2218_v44  ;;  %v2314_v58 = vpop.f32.mrf.mxu2  ;;  %v7948_v44 = vld [vmem:[#allocation2 + $0x50] sm:$0xff] }
 0x6f1   :  { %2766 = vmatmul.f32.gmra.mxu3 %v7670_v12 }
 0x6f4   :  { %v2425_v21 = vpop.f32.mrf.mxu3 }
 0x6f5   :  { %v7921_v11 = vadd.f32 %v2425_v21, %v2333_v37  ;;  %v2199_v42 = vpop.f32.mrf.mxu1  ;;  %2658 = vmatmul.f32.gmra.mxu2 %v2579_v56  ;;  %v2911_v21 = vld [vmem:[#allocation2 + $0x71] sm:$0xff] }
 0x6f6   :  { %v2219_v27 = vadd.f32 %v2199_v42, %v7674_v6 }
 0x6f8   :  { %2541 = vmatmul.f32.gmra.mxu1 %v7924_v8  ;;  %v2334_v61 = vadd.f32 %v2314_v58, %v2219_v27  ;;  %v2317_v46 = vpop.f32.mrf.mxu2  ;;  %v7958_v27 = vld [vmem:[#allocation2 + $0x60] sm:$0xff] }
 0x6f9   :  { %2769 = vmatmul.f32.gmra.mxu3 %v7677_v10 }
 0x6fc   :  { %v2428_v62 = vpop.f32.mrf.mxu3 }
 0x6fd   :  { %v7928_v12 = vadd.f32 %v2428_v62, %v2334_v61  ;;  %v2202_v26 = vpop.f32.mrf.mxu1  ;;  %2956 = vmatmul.f32.vlgmr.msrb.gmra.mxu2 %v2907_v16  ;;  %v2912_v16 = vld [vmem:[#allocation2 + $0x81] sm:$0xff] }
 0x6fe   :  { %v2220_v14 = vadd.f32 %v2202_v26, %v7680_v1 }
 0x700   :  { %2544 = vmatmul.f32.gmra.mxu1 %v7931_v34  ;;  %v2335_v6 = vadd.f32 %v2317_v46, %v2220_v14  ;;  %v2614_v59 = vpop.f32.mrf.mxu2  ;;  %v5287_v14 = vld [vmem:[%s9800_s3 + $0x970] sm:$0xff] }
 0x701   :  { %2772 = vmatmul.f32.gmra.mxu3 %v2693_v43  ;;  %v7968_v43 = vld [vmem:[#allocation2 + $0x70] sm:$0xff] }
 0x704   :  { %v2431_v23 = vpop.f32.mrf.mxu3 }
 0x705   :  { %v7934_v10 = vadd.f32 %v2431_v23, %v2335_v6  ;;  %v2500_v55 = vpop.f32.mrf.mxu1  ;;  %2959 = vmatmul.f32.gmra.mxu2 %v2908_v13  ;;  %v2913_v13 = vld [vmem:[#allocation2 + $0x91] sm:$0xff] }
 0x706   :  { %v2548_v18 = vadd.f32 %v2500_v55, %v7684_v51 }
 0x708   :  { %2842 = vmatmul.f32.vlgmr.msrb.gmra.mxu1 %v2793_v31  ;;  %v2662_v1 = vadd.f32 %v2614_v59, %v2548_v18  ;;  %v2617_v25 = vpop.f32.mrf.mxu2  ;;  %v5286_v18 = vld [vmem:[%s9800_s3 + $0x968] sm:$0xff]  ;;  %v7978_v31 = vld [vmem:[#allocation2 + $0x80] sm:$0xff] }
 0x709   :  { %3070 = vmatmul.f32.vlgmr.msrb.gmra.mxu3 %v7687_v15 }
 0x70c   :  { %v2728_v32 = vpop.f32.mrf.mxu3 }
 0x70d   :  { %v7938_v36 = vadd.f32 %v2728_v32, %v2662_v1  ;;  %v2503_v52 = vpop.f32.mrf.mxu1  ;;  %2962 = vmatmul.f32.gmra.mxu2 %v2909_v41  ;;  %v2914_v41 = vld [vmem:[#allocation2 + $0xa1] sm:$0xff] }
 0x70e   :  { %v2549_v2 = vadd.f32 %v2503_v52, %v7691_v47 }
 0x710   :  { %2845 = vmatmul.f32.gmra.mxu1 %v7941_v39  ;;  %v2663_v51 = vadd.f32 %v2617_v25, %v2549_v2  ;;  %v2620_v9 = vpop.f32.mrf.mxu2 }
 0x711   :  { %3073 = vmatmul.f32.gmra.mxu3 %v7694_v19 }
 0x714   :  { %v2731_v4 = vpop.f32.mrf.mxu3 }
 0x715   :  { %v7945_v15 = vadd.f32 %v2731_v4, %v2663_v51  ;;  %v2506_v33 = vpop.f32.mrf.mxu1  ;;  %2965 = vmatmul.f32.gmra.mxu2 %v2910_v40  ;;  %v5285_v51 = vld [vmem:[%s9800_s3 + $0x960] sm:$0xff] }
 0x716   :  { %v2550_v28 = vadd.f32 %v2506_v33, %v7698_v54  ;;  %v5288_v54 = vld [vmem:[%s9800_s3 + $0x978] sm:$0xff] }
 0x717   :  { %3168 = vmatpush.msra.mxu1 %v5288_v54  ;;  %v5304_v54 = vld [vmem:[%s9800_s3 + $0x9f8] sm:$0xff] }
 0x718   :  { %2848 = vmatmul.f32.gmra.mxu1 %v7948_v44  ;;  %v2664_v47 = vadd.f32 %v2620_v9, %v2550_v28  ;;  %v2623_v37 = vpop.f32.mrf.mxu2  ;;  %v2915_v28 = vld [vmem:[#allocation2 + $0xf1] sm:$0xff]  ;;  %3282 = vmatpush.msra.mxu2 %v5304_v54  ;;  %v5313_v54 = vld [vmem:[%s9800_s3 + $0xa40] sm:$0xff] }
 0x719   :  { %3076 = vmatmul.f32.gmra.mxu3 %v7704_v35  ;;  %3169 = vmatpush.msra.mxu1 %v5287_v14  ;;  %v5302_v14 = vld [vmem:[%s9800_s3 + $0x9e8] sm:$0xff] }
 0x71b   :  { %3170 = vmatpush.msra.mxu1 %v5286_v18  ;;  %v5319_v18 = vld [vmem:[%s9800_s3 + $0xa70] sm:$0xff] }
 0x71c   :  { %v2734_v58 = vpop.f32.mrf.mxu3 }
 0x71d   :  { %v7952_v19 = vadd.f32 %v2734_v58, %v2664_v47  ;;  %v2509_v56 = vpop.f32.mrf.mxu1  ;;  %2968 = vmatmul.f32.gmra.mxu2 %v2911_v21  ;;  %3171 = vmatpush.msra.mxu1 %v5285_v51  ;;  %v8001_v58 = vld [vmem:[#allocation2 + $0xa0] sm:$0xff] }
 0x71e   :  { %v2551_v42 = vadd.f32 %v2509_v56, %v7708_v24  ;;  %v3028_v21 = vld [vmem:[#allocation2 + $0xa2] sm:$0xff] }
 0x720   :  { %2851 = vmatmul.f32.gmra.mxu1 %v7958_v27  ;;  %v2665_v35 = vadd.f32 %v2623_v37, %v2551_v42  ;;  %v2626_v61 = vpop.f32.mrf.mxu2  ;;  %v5284_v37 = vld [vmem:[%s9800_s3 + $0x958] sm:$0xff] }
 0x721   :  { %3079 = vmatmul.f32.gmra.mxu3 %v7717_v48  ;;  %3172 = vmatpush.msra.mxu1 %v5284_v37 }
 0x724   :  { %v2737_v46 = vpop.f32.mrf.mxu3 }
 0x725   :  { %v7962_v62 = vadd.f32 %v2737_v46, %v2665_v35  ;;  %v2512_v26 = vpop.f32.mrf.mxu1  ;;  %2971 = vmatmul.f32.gmra.mxu2 %v2912_v16  ;;  %v5303_v46 = vld [vmem:[%s9800_s3 + $0x9f0] sm:$0xff] }
 0x726   :  { %v2552_v24 = vadd.f32 %v2512_v26, %v7721_v50  ;;  %v5283_v26 = vld [vmem:[%s9800_s3 + $0x950] sm:$0xff]  ;;  %3283 = vmatpush.msra.mxu2 %v5303_v46  ;;  %v5280_v46 = vld [vmem:[%s9800_s3 + $0x938] sm:$0xff] }
 0x727   :  { %3173 = vmatpush.msra.mxu1 %v5283_v26  ;;  %v5312_v26 = vld [vmem:[%s9800_s3 + $0xa38] sm:$0xff] }
 0x728   :  { %2854 = vmatmul.f32.gmra.mxu1 %v7968_v43  ;;  %v2666_v48 = vadd.f32 %v2626_v61, %v2552_v24  ;;  %v2629_v6 = vpop.f32.mrf.mxu2  ;;  %v2801_v24 = vld [vmem:[#allocation2 + $0xf0] sm:$0xff]  ;;  %3284 = vmatpush.msra.mxu2 %v5302_v14 }
 0x729   :  { %3082 = vmatmul.f32.gmra.mxu3 %v7727_v17 }
 0x72c   :  { %v2740_v59 = vpop.f32.mrf.mxu3 }
 0x72d   :  { %v7972_v23 = vadd.f32 %v2740_v59, %v2666_v48  ;;  %v2515_v55 = vpop.f32.mrf.mxu1  ;;  %2974 = vmatmul.f32.gmra.mxu2 %v2913_v13  ;;  %v5301_v59 = vld [vmem:[%s9800_s3 + $0x9e0] sm:$0xff] }
 0x72e   :  { %v2553_v50 = vadd.f32 %v2515_v55, %v7731_v29  ;;  %v5505_v29 = vld [vmem:[%s9802_s5 + $0x440] sm:$0xff]  ;;  %3285 = vmatpush.msra.mxu2 %v5301_v59  ;;  %v5300_v55 = vld [vmem:[%s9800_s3 + $0x9d8] sm:$0xff] }
 0x72f   :  { %4669 = vmatpush.msrb.mxu0 %v5505_v29  ;;  %v5318_v29 = vld [vmem:[%s9800_s3 + $0xa68] sm:$0xff] }
 0x730   :  { %2857 = vmatmul.f32.gmra.mxu1 %v7978_v31  ;;  %v2667_v17 = vadd.f32 %v2629_v6, %v2553_v50  ;;  %v2632_v1 = vpop.f32.mrf.mxu2  ;;  %3286 = vmatpush.msra.mxu2 %v5300_v55  ;;  %v5278_v55 = vld [vmem:[%s9800_s3 + $0x928] sm:$0xff] }
 0x731   :  { %3085 = vmatmul.f32.gmra.mxu3 %v7737_v60  ;;  %v7991_v60 = vld [vmem:[#allocation2 + $0x90] sm:$0xff] }
 0x734   :  { %v2743_v25 = vpop.f32.mrf.mxu3 }
 0x735   :  { %v7982_v32 = vadd.f32 %v2743_v25, %v2667_v17  ;;  %v2518_v52 = vpop.f32.mrf.mxu1  ;;  %2977 = vmatmul.f32.gmra.mxu2 %v2914_v41  ;;  %v5282_v41 = vld [vmem:[%s9800_s3 + $0x948] sm:$0xff] }
 0x736   :  { %v2554_v2 = vadd.f32 %v2518_v52, %v7741_v57  ;;  %v5317_v52 = vld [vmem:[%s9800_s3 + $0xa60] sm:$0xff]  ;;  %3174 = vmatpush.msra.mxu1 %v5282_v41  ;;  %v5292_v41 = vld [vmem:[%s9800_s3 + $0x998] sm:$0xff] }
 0x738   :  { %2860 = vmatmul.f32.gmra.mxu1 %v7991_v60  ;;  %v2668_v9 = vadd.f32 %v2632_v1, %v2554_v2  ;;  %v2635_v4 = vpop.f32.mrf.mxu2  ;;  %v5299_v1 = vld [vmem:[%s9800_s3 + $0x9d0] sm:$0xff]  ;;  %v8047_v2 = vld [vmem:[#allocation2 + $0x100] sm:$0xff] }
 0x739   :  { %3088 = vmatmul.f32.gmra.mxu3 %v7747_v30  ;;  %3287 = vmatpush.msra.mxu2 %v5299_v1 }
 0x73c   :  { %v2746_v40 = vpop.f32.mrf.mxu3 }
 0x73d   :  { %v7995_v33 = vadd.f32 %v2746_v40, %v2668_v9  ;;  %v2521_v47 = vpop.f32.mrf.mxu1  ;;  %2980 = vmatmul.f32.gmra.mxu2 %v2915_v28  ;;  %v5316_v9 = vld [vmem:[%s9800_s3 + $0xa58] sm:$0xff]  ;;  %v5297_v28 = vld [vmem:[%s9800_s3 + $0x9c0] sm:$0xff] }
 0x73e   :  { %v2555_v57 = vadd.f32 %v2521_v47, %v7753_v22  ;;  %v2916_v22 = vld [vmem:[#allocation2 + $0x101] sm:$0xff] }
 0x73f   :  { %v2918_v47 = vld [vmem:[#allocation2 + $0x121] sm:$0xff] }
 0x740   :  { %2863 = vmatmul.f32.gmra.mxu1 %v8001_v58  ;;  %v2669_v30 = vadd.f32 %v2635_v4, %v2555_v57  ;;  %v2638_v56 = vpop.f32.mrf.mxu2  ;;  %v5298_v4 = vld [vmem:[%s9800_s3 + $0x9c8] sm:$0xff]  ;;  %v5315_v57 = vld [vmem:[%s9800_s3 + $0xa50] sm:$0xff] }
 0x741   :  { %3091 = vmatmul.f32.gmra.mxu3 %v3028_v21  ;;  %3288 = vmatpush.msra.mxu2 %v5298_v4  ;;  %v5296_v21 = vld [vmem:[%s9800_s3 + $0x9b8] sm:$0xff] }
 0x742   :  { %v2920_v4 = vld [vmem:[#allocation2 + $0x141] sm:$0xff] }
 0x743   :  { %3289 = vmatpush.msra.mxu2 %v5297_v28  ;;  %v5307_v28 = vld [vmem:[%s9800_s3 + $0xa10] sm:$0xff] }
 0x744   :  { %v2749_v42 = vpop.f32.mrf.mxu3 }
 0x745   :  { %v8007_v35 = vadd.f32 %v2749_v42, %v2669_v30  ;;  %v2524_v61 = vpop.f32.mrf.mxu1  ;;  %2983 = vmatmul.f32.gmra.mxu2 %v2916_v22  ;;  %v5314_v42 = vld [vmem:[%s9800_s3 + $0xa48] sm:$0xff] }
 0x746   :  { %v2556_v16 = vadd.f32 %v2524_v61, %v7775_v3  ;;  %v5320_v3 = vld [vmem:[%s9800_s3 + $0xa78] sm:$0xff]  ;;  %v8078_v22 = vld [vmem:[#allocation2 + $0x110] sm:$0xff]  ;;  %3290 = vmatpush.msra.mxu2 %v5296_v21 }
 0x747   :  { %3397 = vmatpush.msra.mxu3 %v5320_v3  ;;  %v5311_v3 = vld [vmem:[%s9800_s3 + $0xa30] sm:$0xff]  ;;  %v5274_v21 = vld [vmem:[%s9800_s3 + $0x908] sm:$0xff] }
 0x748   :  { %2866 = vmatmul.f32.gmra.mxu1 %v2801_v24  ;;  %v2670_v48 = vadd.f32 %v2638_v56, %v2556_v16  ;;  %v2641_v6 = vpop.f32.mrf.mxu2  ;;  %v5281_v56 = vld [vmem:[%s9800_s3 + $0x940] sm:$0xff]  ;;  %v5295_v16 = vld [vmem:[%s9800_s3 + $0x9b0] sm:$0xff] }
 0x749   :  { %3094 = vmatmul.f32.gmra.mxu3 %v7793_v7  ;;  %v2917_v7 = vld [vmem:[#allocation2 + $0x111] sm:$0xff]  ;;  %3175 = vmatpush.msra.mxu1 %v5281_v56 }
 0x74a   :  { %3398 = vmatpush.msra.mxu3 %v5319_v18  ;;  %3291 = vmatpush.msra.mxu2 %v5295_v16  ;;  %v5310_v18 = vld [vmem:[%s9800_s3 + $0xa28] sm:$0xff] }
 0x74b   :  { %3176 = vmatpush.msra.mxu1 %v5280_v46  ;;  %v5306_v56 = vld [vmem:[%s9800_s3 + $0xa08] sm:$0xff] }
 0x74c   :  { %v2752_v13 = vpop.f32.mrf.mxu3  ;;  %3399 = vmatpush.msra.mxu3 %v5318_v29  ;;  %v5309_v29 = vld [vmem:[%s9800_s3 + $0xa20] sm:$0xff]  ;;  %v2921_v16 = vld [vmem:[#allocation2 + $0x151] sm:$0xff] }
 0x74d   :  { %v8029_v50 = vadd.f32 %v2752_v13, %v2670_v48  ;;  %v2527_v17 = vpop.f32.mrf.mxu1  ;;  %2986 = vmatmul.f32.gmra.mxu2 %v2917_v7  ;;  %v2919_v48 = vld [vmem:[#allocation2 + $0x131] sm:$0xff]  ;;  %v5293_v7 = vld [vmem:[%s9800_s3 + $0x9a0] sm:$0xff] }
 0x74e   :  { %v2557_v25 = vadd.f32 %v2527_v17, %v7806_v38  ;;  %3400 = vmatpush.msra.mxu3 %v5317_v52  ;;  %v8112_v17 = vld [vmem:[#allocation2 + $0x120] sm:$0xff] }
 0x74f   :  { %v5276_v52 = vld [vmem:[%s9800_s3 + $0x918] sm:$0xff] }
 0x750   :  { %2869 = vmatmul.f32.gmra.mxu1 %v8047_v2  ;;  %v2671_v38 = vadd.f32 %v2641_v6, %v2557_v25  ;;  %v2644_v51 = vpop.f32.mrf.mxu2  ;;  %3401 = vmatpush.msra.mxu3 %v5316_v9  ;;  %v5279_v6 = vld [vmem:[%s9800_s3 + $0x930] sm:$0xff] }
 0x751   :  { %3097 = vmatmul.f32.gmra.mxu3 %v7824_v63  ;;  %3177 = vmatpush.msra.mxu1 %v5279_v6 }
 0x752   :  { %3402 = vmatpush.msra.mxu3 %v5315_v57 }
 0x753   :  { %3178 = vmatpush.msra.mxu1 %v5278_v55 }
 0x754   :  { %v2755_v40 = vpop.f32.mrf.mxu3  ;;  %3403 = vmatpush.msra.mxu3 %v5314_v42 }
 0x755   :  { %v8060_v63 = vadd.f32 %v2755_v40, %v2671_v38  ;;  %v2530_v37 = vpop.f32.mrf.mxu1  ;;  %2989 = vmatmul.f32.gmra.mxu2 %v2918_v47  ;;  %v5275_v40 = vld [vmem:[%s9800_s3 + $0x910] sm:$0xff] }
 0x756   :  { %v2558_v30 = vadd.f32 %v2530_v37, %v7840_v20  ;;  %3404 = vmatpush.msra.mxu3 %v5313_v54  ;;  %v5290_v37 = vld [vmem:[%s9800_s3 + $0x988] sm:$0xff]  ;;  %v5289_v54 = vld [vmem:[%s9800_s3 + $0x980] sm:$0xff] }
 0x758   :  { %2872 = vmatmul.f32.gmra.mxu1 %v8078_v22  ;;  %v2672_v20 = vadd.f32 %v2644_v51, %v2558_v30  ;;  %v2647_v61 = vpop.f32.mrf.mxu2  ;;  %3405 = vmatpush.msra.mxu3 %v5312_v26  ;;  %v5291_v51 = vld [vmem:[%s9800_s3 + $0x990] sm:$0xff]  ;;  %v8149_v30 = vld [vmem:[#allocation2 + $0x130] sm:$0xff] }
 0x759   :  { %3100 = vmatmul.f32.gmra.mxu3 %v7858_v5  ;;  %v5294_v5 = vld [vmem:[%s9800_s3 + $0x9a8] sm:$0xff] }
 0x75a   :  { %3292 = vmatpush.msra.mxu2 %v5294_v5  ;;  %3406 = vmatpush.msra.mxu3 %v5311_v3  ;;  %v8168_v5 = vld [vmem:[#allocation2 + $0x140] sm:$0xff] }
 0x75c   :  { %v2758_v24 = vpop.f32.mrf.mxu3  ;;  %3293 = vmatpush.msra.mxu2 %v5293_v7  ;;  %3407 = vmatpush.msra.mxu3 %v5310_v18  ;;  %v8175_v18 = vld [vmem:[#allocation2 + $0x150] sm:$0xff] }
 0x75d   :  { %v8094_v14 = vadd.f32 %v2758_v24, %v2672_v20  ;;  %v2533_v59 = vpop.f32.mrf.mxu1  ;;  %2992 = vmatmul.f32.gmra.mxu2 %v2919_v48  ;;  %v5273_v20 = vld [vmem:[%s9800_s3 + $0x900] sm:$0xff] }
 0x75e   :  { %v2559_v13 = vadd.f32 %v2533_v59, %v7880_v45  ;;  %v5277_v45 = vld [vmem:[%s9800_s3 + $0x920] sm:$0xff]  ;;  %3294 = vmatpush.msra.mxu2 %v5292_v41  ;;  %3408 = vmatpush.msra.mxu3 %v5309_v29  ;;  %v5504_v41 = vld [vmem:[%s9802_s5 + $0x438] sm:$0xff] }
 0x75f   :  { %3179 = vmatpush.msra.mxu1 %v5277_v45  ;;  %4670 = vmatpush.msrb.mxu0 %v5504_v41  ;;  %v8233_v41 = vld [vmem:[#allocation2 + $0x84] sm:$0xff] }
 0x760   :  { %2875 = vmatmul.f32.gmra.mxu1 %v8112_v17  ;;  %v2673_v1 = vadd.f32 %v2647_v61, %v2559_v13  ;;  %v2650_v25 = vpop.f32.mrf.mxu2  ;;  %3295 = vmatpush.msra.mxu2 %v5291_v51  ;;  %v5305_v61 = vld [vmem:[%s9800_s3 + $0xa00] sm:$0xff] }
 0x761   :  { %3103 = vmatmul.f32.gmra.mxu3 %v7895_v0  ;;  %v5308_v0 = vld [vmem:[%s9800_s3 + $0xa18] sm:$0xff]  ;;  %3180 = vmatpush.msra.mxu1 %v5276_v52 }
 0x762   :  { %3409 = vmatpush.msra.mxu3 %v5308_v0  ;;  %3296 = vmatpush.msra.mxu2 %v5290_v37  ;;  %v2922_v13 = vld [vmem:[#allocation2 + $0x161] sm:$0xff] }
 0x763   :  { %3181 = vmatpush.msra.mxu1 %v5275_v40  ;;  %v8185_v52 = vld [vmem:[#allocation2 + $0x162] sm:$0xff] }
 0x764   :  { %v2761_v38 = vpop.f32.mrf.mxu3  ;;  %3410 = vmatpush.msra.mxu3 %v5307_v28  ;;  %3297 = vmatpush.msra.mxu2 %v5289_v54  ;;  %v8187_v0 = vld [vmem:[#allocation2 + $0x160] sm:$0xff] }
 0x765   :  { %v8134_v9 = vadd.f32 %v2761_v38, %v2673_v1  ;;  %v2536_v47 = vpop.f32.mrf.mxu1  ;;  %2995 = vmatmul.f32.gmra.mxu2 %v2920_v4  ;;  %3182 = vmatpush.msra.mxu1 %v5274_v21  ;;  %v8193_v40 = vld [vmem:[#allocation2 + $0x44] sm:$0xff] }
 0x766   :  { %v2560_v57 = vadd.f32 %v2536_v47, %v7911_v49  ;;  %3411 = vmatpush.msra.mxu3 %v5306_v56  ;;  %v3135_v47 = vld [vmem:[#allocation2 + $0x33] sm:$0xff] }
 0x767   :  { %3183 = vmatpush.msra.mxu1 %v5273_v20  ;;  %v8204_v20 = vld [vmem:[#allocation2 + $0x43] sm:$0xff] }
 0x768   :  { %2878 = vmatmul.f32.gmra.mxu1 %v8149_v30  ;;  %v2674_v49 = vadd.f32 %v2650_v25, %v2560_v57  ;;  %v2653_v42 = vpop.f32.mrf.mxu2  ;;  %3412 = vmatpush.msra.mxu3 %v5305_v61  ;;  %v3249_v25 = vld [vmem:[#allocation2 + $0x34] sm:$0xff] }
 0x769   :  { %3106 = vmatmul.f32.gmra.mxu3 %v7917_v53 }
 0x76c   :  { %v2764_v46 = vpop.f32.mrf.mxu3 }
 0x76d   :  { %v8165_v53 = vadd.f32 %v2764_v46, %v2674_v49  ;;  %v2539_v26 = vpop.f32.mrf.mxu1  ;;  %2998 = vmatmul.f32.gmra.mxu2 %v2921_v16  ;;  %v8200_v49 = vld [vmem:[#allocation2 + $0x54] sm:$0xff]  ;;  %v8210_v16 = vld [vmem:[#allocation2 + $0x64] sm:$0xff] }
 0x76e   :  { %v2561_v24 = vadd.f32 %v2539_v26, %v7921_v11 }
 0x770   :  { %2881 = vmatmul.f32.gmra.mxu1 %v8168_v5  ;;  %v2675_v48 = vadd.f32 %v2653_v42, %v2561_v24  ;;  %v2656_v6 = vpop.f32.mrf.mxu2 }
 0x771   :  { %3109 = vmatmul.f32.gmra.mxu3 %v7924_v8 }
 0x774   :  { %v2767_v3 = vpop.f32.mrf.mxu3 }
 0x775   :  { %v8172_v59 = vadd.f32 %v2767_v3, %v2675_v48  ;;  %v2542_v55 = vpop.f32.mrf.mxu1  ;;  %3001 = vmatmul.f32.gmra.mxu2 %v2922_v13  ;;  %v8214_v48 = vld [vmem:[#allocation2 + $0x53] sm:$0xff] }
 0x776   :  { %v2562_v7 = vadd.f32 %v2542_v55, %v7928_v12  ;;  %v8220_v13 = vld [vmem:[#allocation2 + $0x74] sm:$0xff] }
 0x778   :  { %2884 = vmatmul.f32.gmra.mxu1 %v8175_v18  ;;  %v2676_v11 = vadd.f32 %v2656_v6, %v2562_v7  ;;  %v2659_v45 = vpop.f32.mrf.mxu2 }
 0x779   :  { %3112 = vmatmul.f32.gmra.mxu3 %v7931_v34 }
 0x77c   :  { %v2770_v1 = vpop.f32.mrf.mxu3 }
 0x77d   :  { %v8179_v8 = vadd.f32 %v2770_v1, %v2676_v11  ;;  %v2545_v29 = vpop.f32.mrf.mxu1  ;;  %3298 = vmatmul.f32.vlgmr.msra.gmra.mxu2 %v3249_v25  ;;  %v8227_v11 = vld [vmem:[#allocation2 + $0x63] sm:$0xff] }
 0x77e   :  { %v2563_v12 = vadd.f32 %v2545_v29, %v7934_v10 }
 0x780   :  { %2887 = vmatmul.f32.gmra.mxu1 %v8187_v0  ;;  %v2677_v34 = vadd.f32 %v2659_v45, %v2563_v12  ;;  %v2957_v38 = vpop.f32.mrf.mxu2  ;;  %v5335_v12 = vld [vmem:[%s9800_s3 + $0xaf0] sm:$0xff] }
 0x781   :  { %3115 = vmatmul.f32.gmra.mxu3 %v8185_v52 }
 0x784   :  { %v2773_v51 = vpop.f32.mrf.mxu3 }
 0x785   :  { %v8191_v4 = vadd.f32 %v2773_v51, %v2677_v34  ;;  %v2843_v28 = vpop.f32.mrf.mxu1  ;;  %3301 = vmatmul.f32.gmra.mxu2 %v8193_v40  ;;  %v8240_v34 = vld [vmem:[#allocation2 + $0x73] sm:$0xff] }
 0x786   :  { %v2891_v10 = vadd.f32 %v2843_v28, %v7938_v36 }
 0x788   :  { %3184 = vmatmul.f32.vlgmr.msra.gmra.mxu1 %v3135_v47  ;;  %v3005_v57 = vadd.f32 %v2957_v38, %v2891_v10  ;;  %v2960_v37 = vpop.f32.mrf.mxu2  ;;  %v8246_v10 = vld [vmem:[#allocation2 + $0x94] sm:$0xff] }
 0x789   :  { %3413 = vmatmul.f32.vlgmr.msra.gmra.mxu3 %v7941_v39 }
 0x78c   :  { %v3071_v21 = vpop.f32.mrf.mxu3 }
 0x78d   :  { %v8198_v56 = vadd.f32 %v3071_v21, %v3005_v57  ;;  %v2846_v42 = vpop.f32.mrf.mxu1  ;;  %3304 = vmatmul.f32.gmra.mxu2 %v8200_v49  ;;  %v5334_v57 = vld [vmem:[%s9800_s3 + $0xae8] sm:$0xff] }
 0x78e   :  { %v2892_v54 = vadd.f32 %v2846_v42, %v7945_v15 }
 0x790   :  { %3187 = vmatmul.f32.gmra.mxu1 %v8204_v20  ;;  %v3006_v36 = vadd.f32 %v2960_v37, %v2892_v54  ;;  %v2963_v39 = vpop.f32.mrf.mxu2  ;;  %v8253_v37 = vld [vmem:[#allocation2 + $0x83] sm:$0xff] }
 0x791   :  { %3416 = vmatmul.f32.gmra.mxu3 %v7948_v44 }
 0x794   :  { %v3074_v61 = vpop.f32.mrf.mxu3 }
 0x795   :  { %v8208_v46 = vadd.f32 %v3074_v61, %v3006_v36  ;;  %v2849_v26 = vpop.f32.mrf.mxu1  ;;  %3307 = vmatmul.f32.gmra.mxu2 %v8210_v16  ;;  %v8259_v36 = vld [vmem:[#allocation2 + $0xa4] sm:$0xff] }
 0x796   :  { %v2893_v24 = vadd.f32 %v2849_v26, %v7952_v19  ;;  %v5336_v19 = vld [vmem:[%s9800_s3 + $0xaf8] sm:$0xff]  ;;  %v5333_v61 = vld [vmem:[%s9800_s3 + $0xae0] sm:$0xff]  ;;  %v8266_v26 = vld [vmem:[#allocation2 + $0x93] sm:$0xff] }
 0x797   :  { %3511 = vmatpush.msrb.mxu1 %v5336_v19  ;;  %v8276_v19 = vld [vmem:[#allocation2 + $0xa3] sm:$0xff] }
 0x798   :  { %3190 = vmatmul.f32.gmra.mxu1 %v8214_v48  ;;  %v3007_v15 = vadd.f32 %v2963_v39, %v2893_v24  ;;  %v2966_v44 = vpop.f32.mrf.mxu2 }
 0x799   :  { %3419 = vmatmul.f32.gmra.mxu3 %v7958_v27  ;;  %3512 = vmatpush.msrb.mxu1 %v5335_v12  ;;  %v5352_v12 = vld [vmem:[%s9800_s3 + $0xb78] sm:$0xff] }
 0x79a   :  { %3625 = vmatpush.msrb.mxu2 %v5352_v12  ;;  %v8343_v12 = vld [vmem:[#allocation2 + $0x124] sm:$0xff] }
 0x79b   :  { %3513 = vmatpush.msrb.mxu1 %v5334_v57 }
 0x79c   :  { %v3077_v6 = vpop.f32.mrf.mxu3 }
 0x79d   :  { %v8218_v3 = vadd.f32 %v3077_v6, %v3007_v15  ;;  %v2852_v55 = vpop.f32.mrf.mxu1  ;;  %3310 = vmatmul.f32.gmra.mxu2 %v8220_v13  ;;  %3514 = vmatpush.msrb.mxu1 %v5333_v61  ;;  %v3257_v6 = vld [vmem:[#allocation2 + $0xf4] sm:$0xff] }
 0x79e   :  { %v2894_v7 = vadd.f32 %v2852_v55, %v7962_v62  ;;  %v5367_v61 = vld [vmem:[%s9800_s3 + $0xbf0] sm:$0xff] }
 0x7a0   :  { %3193 = vmatmul.f32.gmra.mxu1 %v8227_v11  ;;  %v3008_v27 = vadd.f32 %v2966_v44, %v2894_v7  ;;  %v2969_v45 = vpop.f32.mrf.mxu2  ;;  %v5332_v7 = vld [vmem:[%s9800_s3 + $0xad8] sm:$0xff] }
 0x7a1   :  { %3422 = vmatmul.f32.gmra.mxu3 %v7968_v43  ;;  %3515 = vmatpush.msrb.mxu1 %v5332_v7  ;;  %v8328_v7 = vld [vmem:[#allocation2 + $0x103] sm:$0xff] }
 0x7a4   :  { %v3080_v1 = vpop.f32.mrf.mxu3 }
 0x7a5   :  { %v8231_v25 = vadd.f32 %v3080_v1, %v3008_v27  ;;  %v2855_v29 = vpop.f32.mrf.mxu1  ;;  %3313 = vmatmul.f32.gmra.mxu2 %v8233_v41  ;;  %v3371_v27 = vld [vmem:[#allocation2 + $0xb0] sm:$0xff] }
 0x7a6   :  { %v2895_v62 = vadd.f32 %v2855_v29, %v7972_v23 }
 0x7a8   :  { %3196 = vmatmul.f32.gmra.mxu1 %v8240_v34  ;;  %v3009_v43 = vadd.f32 %v2969_v45, %v2895_v62  ;;  %v2972_v38 = vpop.f32.mrf.mxu2  ;;  %v8281_v62 = vld [vmem:[#allocation2 + $0x104] sm:$0xff] }
 0x7a9   :  { %3425 = vmatmul.f32.gmra.mxu3 %v7978_v31 }
 0x7ac   :  { %v3083_v51 = vpop.f32.mrf.mxu3 }
 0x7ad   :  { %v8244_v28 = vadd.f32 %v3083_v51, %v3009_v43  ;;  %v2858_v47 = vpop.f32.mrf.mxu1  ;;  %3316 = vmatmul.f32.gmra.mxu2 %v8246_v10  ;;  %v5331_v51 = vld [vmem:[%s9800_s3 + $0xad0] sm:$0xff] }
 0x7ae   :  { %v2896_v23 = vadd.f32 %v2858_v47, %v7982_v32  ;;  %v5351_v47 = vld [vmem:[%s9800_s3 + $0xb70] sm:$0xff]  ;;  %3516 = vmatpush.msrb.mxu1 %v5331_v51  ;;  %v5345_v51 = vld [vmem:[%s9800_s3 + $0xb40] sm:$0xff] }
 0x7af   :  { %3626 = vmatpush.msrb.mxu2 %v5351_v47 }
 0x7b0   :  { %3199 = vmatmul.f32.gmra.mxu1 %v8253_v37  ;;  %v3010_v31 = vadd.f32 %v2972_v38, %v2896_v23  ;;  %v2975_v21 = vpop.f32.mrf.mxu2  ;;  %v3143_v23 = vld [vmem:[#allocation2 + $0xf3] sm:$0xff] }
 0x7b1   :  { %3428 = vmatmul.f32.gmra.mxu3 %v7991_v60 }
 0x7b4   :  { %v3086_v42 = vpop.f32.mrf.mxu3 }
 0x7b5   :  { %v8257_v54 = vadd.f32 %v3086_v42, %v3010_v31  ;;  %v2861_v39 = vpop.f32.mrf.mxu1  ;;  %3319 = vmatmul.f32.gmra.mxu2 %v8259_v36 }
 0x7b6   :  { %v2897_v32 = vadd.f32 %v2861_v39, %v7995_v33  ;;  %v5349_v39 = vld [vmem:[%s9800_s3 + $0xb60] sm:$0xff] }
 0x7b8   :  { %3202 = vmatmul.f32.gmra.mxu1 %v8266_v26  ;;  %v3011_v60 = vadd.f32 %v2975_v21, %v2897_v32  ;;  %v2978_v24 = vpop.f32.mrf.mxu2  ;;  %v5350_v21 = vld [vmem:[%s9800_s3 + $0xb68] sm:$0xff] }
 0x7b9   :  { %3431 = vmatmul.f32.gmra.mxu3 %v8001_v58  ;;  %3627 = vmatpush.msrb.mxu2 %v5350_v21 }
 0x7bb   :  { %3628 = vmatpush.msrb.mxu2 %v5349_v39  ;;  %v5328_v39 = vld [vmem:[%s9800_s3 + $0xab8] sm:$0xff] }
 0x7bc   :  { %v3089_v15 = vpop.f32.mrf.mxu3 }
 0x7bd   :  { %v8270_v44 = vadd.f32 %v3089_v15, %v3011_v60  ;;  %v2864_v55 = vpop.f32.mrf.mxu1  ;;  %3322 = vmatmul.f32.gmra.mxu2 %v3257_v6  ;;  %v5330_v6 = vld [vmem:[%s9800_s3 + $0xac8] sm:$0xff] }
 0x7be   :  { %v2898_v33 = vadd.f32 %v2864_v55, %v8007_v35  ;;  %v5503_v35 = vld [vmem:[%s9802_s5 + $0x430] sm:$0xff]  ;;  %v5366_v55 = vld [vmem:[%s9800_s3 + $0xbe8] sm:$0xff]  ;;  %3517 = vmatpush.msrb.mxu1 %v5330_v6 }
 0x7bf   :  { %4671 = vmatpush.msrb.mxu0 %v5503_v35  ;;  %v5346_v35 = vld [vmem:[%s9800_s3 + $0xb48] sm:$0xff]  ;;  %v5327_v6 = vld [vmem:[%s9800_s3 + $0xab0] sm:$0xff] }
 0x7c0   :  { %3205 = vmatmul.f32.gmra.mxu1 %v8276_v19  ;;  %v3012_v58 = vadd.f32 %v2978_v24, %v2898_v33  ;;  %v2981_v45 = vpop.f32.mrf.mxu2  ;;  %v5348_v24 = vld [vmem:[%s9800_s3 + $0xb58] sm:$0xff]  ;;  %v5365_v33 = vld [vmem:[%s9800_s3 + $0xbe0] sm:$0xff] }
 0x7c1   :  { %3434 = vmatmul.f32.gmra.mxu3 %v3371_v27  ;;  %3629 = vmatpush.msrb.mxu2 %v5348_v24 }
 0x7c4   :  { %v3092_v1 = vpop.f32.mrf.mxu3 }
 0x7c5   :  { %v8279_v29 = vadd.f32 %v3092_v1, %v3012_v58  ;;  %v2867_v43 = vpop.f32.mrf.mxu1  ;;  %3325 = vmatmul.f32.gmra.mxu2 %v8281_v62  ;;  %v5347_v58 = vld [vmem:[%s9800_s3 + $0xb50] sm:$0xff] }
 0x7c6   :  { %v2899_v38 = vadd.f32 %v2867_v43, %v8029_v50  ;;  %v5368_v50 = vld [vmem:[%s9800_s3 + $0xbf8] sm:$0xff]  ;;  %3630 = vmatpush.msrb.mxu2 %v5347_v58  ;;  %v5363_v43 = vld [vmem:[%s9800_s3 + $0xbd0] sm:$0xff]  ;;  %v5326_v58 = vld [vmem:[%s9800_s3 + $0xaa8] sm:$0xff] }
 0x7c7   :  { %3739 = vmatpush.msrb.mxu3 %v5368_v50  ;;  %v8362_v50 = vld [vmem:[#allocation2 + $0x113] sm:$0xff] }
 0x7c8   :  { %3208 = vmatmul.f32.gmra.mxu1 %v3143_v23  ;;  %v3013_v57 = vadd.f32 %v2981_v45, %v2899_v38  ;;  %v2984_v31 = vpop.f32.mrf.mxu2  ;;  %v5364_v45 = vld [vmem:[%s9800_s3 + $0xbd8] sm:$0xff]  ;;  %3631 = vmatpush.msrb.mxu2 %v5346_v35  ;;  %v5329_v23 = vld [vmem:[%s9800_s3 + $0xac0] sm:$0xff] }
 0x7c9   :  { %3437 = vmatmul.f32.gmra.mxu3 %v8047_v2  ;;  %v8309_v2 = vld [vmem:[#allocation2 + $0x114] sm:$0xff]  ;;  %3518 = vmatpush.msrb.mxu1 %v5329_v23 }
 0x7ca   :  { %3740 = vmatpush.msrb.mxu3 %v5367_v61  ;;  %v5360_v61 = vld [vmem:[%s9800_s3 + $0xbb8] sm:$0xff]  ;;  %3632 = vmatpush.msrb.mxu2 %v5345_v51  ;;  %v5357_v51 = vld [vmem:[%s9800_s3 + $0xba0] sm:$0xff] }
 0x7cb   :  { %3519 = vmatpush.msrb.mxu1 %v5328_v39 }
 0x7cc   :  { %v3095_v42 = vpop.f32.mrf.mxu3  ;;  %3741 = vmatpush.msrb.mxu3 %v5366_v55  ;;  %v5359_v55 = vld [vmem:[%s9800_s3 + $0xbb0] sm:$0xff] }
 0x7cd   :  { %v8307_v32 = vadd.f32 %v3095_v42, %v3013_v57  ;;  %v2870_v60 = vpop.f32.mrf.mxu1  ;;  %3328 = vmatmul.f32.gmra.mxu2 %v8309_v2  ;;  %v5362_v57 = vld [vmem:[%s9800_s3 + $0xbc8] sm:$0xff]  ;;  %v5344_v42 = vld [vmem:[%s9800_s3 + $0xb38] sm:$0xff]  ;;  %3520 = vmatpush.msrb.mxu1 %v5327_v6 }
 0x7ce   :  { %v2900_v15 = vadd.f32 %v2870_v60, %v8060_v63  ;;  %3742 = vmatpush.msrb.mxu3 %v5365_v33  ;;  %3633 = vmatpush.msrb.mxu2 %v5344_v42  ;;  %v5355_v42 = vld [vmem:[%s9800_s3 + $0xb90] sm:$0xff] }
 0x7cf   :  { %3521 = vmatpush.msrb.mxu1 %v5326_v58  ;;  %v8439_v6 = vld [vmem:[#allocation2 + $0x133] sm:$0xff]  ;;  %v5353_v58 = vld [vmem:[%s9800_s3 + $0xb80] sm:$0xff] }
 0x7d0   :  { %3211 = vmatmul.f32.gmra.mxu1 %v8328_v7  ;;  %v3014_v63 = vadd.f32 %v2984_v31, %v2900_v15  ;;  %v2987_v27 = vpop.f32.mrf.mxu2  ;;  %3743 = vmatpush.msrb.mxu3 %v5364_v45  ;;  %v5361_v31 = vld [vmem:[%s9800_s3 + $0xbc0] sm:$0xff]  ;;  %v8380_v15 = vld [vmem:[#allocation2 + $0x134] sm:$0xff] }
 0x7d1   :  { %3440 = vmatmul.f32.gmra.mxu3 %v8078_v22  ;;  %v5358_v45 = vld [vmem:[%s9800_s3 + $0xba8] sm:$0xff] }
 0x7d2   :  { %3744 = vmatpush.msrb.mxu3 %v5363_v43 }
 0x7d4   :  { %v3098_v1 = vpop.f32.mrf.mxu3  ;;  %3745 = vmatpush.msrb.mxu3 %v5362_v57  ;;  %v5340_v57 = vld [vmem:[%s9800_s3 + $0xb18] sm:$0xff] }
 0x7d5   :  { %v8341_v22 = vadd.f32 %v3098_v1, %v3014_v63  ;;  %v2873_v38 = vpop.f32.mrf.mxu1  ;;  %3331 = vmatmul.f32.gmra.mxu2 %v8343_v12  ;;  %v8399_v1 = vld [vmem:[#allocation2 + $0x123] sm:$0xff] }
 0x7d6   :  { %v2901_v47 = vadd.f32 %v2873_v38, %v8094_v14  ;;  %3746 = vmatpush.msrb.mxu3 %v5361_v31  ;;  %v5341_v38 = vld [vmem:[%s9800_s3 + $0xb20] sm:$0xff] }
 0x7d8   :  { %3214 = vmatmul.f32.gmra.mxu1 %v8362_v50  ;;  %v3015_v14 = vadd.f32 %v2987_v27, %v2901_v47  ;;  %v2990_v21 = vpop.f32.mrf.mxu2  ;;  %3747 = vmatpush.msrb.mxu3 %v5360_v61  ;;  %v5342_v27 = vld [vmem:[%s9800_s3 + $0xb28] sm:$0xff]  ;;  %v5324_v47 = vld [vmem:[%s9800_s3 + $0xa98] sm:$0xff] }
 0x7d9   :  { %3443 = vmatmul.f32.gmra.mxu3 %v8112_v17  ;;  %v5343_v17 = vld [vmem:[%s9800_s3 + $0xb30] sm:$0xff] }
 0x7da   :  { %3634 = vmatpush.msrb.mxu2 %v5343_v17  ;;  %3748 = vmatpush.msrb.mxu3 %v5359_v55  ;;  %v5322_v17 = vld [vmem:[%s9800_s3 + $0xa88] sm:$0xff] }
 0x7db   :  { %v5354_v55 = vld [vmem:[%s9800_s3 + $0xb88] sm:$0xff] }
 0x7dc   :  { %v3101_v60 = vpop.f32.mrf.mxu3  ;;  %3635 = vmatpush.msrb.mxu2 %v5342_v27  ;;  %3749 = vmatpush.msrb.mxu3 %v5358_v45  ;;  %v5321_v27 = vld [vmem:[%s9800_s3 + $0xa80] sm:$0xff] }
 0x7dd   :  { %v8378_v24 = vadd.f32 %v3101_v60, %v3015_v14  ;;  %v2876_v33 = vpop.f32.mrf.mxu1  ;;  %3334 = vmatmul.f32.gmra.mxu2 %v8380_v15  ;;  %v8423_v14 = vld [vmem:[#allocation2 + $0x144] sm:$0xff]  ;;  %v5339_v60 = vld [vmem:[%s9800_s3 + $0xb10] sm:$0xff] }
 0x7de   :  { %v2902_v63 = vadd.f32 %v2876_v33, %v8134_v9  ;;  %v5325_v9 = vld [vmem:[%s9800_s3 + $0xaa0] sm:$0xff]  ;;  %3636 = vmatpush.msrb.mxu2 %v5341_v38  ;;  %3750 = vmatpush.msrb.mxu3 %v5357_v51 }
 0x7df   :  { %3522 = vmatpush.msrb.mxu1 %v5325_v9  ;;  %v8464_v51 = vld [vmem:[#allocation2 + $0x143] sm:$0xff] }
 0x7e0   :  { %3217 = vmatmul.f32.gmra.mxu1 %v8399_v1  ;;  %v3016_v35 = vadd.f32 %v2990_v21, %v2902_v63  ;;  %v2993_v43 = vpop.f32.mrf.mxu2  ;;  %v5323_v21 = vld [vmem:[%s9800_s3 + $0xa90] sm:$0xff]  ;;  %3637 = vmatpush.msrb.mxu2 %v5340_v57  ;;  %v5338_v63 = vld [vmem:[%s9800_s3 + $0xb08] sm:$0xff] }
 0x7e1   :  { %3446 = vmatmul.f32.gmra.mxu3 %v8149_v30  ;;  %v5356_v30 = vld [vmem:[%s9800_s3 + $0xb98] sm:$0xff]  ;;  %3523 = vmatpush.msrb.mxu1 %v5324_v47 }
 0x7e2   :  { %3751 = vmatpush.msrb.mxu3 %v5356_v30  ;;  %3638 = vmatpush.msrb.mxu2 %v5339_v60 }
 0x7e3   :  { %3524 = vmatpush.msrb.mxu1 %v5323_v21  ;;  %v8470_v21 = vld [vmem:[#allocation2 + $0x164] sm:$0xff] }
 0x7e4   :  { %v3104_v23 = vpop.f32.mrf.mxu3  ;;  %3752 = vmatpush.msrb.mxu3 %v5355_v42  ;;  %3639 = vmatpush.msrb.mxu2 %v5338_v63  ;;  %v8481_v63 = vld [vmem:[#allocation2 + $0x163] sm:$0xff] }
 0x7e5   :  { %v8421_v31 = vadd.f32 %v3104_v23, %v3016_v35  ;;  %v2879_v39 = vpop.f32.mrf.mxu1  ;;  %3337 = vmatmul.f32.gmra.mxu2 %v8423_v14  ;;  %3525 = vmatpush.msrb.mxu1 %v5322_v17  ;;  %v8460_v35 = vld [vmem:[#allocation2 + $0x154] sm:$0xff] }
 0x7e6   :  { %v2903_v61 = vadd.f32 %v2879_v39, %v8165_v53  ;;  %3753 = vmatpush.msrb.mxu3 %v5354_v55  ;;  %v3592_v55 = vld [vmem:[#allocation2 + $0x42] sm:$0xff] }
 0x7e7   :  { %3526 = vmatpush.msrb.mxu1 %v5321_v27 }
 0x7e8   :  { %3220 = vmatmul.f32.gmra.mxu1 %v8439_v6  ;;  %v3017_v53 = vadd.f32 %v2993_v43, %v2903_v61  ;;  %v2996_v33 = vpop.f32.mrf.mxu2  ;;  %3754 = vmatpush.msrb.mxu3 %v5353_v58 }
 0x7e9   :  { %3449 = vmatmul.f32.gmra.mxu3 %v8168_v5  ;;  %v5337_v5 = vld [vmem:[%s9800_s3 + $0xb00] sm:$0xff] }
 0x7ea   :  { %3640 = vmatpush.msrb.mxu2 %v5337_v5  ;;  %v3593_v5 = vld [vmem:[#allocation2 + $0x52] sm:$0xff] }
 0x7ec   :  { %v3107_v45 = vpop.f32.mrf.mxu3 }
 0x7ed   :  { %v8458_v9 = vadd.f32 %v3107_v45, %v3017_v53  ;;  %v2882_v43 = vpop.f32.mrf.mxu1  ;;  %3340 = vmatmul.f32.gmra.mxu2 %v8460_v35 }
 0x7ee   :  { %v2904_v38 = vadd.f32 %v2882_v43, %v8172_v59  ;;  %v8474_v59 = vld [vmem:[#allocation2 + $0x153] sm:$0xff] }
 0x7f0   :  { %3223 = vmatmul.f32.gmra.mxu1 %v8464_v51  ;;  %v3018_v47 = vadd.f32 %v2996_v33, %v2904_v38  ;;  %v2999_v30 = vpop.f32.mrf.mxu2 }
 0x7f1   :  { %3452 = vmatmul.f32.gmra.mxu3 %v8175_v18 }
 0x7f4   :  { %v3110_v23 = vpop.f32.mrf.mxu3 }
 0x7f5   :  { %v8468_v57 = vadd.f32 %v3110_v23, %v3018_v47  ;;  %v2885_v42 = vpop.f32.mrf.mxu1  ;;  %3343 = vmatmul.f32.gmra.mxu2 %v8470_v21  ;;  %v3478_v47 = vld [vmem:[#allocation2 + $0x41] sm:$0xff] }
 0x7f6   :  { %v2905_v39 = vadd.f32 %v2885_v42, %v8179_v8  ;;  %v5634_v8 = vld [vmem:[#allocation2 + $0x170] sm:$0xff] }
 0x7f8   :  { %3226 = vmatmul.f32.gmra.mxu1 %v8474_v59  ;;  %v3019_v61 = vadd.f32 %v2999_v30, %v2905_v39  ;;  %v3002_v18 = vpop.f32.mrf.mxu2  ;;  %v3594_v39 = vld [vmem:[#allocation2 + $0x62] sm:$0xff] }
 0x7f9   :  { %3455 = vmatmul.f32.gmra.mxu3 %v8187_v0 }
 0x7fc   :  { %v3113_v60 = vpop.f32.mrf.mxu3 }
 0x7fd   :  { %v8478_v17 = vadd.f32 %v3113_v60, %v3019_v61  ;;  %v2888_v53 = vpop.f32.mrf.mxu1  ;;  %3641 = vmatmul.f32.vlgmr.msrb.gmra.mxu2 %v3592_v55  ;;  %v5502_v61 = vld [vmem:[%s9802_s5 + $0x428] sm:$0xff] }
 0x7fe   :  { %v2906_v33 = vadd.f32 %v2888_v53, %v8191_v4  ;;  %4672 = vmatpush.msrb.mxu0 %v5502_v61 }
 0x800   :  { %3229 = vmatmul.f32.gmra.mxu1 %v8481_v63  ;;  %v3020_v27 = vadd.f32 %v3002_v18, %v2906_v33  ;;  %v3299_v58 = vpop.f32.mrf.mxu2 }
 0x801   :  { %3458 = vmatmul.f32.gmra.mxu3 %v5634_v8  ;;  %v3595_v8 = vld [vmem:[#allocation2 + $0x72] sm:$0xff] }
 0x804   :  { %v3116_v45 = vpop.f32.mrf.mxu3 }
 0x805   :  { %v8484_v0 = vadd.f32 %v3116_v45, %v3020_v27  ;;  %v3185_v43 = vpop.f32.mrf.mxu1  ;;  %3644 = vmatmul.f32.gmra.mxu2 %v3593_v5  ;;  %v3480_v45 = vld [vmem:[#allocation2 + $0x61] sm:$0xff] }
 0x806   :  { %v3233_v38 = vadd.f32 %v3185_v43, %v8198_v56  ;;  %v3479_v56 = vld [vmem:[#allocation2 + $0x51] sm:$0xff] }
 0x808   :  { %3527 = vmatmul.f32.vlgmr.msrb.gmra.mxu1 %v3478_v47  ;;  %v3347_v4 = vadd.f32 %v3299_v58, %v3233_v38  ;;  %v3302_v30 = vpop.f32.mrf.mxu2 }
 0x809   :  { %3755 = vmatmul.f32.vlgmr.msrb.gmra.mxu3 %v8204_v20 }
 0x80c   :  { %v3414_v23 = vpop.f32.mrf.mxu3 }
 0x80d   :  { %v8488_v42 = vadd.f32 %v3414_v23, %v3347_v4  ;;  %v3188_v18 = vpop.f32.mrf.mxu1  ;;  %3647 = vmatmul.f32.gmra.mxu2 %v3594_v39  ;;  %v3481_v23 = vld [vmem:[#allocation2 + $0x71] sm:$0xff] }
 0x80e   :  { %v3234_v60 = vadd.f32 %v3188_v18, %v8208_v46  ;;  %v3597_v18 = vld [vmem:[#allocation2 + $0x92] sm:$0xff] }
 0x810   :  { %3530 = vmatmul.f32.gmra.mxu1 %v3479_v56  ;;  %v3348_v20 = vadd.f32 %v3302_v30, %v3234_v60  ;;  %v3305_v55 = vpop.f32.mrf.mxu2  ;;  %v5384_v30 = vld [vmem:[%s9800_s3 + $0xc78] sm:$0xff] }
 0x811   :  { %3758 = vmatmul.f32.gmra.mxu3 %v8214_v48  ;;  %v3596_v48 = vld [vmem:[#allocation2 + $0x82] sm:$0xff]  ;;  %3853 = vmatpush.msra.mxu1 %v5384_v30 }
 0x814   :  { %v3417_v53 = vpop.f32.mrf.mxu3 }
 0x815   :  { %v8495_v33 = vadd.f32 %v3417_v53, %v3348_v20  ;;  %v3191_v27 = vpop.f32.mrf.mxu1  ;;  %3650 = vmatmul.f32.gmra.mxu2 %v3595_v8  ;;  %v3482_v20 = vld [vmem:[#allocation2 + $0x81] sm:$0xff] }
 0x816   :  { %v3235_v58 = vadd.f32 %v3191_v27, %v8218_v3  ;;  %v3598_v27 = vld [vmem:[#allocation2 + $0xa2] sm:$0xff] }
 0x818   :  { %3533 = vmatmul.f32.gmra.mxu1 %v3480_v45  ;;  %v3349_v5 = vadd.f32 %v3305_v55, %v3235_v58  ;;  %v3308_v46 = vpop.f32.mrf.mxu2 }
 0x819   :  { %3761 = vmatmul.f32.gmra.mxu3 %v8227_v11 }
 0x81c   :  { %v3420_v43 = vpop.f32.mrf.mxu3 }
 0x81d   :  { %v8499_v38 = vadd.f32 %v3420_v43, %v3349_v5  ;;  %v3194_v47 = vpop.f32.mrf.mxu1  ;;  %3653 = vmatmul.f32.gmra.mxu2 %v3596_v48  ;;  %v3483_v5 = vld [vmem:[#allocation2 + $0x91] sm:$0xff] }
 0x81e   :  { %v3236_v4 = vadd.f32 %v3194_v47, %v8231_v25  ;;  %v5383_v25 = vld [vmem:[%s9800_s3 + $0xc70] sm:$0xff] }
 0x81f   :  { %3854 = vmatpush.msra.mxu1 %v5383_v25  ;;  %v3599_v47 = vld [vmem:[#allocation2 + $0xb2] sm:$0xff] }
 0x820   :  { %3536 = vmatmul.f32.gmra.mxu1 %v3481_v23  ;;  %v3350_v3 = vadd.f32 %v3308_v46, %v3236_v4  ;;  %v3311_v11 = vpop.f32.mrf.mxu2  ;;  %v3484_v23 = vld [vmem:[#allocation2 + $0xa1] sm:$0xff]  ;;  %v3485_v25 = vld [vmem:[#allocation2 + $0xb1] sm:$0xff] }
 0x821   :  { %3764 = vmatmul.f32.gmra.mxu3 %v8240_v34 }
 0x824   :  { %v3423_v39 = vpop.f32.mrf.mxu3 }
 0x825   :  { %v8506_v61 = vadd.f32 %v3423_v39, %v3350_v3  ;;  %v3197_v60 = vpop.f32.mrf.mxu1  ;;  %3656 = vmatmul.f32.gmra.mxu2 %v3597_v18  ;;  %v3600_v18 = vld [vmem:[#allocation2 + $0x102] sm:$0xff] }
 0x826   :  { %v3237_v56 = vadd.f32 %v3197_v60, %v8244_v28  ;;  %v5382_v28 = vld [vmem:[%s9800_s3 + $0xc68] sm:$0xff] }
 0x827   :  { %3855 = vmatpush.msra.mxu1 %v5382_v28 }
 0x828   :  { %3539 = vmatmul.f32.gmra.mxu1 %v3482_v20  ;;  %v3351_v34 = vadd.f32 %v3311_v11, %v3237_v56  ;;  %v3314_v55 = vpop.f32.mrf.mxu2  ;;  %v3713_v20 = vld [vmem:[#allocation2 + $0xb3] sm:$0xff] }
 0x829   :  { %3767 = vmatmul.f32.gmra.mxu3 %v8253_v37 }
 0x82c   :  { %v3426_v53 = vpop.f32.mrf.mxu3 }
 0x82d   :  { %v8513_v8 = vadd.f32 %v3426_v53, %v3351_v34  ;;  %v3200_v58 = vpop.f32.mrf.mxu1  ;;  %3659 = vmatmul.f32.gmra.mxu2 %v3598_v27  ;;  %v3601_v27 = vld [vmem:[#allocation2 + $0x112] sm:$0xff] }
 0x82e   :  { %v3238_v45 = vadd.f32 %v3200_v58, %v8257_v54  ;;  %v5381_v54 = vld [vmem:[%s9800_s3 + $0xc60] sm:$0xff] }
 0x82f   :  { %3856 = vmatpush.msra.mxu1 %v5381_v54  ;;  %v5501_v54 = vld [vmem:[%s9802_s5 + $0x420] sm:$0xff] }
 0x830   :  { %3542 = vmatmul.f32.gmra.mxu1 %v3483_v5  ;;  %v3352_v37 = vadd.f32 %v3314_v55, %v3238_v45  ;;  %v3317_v46 = vpop.f32.mrf.mxu2  ;;  %v3486_v45 = vld [vmem:[#allocation2 + $0x101] sm:$0xff]  ;;  %4673 = vmatpush.msrb.mxu0 %v5501_v54 }
 0x831   :  { %3770 = vmatmul.f32.gmra.mxu3 %v8266_v26 }
 0x834   :  { %v3429_v43 = vpop.f32.mrf.mxu3 }
 0x835   :  { %v8520_v48 = vadd.f32 %v3429_v43, %v3352_v37  ;;  %v3203_v4 = vpop.f32.mrf.mxu1  ;;  %3662 = vmatmul.f32.gmra.mxu2 %v3599_v47  ;;  %v3602_v37 = vld [vmem:[#allocation2 + $0x122] sm:$0xff]  ;;  %v5378_v43 = vld [vmem:[%s9800_s3 + $0xc48] sm:$0xff] }
 0x836   :  { %v3239_v30 = vadd.f32 %v3203_v4, %v8270_v44  ;;  %v5380_v44 = vld [vmem:[%s9800_s3 + $0xc58] sm:$0xff]  ;;  %v3487_v47 = vld [vmem:[#allocation2 + $0x111] sm:$0xff] }
 0x837   :  { %3857 = vmatpush.msra.mxu1 %v5380_v44 }
 0x838   :  { %3545 = vmatmul.f32.gmra.mxu1 %v3484_v23  ;;  %v3353_v26 = vadd.f32 %v3317_v46, %v3239_v30  ;;  %v3320_v3 = vpop.f32.mrf.mxu2  ;;  %v3603_v30 = vld [vmem:[#allocation2 + $0x132] sm:$0xff] }
 0x839   :  { %3773 = vmatmul.f32.gmra.mxu3 %v8276_v19 }
 0x83c   :  { %v3432_v11 = vpop.f32.mrf.mxu3 }
 0x83d   :  { %v8527_v39 = vadd.f32 %v3432_v11, %v3353_v26  ;;  %v3206_v60 = vpop.f32.mrf.mxu1  ;;  %3665 = vmatmul.f32.gmra.mxu2 %v3600_v18  ;;  %v5377_v26 = vld [vmem:[%s9800_s3 + $0xc40] sm:$0xff]  ;;  %v5376_v11 = vld [vmem:[%s9800_s3 + $0xc38] sm:$0xff] }
 0x83e   :  { %v3240_v56 = vadd.f32 %v3206_v60, %v8279_v29  ;;  %v5379_v29 = vld [vmem:[%s9800_s3 + $0xc50] sm:$0xff]  ;;  %v3604_v60 = vld [vmem:[#allocation2 + $0x142] sm:$0xff] }
 0x83f   :  { %3858 = vmatpush.msra.mxu1 %v5379_v29  ;;  %v3605_v29 = vld [vmem:[#allocation2 + $0x152] sm:$0xff] }
 0x840   :  { %3548 = vmatmul.f32.gmra.mxu1 %v3485_v25  ;;  %v3354_v19 = vadd.f32 %v3320_v3, %v3240_v56  ;;  %v8533_v34 = vpop.f32.mrf.mxu2  ;;  %v3488_v3 = vld [vmem:[#allocation2 + $0x121] sm:$0xff]  ;;  %v5375_v56 = vld [vmem:[%s9800_s3 + $0xc30] sm:$0xff] }
 0x841   :  { %3776 = vmatmul.f32.gmra.mxu3 %v3713_v20  ;;  %3859 = vmatpush.msra.mxu1 %v5378_v43  ;;  %v5373_v25 = vld [vmem:[%s9800_s3 + $0xc20] sm:$0xff]  ;;  %v3489_v20 = vld [vmem:[#allocation2 + $0x131] sm:$0xff] }
 0x842   :  { %v5369_v43 = vld [vmem:[%s9800_s3 + $0xc00] sm:$0xff] }
 0x843   :  { %3860 = vmatpush.msra.mxu1 %v5377_v26 }
 0x844   :  { %v3435_v55 = vpop.f32.mrf.mxu3 }
 0x845   :  { %v8535_v53 = vadd.f32 %v3435_v55, %v3354_v19  ;;  %v8537_v58 = vpop.f32.mrf.mxu1  ;;  %3668 = vmatmul.f32.gmra.mxu2 %v3601_v27  ;;  %3861 = vmatpush.msra.mxu1 %v5376_v11  ;;  %v5372_v55 = vld [vmem:[%s9800_s3 + $0xc18] sm:$0xff] }
 0x847   :  { %3862 = vmatpush.msra.mxu1 %v5375_v56  ;;  %v3607_v56 = vld [vmem:[#allocation2 + $0x172] sm:$0xff] }
 0x848   :  { %3551 = vmatmul.f32.gmra.mxu1 %v3486_v45  ;;  %v8543_v28 = vpop.f32.mrf.mxu2  ;;  %v5371_v45 = vld [vmem:[%s9800_s3 + $0xc10] sm:$0xff] }
 0x849   :  { %3779 = vmatmul.f32.gmra.mxu3 %v8328_v7 }
 0x84c   :  { %v8545_v5 = vpop.f32.mrf.mxu3 }
 0x84d   :  { %v8547_v46 = vpop.f32.mrf.mxu1  ;;  %3671 = vmatmul.f32.gmra.mxu2 %v3602_v37 }
 0x850   :  { %3554 = vmatmul.f32.gmra.mxu1 %v3487_v47  ;;  %v8553_v4 = vpop.f32.mrf.mxu2  ;;  %v3490_v47 = vld [vmem:[#allocation2 + $0x141] sm:$0xff] }
 0x851   :  { %3782 = vmatmul.f32.gmra.mxu3 %v8362_v50 }
 0x854   :  { %v8555_v7 = vpop.f32.mrf.mxu3 }
 0x855   :  { %v8560_v23 = vpop.f32.mrf.mxu1  ;;  %3674 = vmatmul.f32.gmra.mxu2 %v3603_v30 }
 0x858   :  { %3557 = vmatmul.f32.gmra.mxu1 %v3488_v3  ;;  %v8566_v50 = vpop.f32.mrf.mxu2  ;;  %v3491_v3 = vld [vmem:[#allocation2 + $0x151] sm:$0xff] }
 0x859   :  { %3785 = vmatmul.f32.gmra.mxu3 %v8399_v1  ;;  %v5374_v1 = vld [vmem:[%s9800_s3 + $0xc28] sm:$0xff] }
 0x85a   :  { %3863 = vmatpush.msra.mxu1 %v5374_v1 }
 0x85c   :  { %v8571_v18 = vpop.f32.mrf.mxu3  ;;  %3864 = vmatpush.msra.mxu1 %v5373_v25  ;;  %v3492_v25 = vld [vmem:[#allocation2 + $0x161] sm:$0xff] }
 0x85d   :  { %v8576_v44 = vpop.f32.mrf.mxu1  ;;  %3677 = vmatmul.f32.gmra.mxu2 %v3604_v60 }
 0x85e   :  { %3865 = vmatpush.msra.mxu1 %v5372_v55 }
 0x860   :  { %3560 = vmatmul.f32.gmra.mxu1 %v3489_v20  ;;  %v8585_v19 = vpop.f32.mrf.mxu2 }
 0x861   :  { %3788 = vmatmul.f32.gmra.mxu3 %v8439_v6  ;;  %3866 = vmatpush.msra.mxu1 %v5371_v45  ;;  %v5370_v6 = vld [vmem:[%s9800_s3 + $0xc08] sm:$0xff] }
 0x863   :  { %3867 = vmatpush.msra.mxu1 %v5370_v6  ;;  %v3493_v6 = vld [vmem:[#allocation2 + $0x171] sm:$0xff] }
 0x864   :  { %v8590_v27 = vpop.f32.mrf.mxu3 }
 0x865   :  { %v8595_v37 = vpop.f32.mrf.mxu1  ;;  %3680 = vmatmul.f32.gmra.mxu2 %v3605_v29  ;;  %3868 = vmatpush.msra.mxu1 %v5369_v43  ;;  %v3721_v43 = vld [vmem:[#allocation2 + $0x173] sm:$0xff] }
 0x868   :  { %3563 = vmatmul.f32.gmra.mxu1 %v3490_v47  ;;  %v8604_v30 = vpop.f32.mrf.mxu2 }
 0x869   :  { %3791 = vmatmul.f32.gmra.mxu3 %v8464_v51 }
 0x86c   :  { %v8606_v54 = vpop.f32.mrf.mxu3 }
 0x86d   :  { %v8608_v26 = vpop.f32.mrf.mxu1  ;;  %3683 = vmatmul.f32.gmra.mxu2 %v8185_v52 }
 0x870   :  { %3566 = vmatmul.f32.gmra.mxu1 %v3491_v3  ;;  %v3341_v11 = vpop.f32.mrf.mxu2 }
 0x871   :  { %3794 = vmatmul.f32.gmra.mxu3 %v8474_v59 }
 0x874   :  { %v8612_v60 = vpop.f32.mrf.mxu3 }
 0x875   :  { %v3227_v1 = vpop.f32.mrf.mxu1  ;;  %3686 = vmatmul.f32.gmra.mxu2 %v3607_v56 }
 0x876   :  { %v3247_v51 = vadd.f32 %v3227_v1, %v8478_v17 }
 0x878   :  { %3569 = vmatmul.f32.gmra.mxu1 %v3492_v25  ;;  %v3361_v20 = vadd.f32 %v3341_v11, %v3247_v51  ;;  %v3344_v55 = vpop.f32.mrf.mxu2 }
 0x879   :  { %3797 = vmatmul.f32.gmra.mxu3 %v8481_v63 }
 0x87c   :  { %v3456_v29 = vpop.f32.mrf.mxu3 }
 0x87d   :  { %v8616_v52 = vadd.f32 %v3456_v29, %v3361_v20  ;;  %v3230_v45 = vpop.f32.mrf.mxu1 }
 0x87e   :  { %v3248_v59 = vadd.f32 %v3230_v45, %v8484_v0 }
 0x880   :  { %3572 = vmatmul.f32.gmra.mxu1 %v3493_v6  ;;  %v3362_v47 = vadd.f32 %v3344_v55, %v3248_v59  ;;  %v3642_v3 = vpop.f32.mrf.mxu2 }
 0x881   :  { %3800 = vmatmul.f32.gmra.mxu3 %v3721_v43 }
 0x884   :  { %v3459_v56 = vpop.f32.mrf.mxu3 }
 0x885   :  { %v8619_v17 = vadd.f32 %v3459_v56, %v3362_v47  ;;  %v3528_v1 = vpop.f32.mrf.mxu1 }
 0x886   :  { %v3576_v63 = vadd.f32 %v3528_v1, %v8488_v42 }
 0x888   :  { %3869 = vmatmul.f32.vlgmr.msra.gmra.mxu1 %v8193_v40  ;;  %v3690_v11 = vadd.f32 %v3642_v3, %v3576_v63  ;;  %v3645_v51 = vpop.f32.mrf.mxu2 }
 0x88c   :  { %v3756_v25 = vpop.f32.mrf.mxu3 }
 0x88d   :  { %v8623_v20 = vadd.f32 %v3756_v25, %v3690_v11  ;;  %v3531_v0 = vpop.f32.mrf.mxu1 }
 0x88e   :  { %v3577_v29 = vadd.f32 %v3531_v0, %v8495_v33  ;;  %v5500_v33 = vld [vmem:[%s9802_s5 + $0x418] sm:$0xff] }
 0x88f   :  { %4674 = vmatpush.msrb.mxu0 %v5500_v33 }
 0x890   :  { %3872 = vmatmul.f32.gmra.mxu1 %v8200_v49  ;;  %v3691_v55 = vadd.f32 %v3645_v51, %v3577_v29  ;;  %v3648_v45 = vpop.f32.mrf.mxu2 }
 0x894   :  { %v3759_v59 = vpop.f32.mrf.mxu3 }
 0x895   :  { %v8627_v6 = vadd.f32 %v3759_v59, %v3691_v55  ;;  %v3534_v43 = vpop.f32.mrf.mxu1 }
 0x896   :  { %v3578_v42 = vadd.f32 %v3534_v43, %v8499_v38 }
 0x898   :  { %3875 = vmatmul.f32.gmra.mxu1 %v8210_v16  ;;  %v3692_v40 = vadd.f32 %v3648_v45, %v3578_v42  ;;  %v3651_v47 = vpop.f32.mrf.mxu2 }
 0x89c   :  { %v3762_v3 = vpop.f32.mrf.mxu3 }
 0x89d   :  { %v8631_v56 = vadd.f32 %v3762_v3, %v3692_v40  ;;  %v3537_v49 = vpop.f32.mrf.mxu1 }
 0x89e   :  { %v3579_v1 = vadd.f32 %v3537_v49, %v8506_v61 }
 0x8a0   :  { %3878 = vmatmul.f32.gmra.mxu1 %v8220_v13  ;;  %v3693_v63 = vadd.f32 %v3651_v47, %v3579_v1  ;;  %v3654_v11 = vpop.f32.mrf.mxu2 }
 0x8a4   :  { %v3765_v38 = vpop.f32.mrf.mxu3 }
 0x8a5   :  { %v8638_v51 = vadd.f32 %v3765_v38, %v3693_v63  ;;  %v3540_v16 = vpop.f32.mrf.mxu1 }
 0x8a6   :  { %v3580_v25 = vadd.f32 %v3540_v16, %v8513_v8 }
 0x8a8   :  { %3881 = vmatmul.f32.gmra.mxu1 %v8233_v41  ;;  %v3694_v0 = vadd.f32 %v3654_v11, %v3580_v25  ;;  %v3657_v55 = vpop.f32.mrf.mxu2 }
 0x8ac   :  { %v3768_v29 = vpop.f32.mrf.mxu3 }
 0x8ad   :  { %v8642_v45 = vadd.f32 %v3768_v29, %v3694_v0  ;;  %v3543_v59 = vpop.f32.mrf.mxu1  ;;  %v3244_v29 = vadd.f32 %v8576_v44, %v8421_v31 }
 0x8ae   :  { %v3581_v61 = vadd.f32 %v3543_v59, %v8520_v48  ;;  %v3827_v48 = vld [vmem:[#allocation2 + $0xb4] sm:$0xff] }
 0x8b0   :  { %3884 = vmatmul.f32.gmra.mxu1 %v8246_v10  ;;  %v3695_v13 = vadd.f32 %v3657_v55, %v3581_v61  ;;  %v3660_v47 = vpop.f32.mrf.mxu2 }
 0x8b4   :  { %v3771_v43 = vpop.f32.mrf.mxu3 }
 0x8b5   :  { %v8646_v42 = vadd.f32 %v3771_v43, %v3695_v13  ;;  %v3546_v40 = vpop.f32.mrf.mxu1  ;;  %v4310_v13 = vld [vmem:[%s9802_s5 + $0x70] sm:$0xff]  ;;  %v4309_v43 = vld [vmem:[%s9802_s5 + $0x68] sm:$0xff] }
 0x8b6   :  { %v3582_v8 = vadd.f32 %v3546_v40, %v8527_v39 }
 0x8b8   :  { %3887 = vmatmul.f32.gmra.mxu1 %v8259_v36  ;;  %v3696_v41 = vadd.f32 %v3660_v47, %v3582_v8  ;;  %v3663_v63 = vpop.f32.mrf.mxu2  ;;  %v3243_v36 = vadd.f32 %v8560_v23, %v8378_v24 }
 0x8bc   :  { %v3774_v3 = vpop.f32.mrf.mxu3 }
 0x8bd   :  { %v8650_v33 = vadd.f32 %v3774_v3, %v3696_v41  ;;  %v3549_v49 = vpop.f32.mrf.mxu1  ;;  %v5398_v3 = vld [vmem:[%s9802_s5 + $0xe8] sm:$0xff] }
 0x8be   :  { %v3583_v1 = vadd.f32 %v3549_v49, %v8535_v53  ;;  %v3357_v53 = vadd.f32 %v8553_v4, %v3243_v36  ;;  %v4308_v49 = vld [vmem:[%s9802_s5 + $0x60] sm:$0xff] }
 0x8c0   :  { %3890 = vmatmul.f32.gmra.mxu1 %v3827_v48  ;;  %v3697_v10 = vadd.f32 %v3663_v63, %v3583_v1  ;;  %v3472_v25 = vadd.f32 %v8571_v18, %v3357_v53  ;;  %v5397_v63 = vld [vmem:[%s9802_s5 + $0xe0] sm:$0xff]  ;;  %v4305_v53 = vld [vmem:[%s9802_s5 + $0x48] sm:$0xff] }
 0x8c4   :  { %v3777_v11 = vpop.f32.mrf.mxu3 }
 0x8c5   :  { %v8653_v38 = vadd.f32 %v3777_v11, %v3697_v10  ;;  %v8655_v16 = vpop.f32.mrf.mxu1  ;;  %v4306_v11 = vld [vmem:[%s9802_s5 + $0x50] sm:$0xff] }
 0x8c8   :  { %3893 = vmatmul.f32.gmra.mxu1 %v8281_v62  ;;  %v3358_v62 = vadd.f32 %v8566_v50, %v3244_v29  ;;  %v3246_v50 = vadd.f32 %v8608_v26, %v8468_v57  ;;  %v4311_v57 = vld [vmem:[%s9802_s5 + $0x78] sm:$0xff]  ;;  %v8702_v26 = vpop.f32.mrf.mxu2  ;;  %v5394_v29 = vld [vmem:[%s9802_s5 + $0xc8] sm:$0xff] }
 0x8c9   :  { %4318 = vmatpush.msra.mxu2 %v4311_v57 }
 0x8ca   :  { %v3473_v59 = vadd.f32 %v8590_v27, %v3358_v62  ;;  %v4303_v62 = vld [vmem:[%s9802_s5 + $0x38] sm:$0xff] }
 0x8cb   :  { %4319 = vmatpush.msra.mxu2 %v4310_v13  ;;  %v4296_v13 = vld [vmem:[%s9802_s5] sm:$0xff] }
 0x8cd   :  { %v8658_v39 = vpop.f32.mrf.mxu1  ;;  %4320 = vmatpush.msra.mxu2 %v4309_v43 }
 0x8cf   :  { %4321 = vmatpush.msra.mxu2 %v4308_v49  ;;  %v5498_v49 = vld [vmem:[%s9802_s5 + $0x408] sm:$0xff] }
 0x8d0   :  { %3896 = vmatmul.f32.gmra.mxu1 %v8309_v2  ;;  %v3245_v2 = vadd.f32 %v8595_v37, %v8458_v9  ;;  %v3360_v9 = vadd.f32 %v8604_v30, %v3246_v50 }
 0x8d2   :  { %v3359_v4 = vadd.f32 %v8585_v19, %v3245_v2 }
 0x8d4   :  { %v3474_v31 = vadd.f32 %v8606_v54, %v3359_v4  ;;  %v3835_v54 = vld [vmem:[#allocation2 + $0x174] sm:$0xff] }
 0x8d5   :  { %v3558_v0 = vpop.f32.mrf.mxu1  ;;  %v4302_v4 = vld [vmem:[%s9802_s5 + $0x30] sm:$0xff] }
 0x8d6   :  { %v8667_v55 = vadd.f32 %v3558_v0, %v3472_v25  ;;  %v5395_v25 = vld [vmem:[%s9802_s5 + $0xd0] sm:$0xff]  ;;  %v4304_v0 = vld [vmem:[%s9802_s5 + $0x40] sm:$0xff] }
 0x8d8   :  { %3899 = vmatmul.f32.gmra.mxu1 %v8343_v12  ;;  %v5499_v12 = vld [vmem:[%s9802_s5 + $0x410] sm:$0xff] }
 0x8d9   :  { %4675 = vmatpush.msrb.mxu0 %v5499_v12 }
 0x8db   :  { %4676 = vmatpush.msrb.mxu0 %v5498_v49  ;;  %v5409_v49 = vld [vmem:[%s9802_s5 + $0x140] sm:$0xff] }
 0x8dd   :  { %v3561_v61 = vpop.f32.mrf.mxu1 }
 0x8de   :  { %v8674_v24 = vadd.f32 %v3561_v61, %v3473_v59  ;;  %v5393_v59 = vld [vmem:[%s9802_s5 + $0xc0] sm:$0xff] }
 0x8e0   :  { %3902 = vmatmul.f32.gmra.mxu1 %v8380_v15  ;;  %v3475_v15 = vadd.f32 %v8612_v60, %v3360_v9 }
 0x8e5   :  { %v3564_v23 = vpop.f32.mrf.mxu1 }
 0x8e6   :  { %v8684_v18 = vadd.f32 %v3564_v23, %v3474_v31  ;;  %v5392_v31 = vld [vmem:[%s9802_s5 + $0xb8] sm:$0xff]  ;;  %v4301_v23 = vld [vmem:[%s9802_s5 + $0x28] sm:$0xff] }
 0x8e8   :  { %3905 = vmatmul.f32.gmra.mxu1 %v8423_v14 }
 0x8ed   :  { %v3567_v44 = vpop.f32.mrf.mxu1 }
 0x8ee   :  { %v8689_v19 = vadd.f32 %v3567_v44, %v3475_v15  ;;  %v4300_v15 = vld [vmem:[%s9802_s5 + $0x20] sm:$0xff]  ;;  %v5390_v44 = vld [vmem:[%s9802_s5 + $0xa8] sm:$0xff] }
 0x8f0   :  { %3908 = vmatmul.f32.gmra.mxu1 %v8460_v35  ;;  %v8704_v35 = vpop.f32.mrf.mxu3 }
 0x8f5   :  { %v3570_v27 = vpop.f32.mrf.mxu1 }
 0x8f6   :  { %v8693_v37 = vadd.f32 %v3570_v27, %v8616_v52 }
 0x8f8   :  { %3911 = vmatmul.f32.gmra.mxu1 %v8470_v21  ;;  %v5400_v21 = vld [vmem:[%s9802_s5 + $0xf8] sm:$0xff]  ;;  %v8722_v8 = vpop.f32.mrf.mxu3 }
 0x8f9   :  { %4361 = vmatpush.msra.mxu3 %v5400_v21  ;;  %v5387_v21 = vld [vmem:[%s9802_s5 + $0x90] sm:$0xff] }
 0x8fd   :  { %v3573_v14 = vpop.f32.mrf.mxu1 }
 0x8fe   :  { %v8700_v30 = vadd.f32 %v3573_v14, %v8619_v17  ;;  %v5399_v17 = vld [vmem:[%s9802_s5 + $0xf0] sm:$0xff]  ;;  %v4299_v14 = vld [vmem:[%s9802_s5 + $0x18] sm:$0xff] }
 0x8ff   :  { %4362 = vmatpush.msra.mxu3 %v5399_v17  ;;  %v5386_v17 = vld [vmem:[%s9802_s5 + $0x88] sm:$0xff] }
 0x900   :  { %3914 = vmatmul.f32.gmra.mxu1 %v3835_v54  ;;  %v8747_v36 = vpop.f32.mrf.mxu3  ;;  %v5389_v54 = vld [vmem:[%s9802_s5 + $0xa0] sm:$0xff] }
 0x901   :  { %4363 = vmatpush.msra.mxu3 %v5398_v3  ;;  %v5385_v3 = vld [vmem:[%s9802_s5 + $0x80] sm:$0xff] }
 0x903   :  { %4364 = vmatpush.msra.mxu3 %v5397_v63 }
 0x905   :  { %v3870_v60 = vpop.f32.mrf.mxu1 }
 0x906   :  { %v3918_v52 = vadd.f32 %v3870_v60, %v8623_v20  ;;  %v8719_v20 = vpop.f32.mrf.mxu2  ;;  %v4298_v60 = vld [vmem:[%s9802_s5 + $0x10] sm:$0xff] }
 0x908   :  { %v8784_v9 = vpop.f32.mrf.mxu3 }
 0x90d   :  { %v3873_v40 = vpop.f32.mrf.mxu1 }
 0x90e   :  { %v3919_v47 = vadd.f32 %v3873_v40, %v8627_v6  ;;  %v4307_v6 = vld [vmem:[%s9802_s5 + $0x58] sm:$0xff]  ;;  %v8739_v10 = vpop.f32.mrf.mxu2 }
 0x90f   :  { %4322 = vmatpush.msra.mxu2 %v4307_v6  ;;  %v5416_v40 = vld [vmem:[%s9802_s5 + $0x178] sm:$0xff] }
 0x910   :  { %v8724_v41 = vmax.f32 %v3918_v52, %v3919_v47  ;;  %v5388_v52 = vld [vmem:[%s9802_s5 + $0x98] sm:$0xff] }
 0x911   :  { %4323 = vmatpush.msra.mxu2 %v4306_v11  ;;  %v5415_v11 = vld [vmem:[%s9802_s5 + $0x170] sm:$0xff] }
 0x912   :  { %v3950_v47 = vrot.slane %v8724_v41, 2  ;;  %v3952_v6 = vrot.slane %v8724_v41, 6 }
 0x913   :  { %4324 = vmatpush.msra.mxu2 %v4305_v53 }
 0x915   :  { %v3876_v1 = vpop.f32.mrf.mxu1  ;;  %4325 = vmatpush.msra.mxu2 %v4304_v0  ;;  %v3242_v0 = vadd.f32 %v8547_v46, %v8341_v22  ;;  %v4020_v22 = vsel %vm3998_vm0, %v3952_v6, -inf }
 0x916   :  { %v3920_v48 = vadd.f32 %v3876_v1, %v8631_v56  ;;  %v5396_v56 = vld [vmem:[%s9802_s5 + $0xd8] sm:$0xff]  ;;  %v8782_v50 = vpop.f32.mrf.mxu2  ;;  %v8829_v1 = vpop.f32.mrf.mxu3 }
 0x917   :  { %4365 = vmatpush.msra.mxu3 %v5396_v56  ;;  %4326 = vmatpush.msra.mxu2 %v4303_v62  ;;  %v5432_v56 = vld [vmem:[%s9802_s5 + $0x1f8] sm:$0xff]  ;;  %v5414_v62 = vld [vmem:[%s9802_s5 + $0x168] sm:$0xff] }
 0x919   :  { %4366 = vmatpush.msra.mxu3 %v5395_v25  ;;  %4327 = vmatpush.msra.mxu2 %v4302_v4  ;;  %v3241_v25 = vadd.f32 %v8537_v58, %v8307_v32  ;;  %v5413_v4 = vld [vmem:[%s9802_s5 + $0x160] sm:$0xff] }
 0x91b   :  { %4367 = vmatpush.msra.mxu3 %v5394_v29  ;;  %4328 = vmatpush.msra.mxu2 %v4301_v23  ;;  %v3999_v29 = vsel %vm3998_vm0, %v8724_v41, -inf  ;;  %v3355_v46 = vadd.f32 %v8533_v34, %v3241_v25 }
 0x91c   :  { %v4000_v58 = vrot.slane %v3999_v29, 4 }
 0x91d   :  { %v3879_v61 = vpop.f32.mrf.mxu1  ;;  %4368 = vmatpush.msra.mxu3 %v5393_v59  ;;  %4329 = vmatpush.msra.mxu2 %v4300_v15  ;;  %v4006_v59 = vsel %vm3998_vm0, %v3950_v47, -inf  ;;  %v3470_v15 = vadd.f32 %v8545_v5, %v3355_v46 }
 0x91e   :  { %v3921_v2 = vadd.f32 %v3879_v61, %v8638_v51  ;;  %v5391_v51 = vld [vmem:[%s9802_s5 + $0xb0] sm:$0xff]  ;;  %v8817_v43 = vpop.f32.mrf.mxu2 }
 0x91f   :  { %4369 = vmatpush.msra.mxu3 %v5392_v31  ;;  %4330 = vmatpush.msra.mxu2 %v4299_v14  ;;  %v5430_v31 = vld [vmem:[%s9802_s5 + $0x1e8] sm:$0xff]  ;;  %v4001_v14 = vmax.f32 %v3999_v29, %v4000_v58  ;;  %v5425_v29 = vld [vmem:[%s9802_s5 + $0x1c0] sm:$0xff] }
 0x920   :  { %v8774_v12 = vmax.f32 %v3920_v48, %v3921_v2  ;;  %v3951_v48 = vrot.slane %v8724_v41, 4  ;;  %v3356_v41 = vadd.f32 %v8543_v28, %v3242_v0  ;;  %v4007_v2 = vrot.slane %v4006_v59, 4  ;;  %v5408_v0 = vld [vmem:[%s9802_s5 + $0x138] sm:$0xff] }
 0x921   :  { %4370 = vmatpush.msra.mxu3 %v5391_v51  ;;  %4331 = vmatpush.msra.mxu2 %v4298_v60  ;;  %v4021_v51 = vrot.slane %v4020_v22, 4 }
 0x922   :  { %v4013_v32 = vsel %vm3998_vm0, %v3951_v48, -inf  ;;  %v3954_v60 = vrot.slane %v8774_v12, 4  ;;  %v4002_v48 = vrot.slane %v4001_v14, 2 }
 0x923   :  { %4371 = vmatpush.msra.mxu3 %v5390_v44  ;;  %v4014_v23 = vrot.slane %v4013_v32, 4  ;;  %v3471_v44 = vadd.f32 %v8555_v7, %v3356_v41  ;;  %v3584_v7 = vadd.f32 %v8655_v16, %v3470_v15  ;;  %v4022_v47 = vmax.f32 %v4020_v22, %v4021_v51 }
 0x924   :  { %v4027_v16 = vsel %vm3998_vm0, %v8774_v12, -inf  ;;  %v3701_v51 = vadd.f32 %v8782_v50, %v8674_v24 }
 0x925   :  { %v3882_v27 = vpop.f32.mrf.mxu1  ;;  %4372 = vmatpush.msra.mxu3 %v5389_v54  ;;  %v3953_v54 = vrot.slane %v8774_v12, 2  ;;  %v4028_v25 = vrot.slane %v4027_v16, 4 }
 0x926   :  { %v3922_v57 = vadd.f32 %v3882_v27, %v8642_v45  ;;  %v4297_v45 = vld [vmem:[%s9802_s5 + $0x8] sm:$0xff]  ;;  %v8867_v34 = vpop.f32.mrf.mxu2  ;;  %v5412_v27 = vld [vmem:[%s9802_s5 + $0x158] sm:$0xff] }
 0x927   :  { %4373 = vmatpush.msra.mxu3 %v5388_v52  ;;  %4332 = vmatpush.msra.mxu2 %v4297_v45  ;;  %v3585_v52 = vadd.f32 %v8658_v39, %v3471_v44  ;;  %v8880_v45 = vpop.f32.mrf.mxu3  ;;  %v5410_v39 = vld [vmem:[%s9802_s5 + $0x148] sm:$0xff]  ;;  %v4034_v6 = vsel %vm3998_vm0, %v3953_v54, -inf  ;;  %v4029_v44 = vmax.f32 %v4027_v16, %v4028_v25  ;;  %v5405_v16 = vld [vmem:[%s9802_s5 + $0x120] sm:$0xff] }
 0x928   :  { %v4035_v58 = vrot.slane %v4034_v6, 4  ;;  %v5525_v25 = vld [vmem:[%s9802_s5 + $0x4e0] sm:$0xff] }
 0x929   :  { %4374 = vmatpush.msra.mxu3 %v5387_v21  ;;  %4333 = vmatpush.msra.mxu2 %v4296_v13  ;;  %v4008_v21 = vmax.f32 %v4006_v59, %v4007_v2  ;;  %v5411_v13 = vld [vmem:[%s9802_s5 + $0x150] sm:$0xff]  ;;  %v4023_v59 = vrot.slane %v4022_v47, 2 }
 0x92a   :  { %v5407_v2 = vld [vmem:[%s9802_s5 + $0x130] sm:$0xff]  ;;  %v4036_v54 = vmax.f32 %v4034_v6, %v4035_v58 }
 0x92b   :  { %4375 = vmatpush.msra.mxu3 %v5386_v17  ;;  %4404 = vmatpush.msrb.mxu2 %v5416_v40  ;;  %v5428_v17 = vld [vmem:[%s9802_s5 + $0x1d8] sm:$0xff]  ;;  %v4015_v40 = vmax.f32 %v4013_v32, %v4014_v23  ;;  %v4024_v50 = vmax.f32 %v4022_v47, %v4023_v59  ;;  %v4030_v47 = vrot.slane %v4029_v44, 2 }
 0x92c   :  { %v5420_v59 = vld [vmem:[%s9802_s5 + $0x198] sm:$0xff] }
 0x92d   :  { %v3885_v63 = vpop.f32.mrf.mxu1  ;;  %4376 = vmatpush.msra.mxu3 %v5385_v3  ;;  %4405 = vmatpush.msrb.mxu2 %v5415_v11  ;;  %v5427_v3 = vld [vmem:[%s9802_s5 + $0x1d0] sm:$0xff]  ;;  %v3698_v11 = vadd.f32 %v8702_v26, %v3584_v7 }
 0x92e   :  { %v3923_v53 = vadd.f32 %v3885_v63, %v8646_v42  ;;  %v5431_v42 = vld [vmem:[%s9802_s5 + $0x1f0] sm:$0xff]  ;;  %v4041_v63 = vsel %vm3998_vm0, %v3954_v60, -inf  ;;  %v3684_v15 = vpop.f32.mrf.mxu2 }
 0x92f   :  { %4447 = vmatpush.msrb.mxu3 %v5432_v56  ;;  %4406 = vmatpush.msrb.mxu2 %v5414_v62  ;;  %v3699_v56 = vadd.f32 %v8719_v20, %v3585_v52  ;;  %v5528_v62 = vld [vmem:[%s9802_s5 + $0x4f8] sm:$0xff]  ;;  %v5527_v20 = vld [vmem:[%s9802_s5 + $0x4f0] sm:$0xff]  ;;  %v8921_v32 = vadd.f32 %v8704_v35, %v3698_v11  ;;  %v4042_v46 = vrot.slane %v4041_v63, 4  ;;  %v4003_v35 = vmax.f32 %v4001_v14, %v4002_v48  ;;  %v8948_v14 = vpop.f32.mrf.mxu3 }
 0x930   :  { %v8853_v61 = vmax.f32 %v3922_v57, %v3923_v53  ;;  %v5429_v57 = vld [vmem:[%s9802_s5 + $0x1e0] sm:$0xff]  ;;  %v4009_v53 = vrot.slane %v4008_v21, 2  ;;  %4705 = vmatpush.msrb.mxu1 %v5528_v62  ;;  %v4031_v62 = vmax.f32 %v4029_v44, %v4030_v47 }
 0x931   :  { %4448 = vmatpush.msrb.mxu3 %v5431_v42  ;;  %4407 = vmatpush.msrb.mxu2 %v5413_v4  ;;  %v4016_v42 = vrot.slane %v4015_v40, 2  ;;  %v8924_v22 = vadd.f32 %v8722_v8, %v3699_v56  ;;  %v5424_v4 = vld [vmem:[%s9802_s5 + $0x1b8] sm:$0xff]  ;;  %v4043_v60 = vmax.f32 %v4041_v63, %v4042_v46 }
 0x932   :  { %v4055_v8 = vsel %vm3998_vm0, %v8853_v61, -inf  ;;  %4706 = vmatpush.msrb.mxu1 %v5527_v20  ;;  %v3957_v7 = vrot.slane %v8853_v61, 4  ;;  %v3704_v20 = vadd.f32 %v3684_v15, %v8693_v37  ;;  %v5524_v46 = vld [vmem:[%s9802_s5 + $0x4d8] sm:$0xff]  ;;  %v5419_v37 = vld [vmem:[%s9802_s5 + $0x190] sm:$0xff] }
 0x933   :  { %4449 = vmatpush.msrb.mxu3 %v5430_v31  ;;  %4408 = vmatpush.msrb.mxu2 %v5412_v27  ;;  %v3700_v31 = vadd.f32 %v8739_v10, %v8667_v55  ;;  %v5406_v27 = vld [vmem:[%s9802_s5 + $0x128] sm:$0xff]  ;;  %v5423_v55 = vld [vmem:[%s9802_s5 + $0x1b0] sm:$0xff]  ;;  %v4010_v10 = vmax.f32 %v4008_v21, %v4009_v53  ;;  %v4017_v24 = vmax.f32 %v4015_v40, %v4016_v42  ;;  %v4056_v52 = vrot.slane %v4055_v8, 4 }
 0x934   :  { %v8955_v21 = vadd.f32 %v8784_v9, %v3701_v51  ;;  %v3702_v40 = vadd.f32 %v8817_v43, %v8684_v18  ;;  %v5526_v18 = vld [vmem:[%s9802_s5 + $0x4e8] sm:$0xff]  ;;  %v4044_v48 = vrot.slane %v4043_v60, 2  ;;  %v4069_v63 = vsel %vm3998_vm0, %v3957_v7, -inf }
 0x935   :  { %v3888_v28 = vpop.f32.mrf.mxu1  ;;  %4450 = vmatpush.msrb.mxu3 %v5429_v57  ;;  %4409 = vmatpush.msrb.mxu2 %v5411_v13  ;;  %v8952_v13 = vadd.f32 %v8747_v36, %v3700_v31  ;;  %v5422_v36 = vld [vmem:[%s9802_s5 + $0x1a8] sm:$0xff]  ;;  %v4011_v9 = vrot.slane %v4010_v10, 1  ;;  %v4018_v43 = vrot.slane %v4017_v24, 1  ;;  %v4057_v6 = vmax.f32 %v4055_v8, %v4056_v52  ;;  %v5521_v52 = vld [vmem:[%s9802_s5 + $0x4c0] sm:$0xff] }
 0x936   :  { %v3924_v5 = vadd.f32 %v3888_v28, %v8650_v33  ;;  %v3955_v33 = vrot.slane %v8774_v12, 6  ;;  %v5426_v12 = vld [vmem:[%s9802_s5 + $0x1c8] sm:$0xff]  ;;  %4707 = vmatpush.msrb.mxu1 %v5526_v18  ;;  %v8984_v11 = vadd.f32 %v8829_v1, %v3702_v40  ;;  %v4070_v58 = vrot.slane %v4069_v63, 4 }
 0x937   :  { %4451 = vmatpush.msrb.mxu3 %v5428_v17  ;;  %4410 = vmatpush.msrb.mxu2 %v5410_v39  ;;  %v4004_v17 = vrot.slane %v4003_v35, 1  ;;  %v4058_v31 = vrot.slane %v4057_v6, 2  ;;  %v5402_v8 = vld [vmem:[%s9802_s5 + $0x108] sm:$0xff]  ;;  %v4045_v15 = vmax.f32 %v4043_v60, %v4044_v48  ;;  %v9019_v44 = vadd.f32 %v8948_v14, %v3704_v20 }
 0x938   :  { %v4048_v26 = vsel %vm3998_vm0, %v3955_v33, -inf  ;;  %4708 = vmatpush.msrb.mxu1 %v5525_v25  ;;  %v4071_v7 = vmax.f32 %v4069_v63, %v4070_v58 }
 0x939   :  { %4452 = vmatpush.msrb.mxu3 %v5427_v3  ;;  %4411 = vmatpush.msrb.mxu2 %v5409_v49  ;;  %v4049_v28 = vrot.slane %v4048_v26, 4  ;;  %v4025_v3 = vrot.slane %v4024_v50, 1  ;;  %v4037_v49 = vrot.slane %v4036_v54, 2 }
 0x93a   :  { %4709 = vmatpush.msrb.mxu1 %v5524_v46  ;;  %v4072_v63 = vrot.slane %v4071_v7, 2 }
 0x93b   :  { %4453 = vmatpush.msrb.mxu3 %v5426_v12  ;;  %4412 = vmatpush.msrb.mxu2 %v5408_v0  ;;  %v8960_v33 = vmax.f32 %v4048_v26, %v4049_v28  ;;  %v4005_v0 = vmax.f32 %v4003_v35, %v4004_v17  ;;  %v4012_v26 = vmax.f32 %v4010_v10, %v4011_v9  ;;  %v4046_v9 = vrot.slane %v4045_v15, 1 }
 0x93c   :  { %v4038_v51 = vmax.f32 %v4036_v54, %v4037_v49  ;;  %v4032_v54 = vrot.slane %v4031_v62, 1 }
 0x93d   :  { %v3891_v41 = vpop.f32.mrf.mxu1  ;;  %4454 = vmatpush.msrb.mxu3 %v5425_v29  ;;  %4413 = vmatpush.msrb.mxu2 %v5407_v2  ;;  %v8996_v29 = vld [vmem:[%s9801_s4] ss:$0 sm:$0xff]  ;;  %v4051_v1 = vrot.slane %v8960_v33, 2  ;;  %v4026_v2 = vmax.f32 %v4024_v50, %v4025_v3 }
 0x93e   :  { %v3925_v23 = vadd.f32 %v3891_v41, %v8653_v38  ;;  %v3956_v38 = vrot.slane %v8853_v61, 2  ;;  %v4019_v41 = vmax.f32 %v4017_v24, %v4018_v43  ;;  %v9029_v10 = vadd.f32 %v8996_v29, %v4005_v0  ;;  %v5417_v50 = vld [vmem:[%s9802_s5 + $0x180] sm:$0xff]  ;;  %v5520_v43 = vld [vmem:[%s9802_s5 + $0x4b8] sm:$0xff] }
 0x93f   :  { %4455 = vmatpush.msrb.mxu3 %v5424_v4  ;;  %4414 = vmatpush.msrb.mxu2 %v5406_v27  ;;  %v3687_v4 = vpop.f32.mrf.mxu2  ;;  %v5401_v27 = vld [vmem:[%s9802_s5 + $0x100] sm:$0xff]  ;;  %v9038_v14 = vadd.f32 %v8996_v29, %v4012_v26  ;;  %v4052_v60 = vmax.f32 %v8960_v33, %v4051_v1  ;;  %v9048_v17 = vadd.f32 %v8996_v29, %v4026_v2 }
 0x940   :  { %v8946_v57 = vmax.f32 %v3924_v5, %v3925_v23  ;;  %v3958_v5 = vrot.slane %v8853_v61, 6  ;;  %v3703_v61 = vadd.f32 %v8867_v34, %v8689_v19  ;;  %v4062_v39 = vsel %vm3998_vm0, %v3956_v38, -inf  ;;  %v5404_v19 = vld [vmem:[%s9802_s5 + $0x118] sm:$0xff]  ;;  %v5421_v34 = vld [vmem:[%s9802_s5 + $0x1a0] sm:$0xff]  ;;  %v5523_v23 = vld [vmem:[%s9802_s5 + $0x4d0] sm:$0xff]  ;;  %v3801_v38 = vpop.f32.mrf.mxu3 }
 0x941   :  { %4456 = vmatpush.msrb.mxu3 %v5423_v55  ;;  %4415 = vmatpush.msrb.mxu2 %v5405_v16  ;;  %v4063_v42 = vrot.slane %v4062_v39, 4  ;;  %v3705_v28 = vadd.f32 %v3687_v4, %v8700_v30  ;;  %v5418_v55 = vld [vmem:[%s9802_s5 + $0x188] sm:$0xff]  ;;  %v4059_v16 = vmax.f32 %v4057_v6, %v4058_v31  ;;  %v4259_v18 = vmax.f32 %v9029_v10, 0.0  ;;  %v5571_v10 = vld [vmem:[%s9802_s5 + $0x650] sm:$0xff] }
 0x942   :  { %v8987_v56 = vadd.f32 %v8880_v45, %v3703_v61  ;;  %v4076_v53 = vsel %vm3998_vm0, %v3958_v5, -inf  ;;  %v5403_v45 = vld [vmem:[%s9802_s5 + $0x110] sm:$0xff]  ;;  %4710 = vmatpush.msrb.mxu1 %v5523_v23  ;;  %v5522_v30 = vld [vmem:[%s9802_s5 + $0x4c8] sm:$0xff]  ;;  %v9045_v5 = vadd.f32 %v8996_v29, %v4019_v41  ;;  %v4260_v49 = vmax.f32 %v9038_v14, 0.0 }
 0x943   :  { %4457 = vmatpush.msrb.mxu3 %v5422_v36  ;;  %4416 = vmatpush.msrb.mxu2 %v5404_v19  ;;  %v4077_v35 = vrot.slane %v4076_v53, 4  ;;  %v4064_v24 = vmax.f32 %v4062_v39, %v4063_v42  ;;  %v4039_v36 = vrot.slane %v4038_v51, 1  ;;  %v9050_v33 = vadd.f32 %v3801_v38, %v3705_v28  ;;  %v5518_v4 = vld [vmem:[%s9802_s5 + $0x4a8] sm:$0xff]  ;;  %v5463_v14 = vld [vmem:[%s9802_s5 + $0x2f0] sm:$0xff] }
 0x944   :  { %4711 = vmatpush.msrb.mxu1 %v5522_v30  ;;  %v4033_v48 = vmax.f32 %v4031_v62, %v4032_v54  ;;  %v4053_v6 = vrot.slane %v4052_v60, 1  ;;  %v4047_v0 = vmax.f32 %v4045_v15, %v4046_v9  ;;  %v4073_v31 = vmax.f32 %v4071_v7, %v4072_v63  ;;  %v5517_v15 = vld [vmem:[%s9802_s5 + $0x4a0] sm:$0xff] }
 0x945   :  { %v8975_v12 = vpop.f32.mrf.mxu1  ;;  %4458 = vmatpush.msrb.mxu3 %v5421_v34  ;;  %4417 = vmatpush.msrb.mxu2 %v5403_v45  ;;  %v4078_v40 = vmax.f32 %v4076_v53, %v4077_v35  ;;  %v4065_v3 = vrot.slane %v4064_v24, 2  ;;  %v4060_v53 = vrot.slane %v4059_v16, 1  ;;  %v4040_v25 = vmax.f32 %v4038_v51, %v4039_v36 }
 0x946   :  { %v3926_v61 = vadd.f32 %v8975_v12, %v8921_v32  ;;  %4712 = vmatpush.msrb.mxu1 %v5521_v52  ;;  %v5519_v32 = vld [vmem:[%s9802_s5 + $0x4b0] sm:$0xff]  ;;  %v4262_v12 = vmax.f32 %v9048_v17, 0.0  ;;  %v9067_v26 = vadd.f32 %v8996_v29, %v4033_v48  ;;  %v4054_v58 = vmax.f32 %v4052_v60, %v4053_v6  ;;  %v5516_v60 = vld [vmem:[%s9802_s5 + $0x498] sm:$0xff]  ;;  %v5462_v17 = vld [vmem:[%s9802_s5 + $0x2e8] sm:$0xff] }
 0x947   :  { %4459 = vmatpush.msrb.mxu3 %v5420_v59  ;;  %4418 = vmatpush.msrb.mxu2 %v5402_v8  ;;  %v4079_v34 = vrot.slane %v4078_v40, 2  ;;  %v4066_v20 = vmax.f32 %v4064_v24, %v4065_v3  ;;  %v4061_v28 = vmax.f32 %v4059_v16, %v4060_v53  ;;  %v4074_v16 = vrot.slane %v4073_v31, 1 }
 0x948   :  { %4713 = vmatpush.msrb.mxu1 %v5520_v43  ;;  %v4263_v7 = vmax.f32 %v9067_v26, 0.0  ;;  %v5497_v43 = vld [vmem:[%s9802_s5 + $0x400] sm:$0xff]  ;;  %v5439_v26 = vld [vmem:[%s9802_s5 + $0x230] sm:$0xff] }
 0x949   :  { %4460 = vmatpush.msrb.mxu3 %v5419_v37  ;;  %4419 = vmatpush.msrb.mxu2 %v5401_v27  ;;  %v9079_v27 = vadd.f32 %v8996_v29, %v4040_v25  ;;  %v9084_v38 = vmax.f32 %v4078_v40, %v4079_v34  ;;  %v4067_v52 = vrot.slane %v4066_v20, 1  ;;  %v9100_v3 = vadd.f32 %v8996_v29, %v4061_v28  ;;  %v5514_v25 = vld [vmem:[%s9802_s5 + $0x488] sm:$0xff] }
 0x94a   :  { %4714 = vmatpush.msrb.mxu1 %v5519_v32  ;;  %4677 = vmatpush.msrb.mxu0 %v5497_v43 }
 0x94b   :  { %4461 = vmatpush.msrb.mxu3 %v5418_v55  ;;  %v9082_v55 = vadd.f32 %v8996_v29, %v4047_v0  ;;  %v4264_v48 = vmax.f32 %v9079_v27, 0.0  ;;  %v4081_v63 = vrot.slane %v9084_v38, 1  ;;  %v5576_v0 = vld [vmem:[%s9802_s5 + $0x678] sm:$0xff] }
 0x94c   :  { %4715 = vmatpush.msrb.mxu1 %v5518_v4  ;;  %4834 = vmatpush.msra.mxu0 %v5576_v0 }
 0x94d   :  { %v3897_v47 = vpop.f32.mrf.mxu1  ;;  %4462 = vmatpush.msrb.mxu3 %v5417_v50  ;;  %v4265_v6 = vmax.f32 %v9082_v55, 0.0 }
 0x94e   :  { %v3927_v39 = vadd.f32 %v3897_v47, %v8924_v22  ;;  %v4261_v22 = vmax.f32 %v9045_v5, 0.0  ;;  %4716 = vmatpush.msrb.mxu1 %v5517_v15  ;;  %v9091_v47 = vadd.f32 %v8996_v29, %v4054_v58  ;;  %v9124_v58 = vmax.f32 %v4073_v31, %v4074_v16  ;;  %v5574_v31 = vld [vmem:[%s9802_s5 + $0x668] sm:$0xff]  ;;  %v5587_v5 = vld [vmem:[%s9802_s5 + $0x6d0] sm:$0xff] }
 0x950   :  { %v3938_v19 = vmax.f32 %v3926_v61, %v3927_v39  ;;  %4717 = vmatpush.msrb.mxu1 %v5516_v60  ;;  %v5515_v39 = vld [vmem:[%s9802_s5 + $0x490] sm:$0xff] }
 0x952   :  { %v3962_v1 = vrot.slane %v3938_v19, 2  ;;  %v3963_v42 = vrot.slane %v3938_v19, 4  ;;  %v3964_v45 = vrot.slane %v3938_v19, 6  ;;  %v4111_v62 = vsel %vm3998_vm0, %v3938_v19, -inf  ;;  %4718 = vmatpush.msrb.mxu1 %v5515_v39 }
 0x953   :  { %v4112_v59 = vrot.slane %v4111_v62, 4 }
 0x954   :  { %v4118_v46 = vsel %vm3998_vm0, %v3962_v1, -inf  ;;  %v4125_v41 = vsel %vm3998_vm0, %v3963_v42, -inf  ;;  %v4132_v2 = vsel %vm3998_vm0, %v3964_v45, -inf  ;;  %v3959_v1 = vrot.slane %v8946_v57, 2  ;;  %v5513_v45 = vld [vmem:[%s9802_s5 + $0x480] sm:$0xff]  ;;  %4719 = vmatpush.msrb.mxu1 %v5514_v25 }
 0x955   :  { %v4113_v35 = vmax.f32 %v4111_v62, %v4112_v59  ;;  %v4119_v8 = vrot.slane %v4118_v46, 4  ;;  %v4126_v37 = vrot.slane %v4125_v41, 4  ;;  %v4133_v23 = vrot.slane %v4132_v2, 4  ;;  %v3900_v51 = vpop.f32.mrf.mxu1  ;;  %v5575_v62 = vld [vmem:[%s9802_s5 + $0x670] sm:$0xff] }
 0x956   :  { %v9114_v42 = vsel %vm3998_vm0, %v8946_v57, -inf  ;;  %v9122_v59 = vmax.f32 %v4066_v20, %v4067_v52  ;;  %v3928_v15 = vadd.f32 %v3900_v51, %v8952_v13  ;;  %4835 = vmatpush.msra.mxu0 %v5575_v62  ;;  %4720 = vmatpush.msrb.mxu1 %v5513_v45  ;;  %v9142_v13 = vsel %vm3998_vm0, %v3959_v1, -inf }
 0x957   :  { %v4114_v24 = vrot.slane %v4113_v35, 2  ;;  %v4120_v30 = vmax.f32 %v4118_v46, %v4119_v8  ;;  %v4127_v50 = vmax.f32 %v4125_v41, %v4126_v37  ;;  %v4134_v54 = vmax.f32 %v4132_v2, %v4133_v23  ;;  %v5592_v8 = vld [vmem:[%s9802_s5 + $0x6f8] sm:$0xff] }
 0x958   :  { %v3960_v37 = vrot.slane %v8946_v57, 4  ;;  %v3961_v23 = vrot.slane %v8946_v57, 6  ;;  %v4084_v57 = vrot.slane %v9114_v42, 4  ;;  %4877 = vmatpush.msra.mxu1 %v5592_v8  ;;  %4836 = vmatpush.msra.mxu0 %v5574_v31  ;;  %v5572_v8 = vld [vmem:[%s9802_s5 + $0x658] sm:$0xff] }
 0x959   :  { %v4115_v36 = vmax.f32 %v4113_v35, %v4114_v24  ;;  %v4121_v9 = vrot.slane %v4120_v30, 2  ;;  %v4128_v40 = vrot.slane %v4127_v50, 2  ;;  %v4135_v61 = vrot.slane %v4134_v54, 2 }
 0x95b   :  { %v4116_v19 = vrot.slane %v4115_v36, 1  ;;  %v4122_v32 = vmax.f32 %v4120_v30, %v4121_v9  ;;  %v4129_v34 = vmax.f32 %v4127_v50, %v4128_v40  ;;  %v4136_v53 = vmax.f32 %v4134_v54, %v4135_v61  ;;  %v5591_v54 = vld [vmem:[%s9802_s5 + $0x6f0] sm:$0xff] }
 0x95c   :  { %4878 = vmatpush.msra.mxu1 %v5591_v54 }
 0x95d   :  { %v3903_v46 = vpop.f32.mrf.mxu1  ;;  %v4117_v41 = vmax.f32 %v4115_v36, %v4116_v19  ;;  %v4123_v2 = vrot.slane %v4122_v32, 1  ;;  %v4130_v4 = vrot.slane %v4129_v34, 1  ;;  %v4137_v35 = vrot.slane %v4136_v53, 1 }
 0x95e   :  { %v3929_v20 = vadd.f32 %v3903_v46, %v8955_v21 }
 0x95f   :  { %v4243_v28 = vadd.f32 %v8996_v29, %v4117_v41  ;;  %v4124_v24 = vmax.f32 %v4122_v32, %v4123_v2  ;;  %v4131_v30 = vmax.f32 %v4129_v34, %v4130_v4  ;;  %v4138_v50 = vmax.f32 %v4136_v53, %v4137_v35  ;;  %v5573_v34 = vld [vmem:[%s9802_s5 + $0x660] sm:$0xff]  ;;  %v5590_v53 = vld [vmem:[%s9802_s5 + $0x6e8] sm:$0xff]  ;;  %v5448_v35 = vld [vmem:[%s9802_s5 + $0x278] sm:$0xff] }
 0x960   :  { %v3939_v21 = vmax.f32 %v3928_v15, %v3929_v20  ;;  %4837 = vmatpush.msra.mxu0 %v5573_v34  ;;  %4879 = vmatpush.msra.mxu1 %v5590_v53  ;;  %v5589_v15 = vld [vmem:[%s9802_s5 + $0x6e0] sm:$0xff]  ;;  %v9169_v20 = vsel %vm3998_vm0, %v3960_v37, -inf  ;;  %v5464_v37 = vld [vmem:[%s9802_s5 + $0x2f8] sm:$0xff]  ;;  %v9221_v34 = vmax.f32 %v9084_v38, %v4081_v63  ;;  %v9235_v38 = vmax.f32 %v9114_v42, %v4084_v57 }
 0x961   :  { %v4275_v51 = vmax.f32 %v4243_v28, 0.0  ;;  %v4244_v60 = vadd.f32 %v8996_v29, %v4124_v24  ;;  %v4245_v52 = vadd.f32 %v8996_v29, %v4131_v30  ;;  %v4246_v16 = vadd.f32 %v8996_v29, %v4138_v50  ;;  %v5447_v24 = vld [vmem:[%s9802_s5 + $0x270] sm:$0xff]  ;;  %v5445_v53 = vld [vmem:[%s9802_s5 + $0x260] sm:$0xff]  ;;  %v5444_v42 = vld [vmem:[%s9802_s5 + $0x258] sm:$0xff] }
 0x962   :  { %v3965_v36 = vrot.slane %v3939_v21, 2  ;;  %v3966_v9 = vrot.slane %v3939_v21, 4  ;;  %v3967_v40 = vrot.slane %v3939_v21, 6  ;;  %v4139_v61 = vsel %vm3998_vm0, %v3939_v21, -inf  ;;  %4838 = vmatpush.msra.mxu0 %v5572_v8  ;;  %4880 = vmatpush.msra.mxu1 %v5589_v15  ;;  %v5461_v57 = vld [vmem:[%s9802_s5 + $0x2e0] sm:$0xff] }
 0x963   :  { %v4140_v39 = vrot.slane %v4139_v61, 4  ;;  %v4314_v43 = vrot.slane %v4275_v51, 7  ;;  %v4276_v19 = vmax.f32 %v4244_v60, 0.0  ;;  %v4277_v32 = vmax.f32 %v4245_v52, 0.0 }
 0x964   :  { %v4146_v25 = vsel %vm3998_vm0, %v3965_v36, -inf  ;;  %v4153_v0 = vsel %vm3998_vm0, %v3966_v9, -inf  ;;  %v4160_v1 = vsel %vm3998_vm0, %v3967_v40, -inf  ;;  %v4278_v45 = vmax.f32 %v4246_v16, 0.0  ;;  %v5446_v16 = vld [vmem:[%s9802_s5 + $0x268] sm:$0xff]  ;;  %4839 = vmatpush.msra.mxu0 %v5571_v10  ;;  %v5567_v10 = vld [vmem:[%s9802_s5 + $0x630] sm:$0xff] }
 0x965   :  { %v4141_v62 = vmax.f32 %v4139_v61, %v4140_v39  ;;  %v4147_v46 = vrot.slane %v4146_v25, 4  ;;  %v4154_v41 = vrot.slane %v4153_v0, 4  ;;  %v4161_v2 = vrot.slane %v4160_v1, 4  ;;  %v9157_v4 = vpop.f32.mrf.mxu1 }
 0x966   :  { %v4316_v31 = vsel %vm4315_vm1, %v4314_v43, %v4259_v18  ;;  %v4358_v28 = vrot.slane %v4276_v19, 7  ;;  %v4401_v30 = vrot.slane %v4277_v32, 7  ;;  %v5588_v18 = vld [vmem:[%s9802_s5 + $0x6d8] sm:$0xff]  ;;  %v9187_v60 = vsel %vm3998_vm0, %v3961_v23, -inf  ;;  %v5569_v19 = vld [vmem:[%s9802_s5 + $0x640] sm:$0xff] }
 0x967   :  { %v4142_v50 = vrot.slane %v4141_v62, 2  ;;  %v4148_v54 = vmax.f32 %v4146_v25, %v4147_v46  ;;  %v4155_v21 = vmax.f32 %v4153_v0, %v4154_v41  ;;  %v4162_v51 = vmax.f32 %v4160_v1, %v4161_v2  ;;  %4334 = vmatmul.f32.vlgmr.msra.gmra.mxu2 %v4316_v31  ;;  %4881 = vmatpush.msra.mxu1 %v5588_v18  ;;  %v5584_v18 = vld [vmem:[%s9802_s5 + $0x6b8] sm:$0xff] }
 0x968   :  { %4490 = vmatpush.msra.mxu2 %v5448_v35  ;;  %v4359_v52 = vsel %vm4315_vm1, %v4358_v28, %v4260_v49  ;;  %v4402_v36 = vsel %vm4315_vm1, %v4401_v30, %v4261_v22  ;;  %v4444_v9 = vrot.slane %v4278_v45, 7  ;;  %v5570_v49 = vld [vmem:[%s9802_s5 + $0x648] sm:$0xff]  ;;  %v4091_v22 = vrot.slane %v9142_v13, 4 }
 0x969   :  { %v4143_v40 = vmax.f32 %v4141_v62, %v4142_v50  ;;  %v4149_v61 = vrot.slane %v4148_v54, 2  ;;  %v4156_v39 = vrot.slane %v4155_v21, 2  ;;  %v4163_v23 = vrot.slane %v4162_v51, 2  ;;  %4377 = vmatmul.f32.vlgmr.msra.gmra.mxu3 %v4359_v52  ;;  %4840 = vmatpush.msra.mxu0 %v5570_v49  ;;  %v5568_v62 = vld [vmem:[%s9802_s5 + $0x638] sm:$0xff]  ;;  %v5443_v50 = vld [vmem:[%s9802_s5 + $0x250] sm:$0xff]  ;;  %v5566_v49 = vld [vmem:[%s9802_s5 + $0x628] sm:$0xff] }
 0x96a   :  { %4491 = vmatpush.msra.mxu2 %v5447_v24  ;;  %4533 = vmatpush.msra.mxu3 %v5464_v37  ;;  %v4445_v43 = vsel %vm4315_vm1, %v4444_v9, %v4262_v12  ;;  %v9216_v32 = vadd.f32 %v8996_v29, %v9122_v59  ;;  %v5586_v59 = vld [vmem:[%s9802_s5 + $0x6c8] sm:$0xff]  ;;  %v4098_v63 = vrot.slane %v9169_v20, 4  ;;  %v4105_v45 = vrot.slane %v9187_v60, 4  ;;  %v5585_v24 = vld [vmem:[%s9802_s5 + $0x6c0] sm:$0xff] }
 0x96b   :  { %4882 = vmatpush.msra.mxu1 %v5587_v5  ;;  %v4144_v12 = vrot.slane %v4143_v40, 1  ;;  %v4150_v25 = vmax.f32 %v4148_v54, %v4149_v61  ;;  %v4157_v0 = vmax.f32 %v4155_v21, %v4156_v39  ;;  %v4164_v1 = vmax.f32 %v4162_v51, %v4163_v23  ;;  %4841 = vmatpush.msra.mxu0 %v5569_v19  ;;  %v5583_v5 = vld [vmem:[%s9802_s5 + $0x6b0] sm:$0xff]  ;;  %v5458_v19 = vld [vmem:[%s9802_s5 + $0x2c8] sm:$0xff] }
 0x96c   :  { %4492 = vmatpush.msra.mxu2 %v5446_v16  ;;  %4534 = vmatpush.msra.mxu3 %v5463_v14  ;;  %v9244_v46 = vadd.f32 %v8996_v29, %v9124_v58  ;;  %v9253_v31 = vmax.f32 %v9142_v13, %v4091_v22  ;;  %v3930_v58 = vadd.f32 %v9157_v4, %v8984_v11  ;;  %v4266_v30 = vmax.f32 %v9091_v47, 0.0  ;;  %v5460_v13 = vld [vmem:[%s9802_s5 + $0x2d8] sm:$0xff] }
 0x96d   :  { %v3909_v41 = vpop.f32.mrf.mxu1  ;;  %v4145_v2 = vmax.f32 %v4143_v40, %v4144_v12  ;;  %4883 = vmatpush.msra.mxu1 %v5586_v59  ;;  %v4151_v35 = vrot.slane %v4150_v25, 1  ;;  %v4158_v8 = vrot.slane %v4157_v0, 1  ;;  %v4165_v15 = vrot.slane %v4164_v1, 1  ;;  %4842 = vmatpush.msra.mxu0 %v5568_v62 }
 0x96e   :  { %4493 = vmatpush.msra.mxu2 %v5445_v53  ;;  %4535 = vmatpush.msra.mxu3 %v5462_v17  ;;  %v3931_v28 = vadd.f32 %v3909_v41, %v8987_v56  ;;  %v4267_v4 = vmax.f32 %v9100_v3, 0.0  ;;  %v4086_v21 = vrot.slane %v9235_v38, 2  ;;  %v9272_v51 = vmax.f32 %v9169_v20, %v4098_v63  ;;  %v5442_v20 = vld [vmem:[%s9802_s5 + $0x248] sm:$0xff]  ;;  %v5496_v3 = vld [vmem:[%s9802_s5 + $0x3f8] sm:$0xff] }
 0x96f   :  { %4420 = vmatmul.f32.vlgmr.msrb.gmra.mxu2 %v4402_v36  ;;  %v4247_v11 = vadd.f32 %v8996_v29, %v4145_v2  ;;  %v4152_v56 = vmax.f32 %v4150_v25, %v4151_v35  ;;  %v4159_v54 = vmax.f32 %v4157_v0, %v4158_v8  ;;  %v4166_v52 = vmax.f32 %v4164_v1, %v4165_v15  ;;  %v5459_v36 = vld [vmem:[%s9802_s5 + $0x2d0] sm:$0xff]  ;;  %v5565_v1 = vld [vmem:[%s9802_s5 + $0x620] sm:$0xff]  ;;  %v5582_v63 = vld [vmem:[%s9802_s5 + $0x6a8] sm:$0xff] }
 0x970   :  { %v3940_v37 = vmax.f32 %v3930_v58, %v3931_v28  ;;  %4494 = vmatpush.msra.mxu2 %v5444_v42  ;;  %4536 = vmatpush.msra.mxu3 %v5461_v57  ;;  %v9281_v16 = vmax.f32 %v9187_v60, %v4105_v45  ;;  %v5440_v35 = vld [vmem:[%s9802_s5 + $0x238] sm:$0xff]  ;;  %v5457_v8 = vld [vmem:[%s9802_s5 + $0x2c0] sm:$0xff]  ;;  %v4093_v15 = vrot.slane %v9253_v31, 2  ;;  %v9366_v55 = vmax.f32 %v9235_v38, %v4086_v21  ;;  %v5454_v21 = vld [vmem:[%s9802_s5 + $0x2a8] sm:$0xff] }
 0x971   :  { %4463 = vmatmul.f32.vlgmr.msrb.gmra.mxu3 %v4445_v43  ;;  %v4279_v9 = vmax.f32 %v4247_v11, 0.0  ;;  %v4248_v40 = vadd.f32 %v8996_v29, %v4152_v56  ;;  %4884 = vmatpush.msra.mxu1 %v5585_v24  ;;  %v4249_v61 = vadd.f32 %v8996_v29, %v4159_v54  ;;  %v5441_v43 = vld [vmem:[%s9802_s5 + $0x240] sm:$0xff]  ;;  %v4250_v45 = vadd.f32 %v8996_v29, %v4166_v52  ;;  %v5564_v24 = vld [vmem:[%s9802_s5 + $0x618] sm:$0xff]  ;;  %v5563_v52 = vld [vmem:[%s9802_s5 + $0x610] sm:$0xff] }
 0x972   :  { %v3968_v39 = vrot.slane %v3940_v37, 2  ;;  %v3969_v23 = vrot.slane %v3940_v37, 4  ;;  %v3970_v14 = vrot.slane %v3940_v37, 6  ;;  %v4167_v60 = vsel %vm3998_vm0, %v3940_v37, -inf  ;;  %4495 = vmatpush.msra.mxu2 %v5443_v50  ;;  %4537 = vmatpush.msra.mxu3 %v5460_v13  ;;  %v5581_v50 = vld [vmem:[%s9802_s5 + $0x6a0] sm:$0xff] }
 0x973   :  { %v4168_v22 = vrot.slane %v4167_v60, 4  ;;  %v4487_v53 = vrot.slane %v4279_v9, 7  ;;  %v4280_v17 = vmax.f32 %v4248_v40, 0.0  ;;  %4843 = vmatpush.msra.mxu0 %v5567_v10  ;;  %4885 = vmatpush.msra.mxu1 %v5584_v18  ;;  %v4281_v12 = vmax.f32 %v4249_v61, 0.0  ;;  %v5437_v38 = vld [vmem:[%s9802_s5 + $0x220] sm:$0xff] }
 0x974   :  { %v4174_v59 = vsel %vm3998_vm0, %v3968_v39, -inf  ;;  %v4181_v25 = vsel %vm3998_vm0, %v3969_v23, -inf  ;;  %v4188_v0 = vsel %vm3998_vm0, %v3970_v14, -inf  ;;  %4496 = vmatpush.msra.mxu2 %v5442_v20  ;;  %4538 = vmatpush.msra.mxu3 %v5459_v36  ;;  %v4100_v10 = vrot.slane %v9272_v51, 2  ;;  %v5580_v20 = vld [vmem:[%s9802_s5 + $0x698] sm:$0xff]  ;;  %v5455_v39 = vld [vmem:[%s9802_s5 + $0x2b0] sm:$0xff] }
 0x975   :  { %v4169_v62 = vmax.f32 %v4167_v60, %v4168_v22  ;;  %v4175_v41 = vrot.slane %v4174_v59, 4  ;;  %v4182_v42 = vrot.slane %v4181_v25, 4  ;;  %v4189_v57 = vrot.slane %v4188_v0, 4  ;;  %v9314_v2 = vpop.f32.mrf.mxu1  ;;  %4844 = vmatpush.msra.mxu0 %v5566_v49  ;;  %4886 = vmatpush.msra.mxu1 %v5583_v5  ;;  %v5562_v14 = vld [vmem:[%s9802_s5 + $0x608] sm:$0xff]  ;;  %v5579_v60 = vld [vmem:[%s9802_s5 + $0x690] sm:$0xff] }
 0x976   :  { %4497 = vmatpush.msra.mxu2 %v5441_v43  ;;  %4539 = vmatpush.msra.mxu3 %v5458_v19  ;;  %v9326_v58 = vsel %vm4315_vm1, %v4487_v53, %v4263_v7  ;;  %v4530_v28 = vrot.slane %v4280_v17, 7  ;;  %v4573_v13 = vrot.slane %v4281_v12, 7  ;;  %v5456_v7 = vld [vmem:[%s9802_s5 + $0x2b8] sm:$0xff]  ;;  %v4282_v9 = vmax.f32 %v4250_v45, 0.0  ;;  %v5578_v12 = vld [vmem:[%s9802_s5 + $0x688] sm:$0xff]  ;;  %v5453_v45 = vld [vmem:[%s9802_s5 + $0x2a0] sm:$0xff] }
 0x977   :  { %v4170_v11 = vrot.slane %v4169_v62, 2  ;;  %v4176_v56 = vmax.f32 %v4174_v59, %v4175_v41  ;;  %v4183_v54 = vmax.f32 %v4181_v25, %v4182_v42  ;;  %v4190_v37 = vmax.f32 %v4188_v0, %v4189_v57  ;;  %4845 = vmatpush.msra.mxu0 %v5565_v1  ;;  %4887 = vmatpush.msra.mxu1 %v5582_v63  ;;  %v5436_v63 = vld [vmem:[%s9802_s5 + $0x218] sm:$0xff]  ;;  %v5577_v42 = vld [vmem:[%s9802_s5 + $0x680] sm:$0xff] }
 0x978   :  { %4498 = vmatpush.msra.mxu2 %v5440_v35  ;;  %4540 = vmatpush.msra.mxu3 %v5457_v8  ;;  %v9344_v18 = vsel %vm4315_vm1, %v4530_v28, %v4264_v48  ;;  %v9355_v36 = vsel %vm4315_vm1, %v4573_v13, %v4265_v6  ;;  %v5438_v48 = vld [vmem:[%s9802_s5 + $0x228] sm:$0xff]  ;;  %v4268_v6 = vmax.f32 %v9216_v32, 0.0  ;;  %v4616_v49 = vrot.slane %v4282_v9, 7  ;;  %v5435_v8 = vld [vmem:[%s9802_s5 + $0x210] sm:$0xff] }
 0x979   :  { %v4177_v40 = vrot.slane %v4176_v56, 2  ;;  %v4184_v61 = vrot.slane %v4183_v54, 2  ;;  %v4191_v27 = vrot.slane %v4190_v37, 2  ;;  %v4171_v23 = vmax.f32 %v4169_v62, %v4170_v11  ;;  %4846 = vmatpush.msra.mxu0 %v5564_v24  ;;  %4888 = vmatpush.msra.mxu1 %v5581_v50  ;;  %v5478_v32 = vld [vmem:[%s9802_s5 + $0x368] sm:$0xff] }
 0x97a   :  { %4499 = vmatpush.msra.mxu2 %v5439_v26  ;;  %4541 = vmatpush.msra.mxu3 %v5456_v7  ;;  %v9377_v5 = vadd.f32 %v8996_v29, %v9221_v34  ;;  %v4107_v17 = vrot.slane %v9281_v16, 2  ;;  %v5561_v34 = vld [vmem:[%s9802_s5 + $0x600] sm:$0xff]  ;;  %v9393_v59 = vmax.f32 %v9253_v31, %v4093_v15  ;;  %v9398_v25 = vsel %vm4315_vm1, %v4616_v49, %v4266_v30 }
 0x97b   :  { %v4172_v22 = vrot.slane %v4171_v23, 1  ;;  %v4178_v43 = vmax.f32 %v4176_v56, %v4177_v40  ;;  %4847 = vmatpush.msra.mxu0 %v5563_v52  ;;  %4889 = vmatpush.msra.mxu1 %v5580_v20  ;;  %v4185_v19 = vmax.f32 %v4183_v54, %v4184_v61  ;;  %v4192_v53 = vmax.f32 %v4190_v37, %v4191_v27  ;;  %v5434_v56 = vld [vmem:[%s9802_s5 + $0x208] sm:$0xff]  ;;  %v5451_v54 = vld [vmem:[%s9802_s5 + $0x290] sm:$0xff]  ;;  %v5433_v61 = vld [vmem:[%s9802_s5 + $0x200] sm:$0xff] }
 0x97c   :  { %4500 = vmatpush.msra.mxu2 %v5438_v48  ;;  %4542 = vmatpush.msra.mxu3 %v5455_v39  ;;  %v9401_v0 = vmax.f32 %v9272_v51, %v4100_v10  ;;  %v3932_v30 = vadd.f32 %v9314_v2, %v9019_v44  ;;  %v4269_v57 = vmax.f32 %v9244_v46, 0.0  ;;  %v4270_v35 = vmax.f32 %v9377_v5, 0.0  ;;  %v5452_v44 = vld [vmem:[%s9802_s5 + $0x298] sm:$0xff]  ;;  %v5450_v27 = vld [vmem:[%s9802_s5 + $0x288] sm:$0xff]  ;;  %v5495_v46 = vld [vmem:[%s9802_s5 + $0x3f0] sm:$0xff] }
 0x97d   :  { %v3915_v1 = vpop.f32.mrf.mxu1  ;;  %v4173_v62 = vmax.f32 %v4171_v23, %v4172_v22  ;;  %v4179_v31 = vrot.slane %v4178_v43, 1  ;;  %4848 = vmatpush.msra.mxu0 %v5562_v14  ;;  %4890 = vmatpush.msra.mxu1 %v5579_v60  ;;  %v4186_v47 = vrot.slane %v4185_v19, 1  ;;  %v4193_v41 = vrot.slane %v4192_v53, 1 }
 0x97e   :  { %4501 = vmatpush.msra.mxu2 %v5437_v38  ;;  %4543 = vmatpush.msra.mxu3 %v5454_v21  ;;  %v3933_v51 = vadd.f32 %v3915_v1, %v9050_v33  ;;  %v4088_v33 = vrot.slane %v9366_v55, 1  ;;  %v4095_v50 = vrot.slane %v9393_v59, 1  ;;  %v9427_v11 = vmax.f32 %v9281_v16, %v4107_v17  ;;  %v5449_v17 = vld [vmem:[%s9802_s5 + $0x280] sm:$0xff] }
 0x97f   :  { %v4251_v2 = vadd.f32 %v8996_v29, %v4173_v62  ;;  %v4180_v15 = vmax.f32 %v4178_v43, %v4179_v31  ;;  %4849 = vmatpush.msra.mxu0 %v5561_v34  ;;  %4891 = vmatpush.msra.mxu1 %v5578_v12  ;;  %v4187_v28 = vmax.f32 %v4185_v19, %v4186_v47  ;;  %v4102_v10 = vrot.slane %v9401_v0, 1 }
 0x980   :  { %v3941_v24 = vmax.f32 %v3932_v30, %v3933_v51  ;;  %4502 = vmatpush.msra.mxu2 %v5436_v63  ;;  %4544 = vmatpush.msra.mxu3 %v5453_v45  ;;  %v4194_v13 = vmax.f32 %v4192_v53, %v4193_v41  ;;  %v5480_v53 = vld [vmem:[%s9802_s5 + $0x378] sm:$0xff]  ;;  %v5479_v41 = vld [vmem:[%s9802_s5 + $0x370] sm:$0xff]  ;;  %v4109_v51 = vrot.slane %v9427_v11, 1 }
 0x981   :  { %v4283_v37 = vmax.f32 %v4251_v2, 0.0  ;;  %v4252_v26 = vadd.f32 %v8996_v29, %v4180_v15  ;;  %4892 = vmatpush.msra.mxu1 %v5577_v42  ;;  %v4253_v7 = vadd.f32 %v8996_v29, %v4187_v28  ;;  %v5494_v15 = vld [vmem:[%s9802_s5 + $0x3e8] sm:$0xff]  ;;  %v4103_v5 = vmax.f32 %v9401_v0, %v4102_v10  ;;  %v5475_v0 = vld [vmem:[%s9802_s5 + $0x350] sm:$0xff] }
 0x982   :  { %v3971_v52 = vrot.slane %v3941_v24, 2  ;;  %v3972_v20 = vrot.slane %v3941_v24, 4  ;;  %v3973_v16 = vrot.slane %v3941_v24, 6  ;;  %v4195_v9 = vsel %vm3998_vm0, %v3941_v24, -inf  ;;  %4503 = vmatpush.msra.mxu2 %v5435_v8  ;;  %4545 = vmatpush.msra.mxu3 %v5452_v44 }
 0x983   :  { %v4196_v40 = vrot.slane %v4195_v9, 4  ;;  %v4659_v48 = vrot.slane %v4283_v37, 7  ;;  %v4284_v39 = vmax.f32 %v4252_v26, 0.0  ;;  %v4285_v23 = vmax.f32 %v4253_v7, 0.0 }
 0x984   :  { %v4202_v14 = vsel %vm3998_vm0, %v3971_v52, -inf  ;;  %v4209_v60 = vsel %vm3998_vm0, %v3972_v20, -inf  ;;  %v4216_v49 = vsel %vm3998_vm0, %v3973_v16, -inf  ;;  %4504 = vmatpush.msra.mxu2 %v5434_v56  ;;  %4546 = vmatpush.msra.mxu3 %v5451_v54  ;;  %v4254_v38 = vadd.f32 %v8996_v29, %v4194_v13  ;;  %v5493_v54 = vld [vmem:[%s9802_s5 + $0x3e0] sm:$0xff] }
 0x985   :  { %v4197_v21 = vmax.f32 %v4195_v9, %v4196_v40  ;;  %v4203_v22 = vrot.slane %v4202_v14, 4  ;;  %v4210_v43 = vrot.slane %v4209_v60, 4  ;;  %v4217_v19 = vrot.slane %v4216_v49, 4 }
 0x986   :  { %4505 = vmatpush.msra.mxu2 %v5433_v61  ;;  %4547 = vmatpush.msra.mxu3 %v5450_v27  ;;  %v4660_v34 = vsel %vm4315_vm1, %v4659_v48, %v4267_v4  ;;  %v4702_v12 = vrot.slane %v4284_v39, 7  ;;  %v4745_v1 = vrot.slane %v4285_v23, 7  ;;  %v4286_v63 = vmax.f32 %v4254_v38, 0.0  ;;  %v5474_v27 = vld [vmem:[%s9802_s5 + $0x348] sm:$0xff]  ;;  %v5491_v48 = vld [vmem:[%s9802_s5 + $0x3d0] sm:$0xff]  ;;  %v5473_v38 = vld [vmem:[%s9802_s5 + $0x340] sm:$0xff] }
 0x987   :  { %v4198_v45 = vrot.slane %v4197_v21, 2  ;;  %v4204_v62 = vmax.f32 %v4202_v14, %v4203_v22  ;;  %v4211_v31 = vmax.f32 %v4209_v60, %v4210_v43  ;;  %v4218_v47 = vmax.f32 %v4216_v49, %v4217_v19  ;;  %4506 = vmatmul.f32.vlgmr.msra.gmra.mxu2 %v9326_v58  ;;  %4678 = vmatmul.f32.vlgmr.msrb.gmra.mxu0 %v4660_v34 }
 0x988   :  { %4576 = vmatpush.msrb.mxu2 %v5480_v53  ;;  %4548 = vmatpush.msra.mxu3 %v5449_v17  ;;  %v4703_v4 = vsel %vm4315_vm1, %v4702_v12, %v4268_v6  ;;  %v9471_v30 = vsel %vm4315_vm1, %v4745_v1, %v4269_v57  ;;  %v4788_v58 = vrot.slane %v4286_v63, 7  ;;  %v4089_v6 = vmax.f32 %v9366_v55, %v4088_v33  ;;  %v5476_v33 = vld [vmem:[%s9802_s5 + $0x358] sm:$0xff]  ;;  %v5489_v1 = vld [vmem:[%s9802_s5 + $0x3c0] sm:$0xff] }
 0x989   :  { %v4199_v42 = vmax.f32 %v4197_v21, %v4198_v45  ;;  %v4205_v8 = vrot.slane %v4204_v62, 2  ;;  %v4212_v44 = vrot.slane %v4211_v31, 2  ;;  %v4219_v2 = vrot.slane %v4218_v47, 2  ;;  %4549 = vmatmul.f32.vlgmr.msra.gmra.mxu3 %v9344_v18  ;;  %4721 = vmatmul.f32.vlgmr.msrb.gmra.mxu1 %v4703_v4  ;;  %v5477_v18 = vld [vmem:[%s9802_s5 + $0x360] sm:$0xff]  ;;  %v5490_v21 = vld [vmem:[%s9802_s5 + $0x3c8] sm:$0xff]  ;;  %v5472_v12 = vld [vmem:[%s9802_s5 + $0x338] sm:$0xff] }
 0x98a   :  { %4577 = vmatpush.msrb.mxu2 %v5479_v41  ;;  %4619 = vmatpush.msrb.mxu3 %v5496_v3  ;;  %v9487_v57 = vsel %vm4315_vm1, %v4788_v58, %v4270_v35  ;;  %v4096_v55 = vmax.f32 %v9393_v59, %v4095_v50  ;;  %v4110_v35 = vmax.f32 %v9427_v11, %v4109_v51  ;;  %v5492_v50 = vld [vmem:[%s9802_s5 + $0x3d8] sm:$0xff]  ;;  %v5470_v51 = vld [vmem:[%s9802_s5 + $0x328] sm:$0xff] }
 0x98b   :  { %v4200_v28 = vrot.slane %v4199_v42, 1  ;;  %v4206_v24 = vmax.f32 %v4204_v62, %v4205_v8  ;;  %v4213_v13 = vmax.f32 %v4211_v31, %v4212_v44  ;;  %v4220_v56 = vmax.f32 %v4218_v47, %v4219_v2  ;;  %v5471_v47 = vld [vmem:[%s9802_s5 + $0x330] sm:$0xff]  ;;  %v5488_v41 = vld [vmem:[%s9802_s5 + $0x3b8] sm:$0xff]  ;;  %v5469_v8 = vld [vmem:[%s9802_s5 + $0x320] sm:$0xff] }
 0x98c   :  { %4578 = vmatpush.msrb.mxu2 %v5478_v32  ;;  %4620 = vmatpush.msrb.mxu3 %v5495_v46  ;;  %v4239_v59 = vadd.f32 %v8996_v29, %v4089_v6  ;;  %v4240_v9 = vadd.f32 %v8996_v29, %v4096_v55  ;;  %v4241_v40 = vadd.f32 %v8996_v29, %v4103_v5  ;;  %v5486_v44 = vld [vmem:[%s9802_s5 + $0x3a8] sm:$0xff]  ;;  %v5468_v2 = vld [vmem:[%s9802_s5 + $0x318] sm:$0xff]  ;;  %v5485_v32 = vld [vmem:[%s9802_s5 + $0x3a0] sm:$0xff] }
 0x98d   :  { %v4201_v37 = vmax.f32 %v4199_v42, %v4200_v28  ;;  %v4207_v26 = vrot.slane %v4206_v24, 1  ;;  %v4214_v7 = vrot.slane %v4213_v13, 1  ;;  %v4221_v52 = vrot.slane %v4220_v56, 1  ;;  %v5487_v42 = vld [vmem:[%s9802_s5 + $0x3b0] sm:$0xff]  ;;  %v5484_v6 = vld [vmem:[%s9802_s5 + $0x398] sm:$0xff]  ;;  %v5465_v28 = vld [vmem:[%s9802_s5 + $0x300] sm:$0xff] }
 0x98e   :  { %4579 = vmatpush.msrb.mxu2 %v5477_v18  ;;  %4621 = vmatpush.msrb.mxu3 %v5494_v15  ;;  %v4242_v61 = vadd.f32 %v8996_v29, %v4110_v35  ;;  %v4271_v49 = vmax.f32 %v4239_v59, 0.0  ;;  %v4272_v17 = vmax.f32 %v4240_v9, 0.0  ;;  %v4273_v34 = vmax.f32 %v4241_v40, 0.0  ;;  %v5467_v46 = vld [vmem:[%s9802_s5 + $0x310] sm:$0xff]  ;;  %v5466_v18 = vld [vmem:[%s9802_s5 + $0x308] sm:$0xff]  ;;  %v5560_v5 = vld [vmem:[%s9802_s5 + $0x5f8] sm:$0xff] }
 0x98f   :  { %v4255_v11 = vadd.f32 %v8996_v29, %v4201_v37  ;;  %v4208_v10 = vmax.f32 %v4206_v24, %v4207_v26  ;;  %v4215_v20 = vmax.f32 %v4213_v13, %v4214_v7  ;;  %v4222_v16 = vmax.f32 %v4220_v56, %v4221_v52  ;;  %v5483_v15 = vld [vmem:[%s9802_s5 + $0x390] sm:$0xff]  ;;  %v5482_v24 = vld [vmem:[%s9802_s5 + $0x388] sm:$0xff]  ;;  %v5544_v13 = vld [vmem:[%s9802_s5 + $0x578] sm:$0xff] }
 0x990   :  { %4580 = vmatpush.msrb.mxu2 %v5476_v33  ;;  %4622 = vmatpush.msrb.mxu3 %v5493_v54  ;;  %v5481_v56 = vld [vmem:[%s9802_s5 + $0x380] sm:$0xff]  ;;  %v5543_v55 = vld [vmem:[%s9802_s5 + $0x570] sm:$0xff]  ;;  %v5542_v35 = vld [vmem:[%s9802_s5 + $0x568] sm:$0xff] }
 0x991   :  { %v4287_v39 = vmax.f32 %v4255_v11, 0.0  ;;  %v4256_v23 = vadd.f32 %v8996_v29, %v4208_v10  ;;  %v4257_v14 = vadd.f32 %v8996_v29, %v4215_v20  ;;  %v4258_v60 = vadd.f32 %v8996_v29, %v4222_v16  ;;  %v5541_v33 = vld [vmem:[%s9802_s5 + $0x560] sm:$0xff]  ;;  %v5558_v54 = vld [vmem:[%s9802_s5 + $0x5e8] sm:$0xff]  ;;  %v5539_v26 = vld [vmem:[%s9802_s5 + $0x550] sm:$0xff] }
 0x992   :  { %4581 = vmatpush.msrb.mxu2 %v5475_v0  ;;  %4623 = vmatpush.msrb.mxu3 %v5492_v50  ;;  %v4274_v29 = vmax.f32 %v4242_v61, 0.0  ;;  %v5557_v37 = vld [vmem:[%s9802_s5 + $0x5e0] sm:$0xff]  ;;  %v5556_v7 = vld [vmem:[%s9802_s5 + $0x5d8] sm:$0xff]  ;;  %v5538_v52 = vld [vmem:[%s9802_s5 + $0x548] sm:$0xff] }
 0x993   :  { %v4831_v22 = vrot.slane %v4287_v39, 7  ;;  %v4288_v43 = vmax.f32 %v4256_v23, 0.0  ;;  %v4289_v19 = vmax.f32 %v4257_v14, 0.0  ;;  %v4290_v53 = vmax.f32 %v4258_v60, 0.0  ;;  %v5555_v59 = vld [vmem:[%s9802_s5 + $0x5d0] sm:$0xff]  ;;  %v5537_v0 = vld [vmem:[%s9802_s5 + $0x540] sm:$0xff] }
 0x994   :  { %4582 = vmatpush.msrb.mxu2 %v5474_v27  ;;  %4624 = vmatpush.msrb.mxu3 %v5491_v48  ;;  %v5554_v50 = vld [vmem:[%s9802_s5 + $0x5c8] sm:$0xff]  ;;  %v5536_v11 = vld [vmem:[%s9802_s5 + $0x538] sm:$0xff]  ;;  %v5553_v10 = vld [vmem:[%s9802_s5 + $0x5c0] sm:$0xff] }
 0x995   :  { %v4832_v63 = vsel %vm4315_vm1, %v4831_v22, %v4271_v49  ;;  %v4874_v45 = vrot.slane %v4288_v43, 7  ;;  %v4917_v62 = vrot.slane %v4289_v19, 7  ;;  %v4960_v31 = vrot.slane %v4290_v53, 7  ;;  %v5535_v20 = vld [vmem:[%s9802_s5 + $0x530] sm:$0xff]  ;;  %v5552_v16 = vld [vmem:[%s9802_s5 + $0x5b8] sm:$0xff]  ;;  %v5534_v9 = vld [vmem:[%s9802_s5 + $0x528] sm:$0xff] }
 0x996   :  { %4583 = vmatpush.msrb.mxu2 %v5473_v38  ;;  %4625 = vmatpush.msrb.mxu3 %v5490_v21  ;;  %v5551_v40 = vld [vmem:[%s9802_s5 + $0x5b0] sm:$0xff]  ;;  %v5533_v61 = vld [vmem:[%s9802_s5 + $0x520] sm:$0xff]  ;;  %v5550_v27 = vld [vmem:[%s9802_s5 + $0x5a8] sm:$0xff] }
 0x997   :  { %4850 = vmatmul.f32.vlgmr.msra.gmra.mxu0 %v4832_v63  ;;  %v4875_v3 = vsel %vm4315_vm1, %v4874_v45, %v4272_v17  ;;  %v9549_v4 = vsel %vm4315_vm1, %v4917_v62, %v4273_v34  ;;  %v9552_v58 = vsel %vm4315_vm1, %v4960_v31, %v4274_v29  ;;  %v5532_v48 = vld [vmem:[%s9802_s5 + $0x518] sm:$0xff]  ;;  %v5549_v39 = vld [vmem:[%s9802_s5 + $0x5a0] sm:$0xff]  ;;  %v5531_v23 = vld [vmem:[%s9802_s5 + $0x510] sm:$0xff] }
 0x998   :  { %4584 = vmatpush.msrb.mxu2 %v5472_v12  ;;  %4626 = vmatpush.msrb.mxu3 %v5489_v1  ;;  %v5548_v14 = vld [vmem:[%s9802_s5 + $0x598] sm:$0xff]  ;;  %v5530_v60 = vld [vmem:[%s9802_s5 + $0x508] sm:$0xff]  ;;  %v5547_v49 = vld [vmem:[%s9802_s5 + $0x590] sm:$0xff] }
 0x999   :  { %4893 = vmatmul.f32.vlgmr.msra.gmra.mxu1 %v4875_v3  ;;  %v5529_v38 = vld [vmem:[%s9802_s5 + $0x500] sm:$0xff]  ;;  %v5546_v21 = vld [vmem:[%s9802_s5 + $0x588] sm:$0xff]  ;;  %v5608_v22 = vld [vmem:[%s9802_s5 + $0x778] sm:$0xff] }
 0x99a   :  { %4585 = vmatpush.msrb.mxu2 %v5471_v47  ;;  %4627 = vmatpush.msrb.mxu3 %v5488_v41  ;;  %v5545_v43 = vld [vmem:[%s9802_s5 + $0x580] sm:$0xff]  ;;  %v5607_v19 = vld [vmem:[%s9802_s5 + $0x770] sm:$0xff]  ;;  %v5624_v53 = vld [vmem:[%s9802_s5 + $0x7f8] sm:$0xff] }
 0x99b   :  { %v5606_v17 = vld [vmem:[%s9802_s5 + $0x768] sm:$0xff]  ;;  %v5605_v34 = vld [vmem:[%s9802_s5 + $0x760] sm:$0xff]  ;;  %v5603_v1 = vld [vmem:[%s9802_s5 + $0x750] sm:$0xff] }
 0x99c   :  { %4586 = vmatpush.msrb.mxu2 %v5470_v51  ;;  %4628 = vmatpush.msrb.mxu3 %v5487_v42  ;;  %v5622_v29 = vld [vmem:[%s9802_s5 + $0x7e8] sm:$0xff]  ;;  %v5621_v12 = vld [vmem:[%s9802_s5 + $0x7e0] sm:$0xff]  ;;  %v5620_v63 = vld [vmem:[%s9802_s5 + $0x7d8] sm:$0xff] }
 0x99d   :  { %v5602_v45 = vld [vmem:[%s9802_s5 + $0x748] sm:$0xff]  ;;  %v5619_v62 = vld [vmem:[%s9802_s5 + $0x7d0] sm:$0xff]  ;;  %v5601_v31 = vld [vmem:[%s9802_s5 + $0x740] sm:$0xff] }
 0x99e   :  { %4587 = vmatpush.msrb.mxu2 %v5469_v8  ;;  %4629 = vmatpush.msrb.mxu3 %v5486_v44  ;;  %v5618_v47 = vld [vmem:[%s9802_s5 + $0x7c8] sm:$0xff]  ;;  %v5600_v41 = vld [vmem:[%s9802_s5 + $0x738] sm:$0xff]  ;;  %v5617_v3 = vld [vmem:[%s9802_s5 + $0x7c0] sm:$0xff] }
 0x99f   :  { %v5599_v51 = vld [vmem:[%s9802_s5 + $0x730] sm:$0xff]  ;;  %v5616_v42 = vld [vmem:[%s9802_s5 + $0x7b8] sm:$0xff]  ;;  %v5598_v8 = vld [vmem:[%s9802_s5 + $0x728] sm:$0xff] }
 0x9a0   :  { %4588 = vmatpush.msrb.mxu2 %v5468_v2  ;;  %4630 = vmatpush.msrb.mxu3 %v5485_v32  ;;  %v5615_v44 = vld [vmem:[%s9802_s5 + $0x7b0] sm:$0xff]  ;;  %v5597_v2 = vld [vmem:[%s9802_s5 + $0x720] sm:$0xff]  ;;  %v5614_v32 = vld [vmem:[%s9802_s5 + $0x7a8] sm:$0xff] }
 0x9a2   :  { %4589 = vmatpush.msrb.mxu2 %v5467_v46  ;;  %4631 = vmatpush.msrb.mxu3 %v5484_v6  ;;  %v5596_v46 = vld [vmem:[%s9802_s5 + $0x718] sm:$0xff]  ;;  %v5613_v6 = vld [vmem:[%s9802_s5 + $0x7a0] sm:$0xff] }
 0x9a4   :  { %4590 = vmatpush.msrb.mxu2 %v5466_v18  ;;  %4632 = vmatpush.msrb.mxu3 %v5483_v15  ;;  %v5595_v18 = vld [vmem:[%s9802_s5 + $0x710] sm:$0xff]  ;;  %v5612_v15 = vld [vmem:[%s9802_s5 + $0x798] sm:$0xff] }
 0x9a6   :  { %4591 = vmatpush.msrb.mxu2 %v5465_v28  ;;  %4633 = vmatpush.msrb.mxu3 %v5482_v24  ;;  %v5594_v28 = vld [vmem:[%s9802_s5 + $0x708] sm:$0xff]  ;;  %v5611_v24 = vld [vmem:[%s9802_s5 + $0x790] sm:$0xff] }
 0x9a7   :  { %4592 = vmatmul.f32.vlgmr.msrb.gmra.mxu2 %v9355_v36  ;;  %v5559_v36 = vld [vmem:[%s9802_s5 + $0x5f0] sm:$0xff] }
 0x9a8   :  { %4748 = vmatpush.msra.mxu2 %v5544_v13  ;;  %4634 = vmatpush.msrb.mxu3 %v5481_v56  ;;  %v5593_v13 = vld [vmem:[%s9802_s5 + $0x700] sm:$0xff]  ;;  %v5610_v56 = vld [vmem:[%s9802_s5 + $0x788] sm:$0xff] }
 0x9a9   :  { %4635 = vmatmul.f32.vlgmr.msrb.gmra.mxu3 %v9398_v25  ;;  %v5540_v25 = vld [vmem:[%s9802_s5 + $0x558] sm:$0xff] }
 0x9aa   :  { %4749 = vmatpush.msra.mxu2 %v5543_v55  ;;  %4791 = vmatpush.msra.mxu3 %v5560_v5  ;;  %v5609_v55 = vld [vmem:[%s9802_s5 + $0x780] sm:$0xff] }
 0x9ac   :  { %4750 = vmatpush.msra.mxu2 %v5542_v35  ;;  %4792 = vmatpush.msra.mxu3 %v5559_v36  ;;  %v5628_v36 = vld [vmem:[%s9803_s6] ss:$0 sm:$0xff] }
 0x9ae   :  { %4751 = vmatpush.msra.mxu2 %v5541_v33  ;;  %4793 = vmatpush.msra.mxu3 %v5558_v54 }
 0x9b0   :  { %4752 = vmatpush.msra.mxu2 %v5540_v25  ;;  %4794 = vmatpush.msra.mxu3 %v5557_v37 }
 0x9b2   :  { %4753 = vmatpush.msra.mxu2 %v5539_v26  ;;  %4795 = vmatpush.msra.mxu3 %v5556_v7 }
 0x9b4   :  { %4754 = vmatpush.msra.mxu2 %v5538_v52  ;;  %4796 = vmatpush.msra.mxu3 %v5555_v59 }
 0x9b6   :  { %4755 = vmatpush.msra.mxu2 %v5537_v0  ;;  %4797 = vmatpush.msra.mxu3 %v5554_v50 }
 0x9b8   :  { %4756 = vmatpush.msra.mxu2 %v5536_v11  ;;  %4798 = vmatpush.msra.mxu3 %v5553_v10 }
 0x9ba   :  { %4757 = vmatpush.msra.mxu2 %v5535_v20  ;;  %4799 = vmatpush.msra.mxu3 %v5552_v16 }
 0x9bc   :  { %4758 = vmatpush.msra.mxu2 %v5534_v9  ;;  %4800 = vmatpush.msra.mxu3 %v5551_v40 }
 0x9be   :  { %4759 = vmatpush.msra.mxu2 %v5533_v61  ;;  %4801 = vmatpush.msra.mxu3 %v5550_v27 }
 0x9c0   :  { %4760 = vmatpush.msra.mxu2 %v5532_v48  ;;  %4802 = vmatpush.msra.mxu3 %v5549_v39 }
 0x9c2   :  { %4761 = vmatpush.msra.mxu2 %v5531_v23  ;;  %4803 = vmatpush.msra.mxu3 %v5548_v14 }
 0x9c4   :  { %4762 = vmatpush.msra.mxu2 %v5530_v60  ;;  %4804 = vmatpush.msra.mxu3 %v5547_v49 }
 0x9c6   :  { %4763 = vmatpush.msra.mxu2 %v5529_v38  ;;  %4805 = vmatpush.msra.mxu3 %v5546_v21 }
 0x9c7   :  { %4764 = vmatmul.f32.vlgmr.msra.gmra.mxu2 %v9471_v30  ;;  %v5623_v30 = vld [vmem:[%s9802_s5 + $0x7f0] sm:$0xff] }
 0x9c8   :  { %4920 = vmatpush.msrb.mxu2 %v5608_v22  ;;  %4806 = vmatpush.msra.mxu3 %v5545_v43 }
 0x9c9   :  { %4807 = vmatmul.f32.vlgmr.msra.gmra.mxu3 %v9487_v57  ;;  %v5604_v57 = vld [vmem:[%s9802_s5 + $0x758] sm:$0xff]  ;;  %s5661_s5 = smov [#allocation3]  }
 0x9ca   :  { %4921 = vmatpush.msrb.mxu2 %v5607_v19  ;;  %4963 = vmatpush.msrb.mxu3 %v5624_v53  ;;  %s4990_s6 = sshll.u32 %s5661_s5, 4  ;;  %s4991_s6 = int_to_ptr.vmem [resolvable:$true] %s4990_s6 }
 0x9cc   :  { %4922 = vmatpush.msrb.mxu2 %v5606_v17  ;;  %4964 = vmatpush.msrb.mxu3 %v5623_v30 }
 0x9ce   :  { %4923 = vmatpush.msrb.mxu2 %v5605_v34  ;;  %4965 = vmatpush.msrb.mxu3 %v5622_v29 }
 0x9d0   :  { %4924 = vmatpush.msrb.mxu2 %v5604_v57  ;;  %4966 = vmatpush.msrb.mxu3 %v5621_v12 }
 0x9d2   :  { %4925 = vmatpush.msrb.mxu2 %v5603_v1  ;;  %4967 = vmatpush.msrb.mxu3 %v5620_v63 }
 0x9d4   :  { %4926 = vmatpush.msrb.mxu2 %v5602_v45  ;;  %4968 = vmatpush.msrb.mxu3 %v5619_v62 }
 0x9d6   :  { %4927 = vmatpush.msrb.mxu2 %v5601_v31  ;;  %4969 = vmatpush.msrb.mxu3 %v5618_v47 }
 0x9d8   :  { %4928 = vmatpush.msrb.mxu2 %v5600_v41  ;;  %4970 = vmatpush.msrb.mxu3 %v5617_v3 }
 0x9da   :  { %4929 = vmatpush.msrb.mxu2 %v5599_v51  ;;  %4971 = vmatpush.msrb.mxu3 %v5616_v42 }
 0x9dc   :  { %4930 = vmatpush.msrb.mxu2 %v5598_v8  ;;  %4972 = vmatpush.msrb.mxu3 %v5615_v44 }
 0x9de   :  { %4931 = vmatpush.msrb.mxu2 %v5597_v2  ;;  %4973 = vmatpush.msrb.mxu3 %v5614_v32 }
 0x9e0   :  { %4932 = vmatpush.msrb.mxu2 %v5596_v46  ;;  %4974 = vmatpush.msrb.mxu3 %v5613_v6 }
 0x9e2   :  { %4933 = vmatpush.msrb.mxu2 %v5595_v18  ;;  %4975 = vmatpush.msrb.mxu3 %v5612_v15 }
 0x9e4   :  { %4934 = vmatpush.msrb.mxu2 %v5594_v28  ;;  %4976 = vmatpush.msrb.mxu3 %v5611_v24 }
 0x9e6   :  { %4935 = vmatpush.msrb.mxu2 %v5593_v13  ;;  %4977 = vmatpush.msrb.mxu3 %v5610_v56 }
 0x9e7   :  { %4936 = vmatmul.f32.vlgmr.msrb.gmra.mxu2 %v9549_v4 }
 0x9e8   :  { %4978 = vmatpush.msrb.mxu3 %v5609_v55 }
 0x9e9   :  { %4979 = vmatmul.f32.vlgmr.msrb.gmra.mxu3 %v9552_v58 }
 0x9ea   :  { %v4335_v5 = vpop.f32.mrf.mxu2 }
 0x9eb   :  { %v4338_v54 = vadd.f32 %v5628_v36, %v4335_v5 }
 0x9ec   :  { %v4378_v35 = vpop.f32.mrf.mxu3 }
 0x9ed   :  { %v4381_v37 = vadd.f32 %v4378_v35, %v4338_v54 }
 0x9f2   :  { %v4421_v33 = vpop.f32.mrf.mxu2 }
 0x9f3   :  { %v4424_v26 = vadd.f32 %v4421_v33, %v4381_v37 }
 0x9f4   :  { %v4464_v25 = vpop.f32.mrf.mxu3 }
 0x9f5   :  { %v4467_v52 = vadd.f32 %v4464_v25, %v4424_v26 }
 0xa04   :  { %v4679_v20 = vpop.f32.mrf.mxu0 }
 0xa06   :  { %v4722_v9 = vpop.f32.mrf.mxu1 }
 0xa0a   :  { %v4507_v7 = vpop.f32.mrf.mxu2 }
 0xa0b   :  { %v4510_v0 = vadd.f32 %v4507_v7, %v4467_v52 }
 0xa0c   :  { %v4550_v59 = vpop.f32.mrf.mxu3 }
 0xa0d   :  { %v4553_v4 = vadd.f32 %v4550_v59, %v4510_v0 }
 0xa14   :  { %v4851_v23 = vpop.f32.mrf.mxu0 }
 0xa16   :  { %v4894_v60 = vpop.f32.mrf.mxu1 }
 0xa2a   :  { %v4593_v50 = vpop.f32.mrf.mxu2 }
 0xa2b   :  { %v4596_v11 = vadd.f32 %v4593_v50, %v4553_v4 }
 0xa2c   :  { %v4636_v10 = vpop.f32.mrf.mxu3 }
 0xa2d   :  { %v4639_v58 = vadd.f32 %v4636_v10, %v4596_v11 }
 0xa2f   :  { %v4682_v16 = vadd.f32 %v4679_v20, %v4639_v58 }
 0xa31   :  { %v4725_v61 = vadd.f32 %v4722_v9, %v4682_v16 }
 0xa4a   :  { %v4765_v40 = vpop.f32.mrf.mxu2 }
 0xa4b   :  { %v4768_v27 = vadd.f32 %v4765_v40, %v4725_v61 }
 0xa4c   :  { %v4808_v48 = vpop.f32.mrf.mxu3 }
 0xa4d   :  { %v4811_v39 = vadd.f32 %v4808_v48, %v4768_v27 }
 0xa4f   :  { %v4854_v14 = vadd.f32 %v4851_v23, %v4811_v39 }
 0xa51   :  { %v4897_v49 = vadd.f32 %v4894_v60, %v4854_v14 }
 0xa6a   :  { %v4937_v38 = vpop.f32.mrf.mxu2 }
 0xa6b   :  { %v4940_v21 = vadd.f32 %v4937_v38, %v4897_v49 }
 0xa6c   :  { %v4980_v22 = vpop.f32.mrf.mxu3 }
 0xa6d   :  { %v4983_v43 = vadd.f32 %v4980_v22, %v4940_v21 }
 0xa6f   :  { %4984 = vst [vmem:[#allocation3] sm:$0x3] %v4983_v43 }
 0xa70   :  { %4995 = dma.vmem_to_hbm [thread:$0]  %s4991_s6, 32, %s4993_s9, [#allocation4]  }
 0xa71   :  { %5659 = dma.done.wait [#allocation4], 32  }
 0xa72   :  { %5660 = vsyncadd [#allocation4], 4294967264 }
 0xa73   :  { %5000 = vsyncpa [#allocation4], 1 }

</bundles_post_ra>
